<compile_context>
chip_gen: v7x
topology: tpu7x:2x2x1
jax: 0.10.0
libtpu: 0.0.40
codegen_flags: <defaults>
</compile_context>

<pallas_src>
import functools

import numpy as np
import jax
import jax.numpy as jnp
from jax.experimental import pallas as pl
from jax.experimental.pallas import tpu as pltpu

_LANES = 128


# ------------------------------------------------------------------
# Trace-time constants: 0/1 gather matrices encoding im2col / dilation
# ------------------------------------------------------------------

def _conv_gather_np(b, h, w, k, stride, pad):
    """Gv (k*k*S_out, S_in): row-block j gathers the tap-j source row (zero row = padding)."""
    oh = (h + 2 * pad - k) // stride + 1
    ow = (w + 2 * pad - k) // stride + 1
    s_in, s_out = b * h * w, b * oh * ow
    g = np.zeros((k * k, s_out, s_in), np.float32)
    for bi in range(b):
        for oy in range(oh):
            for ox in range(ow):
                r_out = (bi * oh + oy) * ow + ox
                for kh in range(k):
                    for kw in range(k):
                        iy = stride * oy + kh - pad
                        ix = stride * ox + kw - pad
                        if 0 <= iy < h and 0 <= ix < w:
                            g[kh * k + kw, r_out, (bi * h + iy) * w + ix] = 1.0
    return g.reshape(k * k * s_out, s_in)


def _convT_gather_np(b, h, w, k, stride, pad):
    """Same, for ConvTranspose2d lowered as a stride-1 conv over the stride-dilated input."""
    hd, wd = (h - 1) * stride + 1, (w - 1) * stride + 1
    pe = k - 1 - pad
    oh, ow = hd + 2 * pe - k + 1, wd + 2 * pe - k + 1
    s_in, s_out = b * h * w, b * oh * ow
    g = np.zeros((k * k, s_out, s_in), np.float32)
    for bi in range(b):
        for oy in range(oh):
            for ox in range(ow):
                r_out = (bi * oh + oy) * ow + ox
                for kh in range(k):
                    for kw in range(k):
                        iy = oy + kh - pe
                        ix = ox + kw - pe
                        if (0 <= iy < hd and 0 <= ix < wd
                                and iy % stride == 0 and ix % stride == 0):
                            r_in = (bi * h + iy // stride) * w + ix // stride
                            g[kh * k + kw, r_out, r_in] = 1.0
    return g.reshape(k * k * s_out, s_in)


@functools.lru_cache(maxsize=None)
def _gather_mats(batch):
    # spatial sizes fixed by output_size=16: 16 -> 8 -> 4 -> 8 -> 16
    g2 = _conv_gather_np(batch, 8, 8, 4, 2, 1)     # Conv    8x8 -> 4x4
    g3 = _convT_gather_np(batch, 4, 4, 4, 2, 1)    # ConvT   4x4 -> 8x8
    g4 = _convT_gather_np(batch, 8, 8, 4, 2, 1)    # ConvT   8x8 -> 16x16
    return g2, g3, g4


# ------------------------------------------------------------------
# Host-side weight / input plumbing (tiny, one pass, fused by XLA)
# ------------------------------------------------------------------

def _conv_w_to_mat(w):
    # PyTorch Conv2d weight (Cout,Cin,kh,kw) -> (kh*kw*Cin, Cout), row order (kh,kw,cin)
    cout, cin, kh, kw = w.shape
    return jnp.transpose(w, (2, 3, 1, 0)).reshape(kh * kw * cin, cout)


def _convT_w_to_mat(w):
    # PyTorch ConvTranspose2d weight (Cin,Cout,kh,kw) -> equivalent-conv matrix
    w = jnp.flip(w, axis=(2, 3))              # spatial flip
    w = jnp.transpose(w, (2, 3, 0, 1))        # (kh,kw,Cin,Cout)
    kh, kw, cin, cout = w.shape
    return w.reshape(kh * kw * cin, cout)


def _extract_patches(x, k, stride, pad):
    # x: (B,H,W,C) -> patches (B,OH,OW,k*k*C), patch-channel order (kh,kw,cin)
    x = jnp.pad(x, ((0, 0), (pad, pad), (pad, pad), (0, 0)))
    _, hp, wp, _ = x.shape
    oh = (hp - k) // stride + 1
    ow = (wp - k) // stride + 1
    cols = []
    for i in range(k):
        for j in range(k):
            cols.append(x[:, i:i + stride * oh:stride, j:j + stride * ow:stride, :])
    return jnp.concatenate(cols, axis=-1), oh, ow


def _dilate_spatial(x, s):
    b, h, w, c = x.shape
    out = jnp.zeros((b, (h - 1) * s + 1, (w - 1) * s + 1, c), x.dtype)
    return out.at[:, ::s, ::s, :].set(x)


# ------------------------------------------------------------------
# Fused Pallas kernel
# ------------------------------------------------------------------

def _taps_matmul(gv, act, w_ref, bias, n_taps=16):
    """y = sum_j (G_j @ act) @ W_j + bias, with Gv = vstack_j(G_j)."""
    s_in, cin = act.shape
    s_out = gv.shape[0] // n_taps
    # one MXU matmul gathers all 16 shifted copies of `act` (rows of Gv are one-hot / zero)
    z = jnp.dot(gv, act, preferred_element_type=jnp.float32).astype(jnp.bfloat16)
    out = None
    for j in range(n_taps):
        zj = z[j * s_out:(j + 1) * s_out, :]
        wj = w_ref[j * cin:(j + 1) * cin, :]
        t = jnp.dot(zj, wj, preferred_element_type=jnp.float32)
        out = t if out is None else out + t
    return out + bias                                   # f32 (s_out, cout)


def _bn_lrelu(y, gamma, beta, slope, eps=1e-5):
    # training-mode BatchNorm2d: biased batch statistics over all rows ((N,H,W) flattened)
    mean = jnp.mean(y, axis=0, keepdims=True)
    var = jnp.mean((y - mean) * (y - mean), axis=0, keepdims=True)
    scale = gamma * jax.lax.rsqrt(var + eps)
    y = y * scale + (beta - mean * scale)
    return jnp.where(y >= 0, y, slope * y)


def _fused_gan_kernel(p1_ref, w1_ref, b1_ref,
                      gv2_ref, w2_ref, b2_ref, gam2_ref, bet2_ref,
                      gv3_ref, w3_ref, b3_ref, gam3_ref, bet3_ref,
                      gv4_ref, w4_ref, b4_ref,
                      out_ref):
    f32 = jnp.float32

    # layer 1: Conv2d(3,64,4,2,1) + LeakyReLU(0.2)  (im2col of the kernel input is host-side)
    y1 = jnp.dot(p1_ref[...], w1_ref[...], preferred_element_type=f32) + b1_ref[...]
    y1 = jnp.where(y1 >= 0, y1, 0.2 * y1)
    a1 = y1.astype(jnp.bfloat16)                                      # (B*64, 64)

    # layer 2: Conv2d(64,128,4,2,1) + BatchNorm2d + LeakyReLU(0.2)
    y2 = _taps_matmul(gv2_ref[...], a1, w2_ref, b2_ref[...])
    a2 = _bn_lrelu(y2, gam2_ref[...], bet2_ref[...], 0.2).astype(jnp.bfloat16)   # (B*16, 128)

    # layer 3: ConvTranspose2d(128,64,4,2,1) + BatchNorm2d + LeakyReLU(0.01)
    y3 = _taps_matmul(gv3_ref[...], a2, w3_ref, b3_ref[...])
    a3 = _bn_lrelu(y3, gam3_ref[...], bet3_ref[...], 0.01).astype(jnp.bfloat16)  # (B*64, 64)

    # layer 4: ConvTranspose2d(64,3,4,2,1) + Softmax over channels (lanes 0..2 valid)
    y4 = _taps_matmul(gv4_ref[...], a3, w4_ref, b4_ref[...])                     # (B*256, 128)
    lane = jax.lax.broadcasted_iota(jnp.int32, y4.shape, 1)
    valid = lane < 3
    m = jnp.max(jnp.where(valid, y4, -1e30), axis=-1, keepdims=True)
    e = jnp.where(valid, jnp.exp(y4 - m), 0.0)
    out_ref[...] = (e / jnp.sum(e, axis=-1, keepdims=True)).astype(out_ref.dtype)


# ------------------------------------------------------------------
# Full model forward
# ------------------------------------------------------------------

def flexible_gan_forward(x_nchw, p):
    b = x_nchw.shape[0]
    x = jnp.transpose(x_nchw, (0, 2, 3, 1)).astype(jnp.float32)        # NHWC

    # host-side glue: im2col of the tiny network input + weight reshapes (once per call)
    patches, oh, ow = _extract_patches(x, 4, 2, 1)                     # (B,8,8,48)
    p1 = patches.reshape(b * oh * ow, -1)
    k1 = p1.shape[1]                                                   # 48
    p1 = jnp.pad(p1, ((0, 0), (0, _LANES - k1))).astype(jnp.bfloat16)  # K pad 48 -> 128

    w1 = jnp.pad(_conv_w_to_mat(p["w1"]), ((0, _LANES - k1), (0, 0))).astype(jnp.bfloat16)
    w2 = _conv_w_to_mat(p["w2"]).astype(jnp.bfloat16)                  # (1024, 128)
    w3 = _convT_w_to_mat(p["w3"]).astype(jnp.bfloat16)                 # (2048, 64)
    w4 = jnp.pad(_convT_w_to_mat(p["w4"]), ((0, 0), (0, _LANES - 3))).astype(jnp.bfloat16)
    b4 = jnp.pad(p["b4"], (0, _LANES - 3))

    g2, g3, g4 = _gather_mats(b)                                       # numpy constants
    gv2 = jnp.asarray(g2, dtype=jnp.bfloat16)                          # (512, 128)
    gv3 = jnp.asarray(g3, dtype=jnp.bfloat16)                          # (2048, 32)
    gv4 = jnp.asarray(g4, dtype=jnp.bfloat16)                          # (8192, 128)

    row = lambda v: v.reshape(1, -1).astype(jnp.float32)
    vspec = pl.BlockSpec(memory_space=pltpu.MemorySpace.VMEM)

    out2d = pl.pallas_call(
        _fused_gan_kernel,
        out_shape=jax.ShapeDtypeStruct((b * 256, _LANES), jnp.float32),
        in_specs=[vspec] * 16,
        out_specs=vspec,
        compiler_params=pltpu.CompilerParams(vmem_limit_bytes=32 * 1024 * 1024),
    )(p1, w1, row(p["b1"]),
      gv2, w2, row(p["b2"]), row(p["g2"]), row(p["be2"]),
      gv3, w3, row(p["b3"]), row(p["g3"]), row(p["be3"]),
      gv4, w4, row(b4))

    out = out2d[:, :3].reshape(b, 16, 16, 3)
    return jnp.transpose(out, (0, 3, 1, 2))                            # NCHW


# ------------------------------------------------------------------
# Pure-JAX reference (previously validated im2col path), same numerics
# ------------------------------------------------------------------

def _reference_forward(x_nchw, p):
    b = x_nchw.shape[0]
    x = jnp.transpose(x_nchw, (0, 2, 3, 1)).astype(jnp.float32)

    def mm(q, wmat, bias):
        return jnp.dot(q.astype(jnp.bfloat16), wmat.astype(jnp.bfloat16),
                       preferred_element_type=jnp.float32) + bias.reshape(1, -1)

    q, oh, ow = _extract_patches(x, 4, 2, 1)
    y = mm(q.reshape(b * oh * ow, -1), _conv_w_to_mat(p["w1"]), p["b1"])
    y = jnp.where(y >= 0, y, 0.2 * y)
    a = y.astype(jnp.bfloat16).astype(jnp.float32).reshape(b, 8, 8, 64)

    q, oh, ow = _extract_patches(a, 4, 2, 1)
    y = mm(q.reshape(b * oh * ow, -1), _conv_w_to_mat(p["w2"]), p["b2"])
    y = _bn_lrelu(y, p["g2"].reshape(1, -1), p["be2"].reshape(1, -1), 0.2)
    a = y.astype(jnp.bfloat16).astype(jnp.float32).reshape(b, 4, 4, 128)

    q, oh, ow = _extract_patches(_dilate_spatial(a, 2), 4, 1, 2)
    y = mm(q.reshape(b * oh * ow, -1), _convT_w_to_mat(p["w3"]), p["b3"])
    y = _bn_lrelu(y, p["g3"].reshape(1, -1), p["be3"].reshape(1, -1), 0.01)
    a = y.astype(jnp.bfloat16).astype(jnp.float32).reshape(b, 8, 8, 64)

    q, oh, ow = _extract_patches(_dilate_spatial(a, 2), 4, 1, 2)
    y = mm(q.reshape(b * oh * ow, -1), _convT_w_to_mat(p["w4"]), p["b4"])
    y = jax.nn.softmax(y, axis=-1)
    return jnp.transpose(y.reshape(b, 16, 16, 3), (0, 3, 1, 2))


# ------------------------------------------------------------------

def init_params(key):
    ks = jax.random.split(key, 12)

    def nrm(k, shape, scale=0.05):
        return scale * jax.random.normal(k, shape, jnp.float32)

    return {
        "w1": nrm(ks[0], (64, 3, 4, 4)),   "b1": nrm(ks[1], (64,)),
        "w2": nrm(ks[2], (128, 64, 4, 4)), "b2": nrm(ks[3], (128,)),
        "g2": 1.0 + nrm(ks[4], (128,)),    "be2": nrm(ks[5], (128,)),
        "w3": nrm(ks[6], (128, 64, 4, 4)), "b3": nrm(ks[7], (64,)),
        "g3": 1.0 + nrm(ks[8], (64,)),     "be3": nrm(ks[9], (64,)),
        "w4": nrm(ks[10], (64, 3, 4, 4)),  "b4": nrm(ks[11], (3,)),
    }


if __name__ == "__main__":
    root = jax.random.PRNGKey(0)
    k_params, k_x = jax.random.split(root)
    params = init_params(k_params)
    x = jax.random.normal(k_x, (2, 3, 16, 16), jnp.float32)   # NCHW input

    fwd = jax.jit(flexible_gan_forward)
    out = jax.block_until_ready(fwd(x, params))

    assert out.shape == (2, 3, 16, 16), out.shape
    assert bool(jnp.all(jnp.isfinite(out)))
    # softmax over the channel dim must sum to 1
    assert bool(jnp.allclose(jnp.sum(out, axis=1), 1.0, atol=1e-4))

    # cross-check the fused kernel against the pure-JAX im2col reference path
    ref = jax.block_until_ready(jax.jit(_reference_forward)(x, params))
    assert bool(jnp.allclose(out, ref, atol=1e-2)), float(jnp.max(jnp.abs(out - ref)))

    print("KERNEL_OK")
</pallas_src>

<mosaic_0001>
module attributes {stable_mosaic.version = 11 : i64} {
  func.func @_fused_gan_kernel(%arg0: memref<128x128xbf16, #tpu.memory_space<vmem>>, %arg1: memref<128x64xbf16, #tpu.memory_space<vmem>>, %arg2: memref<1x64xf32, #tpu.memory_space<vmem>>, %arg3: memref<512x128xbf16, #tpu.memory_space<vmem>>, %arg4: memref<1024x128xbf16, #tpu.memory_space<vmem>>, %arg5: memref<1x128xf32, #tpu.memory_space<vmem>>, %arg6: memref<1x128xf32, #tpu.memory_space<vmem>>, %arg7: memref<1x128xf32, #tpu.memory_space<vmem>>, %arg8: memref<2048x32xbf16, #tpu.memory_space<vmem>>, %arg9: memref<2048x64xbf16, #tpu.memory_space<vmem>>, %arg10: memref<1x64xf32, #tpu.memory_space<vmem>>, %arg11: memref<1x64xf32, #tpu.memory_space<vmem>>, %arg12: memref<1x64xf32, #tpu.memory_space<vmem>>, %arg13: memref<8192x128xbf16, #tpu.memory_space<vmem>>, %arg14: memref<1024x128xbf16, #tpu.memory_space<vmem>>, %arg15: memref<1x128xf32, #tpu.memory_space<vmem>>, %arg16: memref<512x128xf32, #tpu.memory_space<vmem>>) attributes {dimension_semantics = [], scalar_prefetch = 0 : i64, scratch_operands = 0 : i64, tpu.core_type = #tpu.core_type<tc>} {
    %c0 = arith.constant 0 : index
    %c0_0 = arith.constant 0 : index
    %0 = vector.load %arg0[%c0, %c0_0] : memref<128x128xbf16, #tpu.memory_space<vmem>>, vector<128x128xbf16>
    %c0_1 = arith.constant 0 : index
    %c0_2 = arith.constant 0 : index
    %1 = vector.load %arg1[%c0_1, %c0_2] : memref<128x64xbf16, #tpu.memory_space<vmem>>, vector<128x64xbf16>
    %cst = arith.constant dense<0.000000e+00> : vector<128x64xf32>
    %2 = tpu.matmul %0, %1, %cst {dimension_numbers = #tpu.dot_dimension_numbers<[1], [0], [0], [1], [0, 0, 1, 1], [], []>} : vector<128x128xbf16>, vector<128x64xbf16>, vector<128x64xf32> -> vector<128x64xf32>
    %c0_3 = arith.constant 0 : index
    %c0_4 = arith.constant 0 : index
    %3 = vector.load %arg2[%c0_3, %c0_4] : memref<1x64xf32, #tpu.memory_space<vmem>>, vector<1x64xf32>
    %4 = vector.broadcast %3 : vector<1x64xf32> to vector<128x64xf32>
    %5 = arith.addf %2, %4 : vector<128x64xf32>
    %cst_5 = arith.constant 0.000000e+00 : f32
    %6 = vector.broadcast %cst_5 : f32 to vector<128x64xf32>
    %7 = arith.cmpf oge, %5, %6 : vector<128x64xf32>
    %cst_6 = arith.constant 2.000000e-01 : f32
    %8 = vector.broadcast %cst_6 : f32 to vector<128x64xf32>
    %9 = arith.mulf %8, %5 : vector<128x64xf32>
    %10 = arith.select %7, %5, %9 : vector<128x64xi1>, vector<128x64xf32>
    %11 = arith.truncf %10 : vector<128x64xf32> to vector<128x64xbf16>
    %c0_7 = arith.constant 0 : index
    %c0_8 = arith.constant 0 : index
    %12 = vector.load %arg3[%c0_7, %c0_8] : memref<512x128xbf16, #tpu.memory_space<vmem>>, vector<512x128xbf16>
    %c0_9 = arith.constant 0 : index
    %c0_10 = arith.constant 0 : index
    %13 = vector.load %arg5[%c0_9, %c0_10] : memref<1x128xf32, #tpu.memory_space<vmem>>, vector<1x128xf32>
    %cst_11 = arith.constant dense<0.000000e+00> : vector<512x64xf32>
    %14 = tpu.matmul %12, %11, %cst_11 {dimension_numbers = #tpu.dot_dimension_numbers<[1], [0], [0], [1], [0, 0, 1, 1], [], []>} : vector<512x128xbf16>, vector<128x64xbf16>, vector<512x64xf32> -> vector<512x64xf32>
    %15 = arith.truncf %14 : vector<512x64xf32> to vector<512x64xbf16>
    %16 = vector.extract_strided_slice %15 {offsets = [0, 0], sizes = [32, 64], strides = [1, 1]} : vector<512x64xbf16> to vector<32x64xbf16>
    %c0_12 = arith.constant 0 : index
    %c0_13 = arith.constant 0 : index
    %17 = vector.load %arg4[%c0_12, %c0_13] : memref<1024x128xbf16, #tpu.memory_space<vmem>>, vector<64x128xbf16>
    %cst_14 = arith.constant dense<0.000000e+00> : vector<32x128xf32>
    %18 = tpu.matmul %16, %17, %cst_14 {dimension_numbers = #tpu.dot_dimension_numbers<[1], [0], [0], [1], [0, 0, 1, 1], [], []>} : vector<32x64xbf16>, vector<64x128xbf16>, vector<32x128xf32> -> vector<32x128xf32>
    %19 = vector.extract_strided_slice %15 {offsets = [32, 0], sizes = [32, 64], strides = [1, 1]} : vector<512x64xbf16> to vector<32x64xbf16>
    %c64 = arith.constant 64 : index
    %c0_15 = arith.constant 0 : index
    %20 = vector.load %arg4[%c64, %c0_15] : memref<1024x128xbf16, #tpu.memory_space<vmem>>, vector<64x128xbf16>
    %cst_16 = arith.constant dense<0.000000e+00> : vector<32x128xf32>
    %21 = tpu.matmul %19, %20, %cst_16 {dimension_numbers = #tpu.dot_dimension_numbers<[1], [0], [0], [1], [0, 0, 1, 1], [], []>} : vector<32x64xbf16>, vector<64x128xbf16>, vector<32x128xf32> -> vector<32x128xf32>
    %22 = arith.addf %18, %21 : vector<32x128xf32>
    %23 = vector.extract_strided_slice %15 {offsets = [64, 0], sizes = [32, 64], strides = [1, 1]} : vector<512x64xbf16> to vector<32x64xbf16>
    %c128 = arith.constant 128 : index
    %c0_17 = arith.constant 0 : index
    %24 = vector.load %arg4[%c128, %c0_17] : memref<1024x128xbf16, #tpu.memory_space<vmem>>, vector<64x128xbf16>
    %cst_18 = arith.constant dense<0.000000e+00> : vector<32x128xf32>
    %25 = tpu.matmul %23, %24, %cst_18 {dimension_numbers = #tpu.dot_dimension_numbers<[1], [0], [0], [1], [0, 0, 1, 1], [], []>} : vector<32x64xbf16>, vector<64x128xbf16>, vector<32x128xf32> -> vector<32x128xf32>
    %26 = arith.addf %22, %25 : vector<32x128xf32>
    %27 = vector.extract_strided_slice %15 {offsets = [96, 0], sizes = [32, 64], strides = [1, 1]} : vector<512x64xbf16> to vector<32x64xbf16>
    %c192 = arith.constant 192 : index
    %c0_19 = arith.constant 0 : index
    %28 = vector.load %arg4[%c192, %c0_19] : memref<1024x128xbf16, #tpu.memory_space<vmem>>, vector<64x128xbf16>
    %cst_20 = arith.constant dense<0.000000e+00> : vector<32x128xf32>
    %29 = tpu.matmul %27, %28, %cst_20 {dimension_numbers = #tpu.dot_dimension_numbers<[1], [0], [0], [1], [0, 0, 1, 1], [], []>} : vector<32x64xbf16>, vector<64x128xbf16>, vector<32x128xf32> -> vector<32x128xf32>
    %30 = arith.addf %26, %29 : vector<32x128xf32>
    %31 = vector.extract_strided_slice %15 {offsets = [128, 0], sizes = [32, 64], strides = [1, 1]} : vector<512x64xbf16> to vector<32x64xbf16>
    %c256 = arith.constant 256 : index
    %c0_21 = arith.constant 0 : index
    %32 = vector.load %arg4[%c256, %c0_21] : memref<1024x128xbf16, #tpu.memory_space<vmem>>, vector<64x128xbf16>
    %cst_22 = arith.constant dense<0.000000e+00> : vector<32x128xf32>
    %33 = tpu.matmul %31, %32, %cst_22 {dimension_numbers = #tpu.dot_dimension_numbers<[1], [0], [0], [1], [0, 0, 1, 1], [], []>} : vector<32x64xbf16>, vector<64x128xbf16>, vector<32x128xf32> -> vector<32x128xf32>
    %34 = arith.addf %30, %33 : vector<32x128xf32>
    %35 = vector.extract_strided_slice %15 {offsets = [160, 0], sizes = [32, 64], strides = [1, 1]} : vector<512x64xbf16> to vector<32x64xbf16>
    %c320 = arith.constant 320 : index
    %c0_23 = arith.constant 0 : index
    %36 = vector.load %arg4[%c320, %c0_23] : memref<1024x128xbf16, #tpu.memory_space<vmem>>, vector<64x128xbf16>
    %cst_24 = arith.constant dense<0.000000e+00> : vector<32x128xf32>
    %37 = tpu.matmul %35, %36, %cst_24 {dimension_numbers = #tpu.dot_dimension_numbers<[1], [0], [0], [1], [0, 0, 1, 1], [], []>} : vector<32x64xbf16>, vector<64x128xbf16>, vector<32x128xf32> -> vector<32x128xf32>
    %38 = arith.addf %34, %37 : vector<32x128xf32>
    %39 = vector.extract_strided_slice %15 {offsets = [192, 0], sizes = [32, 64], strides = [1, 1]} : vector<512x64xbf16> to vector<32x64xbf16>
    %c384 = arith.constant 384 : index
    %c0_25 = arith.constant 0 : index
    %40 = vector.load %arg4[%c384, %c0_25] : memref<1024x128xbf16, #tpu.memory_space<vmem>>, vector<64x128xbf16>
    %cst_26 = arith.constant dense<0.000000e+00> : vector<32x128xf32>
    %41 = tpu.matmul %39, %40, %cst_26 {dimension_numbers = #tpu.dot_dimension_numbers<[1], [0], [0], [1], [0, 0, 1, 1], [], []>} : vector<32x64xbf16>, vector<64x128xbf16>, vector<32x128xf32> -> vector<32x128xf32>
    %42 = arith.addf %38, %41 : vector<32x128xf32>
    %43 = vector.extract_strided_slice %15 {offsets = [224, 0], sizes = [32, 64], strides = [1, 1]} : vector<512x64xbf16> to vector<32x64xbf16>
    %c448 = arith.constant 448 : index
    %c0_27 = arith.constant 0 : index
    %44 = vector.load %arg4[%c448, %c0_27] : memref<1024x128xbf16, #tpu.memory_space<vmem>>, vector<64x128xbf16>
    %cst_28 = arith.constant dense<0.000000e+00> : vector<32x128xf32>
    %45 = tpu.matmul %43, %44, %cst_28 {dimension_numbers = #tpu.dot_dimension_numbers<[1], [0], [0], [1], [0, 0, 1, 1], [], []>} : vector<32x64xbf16>, vector<64x128xbf16>, vector<32x128xf32> -> vector<32x128xf32>
    %46 = arith.addf %42, %45 : vector<32x128xf32>
    %47 = vector.extract_strided_slice %15 {offsets = [256, 0], sizes = [32, 64], strides = [1, 1]} : vector<512x64xbf16> to vector<32x64xbf16>
    %c512 = arith.constant 512 : index
    %c0_29 = arith.constant 0 : index
    %48 = vector.load %arg4[%c512, %c0_29] : memref<1024x128xbf16, #tpu.memory_space<vmem>>, vector<64x128xbf16>
    %cst_30 = arith.constant dense<0.000000e+00> : vector<32x128xf32>
    %49 = tpu.matmul %47, %48, %cst_30 {dimension_numbers = #tpu.dot_dimension_numbers<[1], [0], [0], [1], [0, 0, 1, 1], [], []>} : vector<32x64xbf16>, vector<64x128xbf16>, vector<32x128xf32> -> vector<32x128xf32>
    %50 = arith.addf %46, %49 : vector<32x128xf32>
    %51 = vector.extract_strided_slice %15 {offsets = [288, 0], sizes = [32, 64], strides = [1, 1]} : vector<512x64xbf16> to vector<32x64xbf16>
    %c576 = arith.constant 576 : index
    %c0_31 = arith.constant 0 : index
    %52 = vector.load %arg4[%c576, %c0_31] : memref<1024x128xbf16, #tpu.memory_space<vmem>>, vector<64x128xbf16>
    %cst_32 = arith.constant dense<0.000000e+00> : vector<32x128xf32>
    %53 = tpu.matmul %51, %52, %cst_32 {dimension_numbers = #tpu.dot_dimension_numbers<[1], [0], [0], [1], [0, 0, 1, 1], [], []>} : vector<32x64xbf16>, vector<64x128xbf16>, vector<32x128xf32> -> vector<32x128xf32>
    %54 = arith.addf %50, %53 : vector<32x128xf32>
    %55 = vector.extract_strided_slice %15 {offsets = [320, 0], sizes = [32, 64], strides = [1, 1]} : vector<512x64xbf16> to vector<32x64xbf16>
    %c640 = arith.constant 640 : index
    %c0_33 = arith.constant 0 : index
    %56 = vector.load %arg4[%c640, %c0_33] : memref<1024x128xbf16, #tpu.memory_space<vmem>>, vector<64x128xbf16>
    %cst_34 = arith.constant dense<0.000000e+00> : vector<32x128xf32>
    %57 = tpu.matmul %55, %56, %cst_34 {dimension_numbers = #tpu.dot_dimension_numbers<[1], [0], [0], [1], [0, 0, 1, 1], [], []>} : vector<32x64xbf16>, vector<64x128xbf16>, vector<32x128xf32> -> vector<32x128xf32>
    %58 = arith.addf %54, %57 : vector<32x128xf32>
    %59 = vector.extract_strided_slice %15 {offsets = [352, 0], sizes = [32, 64], strides = [1, 1]} : vector<512x64xbf16> to vector<32x64xbf16>
    %c704 = arith.constant 704 : index
    %c0_35 = arith.constant 0 : index
    %60 = vector.load %arg4[%c704, %c0_35] : memref<1024x128xbf16, #tpu.memory_space<vmem>>, vector<64x128xbf16>
    %cst_36 = arith.constant dense<0.000000e+00> : vector<32x128xf32>
    %61 = tpu.matmul %59, %60, %cst_36 {dimension_numbers = #tpu.dot_dimension_numbers<[1], [0], [0], [1], [0, 0, 1, 1], [], []>} : vector<32x64xbf16>, vector<64x128xbf16>, vector<32x128xf32> -> vector<32x128xf32>
    %62 = arith.addf %58, %61 : vector<32x128xf32>
    %63 = vector.extract_strided_slice %15 {offsets = [384, 0], sizes = [32, 64], strides = [1, 1]} : vector<512x64xbf16> to vector<32x64xbf16>
    %c768 = arith.constant 768 : index
    %c0_37 = arith.constant 0 : index
    %64 = vector.load %arg4[%c768, %c0_37] : memref<1024x128xbf16, #tpu.memory_space<vmem>>, vector<64x128xbf16>
    %cst_38 = arith.constant dense<0.000000e+00> : vector<32x128xf32>
    %65 = tpu.matmul %63, %64, %cst_38 {dimension_numbers = #tpu.dot_dimension_numbers<[1], [0], [0], [1], [0, 0, 1, 1], [], []>} : vector<32x64xbf16>, vector<64x128xbf16>, vector<32x128xf32> -> vector<32x128xf32>
    %66 = arith.addf %62, %65 : vector<32x128xf32>
    %67 = vector.extract_strided_slice %15 {offsets = [416, 0], sizes = [32, 64], strides = [1, 1]} : vector<512x64xbf16> to vector<32x64xbf16>
    %c832 = arith.constant 832 : index
    %c0_39 = arith.constant 0 : index
    %68 = vector.load %arg4[%c832, %c0_39] : memref<1024x128xbf16, #tpu.memory_space<vmem>>, vector<64x128xbf16>
    %cst_40 = arith.constant dense<0.000000e+00> : vector<32x128xf32>
    %69 = tpu.matmul %67, %68, %cst_40 {dimension_numbers = #tpu.dot_dimension_numbers<[1], [0], [0], [1], [0, 0, 1, 1], [], []>} : vector<32x64xbf16>, vector<64x128xbf16>, vector<32x128xf32> -> vector<32x128xf32>
    %70 = arith.addf %66, %69 : vector<32x128xf32>
    %71 = vector.extract_strided_slice %15 {offsets = [448, 0], sizes = [32, 64], strides = [1, 1]} : vector<512x64xbf16> to vector<32x64xbf16>
    %c896 = arith.constant 896 : index
    %c0_41 = arith.constant 0 : index
    %72 = vector.load %arg4[%c896, %c0_41] : memref<1024x128xbf16, #tpu.memory_space<vmem>>, vector<64x128xbf16>
    %cst_42 = arith.constant dense<0.000000e+00> : vector<32x128xf32>
    %73 = tpu.matmul %71, %72, %cst_42 {dimension_numbers = #tpu.dot_dimension_numbers<[1], [0], [0], [1], [0, 0, 1, 1], [], []>} : vector<32x64xbf16>, vector<64x128xbf16>, vector<32x128xf32> -> vector<32x128xf32>
    %74 = arith.addf %70, %73 : vector<32x128xf32>
    %75 = vector.extract_strided_slice %15 {offsets = [480, 0], sizes = [32, 64], strides = [1, 1]} : vector<512x64xbf16> to vector<32x64xbf16>
    %c960 = arith.constant 960 : index
    %c0_43 = arith.constant 0 : index
    %76 = vector.load %arg4[%c960, %c0_43] : memref<1024x128xbf16, #tpu.memory_space<vmem>>, vector<64x128xbf16>
    %cst_44 = arith.constant dense<0.000000e+00> : vector<32x128xf32>
    %77 = tpu.matmul %75, %76, %cst_44 {dimension_numbers = #tpu.dot_dimension_numbers<[1], [0], [0], [1], [0, 0, 1, 1], [], []>} : vector<32x64xbf16>, vector<64x128xbf16>, vector<32x128xf32> -> vector<32x128xf32>
    %78 = arith.addf %74, %77 : vector<32x128xf32>
    %79 = vector.broadcast %13 : vector<1x128xf32> to vector<32x128xf32>
    %80 = arith.addf %78, %79 : vector<32x128xf32>
    %c0_45 = arith.constant 0 : index
    %c0_46 = arith.constant 0 : index
    %81 = vector.load %arg6[%c0_45, %c0_46] : memref<1x128xf32, #tpu.memory_space<vmem>>, vector<1x128xf32>
    %c0_47 = arith.constant 0 : index
    %c0_48 = arith.constant 0 : index
    %82 = vector.load %arg7[%c0_47, %c0_48] : memref<1x128xf32, #tpu.memory_space<vmem>>, vector<1x128xf32>
    %cst_49 = arith.constant dense<0.000000e+00> : vector<128xf32>
    %83 = vector.multi_reduction <add>, %80, %cst_49 [0] : vector<32x128xf32> to vector<128xf32>
    %84 = vector.shape_cast %83 : vector<128xf32> to vector<1x128xf32>
    %cst_50 = arith.constant 3.200000e+01 : f32
    %85 = vector.broadcast %cst_50 : f32 to vector<1x128xf32>
    %86 = arith.divf %84, %85 : vector<1x128xf32>
    %87 = vector.broadcast %86 : vector<1x128xf32> to vector<32x128xf32>
    %88 = arith.subf %80, %87 : vector<32x128xf32>
    %89 = vector.broadcast %86 : vector<1x128xf32> to vector<32x128xf32>
    %90 = arith.subf %80, %89 : vector<32x128xf32>
    %91 = arith.mulf %88, %90 : vector<32x128xf32>
    %cst_51 = arith.constant dense<0.000000e+00> : vector<128xf32>
    %92 = vector.multi_reduction <add>, %91, %cst_51 [0] : vector<32x128xf32> to vector<128xf32>
    %93 = vector.shape_cast %92 : vector<128xf32> to vector<1x128xf32>
    %cst_52 = arith.constant 3.200000e+01 : f32
    %94 = vector.broadcast %cst_52 : f32 to vector<1x128xf32>
    %95 = arith.divf %93, %94 : vector<1x128xf32>
    %cst_53 = arith.constant 9.99999974E-6 : f32
    %96 = vector.broadcast %cst_53 : f32 to vector<1x128xf32>
    %97 = arith.addf %95, %96 : vector<1x128xf32>
    %98 = math.rsqrt %97 : vector<1x128xf32>
    %99 = arith.mulf %81, %98 : vector<1x128xf32>
    %100 = vector.broadcast %99 : vector<1x128xf32> to vector<32x128xf32>
    %101 = arith.mulf %80, %100 : vector<32x128xf32>
    %102 = arith.mulf %86, %99 : vector<1x128xf32>
    %103 = arith.subf %82, %102 : vector<1x128xf32>
    %104 = vector.broadcast %103 : vector<1x128xf32> to vector<32x128xf32>
    %105 = arith.addf %101, %104 : vector<32x128xf32>
    %cst_54 = arith.constant 0.000000e+00 : f32
    %106 = vector.broadcast %cst_54 : f32 to vector<32x128xf32>
    %107 = arith.cmpf oge, %105, %106 : vector<32x128xf32>
    %cst_55 = arith.constant 2.000000e-01 : f32
    %108 = vector.broadcast %cst_55 : f32 to vector<32x128xf32>
    %109 = arith.mulf %108, %105 : vector<32x128xf32>
    %110 = arith.select %107, %105, %109 : vector<32x128xi1>, vector<32x128xf32>
    %111 = arith.truncf %110 : vector<32x128xf32> to vector<32x128xbf16>
    %c0_56 = arith.constant 0 : index
    %c0_57 = arith.constant 0 : index
    %112 = vector.load %arg8[%c0_56, %c0_57] : memref<2048x32xbf16, #tpu.memory_space<vmem>>, vector<2048x32xbf16>
    %c0_58 = arith.constant 0 : index
    %c0_59 = arith.constant 0 : index
    %113 = vector.load %arg10[%c0_58, %c0_59] : memref<1x64xf32, #tpu.memory_space<vmem>>, vector<1x64xf32>
    %cst_60 = arith.constant dense<0.000000e+00> : vector<2048x128xf32>
    %114 = tpu.matmul %112, %111, %cst_60 {dimension_numbers = #tpu.dot_dimension_numbers<[1], [0], [0], [1], [0, 0, 1, 1], [], []>} : vector<2048x32xbf16>, vector<32x128xbf16>, vector<2048x128xf32> -> vector<2048x128xf32>
    %115 = arith.truncf %114 : vector<2048x128xf32> to vector<2048x128xbf16>
    %116 = vector.extract_strided_slice %115 {offsets = [0, 0], sizes = [128, 128], strides = [1, 1]} : vector<2048x128xbf16> to vector<128x128xbf16>
    %c0_61 = arith.constant 0 : index
    %c0_62 = arith.constant 0 : index
    %117 = vector.load %arg9[%c0_61, %c0_62] : memref<2048x64xbf16, #tpu.memory_space<vmem>>, vector<128x64xbf16>
    %cst_63 = arith.constant dense<0.000000e+00> : vector<128x64xf32>
    %118 = tpu.matmul %116, %117, %cst_63 {dimension_numbers = #tpu.dot_dimension_numbers<[1], [0], [0], [1], [0, 0, 1, 1], [], []>} : vector<128x128xbf16>, vector<128x64xbf16>, vector<128x64xf32> -> vector<128x64xf32>
    %119 = vector.extract_strided_slice %115 {offsets = [128, 0], sizes = [128, 128], strides = [1, 1]} : vector<2048x128xbf16> to vector<128x128xbf16>
    %c128_64 = arith.constant 128 : index
    %c0_65 = arith.constant 0 : index
    %120 = vector.load %arg9[%c128_64, %c0_65] : memref<2048x64xbf16, #tpu.memory_space<vmem>>, vector<128x64xbf16>
    %cst_66 = arith.constant dense<0.000000e+00> : vector<128x64xf32>
    %121 = tpu.matmul %119, %120, %cst_66 {dimension_numbers = #tpu.dot_dimension_numbers<[1], [0], [0], [1], [0, 0, 1, 1], [], []>} : vector<128x128xbf16>, vector<128x64xbf16>, vector<128x64xf32> -> vector<128x64xf32>
    %122 = arith.addf %118, %121 : vector<128x64xf32>
    %123 = vector.extract_strided_slice %115 {offsets = [256, 0], sizes = [128, 128], strides = [1, 1]} : vector<2048x128xbf16> to vector<128x128xbf16>
    %c256_67 = arith.constant 256 : index
    %c0_68 = arith.constant 0 : index
    %124 = vector.load %arg9[%c256_67, %c0_68] : memref<2048x64xbf16, #tpu.memory_space<vmem>>, vector<128x64xbf16>
    %cst_69 = arith.constant dense<0.000000e+00> : vector<128x64xf32>
    %125 = tpu.matmul %123, %124, %cst_69 {dimension_numbers = #tpu.dot_dimension_numbers<[1], [0], [0], [1], [0, 0, 1, 1], [], []>} : vector<128x128xbf16>, vector<128x64xbf16>, vector<128x64xf32> -> vector<128x64xf32>
    %126 = arith.addf %122, %125 : vector<128x64xf32>
    %127 = vector.extract_strided_slice %115 {offsets = [384, 0], sizes = [128, 128], strides = [1, 1]} : vector<2048x128xbf16> to vector<128x128xbf16>
    %c384_70 = arith.constant 384 : index
    %c0_71 = arith.constant 0 : index
    %128 = vector.load %arg9[%c384_70, %c0_71] : memref<2048x64xbf16, #tpu.memory_space<vmem>>, vector<128x64xbf16>
    %cst_72 = arith.constant dense<0.000000e+00> : vector<128x64xf32>
    %129 = tpu.matmul %127, %128, %cst_72 {dimension_numbers = #tpu.dot_dimension_numbers<[1], [0], [0], [1], [0, 0, 1, 1], [], []>} : vector<128x128xbf16>, vector<128x64xbf16>, vector<128x64xf32> -> vector<128x64xf32>
    %130 = arith.addf %126, %129 : vector<128x64xf32>
    %131 = vector.extract_strided_slice %115 {offsets = [512, 0], sizes = [128, 128], strides = [1, 1]} : vector<2048x128xbf16> to vector<128x128xbf16>
    %c512_73 = arith.constant 512 : index
    %c0_74 = arith.constant 0 : index
    %132 = vector.load %arg9[%c512_73, %c0_74] : memref<2048x64xbf16, #tpu.memory_space<vmem>>, vector<128x64xbf16>
    %cst_75 = arith.constant dense<0.000000e+00> : vector<128x64xf32>
    %133 = tpu.matmul %131, %132, %cst_75 {dimension_numbers = #tpu.dot_dimension_numbers<[1], [0], [0], [1], [0, 0, 1, 1], [], []>} : vector<128x128xbf16>, vector<128x64xbf16>, vector<128x64xf32> -> vector<128x64xf32>
    %134 = arith.addf %130, %133 : vector<128x64xf32>
    %135 = vector.extract_strided_slice %115 {offsets = [640, 0], sizes = [128, 128], strides = [1, 1]} : vector<2048x128xbf16> to vector<128x128xbf16>
    %c640_76 = arith.constant 640 : index
    %c0_77 = arith.constant 0 : index
    %136 = vector.load %arg9[%c640_76, %c0_77] : memref<2048x64xbf16, #tpu.memory_space<vmem>>, vector<128x64xbf16>
    %cst_78 = arith.constant dense<0.000000e+00> : vector<128x64xf32>
    %137 = tpu.matmul %135, %136, %cst_78 {dimension_numbers = #tpu.dot_dimension_numbers<[1], [0], [0], [1], [0, 0, 1, 1], [], []>} : vector<128x128xbf16>, vector<128x64xbf16>, vector<128x64xf32> -> vector<128x64xf32>
    %138 = arith.addf %134, %137 : vector<128x64xf32>
    %139 = vector.extract_strided_slice %115 {offsets = [768, 0], sizes = [128, 128], strides = [1, 1]} : vector<2048x128xbf16> to vector<128x128xbf16>
    %c768_79 = arith.constant 768 : index
    %c0_80 = arith.constant 0 : index
    %140 = vector.load %arg9[%c768_79, %c0_80] : memref<2048x64xbf16, #tpu.memory_space<vmem>>, vector<128x64xbf16>
    %cst_81 = arith.constant dense<0.000000e+00> : vector<128x64xf32>
    %141 = tpu.matmul %139, %140, %cst_81 {dimension_numbers = #tpu.dot_dimension_numbers<[1], [0], [0], [1], [0, 0, 1, 1], [], []>} : vector<128x128xbf16>, vector<128x64xbf16>, vector<128x64xf32> -> vector<128x64xf32>
    %142 = arith.addf %138, %141 : vector<128x64xf32>
    %143 = vector.extract_strided_slice %115 {offsets = [896, 0], sizes = [128, 128], strides = [1, 1]} : vector<2048x128xbf16> to vector<128x128xbf16>
    %c896_82 = arith.constant 896 : index
    %c0_83 = arith.constant 0 : index
    %144 = vector.load %arg9[%c896_82, %c0_83] : memref<2048x64xbf16, #tpu.memory_space<vmem>>, vector<128x64xbf16>
    %cst_84 = arith.constant dense<0.000000e+00> : vector<128x64xf32>
    %145 = tpu.matmul %143, %144, %cst_84 {dimension_numbers = #tpu.dot_dimension_numbers<[1], [0], [0], [1], [0, 0, 1, 1], [], []>} : vector<128x128xbf16>, vector<128x64xbf16>, vector<128x64xf32> -> vector<128x64xf32>
    %146 = arith.addf %142, %145 : vector<128x64xf32>
    %147 = vector.extract_strided_slice %115 {offsets = [1024, 0], sizes = [128, 128], strides = [1, 1]} : vector<2048x128xbf16> to vector<128x128xbf16>
    %c1024 = arith.constant 1024 : index
    %c0_85 = arith.constant 0 : index
    %148 = vector.load %arg9[%c1024, %c0_85] : memref<2048x64xbf16, #tpu.memory_space<vmem>>, vector<128x64xbf16>
    %cst_86 = arith.constant dense<0.000000e+00> : vector<128x64xf32>
    %149 = tpu.matmul %147, %148, %cst_86 {dimension_numbers = #tpu.dot_dimension_numbers<[1], [0], [0], [1], [0, 0, 1, 1], [], []>} : vector<128x128xbf16>, vector<128x64xbf16>, vector<128x64xf32> -> vector<128x64xf32>
    %150 = arith.addf %146, %149 : vector<128x64xf32>
    %151 = vector.extract_strided_slice %115 {offsets = [1152, 0], sizes = [128, 128], strides = [1, 1]} : vector<2048x128xbf16> to vector<128x128xbf16>
    %c1152 = arith.constant 1152 : index
    %c0_87 = arith.constant 0 : index
    %152 = vector.load %arg9[%c1152, %c0_87] : memref<2048x64xbf16, #tpu.memory_space<vmem>>, vector<128x64xbf16>
    %cst_88 = arith.constant dense<0.000000e+00> : vector<128x64xf32>
    %153 = tpu.matmul %151, %152, %cst_88 {dimension_numbers = #tpu.dot_dimension_numbers<[1], [0], [0], [1], [0, 0, 1, 1], [], []>} : vector<128x128xbf16>, vector<128x64xbf16>, vector<128x64xf32> -> vector<128x64xf32>
    %154 = arith.addf %150, %153 : vector<128x64xf32>
    %155 = vector.extract_strided_slice %115 {offsets = [1280, 0], sizes = [128, 128], strides = [1, 1]} : vector<2048x128xbf16> to vector<128x128xbf16>
    %c1280 = arith.constant 1280 : index
    %c0_89 = arith.constant 0 : index
    %156 = vector.load %arg9[%c1280, %c0_89] : memref<2048x64xbf16, #tpu.memory_space<vmem>>, vector<128x64xbf16>
    %cst_90 = arith.constant dense<0.000000e+00> : vector<128x64xf32>
    %157 = tpu.matmul %155, %156, %cst_90 {dimension_numbers = #tpu.dot_dimension_numbers<[1], [0], [0], [1], [0, 0, 1, 1], [], []>} : vector<128x128xbf16>, vector<128x64xbf16>, vector<128x64xf32> -> vector<128x64xf32>
    %158 = arith.addf %154, %157 : vector<128x64xf32>
    %159 = vector.extract_strided_slice %115 {offsets = [1408, 0], sizes = [128, 128], strides = [1, 1]} : vector<2048x128xbf16> to vector<128x128xbf16>
    %c1408 = arith.constant 1408 : index
    %c0_91 = arith.constant 0 : index
    %160 = vector.load %arg9[%c1408, %c0_91] : memref<2048x64xbf16, #tpu.memory_space<vmem>>, vector<128x64xbf16>
    %cst_92 = arith.constant dense<0.000000e+00> : vector<128x64xf32>
    %161 = tpu.matmul %159, %160, %cst_92 {dimension_numbers = #tpu.dot_dimension_numbers<[1], [0], [0], [1], [0, 0, 1, 1], [], []>} : vector<128x128xbf16>, vector<128x64xbf16>, vector<128x64xf32> -> vector<128x64xf32>
    %162 = arith.addf %158, %161 : vector<128x64xf32>
    %163 = vector.extract_strided_slice %115 {offsets = [1536, 0], sizes = [128, 128], strides = [1, 1]} : vector<2048x128xbf16> to vector<128x128xbf16>
    %c1536 = arith.constant 1536 : index
    %c0_93 = arith.constant 0 : index
    %164 = vector.load %arg9[%c1536, %c0_93] : memref<2048x64xbf16, #tpu.memory_space<vmem>>, vector<128x64xbf16>
    %cst_94 = arith.constant dense<0.000000e+00> : vector<128x64xf32>
    %165 = tpu.matmul %163, %164, %cst_94 {dimension_numbers = #tpu.dot_dimension_numbers<[1], [0], [0], [1], [0, 0, 1, 1], [], []>} : vector<128x128xbf16>, vector<128x64xbf16>, vector<128x64xf32> -> vector<128x64xf32>
    %166 = arith.addf %162, %165 : vector<128x64xf32>
    %167 = vector.extract_strided_slice %115 {offsets = [1664, 0], sizes = [128, 128], strides = [1, 1]} : vector<2048x128xbf16> to vector<128x128xbf16>
    %c1664 = arith.constant 1664 : index
    %c0_95 = arith.constant 0 : index
    %168 = vector.load %arg9[%c1664, %c0_95] : memref<2048x64xbf16, #tpu.memory_space<vmem>>, vector<128x64xbf16>
    %cst_96 = arith.constant dense<0.000000e+00> : vector<128x64xf32>
    %169 = tpu.matmul %167, %168, %cst_96 {dimension_numbers = #tpu.dot_dimension_numbers<[1], [0], [0], [1], [0, 0, 1, 1], [], []>} : vector<128x128xbf16>, vector<128x64xbf16>, vector<128x64xf32> -> vector<128x64xf32>
    %170 = arith.addf %166, %169 : vector<128x64xf32>
    %171 = vector.extract_strided_slice %115 {offsets = [1792, 0], sizes = [128, 128], strides = [1, 1]} : vector<2048x128xbf16> to vector<128x128xbf16>
    %c1792 = arith.constant 1792 : index
    %c0_97 = arith.constant 0 : index
    %172 = vector.load %arg9[%c1792, %c0_97] : memref<2048x64xbf16, #tpu.memory_space<vmem>>, vector<128x64xbf16>
    %cst_98 = arith.constant dense<0.000000e+00> : vector<128x64xf32>
    %173 = tpu.matmul %171, %172, %cst_98 {dimension_numbers = #tpu.dot_dimension_numbers<[1], [0], [0], [1], [0, 0, 1, 1], [], []>} : vector<128x128xbf16>, vector<128x64xbf16>, vector<128x64xf32> -> vector<128x64xf32>
    %174 = arith.addf %170, %173 : vector<128x64xf32>
    %175 = vector.extract_strided_slice %115 {offsets = [1920, 0], sizes = [128, 128], strides = [1, 1]} : vector<2048x128xbf16> to vector<128x128xbf16>
    %c1920 = arith.constant 1920 : index
    %c0_99 = arith.constant 0 : index
    %176 = vector.load %arg9[%c1920, %c0_99] : memref<2048x64xbf16, #tpu.memory_space<vmem>>, vector<128x64xbf16>
    %cst_100 = arith.constant dense<0.000000e+00> : vector<128x64xf32>
    %177 = tpu.matmul %175, %176, %cst_100 {dimension_numbers = #tpu.dot_dimension_numbers<[1], [0], [0], [1], [0, 0, 1, 1], [], []>} : vector<128x128xbf16>, vector<128x64xbf16>, vector<128x64xf32> -> vector<128x64xf32>
    %178 = arith.addf %174, %177 : vector<128x64xf32>
    %179 = vector.broadcast %113 : vector<1x64xf32> to vector<128x64xf32>
    %180 = arith.addf %178, %179 : vector<128x64xf32>
    %c0_101 = arith.constant 0 : index
    %c0_102 = arith.constant 0 : index
    %181 = vector.load %arg11[%c0_101, %c0_102] : memref<1x64xf32, #tpu.memory_space<vmem>>, vector<1x64xf32>
    %c0_103 = arith.constant 0 : index
    %c0_104 = arith.constant 0 : index
    %182 = vector.load %arg12[%c0_103, %c0_104] : memref<1x64xf32, #tpu.memory_space<vmem>>, vector<1x64xf32>
    %cst_105 = arith.constant dense<0.000000e+00> : vector<64xf32>
    %183 = vector.multi_reduction <add>, %180, %cst_105 [0] : vector<128x64xf32> to vector<64xf32>
    %184 = vector.shape_cast %183 : vector<64xf32> to vector<1x64xf32>
    %cst_106 = arith.constant 1.280000e+02 : f32
    %185 = vector.broadcast %cst_106 : f32 to vector<1x64xf32>
    %186 = arith.divf %184, %185 : vector<1x64xf32>
    %187 = vector.broadcast %186 : vector<1x64xf32> to vector<128x64xf32>
    %188 = arith.subf %180, %187 : vector<128x64xf32>
    %189 = vector.broadcast %186 : vector<1x64xf32> to vector<128x64xf32>
    %190 = arith.subf %180, %189 : vector<128x64xf32>
    %191 = arith.mulf %188, %190 : vector<128x64xf32>
    %cst_107 = arith.constant dense<0.000000e+00> : vector<64xf32>
    %192 = vector.multi_reduction <add>, %191, %cst_107 [0] : vector<128x64xf32> to vector<64xf32>
    %193 = vector.shape_cast %192 : vector<64xf32> to vector<1x64xf32>
    %cst_108 = arith.constant 1.280000e+02 : f32
    %194 = vector.broadcast %cst_108 : f32 to vector<1x64xf32>
    %195 = arith.divf %193, %194 : vector<1x64xf32>
    %cst_109 = arith.constant 9.99999974E-6 : f32
    %196 = vector.broadcast %cst_109 : f32 to vector<1x64xf32>
    %197 = arith.addf %195, %196 : vector<1x64xf32>
    %198 = math.rsqrt %197 : vector<1x64xf32>
    %199 = arith.mulf %181, %198 : vector<1x64xf32>
    %200 = vector.broadcast %199 : vector<1x64xf32> to vector<128x64xf32>
    %201 = arith.mulf %180, %200 : vector<128x64xf32>
    %202 = arith.mulf %186, %199 : vector<1x64xf32>
    %203 = arith.subf %182, %202 : vector<1x64xf32>
    %204 = vector.broadcast %203 : vector<1x64xf32> to vector<128x64xf32>
    %205 = arith.addf %201, %204 : vector<128x64xf32>
    %cst_110 = arith.constant 0.000000e+00 : f32
    %206 = vector.broadcast %cst_110 : f32 to vector<128x64xf32>
    %207 = arith.cmpf oge, %205, %206 : vector<128x64xf32>
    %cst_111 = arith.constant 0.00999999977 : f32
    %208 = vector.broadcast %cst_111 : f32 to vector<128x64xf32>
    %209 = arith.mulf %208, %205 : vector<128x64xf32>
    %210 = arith.select %207, %205, %209 : vector<128x64xi1>, vector<128x64xf32>
    %211 = arith.truncf %210 : vector<128x64xf32> to vector<128x64xbf16>
    %c0_112 = arith.constant 0 : index
    %c0_113 = arith.constant 0 : index
    %212 = vector.load %arg13[%c0_112, %c0_113] : memref<8192x128xbf16, #tpu.memory_space<vmem>>, vector<8192x128xbf16>
    %c0_114 = arith.constant 0 : index
    %c0_115 = arith.constant 0 : index
    %213 = vector.load %arg15[%c0_114, %c0_115] : memref<1x128xf32, #tpu.memory_space<vmem>>, vector<1x128xf32>
    %cst_116 = arith.constant dense<0.000000e+00> : vector<8192x64xf32>
    %214 = tpu.matmul %212, %211, %cst_116 {dimension_numbers = #tpu.dot_dimension_numbers<[1], [0], [0], [1], [0, 0, 1, 1], [], []>} : vector<8192x128xbf16>, vector<128x64xbf16>, vector<8192x64xf32> -> vector<8192x64xf32>
    %215 = arith.truncf %214 : vector<8192x64xf32> to vector<8192x64xbf16>
    %216 = vector.extract_strided_slice %215 {offsets = [0, 0], sizes = [512, 64], strides = [1, 1]} : vector<8192x64xbf16> to vector<512x64xbf16>
    %c0_117 = arith.constant 0 : index
    %c0_118 = arith.constant 0 : index
    %217 = vector.load %arg14[%c0_117, %c0_118] : memref<1024x128xbf16, #tpu.memory_space<vmem>>, vector<64x128xbf16>
    %cst_119 = arith.constant dense<0.000000e+00> : vector<512x128xf32>
    %218 = tpu.matmul %216, %217, %cst_119 {dimension_numbers = #tpu.dot_dimension_numbers<[1], [0], [0], [1], [0, 0, 1, 1], [], []>} : vector<512x64xbf16>, vector<64x128xbf16>, vector<512x128xf32> -> vector<512x128xf32>
    %219 = vector.extract_strided_slice %215 {offsets = [512, 0], sizes = [512, 64], strides = [1, 1]} : vector<8192x64xbf16> to vector<512x64xbf16>
    %c64_120 = arith.constant 64 : index
    %c0_121 = arith.constant 0 : index
    %220 = vector.load %arg14[%c64_120, %c0_121] : memref<1024x128xbf16, #tpu.memory_space<vmem>>, vector<64x128xbf16>
    %cst_122 = arith.constant dense<0.000000e+00> : vector<512x128xf32>
    %221 = tpu.matmul %219, %220, %cst_122 {dimension_numbers = #tpu.dot_dimension_numbers<[1], [0], [0], [1], [0, 0, 1, 1], [], []>} : vector<512x64xbf16>, vector<64x128xbf16>, vector<512x128xf32> -> vector<512x128xf32>
    %222 = arith.addf %218, %221 : vector<512x128xf32>
    %223 = vector.extract_strided_slice %215 {offsets = [1024, 0], sizes = [512, 64], strides = [1, 1]} : vector<8192x64xbf16> to vector<512x64xbf16>
    %c128_123 = arith.constant 128 : index
    %c0_124 = arith.constant 0 : index
    %224 = vector.load %arg14[%c128_123, %c0_124] : memref<1024x128xbf16, #tpu.memory_space<vmem>>, vector<64x128xbf16>
    %cst_125 = arith.constant dense<0.000000e+00> : vector<512x128xf32>
    %225 = tpu.matmul %223, %224, %cst_125 {dimension_numbers = #tpu.dot_dimension_numbers<[1], [0], [0], [1], [0, 0, 1, 1], [], []>} : vector<512x64xbf16>, vector<64x128xbf16>, vector<512x128xf32> -> vector<512x128xf32>
    %226 = arith.addf %222, %225 : vector<512x128xf32>
    %227 = vector.extract_strided_slice %215 {offsets = [1536, 0], sizes = [512, 64], strides = [1, 1]} : vector<8192x64xbf16> to vector<512x64xbf16>
    %c192_126 = arith.constant 192 : index
    %c0_127 = arith.constant 0 : index
    %228 = vector.load %arg14[%c192_126, %c0_127] : memref<1024x128xbf16, #tpu.memory_space<vmem>>, vector<64x128xbf16>
    %cst_128 = arith.constant dense<0.000000e+00> : vector<512x128xf32>
    %229 = tpu.matmul %227, %228, %cst_128 {dimension_numbers = #tpu.dot_dimension_numbers<[1], [0], [0], [1], [0, 0, 1, 1], [], []>} : vector<512x64xbf16>, vector<64x128xbf16>, vector<512x128xf32> -> vector<512x128xf32>
    %230 = arith.addf %226, %229 : vector<512x128xf32>
    %231 = vector.extract_strided_slice %215 {offsets = [2048, 0], sizes = [512, 64], strides = [1, 1]} : vector<8192x64xbf16> to vector<512x64xbf16>
    %c256_129 = arith.constant 256 : index
    %c0_130 = arith.constant 0 : index
    %232 = vector.load %arg14[%c256_129, %c0_130] : memref<1024x128xbf16, #tpu.memory_space<vmem>>, vector<64x128xbf16>
    %cst_131 = arith.constant dense<0.000000e+00> : vector<512x128xf32>
    %233 = tpu.matmul %231, %232, %cst_131 {dimension_numbers = #tpu.dot_dimension_numbers<[1], [0], [0], [1], [0, 0, 1, 1], [], []>} : vector<512x64xbf16>, vector<64x128xbf16>, vector<512x128xf32> -> vector<512x128xf32>
    %234 = arith.addf %230, %233 : vector<512x128xf32>
    %235 = vector.extract_strided_slice %215 {offsets = [2560, 0], sizes = [512, 64], strides = [1, 1]} : vector<8192x64xbf16> to vector<512x64xbf16>
    %c320_132 = arith.constant 320 : index
    %c0_133 = arith.constant 0 : index
    %236 = vector.load %arg14[%c320_132, %c0_133] : memref<1024x128xbf16, #tpu.memory_space<vmem>>, vector<64x128xbf16>
    %cst_134 = arith.constant dense<0.000000e+00> : vector<512x128xf32>
    %237 = tpu.matmul %235, %236, %cst_134 {dimension_numbers = #tpu.dot_dimension_numbers<[1], [0], [0], [1], [0, 0, 1, 1], [], []>} : vector<512x64xbf16>, vector<64x128xbf16>, vector<512x128xf32> -> vector<512x128xf32>
    %238 = arith.addf %234, %237 : vector<512x128xf32>
    %239 = vector.extract_strided_slice %215 {offsets = [3072, 0], sizes = [512, 64], strides = [1, 1]} : vector<8192x64xbf16> to vector<512x64xbf16>
    %c384_135 = arith.constant 384 : index
    %c0_136 = arith.constant 0 : index
    %240 = vector.load %arg14[%c384_135, %c0_136] : memref<1024x128xbf16, #tpu.memory_space<vmem>>, vector<64x128xbf16>
    %cst_137 = arith.constant dense<0.000000e+00> : vector<512x128xf32>
    %241 = tpu.matmul %239, %240, %cst_137 {dimension_numbers = #tpu.dot_dimension_numbers<[1], [0], [0], [1], [0, 0, 1, 1], [], []>} : vector<512x64xbf16>, vector<64x128xbf16>, vector<512x128xf32> -> vector<512x128xf32>
    %242 = arith.addf %238, %241 : vector<512x128xf32>
    %243 = vector.extract_strided_slice %215 {offsets = [3584, 0], sizes = [512, 64], strides = [1, 1]} : vector<8192x64xbf16> to vector<512x64xbf16>
    %c448_138 = arith.constant 448 : index
    %c0_139 = arith.constant 0 : index
    %244 = vector.load %arg14[%c448_138, %c0_139] : memref<1024x128xbf16, #tpu.memory_space<vmem>>, vector<64x128xbf16>
    %cst_140 = arith.constant dense<0.000000e+00> : vector<512x128xf32>
    %245 = tpu.matmul %243, %244, %cst_140 {dimension_numbers = #tpu.dot_dimension_numbers<[1], [0], [0], [1], [0, 0, 1, 1], [], []>} : vector<512x64xbf16>, vector<64x128xbf16>, vector<512x128xf32> -> vector<512x128xf32>
    %246 = arith.addf %242, %245 : vector<512x128xf32>
    %247 = vector.extract_strided_slice %215 {offsets = [4096, 0], sizes = [512, 64], strides = [1, 1]} : vector<8192x64xbf16> to vector<512x64xbf16>
    %c512_141 = arith.constant 512 : index
    %c0_142 = arith.constant 0 : index
    %248 = vector.load %arg14[%c512_141, %c0_142] : memref<1024x128xbf16, #tpu.memory_space<vmem>>, vector<64x128xbf16>
    %cst_143 = arith.constant dense<0.000000e+00> : vector<512x128xf32>
    %249 = tpu.matmul %247, %248, %cst_143 {dimension_numbers = #tpu.dot_dimension_numbers<[1], [0], [0], [1], [0, 0, 1, 1], [], []>} : vector<512x64xbf16>, vector<64x128xbf16>, vector<512x128xf32> -> vector<512x128xf32>
    %250 = arith.addf %246, %249 : vector<512x128xf32>
    %251 = vector.extract_strided_slice %215 {offsets = [4608, 0], sizes = [512, 64], strides = [1, 1]} : vector<8192x64xbf16> to vector<512x64xbf16>
    %c576_144 = arith.constant 576 : index
    %c0_145 = arith.constant 0 : index
    %252 = vector.load %arg14[%c576_144, %c0_145] : memref<1024x128xbf16, #tpu.memory_space<vmem>>, vector<64x128xbf16>
    %cst_146 = arith.constant dense<0.000000e+00> : vector<512x128xf32>
    %253 = tpu.matmul %251, %252, %cst_146 {dimension_numbers = #tpu.dot_dimension_numbers<[1], [0], [0], [1], [0, 0, 1, 1], [], []>} : vector<512x64xbf16>, vector<64x128xbf16>, vector<512x128xf32> -> vector<512x128xf32>
    %254 = arith.addf %250, %253 : vector<512x128xf32>
    %255 = vector.extract_strided_slice %215 {offsets = [5120, 0], sizes = [512, 64], strides = [1, 1]} : vector<8192x64xbf16> to vector<512x64xbf16>
    %c640_147 = arith.constant 640 : index
    %c0_148 = arith.constant 0 : index
    %256 = vector.load %arg14[%c640_147, %c0_148] : memref<1024x128xbf16, #tpu.memory_space<vmem>>, vector<64x128xbf16>
    %cst_149 = arith.constant dense<0.000000e+00> : vector<512x128xf32>
    %257 = tpu.matmul %255, %256, %cst_149 {dimension_numbers = #tpu.dot_dimension_numbers<[1], [0], [0], [1], [0, 0, 1, 1], [], []>} : vector<512x64xbf16>, vector<64x128xbf16>, vector<512x128xf32> -> vector<512x128xf32>
    %258 = arith.addf %254, %257 : vector<512x128xf32>
    %259 = vector.extract_strided_slice %215 {offsets = [5632, 0], sizes = [512, 64], strides = [1, 1]} : vector<8192x64xbf16> to vector<512x64xbf16>
    %c704_150 = arith.constant 704 : index
    %c0_151 = arith.constant 0 : index
    %260 = vector.load %arg14[%c704_150, %c0_151] : memref<1024x128xbf16, #tpu.memory_space<vmem>>, vector<64x128xbf16>
    %cst_152 = arith.constant dense<0.000000e+00> : vector<512x128xf32>
    %261 = tpu.matmul %259, %260, %cst_152 {dimension_numbers = #tpu.dot_dimension_numbers<[1], [0], [0], [1], [0, 0, 1, 1], [], []>} : vector<512x64xbf16>, vector<64x128xbf16>, vector<512x128xf32> -> vector<512x128xf32>
    %262 = arith.addf %258, %261 : vector<512x128xf32>
    %263 = vector.extract_strided_slice %215 {offsets = [6144, 0], sizes = [512, 64], strides = [1, 1]} : vector<8192x64xbf16> to vector<512x64xbf16>
    %c768_153 = arith.constant 768 : index
    %c0_154 = arith.constant 0 : index
    %264 = vector.load %arg14[%c768_153, %c0_154] : memref<1024x128xbf16, #tpu.memory_space<vmem>>, vector<64x128xbf16>
    %cst_155 = arith.constant dense<0.000000e+00> : vector<512x128xf32>
    %265 = tpu.matmul %263, %264, %cst_155 {dimension_numbers = #tpu.dot_dimension_numbers<[1], [0], [0], [1], [0, 0, 1, 1], [], []>} : vector<512x64xbf16>, vector<64x128xbf16>, vector<512x128xf32> -> vector<512x128xf32>
    %266 = arith.addf %262, %265 : vector<512x128xf32>
    %267 = vector.extract_strided_slice %215 {offsets = [6656, 0], sizes = [512, 64], strides = [1, 1]} : vector<8192x64xbf16> to vector<512x64xbf16>
    %c832_156 = arith.constant 832 : index
    %c0_157 = arith.constant 0 : index
    %268 = vector.load %arg14[%c832_156, %c0_157] : memref<1024x128xbf16, #tpu.memory_space<vmem>>, vector<64x128xbf16>
    %cst_158 = arith.constant dense<0.000000e+00> : vector<512x128xf32>
    %269 = tpu.matmul %267, %268, %cst_158 {dimension_numbers = #tpu.dot_dimension_numbers<[1], [0], [0], [1], [0, 0, 1, 1], [], []>} : vector<512x64xbf16>, vector<64x128xbf16>, vector<512x128xf32> -> vector<512x128xf32>
    %270 = arith.addf %266, %269 : vector<512x128xf32>
    %271 = vector.extract_strided_slice %215 {offsets = [7168, 0], sizes = [512, 64], strides = [1, 1]} : vector<8192x64xbf16> to vector<512x64xbf16>
    %c896_159 = arith.constant 896 : index
    %c0_160 = arith.constant 0 : index
    %272 = vector.load %arg14[%c896_159, %c0_160] : memref<1024x128xbf16, #tpu.memory_space<vmem>>, vector<64x128xbf16>
    %cst_161 = arith.constant dense<0.000000e+00> : vector<512x128xf32>
    %273 = tpu.matmul %271, %272, %cst_161 {dimension_numbers = #tpu.dot_dimension_numbers<[1], [0], [0], [1], [0, 0, 1, 1], [], []>} : vector<512x64xbf16>, vector<64x128xbf16>, vector<512x128xf32> -> vector<512x128xf32>
    %274 = arith.addf %270, %273 : vector<512x128xf32>
    %275 = vector.extract_strided_slice %215 {offsets = [7680, 0], sizes = [512, 64], strides = [1, 1]} : vector<8192x64xbf16> to vector<512x64xbf16>
    %c960_162 = arith.constant 960 : index
    %c0_163 = arith.constant 0 : index
    %276 = vector.load %arg14[%c960_162, %c0_163] : memref<1024x128xbf16, #tpu.memory_space<vmem>>, vector<64x128xbf16>
    %cst_164 = arith.constant dense<0.000000e+00> : vector<512x128xf32>
    %277 = tpu.matmul %275, %276, %cst_164 {dimension_numbers = #tpu.dot_dimension_numbers<[1], [0], [0], [1], [0, 0, 1, 1], [], []>} : vector<512x64xbf16>, vector<64x128xbf16>, vector<512x128xf32> -> vector<512x128xf32>
    %278 = arith.addf %274, %277 : vector<512x128xf32>
    %279 = vector.broadcast %213 : vector<1x128xf32> to vector<512x128xf32>
    %280 = arith.addf %278, %279 : vector<512x128xf32>
    %281 = tpu.iota {dimensions = array<i32: 1>} : vector<512x128xi32>
    %c3_i32 = arith.constant 3 : i32
    %282 = vector.broadcast %c3_i32 : i32 to vector<512x128xi32>
    %283 = arith.cmpi slt, %281, %282 : vector<512x128xi32>
    %cst_165 = arith.constant -1.000000e+30 : f32
    %284 = vector.broadcast %cst_165 : f32 to vector<512x128xf32>
    %285 = arith.select %283, %280, %284 : vector<512x128xi1>, vector<512x128xf32>
    %cst_166 = arith.constant dense<0xFF800000> : vector<512xf32>
    %286 = vector.multi_reduction <maximumf>, %285, %cst_166 [1] : vector<512x128xf32> to vector<512xf32>
    %287 = vector.shape_cast %286 : vector<512xf32> to vector<512x1xf32>
    %288 = vector.broadcast %287 : vector<512x1xf32> to vector<512x128xf32>
    %289 = arith.subf %280, %288 : vector<512x128xf32>
    %290 = math.exp %289 : vector<512x128xf32>
    %cst_167 = arith.constant 0.000000e+00 : f32
    %291 = vector.broadcast %cst_167 : f32 to vector<512x128xf32>
    %292 = arith.select %283, %290, %291 : vector<512x128xi1>, vector<512x128xf32>
    %cst_168 = arith.constant dense<0.000000e+00> : vector<512xf32>
    %293 = vector.multi_reduction <add>, %292, %cst_168 [1] : vector<512x128xf32> to vector<512xf32>
    %294 = vector.shape_cast %293 : vector<512xf32> to vector<512x1xf32>
    %295 = vector.broadcast %294 : vector<512x1xf32> to vector<512x128xf32>
    %296 = arith.divf %292, %295 : vector<512x128xf32>
    %c0_169 = arith.constant 0 : index
    %c0_170 = arith.constant 0 : index
    %297 = vector.load %arg16[%c0_169, %c0_170] : memref<512x128xf32, #tpu.memory_space<vmem>>, vector<512x128xf32>
    tpu.vector_store %arg16[%c0_169, %c0_170], %296 {strides = array<i32>} : memref<512x128xf32, #tpu.memory_space<vmem>>, vector<512x128xf32>,
    return
  }
}

</mosaic_0001>

<bundles_post_ra>
// kernel: flexible_gan_forward.1
= control target key start
LH: loop header
LB: loop body
LE: loop exit
PB: predicated region body
PF: predicated region fallthrough
CT: control target
= control target key end

     0   :  { %s42538_s1 = inlined_call_operand.vmem [shape: bf16[128,64], index: 1, kind: input, shape index: {}]   ;;  %s42539_s0 = inlined_call_operand.vmem [shape: bf16[128,128], index: 0, kind: input, shape index: {}]   ;;  %s42540_s3 = inlined_call_operand.vmem [shape: bf16[512,128], index: 3, kind: input, shape index: {}]   ;;  %s42541_s2 = inlined_call_operand.vmem [shape: f32[1,64], index: 2, kind: input, shape index: {}]   ;;  %s42542_s4 = inlined_call_operand.vmem [shape: bf16[1024,128], index: 4, kind: input, shape index: {}]   ;;  %s42543_s8 = inlined_call_operand.vmem [shape: bf16[2048,32], index: 8, kind: input, shape index: {}]   ;;  %s42544_s5 = inlined_call_operand.vmem [shape: f32[1,128], index: 5, kind: input, shape index: {}]   ;;  %s42545_s6 = inlined_call_operand.vmem [shape: f32[1,128], index: 6, kind: input, shape index: {}]   ;;  %s42546_s7 = inlined_call_operand.vmem [shape: f32[1,128], index: 7, kind: input, shape index: {}]   ;;  %s42547_s9 = inlined_call_operand.vmem [shape: bf16[2048,64], index: 9, kind: input, shape index: {}]   ;;  %s42548_s10 = inlined_call_operand.vmem [shape: f32[1,64], index: 10, kind: input, shape index: {}]   ;;  %s42549_s13 = inlined_call_operand.vmem [shape: bf16[8192,128], index: 13, kind: input, shape index: {}]   ;;  %s42550_s11 = inlined_call_operand.vmem [shape: f32[1,64], index: 11, kind: input, shape index: {}]   ;;  %s42551_s12 = inlined_call_operand.vmem [shape: f32[1,64], index: 12, kind: input, shape index: {}]   ;;  %s42552_s14 = inlined_call_operand.vmem [shape: bf16[1024,128], index: 14, kind: input, shape index: {}]   ;;  %s42553_s15 = inlined_call_operand.vmem [shape: f32[1,128], index: 15, kind: input, shape index: {}]   ;;  %s42554_s16 = inlined_call_operand.vmem [shape: f32[512,128], index: 16, kind: output, shape index: {}]  }
   0x1   :  { %42603 = sst [smem:[#allocation23_spill]] %s42538_s1  ;;  %v32903_v4 = vld [vmem:[%s42539_s0] sm:$0xff]   ;;  %v32904_v9 = vld [vmem:[%s42539_s0 + $0x8] sm:$0xff]   ;;  %v32905_v10 = vld [vmem:[%s42539_s0 + $0x10] sm:$0xff]  }
   0x2   :  { %s42604_s23 = sld [smem:[#allocation23_spill]]  ;;  %28375 = vmatprep.mubr.bf16.mxu0 %v32903_v4  ;;  %v32906_v11 = vld [vmem:[%s42539_s0 + $0x18] sm:$0xff]   ;;  %v32907_v12 = vld [vmem:[%s42539_s0 + $0x20] sm:$0xff]   ;;  %v32908_v13 = vld [vmem:[%s42539_s0 + $0x28] sm:$0xff]  }
   0x3   :  { %v32909_v14 = vld [vmem:[%s42539_s0 + $0x30] sm:$0xff]   ;;  %v32910_v15 = vld [vmem:[%s42539_s0 + $0x38] sm:$0xff]   ;;  %v32911_v16 = vld [vmem:[%s42540_s3] sm:$0xff]  }
   0x4   :  { %28407 = vmatprep.mubr.bf16.mxu1 %v32911_v16  ;;  %v34238_v17 = vld [vmem:[%s42541_s2] ss:$0 sm:$0xff] }
   0x5   :  { %v32937_v46 = vld [vmem:[%s42542_s4 + $0x20] sm:$0xff]  }
   0x8   :  { %v32895_v0 = vld [vmem:[%s42604_s23] sm:$0xff]   ;;  %v32896_v1 = vld [vmem:[%s42604_s23 + $0x8] sm:$0xff]   ;;  %v32897_v2 = vld [vmem:[%s42604_s23 + $0x10] sm:$0xff]  }
   0x9   :  { %28359 = vmatprep.subr.bf16.mxu0 %v32895_v0  ;;  %v32898_v3 = vld [vmem:[%s42604_s23 + $0x18] sm:$0xff]   ;;  %v32899_v5 = vld [vmem:[%s42604_s23 + $0x20] sm:$0xff]   ;;  %v32900_v6 = vld [vmem:[%s42604_s23 + $0x28] sm:$0xff]  }
   0xa   :  { %28360 = vmatpush3.bf16.msra.mxu0 %v32895_v0  ;;  %v32901_v7 = vld [vmem:[%s42604_s23 + $0x30] sm:$0xff]   ;;  %v32902_v8 = vld [vmem:[%s42604_s23 + $0x38] sm:$0xff]  }
   0xb   :  { %28361 = vmatprep.subr.bf16.mxu0 %v32896_v1 }
   0xe   :  { %28362 = vmatpush3.bf16.msra.mxu0 %v32896_v1 }
   0xf   :  { %28363 = vmatprep.subr.bf16.mxu0 %v32897_v2 }
  0x12   :  { %28364 = vmatpush3.bf16.msra.mxu0 %v32897_v2 }
  0x13   :  { %28365 = vmatprep.subr.bf16.mxu0 %v32898_v3 }
  0x16   :  { %28366 = vmatpush3.bf16.msra.mxu0 %v32898_v3 }
  0x17   :  { %28367 = vmatprep.subr.bf16.mxu0 %v32899_v5 }
  0x1a   :  { %28368 = vmatpush3.bf16.msra.mxu0 %v32899_v5 }
  0x1b   :  { %28369 = vmatprep.subr.bf16.mxu0 %v32900_v6 }
  0x1e   :  { %28370 = vmatpush3.bf16.msra.mxu0 %v32900_v6 }
  0x1f   :  { %28371 = vmatprep.subr.bf16.mxu0 %v32901_v7 }
  0x22   :  { %28372 = vmatpush3.bf16.msra.mxu0 %v32901_v7 }
  0x23   :  { %28373 = vmatprep.subr.bf16.mxu0 %v32902_v8 }
  0x26   :  { %28374 = vmatpush3.bf16.msra.mxu0 %v32902_v8 }
  0x27   :  { %28471 = vmatprep.subr.bf16.mxu0 %v32937_v46 }
  0x29   :  { %28376 = vmatmul.mubr.bf16.vlgmr.msra.gmra.mrb[0].mxu0 %v32904_v9 }
  0x2a   :  { %28379 = vmatprep.mubr.bf16.mxu0 %v32905_v10  ;;  %28472 = vmatpush3.bf16.msra.mxu0 %v32937_v46  ;;  %v32931_v46 = vld [vmem:[%s42540_s3 + $0xa0] sm:$0xff]  }
  0x31   :  { %28380 = vmatmul.mubr.bf16.gmra.mrb[4].mxu0 %v32906_v11 }
  0x32   :  { %28383 = vmatprep.mubr.bf16.mxu0 %v32907_v12 }
  0x39   :  { %28384 = vmatmul.mubr.bf16.gmra.mrb[8].mxu0 %v32908_v13 }
  0x3a   :  { %28387 = vmatprep.mubr.bf16.mxu0 %v32909_v14 }
  0x41   :  { %28388 = vmatmul.mubr.bf16.gmra.mrb[12].mxu0 %v32910_v15 }
  0xfc   :  { %v28377_v18 = vpop.f32.mrb[0].mxu0 }
  0xfd   :  { %v232_v19 = vadd.f32 %v28377_v18, %v34238_v17  ;;  %v223_v20 = vpop.f32.mrb[1].mxu0 }
  0xfe   :  { %v224_v21 = vadd.f32 %v34238_v17, %v223_v20  ;;  %v28378_v22 = vpop.f32.mrb[2].mxu0 }
  0xff   :  { %v304_v23 = vmul.f32 0.2, %v232_v19  ;;  %v235_v24 = vadd.f32 %v28378_v22, %v34238_v17  ;;  %v226_v25 = vpop.f32.mrb[3].mxu0  ;;  %vm288_vm0 = vcmp.ge.f32.partialorder %v232_v19, 0.0 }
 0x100   :  { %v302_v26 = vmul.f32 0.2, %v224_v21  ;;  %v227_v27 = vadd.f32 %v34238_v17, %v226_v25  ;;  %vm286_vm2 = vcmp.ge.f32.partialorder %v224_v21, 0.0 }
 0x101   :  { %vm289_vm1 = vcmp.ge.f32.partialorder %v235_v24, 0.0  ;;  %v305_v28 = vmul.f32 0.2, %v235_v24  ;;  %v320_v30 = vsel %vm288_vm0, %v232_v19, %v304_v23  ;;  %vm960_vm0 = vcmask 523264  }
 0x102   :  { %v303_v29 = vmul.f32 0.2, %v227_v27  ;;  %vm287_vm3 = vcmp.ge.f32.partialorder %v227_v27, 0.0  ;;  %v318_v33 = vsel %vm286_vm2, %v224_v21, %v302_v26 }
 0x103   :  { %v321_v31 = vsel %vm289_vm1, %v235_v24, %v305_v28  ;;  %v32913_v28 = vld [vmem:[%s42540_s3 + $0x10] sm:$0xff]   ;;  %vm3346_vm1 = vcmask 261120  }
 0x104   :  { %v28381_v32 = vpop.f32.mrb[4].mxu0  ;;  %v319_v34 = vsel %vm287_vm3, %v227_v27, %v303_v29  ;;  %v335_v35 = vpack.c.bf16 %v321_v31, %v320_v30  ;;  %v32914_v29 = vld [vmem:[%s42540_s3 + $0x18] sm:$0xff]   ;;  %v32915_v30 = vld [vmem:[%s42540_s3 + $0x20] sm:$0xff]   ;;  %v32916_v31 = vld [vmem:[%s42540_s3 + $0x28] sm:$0xff]  }
 0x105   :  { %v248_v36 = vadd.f32 %v28381_v32, %v34238_v17  ;;  %v239_v37 = vpop.f32.mrb[5].mxu0  ;;  %v334_v38 = vpack.c.bf16 %v319_v34, %v318_v33  ;;  %v32917_v32 = vld [vmem:[%s42540_s3 + $0x30] sm:$0xff]   ;;  %v32918_v33 = vld [vmem:[%s42540_s3 + $0x38] sm:$0xff]   ;;  %v32919_v34 = vld [vmem:[%s42540_s3 + $0x40] sm:$0xff]  }
 0x106   :  { %v240_v39 = vadd.f32 %v34238_v17, %v239_v37  ;;  %v28382_v40 = vpop.f32.mrb[6].mxu0  ;;  %v32922_v37 = vld [vmem:[%s42540_s3 + $0x58] sm:$0xff]  }
 0x107   :  { %v308_v41 = vmul.f32 0.2, %v248_v36  ;;  %v251_v42 = vadd.f32 %v28382_v40, %v34238_v17  ;;  %v242_v43 = vpop.f32.mrb[7].mxu0  ;;  %28391 = vmatprep.subr.bf16.mxu1 %v334_v38  ;;  %vm292_vm4 = vcmp.ge.f32.partialorder %v248_v36, 0.0  ;;  %v32925_v40 = vld [vmem:[%s42540_s3 + $0x70] sm:$0xff]  }
 0x108   :  { %v306_v44 = vmul.f32 0.2, %v240_v39  ;;  %v243_v45 = vadd.f32 %v34238_v17, %v242_v43  ;;  %28392 = vmatpush3.bf16.msra.mxu1 %v334_v38  ;;  %vm290_vm5 = vcmp.ge.f32.partialorder %v240_v39, 0.0  ;;  %v32923_v38 = vld [vmem:[%s42540_s3 + $0x60] sm:$0xff]   ;;  %v32928_v43 = vld [vmem:[%s42540_s3 + $0x88] sm:$0xff]  }
 0x109   :  { %vm293_vm6 = vcmp.ge.f32.partialorder %v251_v42, 0.0  ;;  %v309_v47 = vmul.f32 0.2, %v251_v42  ;;  %28393 = vmatprep.subr.bf16.mxu1 %v335_v35  ;;  %v324_v49 = vsel %vm292_vm4, %v248_v36, %v308_v41  ;;  %v32921_v36 = vld [vmem:[%s42540_s3 + $0x50] sm:$0xff]   ;;  %v32926_v41 = vld [vmem:[%s42540_s3 + $0x78] sm:$0xff]  }
 0x10a   :  { %vm291_vm7 = vcmp.ge.f32.partialorder %v243_v45, 0.0  ;;  %v307_v48 = vmul.f32 0.2, %v243_v45  ;;  %v322_v52 = vsel %vm290_vm5, %v240_v39, %v306_v44  ;;  %v32924_v39 = vld [vmem:[%s42540_s3 + $0x68] sm:$0xff]   ;;  %v32929_v44 = vld [vmem:[%s42540_s3 + $0x90] sm:$0xff]  }
 0x10b   :  { %v325_v50 = vsel %vm293_vm6, %v251_v42, %v309_v47  ;;  %v32927_v42 = vld [vmem:[%s42540_s3 + $0x80] sm:$0xff]   ;;  %v32932_v47 = vld [vmem:[%s42540_s3 + $0xa8] sm:$0xff]  }
 0x10c   :  { %v28385_v51 = vpop.f32.mrb[8].mxu0  ;;  %28394 = vmatpush3.bf16.msra.mxu1 %v335_v35  ;;  %v323_v53 = vsel %vm291_vm7, %v243_v45, %v307_v48  ;;  %v337_v54 = vpack.c.bf16 %v325_v50, %v324_v49  ;;  %v32920_v35 = vld [vmem:[%s42540_s3 + $0x48] sm:$0xff]   ;;  %v32930_v45 = vld [vmem:[%s42540_s3 + $0x98] sm:$0xff]   ;;  %v32933_v48 = vld [vmem:[%s42540_s3 + $0xb0] sm:$0xff]  }
 0x10d   :  { %v264_v55 = vadd.f32 %v28385_v51, %v34238_v17  ;;  %v255_v56 = vpop.f32.mrb[9].mxu0  ;;  %v336_v57 = vpack.c.bf16 %v323_v53, %v322_v52  ;;  %v32940_v49 = vld [vmem:[%s42542_s4 + $0x28] sm:$0xff]   ;;  %v32934_v50 = vld [vmem:[%s42540_s3 + $0xb8] sm:$0xff]   ;;  %v32935_v51 = vld [vmem:[%s42540_s3 + $0xc0] sm:$0xff]  }
 0x10e   :  { %v256_v58 = vadd.f32 %v34238_v17, %v255_v56  ;;  %v28386_v59 = vpop.f32.mrb[10].mxu0  ;;  %28473 = vmatprep.subr.bf16.mxu0 %v32940_v49  ;;  %v32941_v52 = vld [vmem:[%s42542_s4 + $0x30] sm:$0xff]   ;;  %v32942_v53 = vld [vmem:[%s42542_s4 + $0x38] sm:$0xff]   ;;  %v32943_v56 = vld [vmem:[%s42542_s4] sm:$0xff]  }
 0x10f   :  { %v312_v60 = vmul.f32 0.2, %v264_v55  ;;  %v267_v61 = vadd.f32 %v28386_v59, %v34238_v17  ;;  %v258_v62 = vpop.f32.mrb[11].mxu0  ;;  %28395 = vmatprep.subr.bf16.mxu1 %v336_v57  ;;  %vm296_vm8 = vcmp.ge.f32.partialorder %v264_v55, 0.0  ;;  %28474 = vmatpush3.bf16.msra.mxu0 %v32940_v49  ;;  %v32945_v59 = vld [vmem:[%s42540_s3 + $0xe8] sm:$0xff]  }
 0x110   :  { %v310_v63 = vmul.f32 0.2, %v256_v58  ;;  %v259_v0 = vadd.f32 %v34238_v17, %v258_v62  ;;  %28396 = vmatpush3.bf16.msra.mxu1 %v336_v57  ;;  %vm294_vm9 = vcmp.ge.f32.partialorder %v256_v58, 0.0  ;;  %28475 = vmatprep.subr.bf16.mxu0 %v32941_v52  ;;  %v32939_v57 = vld [vmem:[%s42540_s3 + $0xd8] sm:$0xff]  }
 0x111   :  { %vm297_vm10 = vcmp.ge.f32.partialorder %v267_v61, 0.0  ;;  %v313_v1 = vmul.f32 0.2, %v267_v61  ;;  %28397 = vmatprep.subr.bf16.mxu1 %v337_v54  ;;  %v328_v3 = vsel %vm296_vm8, %v264_v55, %v312_v60  ;;  %v32938_v55 = vld [vmem:[%s42540_s3 + $0xd0] sm:$0xff]  }
 0x112   :  { %vm295_vm11 = vcmp.ge.f32.partialorder %v259_v0, 0.0  ;;  %v311_v2 = vmul.f32 0.2, %v259_v0  ;;  %v326_v6 = vsel %vm294_vm9, %v256_v58, %v310_v63  ;;  %v32944_v58 = vld [vmem:[%s42540_s3 + $0xe0] sm:$0xff]   ;;  %v32950_v60 = vld [vmem:[%s42540_s3 + $0xf0] sm:$0xff]  }
 0x113   :  { %v329_v4 = vsel %vm297_vm10, %v267_v61, %v313_v1  ;;  %28476 = vmatpush3.bf16.msra.mxu0 %v32941_v52  ;;  %v32951_v61 = vld [vmem:[%s42540_s3 + $0xf8] sm:$0xff]   ;;  %v32959_v52 = vld [vmem:[%s42542_s4 + $0x80] sm:$0xff]  }
 0x114   :  { %v28389_v5 = vpop.f32.mrb[12].mxu0  ;;  %28398 = vmatpush3.bf16.msra.mxu1 %v337_v54  ;;  %v327_v7 = vsel %vm295_vm11, %v259_v0, %v311_v2  ;;  %v339_v8 = vpack.c.bf16 %v329_v4, %v328_v3  ;;  %v32936_v54 = vld [vmem:[%s42540_s3 + $0xc8] sm:$0xff]   ;;  %28477 = vmatprep.subr.bf16.mxu0 %v32942_v53 }
 0x115   :  { %v280_v9 = vadd.f32 %v28389_v5, %v34238_v17  ;;  %v271_v10 = vpop.f32.mrb[13].mxu0  ;;  %v338_v11 = vpack.c.bf16 %v327_v7, %v326_v6 }
 0x116   :  { %v272_v12 = vadd.f32 %v34238_v17, %v271_v10  ;;  %v28390_v13 = vpop.f32.mrb[14].mxu0  ;;  %v32946_v10 = vld [vmem:[%s42542_s4 + $0x8] sm:$0xff]  }
 0x117   :  { %v316_v14 = vmul.f32 0.2, %v280_v9  ;;  %v283_v15 = vadd.f32 %v28390_v13, %v34238_v17  ;;  %v274_v16 = vpop.f32.mrb[15].mxu0  ;;  %28399 = vmatprep.subr.bf16.mxu1 %v338_v11  ;;  %vm300_vm12 = vcmp.ge.f32.partialorder %v280_v9, 0.0  ;;  %28478 = vmatpush3.bf16.msra.mxu0 %v32942_v53 }
 0x118   :  { %v314_v18 = vmul.f32 0.2, %v272_v12  ;;  %v275_v19 = vadd.f32 %v34238_v17, %v274_v16  ;;  %28400 = vmatpush3.bf16.msra.mxu1 %v338_v11  ;;  %vm298_vm13 = vcmp.ge.f32.partialorder %v272_v12, 0.0  ;;  %v32912_v17 = vld [vmem:[%s42540_s3 + $0x8] sm:$0xff]   ;;  %28483 = vmatprep.subr.bf16.mxu0 %v32943_v56 }
 0x119   :  { %vm301_vm14 = vcmp.ge.f32.partialorder %v283_v15, 0.0  ;;  %v317_v20 = vmul.f32 0.2, %v283_v15  ;;  %28401 = vmatprep.subr.bf16.mxu1 %v339_v8  ;;  %v332_v22 = vsel %vm300_vm12, %v280_v9, %v316_v14 }
 0x11a   :  { %vm299_vm15 = vcmp.ge.f32.partialorder %v275_v19, 0.0  ;;  %v315_v21 = vmul.f32 0.2, %v275_v19  ;;  %v330_v24 = vsel %vm298_vm13, %v272_v12, %v314_v18  ;;  %v32947_v12 = vld [vmem:[%s42542_s4 + $0x10] sm:$0xff]  }
 0x11b   :  { %v333_v23 = vsel %vm301_vm14, %v283_v15, %v317_v20 }
 0x11c   :  { %28402 = vmatpush3.bf16.msra.mxu1 %v339_v8  ;;  %v331_v25 = vsel %vm299_vm15, %v275_v19, %v315_v21  ;;  %v341_v26 = vpack.c.bf16 %v333_v23, %v332_v22  ;;  %v32948_v19 = vld [vmem:[%s42542_s4 + $0x18] sm:$0xff]   ;;  %v32949_v21 = vld [vmem:[%s42542_s4 + $0x40] sm:$0xff]  }
 0x11d   :  { %v340_v27 = vpack.c.bf16 %v331_v25, %v330_v24 }
 0x11f   :  { %28403 = vmatprep.subr.bf16.mxu1 %v340_v27 }
 0x120   :  { %28404 = vmatpush3.bf16.msra.mxu1 %v340_v27  ;;  %v32952_v27 = vld [vmem:[%s42542_s4 + $0x48] sm:$0xff]  }
 0x121   :  { %28405 = vmatprep.subr.bf16.mxu1 %v341_v26 }
 0x124   :  { %28406 = vmatpush3.bf16.msra.mxu1 %v341_v26 }
 0x127   :  { %28408 = vmatmul.mubr.bf16.vlgmr.msra.gmra.mrb[0].mxu1 %v32912_v17 }
 0x128   :  { %28411 = vmatprep.mubr.bf16.mxu1 %v32913_v28  ;;  %v32953_v28 = vld [vmem:[%s42542_s4 + $0x50] sm:$0xff]  }
 0x12f   :  { %28412 = vmatmul.mubr.bf16.gmra.mrb[4].mxu1 %v32914_v29 }
 0x130   :  { %28415 = vmatprep.mubr.bf16.mxu1 %v32915_v30 }
 0x137   :  { %28416 = vmatmul.mubr.bf16.gmra.mrb[8].mxu1 %v32916_v31 }
 0x138   :  { %28419 = vmatprep.mubr.bf16.mxu1 %v32917_v32 }
 0x13f   :  { %28420 = vmatmul.mubr.bf16.gmra.mrb[12].mxu1 %v32918_v33 }
 0x140   :  { %28423 = vmatprep.mubr.bf16.mxu1 %v32919_v34  ;;  %v32954_v34 = vld [vmem:[%s42542_s4 + $0x58] sm:$0xff]  }
 0x147   :  { %28424 = vmatmul.mubr.bf16.gmra.mrb[16].mxu1 %v32920_v35 }
 0x148   :  { %28427 = vmatprep.mubr.bf16.mxu1 %v32921_v36  ;;  %v32955_v36 = vld [vmem:[%s42542_s4 + $0x60] sm:$0xff]  }
 0x14f   :  { %28428 = vmatmul.mubr.bf16.gmra.mrb[20].mxu1 %v32922_v37 }
 0x150   :  { %28431 = vmatprep.mubr.bf16.mxu1 %v32923_v38 }
 0x157   :  { %28432 = vmatmul.mubr.bf16.gmra.mrb[24].mxu1 %v32924_v39 }
 0x158   :  { %28435 = vmatprep.mubr.bf16.mxu1 %v32925_v40 }
 0x15f   :  { %28436 = vmatmul.mubr.bf16.gmra.mrb[28].mxu1 %v32926_v41 }
 0x160   :  { %28439 = vmatprep.mubr.bf16.mxu1 %v32927_v42  ;;  %v32956_v42 = vld [vmem:[%s42542_s4 + $0x68] sm:$0xff]  }
 0x167   :  { %28440 = vmatmul.mubr.bf16.gmra.mrb[32].mxu1 %v32928_v43 }
 0x168   :  { %28443 = vmatprep.mubr.bf16.mxu1 %v32929_v44  ;;  %v32957_v44 = vld [vmem:[%s42542_s4 + $0x70] sm:$0xff]  }
 0x16f   :  { %28444 = vmatmul.mubr.bf16.gmra.mrb[36].mxu1 %v32930_v45 }
 0x170   :  { %28447 = vmatprep.mubr.bf16.mxu1 %v32931_v46 }
 0x177   :  { %28448 = vmatmul.mubr.bf16.gmra.mrb[40].mxu1 %v32932_v47 }
 0x178   :  { %28451 = vmatprep.mubr.bf16.mxu1 %v32933_v48 }
 0x17f   :  { %28452 = vmatmul.mubr.bf16.gmra.mrb[44].mxu1 %v32934_v50  ;;  %v32958_v50 = vld [vmem:[%s42542_s4 + $0x78] sm:$0xff]  }
 0x180   :  { %28455 = vmatprep.mubr.bf16.mxu1 %v32935_v51 }
 0x187   :  { %28456 = vmatmul.mubr.bf16.gmra.mrb[48].mxu1 %v32936_v54 }
 0x188   :  { %28459 = vmatprep.mubr.bf16.mxu1 %v32938_v55 }
 0x18f   :  { %28460 = vmatmul.mubr.bf16.gmra.mrb[52].mxu1 %v32939_v57 }
 0x190   :  { %28463 = vmatprep.mubr.bf16.mxu1 %v32944_v58  ;;  %v32960_v58 = vld [vmem:[%s42542_s4 + $0x88] sm:$0xff]  }
 0x197   :  { %28464 = vmatmul.mubr.bf16.gmra.mrb[56].mxu1 %v32945_v59 }
 0x198   :  { %28467 = vmatprep.mubr.bf16.mxu1 %v32950_v60  ;;  %v32961_v60 = vld [vmem:[%s42542_s4 + $0x90] sm:$0xff]  }
 0x19f   :  { %28468 = vmatmul.mubr.bf16.gmra.mrb[60].mxu1 %v32951_v61 }
 0x1fa   :  { %v28409_v62 = vpop.f32.mrb[0].mxu1 }
 0x1fb   :  { %v633_v63 = vpop.f32.mrb[1].mxu1 }
 0x1fc   :  { %v28410_v0 = vpop.f32.mrb[2].mxu1 }
 0x1fd   :  { %v889_v1 = vpack.c.bf16 %v28410_v0, %v28409_v62  ;;  %v636_v2 = vpop.f32.mrb[3].mxu1 }
 0x1fe   :  { %v888_v3 = vpack.c.bf16 %v636_v2, %v633_v63  ;;  %v32962_v2 = vld [vmem:[%s42542_s4 + $0x98] sm:$0xff]  }
 0x202   :  { %v28413_v4 = vpop.f32.mrb[4].mxu1 }
 0x203   :  { %v649_v5 = vpop.f32.mrb[5].mxu1 }
 0x204   :  { %v28414_v6 = vpop.f32.mrb[6].mxu1 }
 0x205   :  { %v891_v7 = vpack.c.bf16 %v28414_v6, %v28413_v4  ;;  %v652_v8 = vpop.f32.mrb[7].mxu1  ;;  %v32963_v4 = vld [vmem:[%s42542_s4 + $0xa0] sm:$0xff]  }
 0x206   :  { %v890_v9 = vpack.c.bf16 %v652_v8, %v649_v5 }
 0x208   :  { %28479 = vmatprep.mubr.msk.bf16.mxu0 %vm960_vm0, %v890_v9 }
 0x209   :  { %28480 = vmatmul.mubr.msk.bf16.vlgmr.msra.gmra.mrb[16].mxu0 %vm960_vm0, %v891_v7 }
 0x20a   :  { %28484 = vmatpush3.bf16.msra.mxu0 %v32943_v56  ;;  %28491 = vmatprep.mubr.msk.bf16.mxu0 %vm960_vm0, %v888_v3  ;;  %v28417_v11 = vpop.f32.mrb[8].mxu1 }
 0x20b   :  { %28485 = vmatprep.subr.bf16.mxu0 %v32946_v10  ;;  %v665_v13 = vpop.f32.mrb[9].mxu1 }
 0x20c   :  { %v28418_v14 = vpop.f32.mrb[10].mxu1 }
 0x20d   :  { %v893_v15 = vpack.c.bf16 %v28418_v14, %v28417_v11  ;;  %v668_v16 = vpop.f32.mrb[11].mxu1 }
 0x20e   :  { %28486 = vmatpush3.bf16.msra.mxu0 %v32946_v10  ;;  %v892_v18 = vpack.c.bf16 %v668_v16, %v665_v13  ;;  %v32964_v10 = vld [vmem:[%s42542_s4 + $0xa8] sm:$0xff]  }
 0x20f   :  { %28487 = vmatprep.subr.bf16.mxu0 %v32947_v12 }
 0x212   :  { %28488 = vmatpush3.bf16.msra.mxu0 %v32947_v12  ;;  %v34376_v20 = vpop.f32.mrb[12].mxu1  ;;  %v32965_v12 = vld [vmem:[%s42542_s4 + $0xb0] sm:$0xff]  }
 0x213   :  { %28489 = vmatprep.subr.bf16.mxu0 %v32948_v19  ;;  %v681_v22 = vpop.f32.mrb[13].mxu1 }
 0x214   :  { %v28422_v23 = vpop.f32.mrb[14].mxu1 }
 0x215   :  { %v895_v24 = vpack.c.bf16 %v28422_v23, %v34376_v20  ;;  %v684_v25 = vpop.f32.mrb[15].mxu1 }
 0x216   :  { %28490 = vmatpush3.bf16.msra.mxu0 %v32948_v19  ;;  %v894_v26 = vpack.c.bf16 %v684_v25, %v681_v22  ;;  %v32966_v19 = vld [vmem:[%s42542_s4 + $0xb8] sm:$0xff]  }
 0x217   :  { %28495 = vmatprep.subr.bf16.mxu0 %v32949_v21 }
 0x219   :  { %28492 = vmatmul.mubr.msk.bf16.vlgmr.msra.gmra.mrb[16].mxu0 %vm960_vm0, %v889_v1 }
 0x21a   :  { %28496 = vmatpush3.bf16.msra.mxu0 %v32949_v21  ;;  %28503 = vmatprep.mubr.msk.bf16.mxu0 %vm960_vm0, %v892_v18  ;;  %v34387_v17 = vpop.f32.mrb[16].mxu1  ;;  %v32967_v21 = vld [vmem:[%s42542_s4 + $0xc0] sm:$0xff]  }
 0x21b   :  { %28497 = vmatprep.subr.bf16.mxu0 %v32952_v27  ;;  %v697_v29 = vpop.f32.mrb[17].mxu1 }
 0x21c   :  { %v34392_v30 = vpop.f32.mrb[18].mxu1 }
 0x21d   :  { %v897_v31 = vpack.c.bf16 %v34392_v30, %v34387_v17  ;;  %v700_v32 = vpop.f32.mrb[19].mxu1 }
 0x21e   :  { %28498 = vmatpush3.bf16.msra.mxu0 %v32952_v27  ;;  %v896_v33 = vpack.c.bf16 %v700_v32, %v697_v29  ;;  %v32968_v27 = vld [vmem:[%s42542_s4 + $0xc8] sm:$0xff]  }
 0x21f   :  { %28499 = vmatprep.subr.bf16.mxu0 %v32953_v28 }
 0x222   :  { %28500 = vmatpush3.bf16.msra.mxu0 %v32953_v28  ;;  %v34399_v35 = vpop.f32.mrb[20].mxu1  ;;  %v32969_v28 = vld [vmem:[%s42542_s4 + $0xd0] sm:$0xff]  }
 0x223   :  { %28501 = vmatprep.subr.bf16.mxu0 %v32954_v34  ;;  %v34404_v37 = vpop.f32.mrb[21].mxu1 }
 0x224   :  { %v34406_v38 = vpop.f32.mrb[22].mxu1 }
 0x225   :  { %v899_v39 = vpack.c.bf16 %v34406_v38, %v34399_v35  ;;  %v716_v40 = vpop.f32.mrb[23].mxu1 }
 0x226   :  { %28502 = vmatpush3.bf16.msra.mxu0 %v32954_v34  ;;  %v898_v41 = vpack.c.bf16 %v716_v40, %v34404_v37  ;;  %v32970_v34 = vld [vmem:[%s42542_s4 + $0xd8] sm:$0xff]  }
 0x227   :  { %28507 = vmatprep.subr.bf16.mxu0 %v32955_v36 }
 0x229   :  { %28504 = vmatmul.mubr.msk.bf16.vlgmr.msra.gmra.mrb[16].mxu0 %vm960_vm0, %v893_v15 }
 0x22a   :  { %28508 = vmatpush3.bf16.msra.mxu0 %v32955_v36  ;;  %28515 = vmatprep.mubr.msk.bf16.mxu0 %vm960_vm0, %v894_v26  ;;  %v34416_v43 = vpop.f32.mrb[24].mxu1  ;;  %v32971_v36 = vld [vmem:[%s42542_s4 + $0xe0] sm:$0xff]  }
 0x22b   :  { %28509 = vmatprep.subr.bf16.mxu0 %v32956_v42  ;;  %v34421_v45 = vpop.f32.mrb[25].mxu1 }
 0x22c   :  { %v34423_v46 = vpop.f32.mrb[26].mxu1 }
 0x22d   :  { %v901_v47 = vpack.c.bf16 %v34423_v46, %v34416_v43  ;;  %v34427_v48 = vpop.f32.mrb[27].mxu1 }
 0x22e   :  { %28510 = vmatpush3.bf16.msra.mxu0 %v32956_v42  ;;  %v900_v49 = vpack.c.bf16 %v34427_v48, %v34421_v45  ;;  %v32972_v42 = vld [vmem:[%s42542_s4 + $0xe8] sm:$0xff]   ;;  %v32973_v45 = vld [vmem:[%s42542_s4 + $0xf0] sm:$0xff]  }
 0x22f   :  { %28511 = vmatprep.subr.bf16.mxu0 %v32957_v44 }
 0x232   :  { %28512 = vmatpush3.bf16.msra.mxu0 %v32957_v44  ;;  %v34434_v51 = vpop.f32.mrb[28].mxu1 }
 0x233   :  { %28513 = vmatprep.subr.bf16.mxu0 %v32958_v50  ;;  %v34439_v53 = vpop.f32.mrb[29].mxu1 }
 0x234   :  { %v34441_v54 = vpop.f32.mrb[30].mxu1 }
 0x235   :  { %v903_v55 = vpack.c.bf16 %v34441_v54, %v34434_v51  ;;  %v34445_v56 = vpop.f32.mrb[31].mxu1  ;;  %v32979_v51 = vld [vmem:[%s42542_s4 + $0x120] sm:$0xff]   ;;  %v32980_v54 = vld [vmem:[%s42542_s4 + $0x128] sm:$0xff]  }
 0x236   :  { %28514 = vmatpush3.bf16.msra.mxu0 %v32958_v50  ;;  %v902_v57 = vpack.c.bf16 %v34445_v56, %v34439_v53  ;;  %v32974_v50 = vld [vmem:[%s42542_s4 + $0xf8] sm:$0xff]   ;;  %v32975_v53 = vld [vmem:[%s42542_s4 + $0x100] sm:$0xff]  }
 0x237   :  { %28519 = vmatprep.subr.bf16.mxu0 %v32959_v52 }
 0x239   :  { %28516 = vmatmul.mubr.msk.bf16.vlgmr.msra.gmra.mrb[16].mxu0 %vm960_vm0, %v895_v24 }
 0x23a   :  { %28520 = vmatpush3.bf16.msra.mxu0 %v32959_v52  ;;  %28527 = vmatprep.mubr.msk.bf16.mxu0 %vm960_vm0, %v896_v33  ;;  %v34454_v59 = vpop.f32.mrb[32].mxu1 }
 0x23b   :  { %28521 = vmatprep.subr.bf16.mxu0 %v32960_v58  ;;  %v34459_v61 = vpop.f32.mrb[33].mxu1 }
 0x23c   :  { %v34461_v62 = vpop.f32.mrb[34].mxu1 }
 0x23d   :  { %v905_v63 = vpack.c.bf16 %v34461_v62, %v34454_v59  ;;  %v34465_v0 = vpop.f32.mrb[35].mxu1  ;;  %v32983_v59 = vld [vmem:[%s42542_s4 + $0x140] sm:$0xff]   ;;  %v32984_v62 = vld [vmem:[%s42542_s4 + $0x148] sm:$0xff]  }
 0x23e   :  { %28522 = vmatpush3.bf16.msra.mxu0 %v32960_v58  ;;  %v904_v1 = vpack.c.bf16 %v34465_v0, %v34459_v61  ;;  %v32982_v61 = vld [vmem:[%s42542_s4 + $0x138] sm:$0xff]  }
 0x23f   :  { %28523 = vmatprep.subr.bf16.mxu0 %v32961_v60  ;;  %v32986_v0 = vld [vmem:[%s42542_s4 + $0x158] sm:$0xff]  }
 0x242   :  { %28524 = vmatpush3.bf16.msra.mxu0 %v32961_v60  ;;  %v34472_v3 = vpop.f32.mrb[36].mxu1 }
 0x243   :  { %28525 = vmatprep.subr.bf16.mxu0 %v32962_v2  ;;  %v34477_v5 = vpop.f32.mrb[37].mxu1 }
 0x244   :  { %v34479_v6 = vpop.f32.mrb[38].mxu1 }
 0x245   :  { %v907_v7 = vpack.c.bf16 %v34479_v6, %v34472_v3  ;;  %v34483_v8 = vpop.f32.mrb[39].mxu1  ;;  %v32988_v3 = vld [vmem:[%s42542_s4 + $0x168] sm:$0xff]   ;;  %v32990_v6 = vld [vmem:[%s42542_s4 + $0x178] sm:$0xff]  }
 0x246   :  { %28526 = vmatpush3.bf16.msra.mxu0 %v32962_v2  ;;  %v906_v9 = vpack.c.bf16 %v34483_v8, %v34477_v5  ;;  %v32989_v5 = vld [vmem:[%s42542_s4 + $0x170] sm:$0xff]   ;;  %v32992_v8 = vld [vmem:[%s42542_s4 + $0x188] sm:$0xff]  }
 0x247   :  { %28531 = vmatprep.subr.bf16.mxu0 %v32963_v4 }
 0x249   :  { %28528 = vmatmul.mubr.msk.bf16.vlgmr.msra.gmra.mrb[16].mxu0 %vm960_vm0, %v897_v31 }
 0x24a   :  { %28532 = vmatpush3.bf16.msra.mxu0 %v32963_v4  ;;  %28539 = vmatprep.mubr.msk.bf16.mxu0 %vm960_vm0, %v898_v41  ;;  %v34495_v11 = vpop.f32.mrb[40].mxu1  ;;  %v32976_v4 = vld [vmem:[%s42542_s4 + $0x108] sm:$0xff]  }
 0x24b   :  { %28533 = vmatprep.subr.bf16.mxu0 %v32964_v10  ;;  %v34500_v13 = vpop.f32.mrb[41].mxu1 }
 0x24c   :  { %v34502_v14 = vpop.f32.mrb[42].mxu1 }
 0x24d   :  { %v909_v15 = vpack.c.bf16 %v34502_v14, %v34495_v11  ;;  %v34506_v16 = vpop.f32.mrb[43].mxu1  ;;  %v32994_v11 = vld [vmem:[%s42542_s4 + $0x198] sm:$0xff]   ;;  %v32996_v14 = vld [vmem:[%s42542_s4 + $0x1a8] sm:$0xff]  }
 0x24e   :  { %28534 = vmatpush3.bf16.msra.mxu0 %v32964_v10  ;;  %v908_v18 = vpack.c.bf16 %v34506_v16, %v34500_v13  ;;  %v32977_v10 = vld [vmem:[%s42542_s4 + $0x110] sm:$0xff]   ;;  %v32995_v13 = vld [vmem:[%s42542_s4 + $0x1a0] sm:$0xff]   ;;  %v32998_v16 = vld [vmem:[%s42542_s4 + $0x1b8] sm:$0xff]  }
 0x24f   :  { %28535 = vmatprep.subr.bf16.mxu0 %v32965_v12 }
 0x252   :  { %28536 = vmatpush3.bf16.msra.mxu0 %v32965_v12  ;;  %v34513_v20 = vpop.f32.mrb[44].mxu1  ;;  %v32978_v12 = vld [vmem:[%s42542_s4 + $0x118] sm:$0xff]  }
 0x253   :  { %28537 = vmatprep.subr.bf16.mxu0 %v32966_v19  ;;  %v34518_v22 = vpop.f32.mrb[45].mxu1 }
 0x254   :  { %v34520_v23 = vpop.f32.mrb[46].mxu1 }
 0x255   :  { %v911_v24 = vpack.c.bf16 %v34520_v23, %v34513_v20  ;;  %v34524_v25 = vpop.f32.mrb[47].mxu1  ;;  %v33001_v20 = vld [vmem:[%s42542_s4 + $0x1d0] sm:$0xff]   ;;  %v33004_v23 = vld [vmem:[%s42542_s4 + $0x1e8] sm:$0xff]  }
 0x256   :  { %28538 = vmatpush3.bf16.msra.mxu0 %v32966_v19  ;;  %v910_v26 = vpack.c.bf16 %v34524_v25, %v34518_v22  ;;  %v33000_v19 = vld [vmem:[%s42542_s4 + $0x1c8] sm:$0xff]   ;;  %v33003_v22 = vld [vmem:[%s42542_s4 + $0x1e0] sm:$0xff]   ;;  %v33006_v25 = vld [vmem:[%s42542_s4 + $0x1f8] sm:$0xff]  }
 0x257   :  { %28543 = vmatprep.subr.bf16.mxu0 %v32967_v21 }
 0x259   :  { %28540 = vmatmul.mubr.msk.bf16.vlgmr.msra.gmra.mrb[16].mxu0 %vm960_vm0, %v899_v39 }
 0x25a   :  { %28544 = vmatpush3.bf16.msra.mxu0 %v32967_v21  ;;  %28551 = vmatprep.mubr.msk.bf16.mxu0 %vm960_vm0, %v900_v49  ;;  %v34539_v17 = vpop.f32.mrb[48].mxu1  ;;  %v33002_v21 = vld [vmem:[%s42542_s4 + $0x1d8] sm:$0xff]  }
 0x25b   :  { %28545 = vmatprep.subr.bf16.mxu0 %v32968_v27  ;;  %v34544_v29 = vpop.f32.mrb[49].mxu1 }
 0x25c   :  { %v34546_v30 = vpop.f32.mrb[50].mxu1 }
 0x25d   :  { %v913_v31 = vpack.c.bf16 %v34546_v30, %v34539_v17  ;;  %v34550_v32 = vpop.f32.mrb[51].mxu1 }
 0x25e   :  { %28546 = vmatpush3.bf16.msra.mxu0 %v32968_v27  ;;  %v912_v33 = vpack.c.bf16 %v34550_v32, %v34544_v29  ;;  %v25250_v27 = vld [vmem:[%s42544_s5] ss:$0 sm:$0xff] }
 0x25f   :  { %28547 = vmatprep.subr.bf16.mxu0 %v32969_v28 }
 0x262   :  { %28548 = vmatpush3.bf16.msra.mxu0 %v32969_v28  ;;  %v34557_v35 = vpop.f32.mrb[52].mxu1 }
 0x263   :  { %28549 = vmatprep.subr.bf16.mxu0 %v32970_v34  ;;  %v34562_v37 = vpop.f32.mrb[53].mxu1 }
 0x264   :  { %v34564_v38 = vpop.f32.mrb[54].mxu1 }
 0x265   :  { %v915_v39 = vpack.c.bf16 %v34564_v38, %v34557_v35  ;;  %v34568_v40 = vpop.f32.mrb[55].mxu1 }
 0x266   :  { %28550 = vmatpush3.bf16.msra.mxu0 %v32970_v34  ;;  %v914_v41 = vpack.c.bf16 %v34568_v40, %v34562_v37 }
 0x267   :  { %28555 = vmatprep.subr.bf16.mxu0 %v32971_v36 }
 0x269   :  { %28552 = vmatmul.mubr.msk.bf16.vlgmr.msra.gmra.mrb[16].mxu0 %vm960_vm0, %v901_v47 }
 0x26a   :  { %28556 = vmatpush3.bf16.msra.mxu0 %v32971_v36  ;;  %28563 = vmatprep.mubr.msk.bf16.mxu0 %vm960_vm0, %v902_v57  ;;  %v34583_v44 = vpop.f32.mrb[56].mxu1 }
 0x26b   :  { %28557 = vmatprep.subr.bf16.mxu0 %v32972_v42  ;;  %v34588_v48 = vpop.f32.mrb[57].mxu1 }
 0x26c   :  { %v34590_v49 = vpop.f32.mrb[58].mxu1 }
 0x26d   :  { %v917_v43 = vpack.c.bf16 %v34590_v49, %v34583_v44  ;;  %v34594_v46 = vpop.f32.mrb[59].mxu1 }
 0x26e   :  { %28558 = vmatpush3.bf16.msra.mxu0 %v32972_v42  ;;  %v916_v47 = vpack.c.bf16 %v34594_v46, %v34588_v48 }
 0x26f   :  { %28559 = vmatprep.subr.bf16.mxu0 %v32973_v45 }
 0x272   :  { %28560 = vmatpush3.bf16.msra.mxu0 %v32973_v45  ;;  %v34601_v52 = vpop.f32.mrb[60].mxu1 }
 0x273   :  { %28561 = vmatprep.subr.bf16.mxu0 %v32974_v50  ;;  %v34606_v56 = vpop.f32.mrb[61].mxu1 }
 0x274   :  { %v34608_v57 = vpop.f32.mrb[62].mxu1 }
 0x275   :  { %v919_v58 = vpack.c.bf16 %v34608_v57, %v34601_v52  ;;  %v34612_v60 = vpop.f32.mrb[63].mxu1 }
 0x276   :  { %28562 = vmatpush3.bf16.msra.mxu0 %v32974_v50  ;;  %v918_v2 = vpack.c.bf16 %v34612_v60, %v34606_v56 }
 0x277   :  { %28567 = vmatprep.subr.bf16.mxu0 %v32975_v53 }
 0x279   :  { %28564 = vmatmul.mubr.msk.bf16.vlgmr.msra.gmra.mrb[16].mxu0 %vm960_vm0, %v903_v55  ;;  %v32981_v55 = vld [vmem:[%s42542_s4 + $0x130] sm:$0xff]  }
 0x27a   :  { %28568 = vmatpush3.bf16.msra.mxu0 %v32975_v53  ;;  %28575 = vmatprep.mubr.msk.bf16.mxu0 %vm960_vm0, %v904_v1  ;;  %v32987_v1 = vld [vmem:[%s42542_s4 + $0x160] sm:$0xff]  }
 0x27b   :  { %28569 = vmatprep.subr.bf16.mxu0 %v32976_v4 }
 0x27e   :  { %28570 = vmatpush3.bf16.msra.mxu0 %v32976_v4 }
 0x27f   :  { %28571 = vmatprep.subr.bf16.mxu0 %v32977_v10 }
 0x282   :  { %28572 = vmatpush3.bf16.msra.mxu0 %v32977_v10 }
 0x283   :  { %28573 = vmatprep.subr.bf16.mxu0 %v32978_v12 }
 0x286   :  { %28574 = vmatpush3.bf16.msra.mxu0 %v32978_v12 }
 0x287   :  { %28579 = vmatprep.subr.bf16.mxu0 %v32979_v51 }
 0x289   :  { %28576 = vmatmul.mubr.msk.bf16.vlgmr.msra.gmra.mrb[16].mxu0 %vm960_vm0, %v905_v63  ;;  %v32985_v63 = vld [vmem:[%s42542_s4 + $0x150] sm:$0xff]  }
 0x28a   :  { %28580 = vmatpush3.bf16.msra.mxu0 %v32979_v51  ;;  %28587 = vmatprep.mubr.msk.bf16.mxu0 %vm960_vm0, %v906_v9  ;;  %v32993_v9 = vld [vmem:[%s42542_s4 + $0x190] sm:$0xff]  }
 0x28b   :  { %28581 = vmatprep.subr.bf16.mxu0 %v32980_v54 }
 0x28e   :  { %28582 = vmatpush3.bf16.msra.mxu0 %v32980_v54 }
 0x28f   :  { %28583 = vmatprep.subr.bf16.mxu0 %v32981_v55 }
 0x292   :  { %28584 = vmatpush3.bf16.msra.mxu0 %v32981_v55 }
 0x293   :  { %28585 = vmatprep.subr.bf16.mxu0 %v32982_v61 }
 0x296   :  { %28586 = vmatpush3.bf16.msra.mxu0 %v32982_v61  ;;  %v42556_v61 = vlaneseq }
 0x297   :  { %28591 = vmatprep.subr.bf16.mxu0 %v32983_v59 }
 0x299   :  { %28588 = vmatmul.mubr.msk.bf16.vlgmr.msra.gmra.mrb[16].mxu0 %vm960_vm0, %v907_v7  ;;  %v32991_v7 = vld [vmem:[%s42542_s4 + $0x180] sm:$0xff]  }
 0x29a   :  { %28592 = vmatpush3.bf16.msra.mxu0 %v32983_v59  ;;  %28599 = vmatprep.mubr.msk.bf16.mxu0 %vm960_vm0, %v908_v18  ;;  %v32999_v18 = vld [vmem:[%s42542_s4 + $0x1c0] sm:$0xff]   ;;  %v2415_v59 = vshrl.u32 %v42556_v61, 7 }
 0x29b   :  { %28593 = vmatprep.subr.bf16.mxu0 %v32984_v62 }
 0x29e   :  { %28594 = vmatpush3.bf16.msra.mxu0 %v32984_v62  ;;  %v2379_v62 = vld [vmem:[%s42545_s6] sm:$0x1] }
 0x29f   :  { %28595 = vmatprep.subr.bf16.mxu0 %v32985_v63 }
 0x2a2   :  { %28596 = vmatpush3.bf16.msra.mxu0 %v32985_v63  ;;  %v34788_v63 = vsub.s32 0, %v2415_v59  ;;  %v33066_v59 = vld [vmem:[%s42547_s9 + $0x68] sm:$0xff]  }
 0x2a3   :  { %28597 = vmatprep.subr.bf16.mxu0 %v32986_v0 }
 0x2a6   :  { %28598 = vmatpush3.bf16.msra.mxu0 %v32986_v0 }
 0x2a7   :  { %28603 = vmatprep.subr.bf16.mxu0 %v32987_v1 }
 0x2a9   :  { %28600 = vmatmul.mubr.msk.bf16.vlgmr.msra.gmra.mrb[16].mxu0 %vm960_vm0, %v909_v15  ;;  %v32997_v15 = vld [vmem:[%s42542_s4 + $0x1b0] sm:$0xff]  }
 0x2aa   :  { %28604 = vmatpush3.bf16.msra.mxu0 %v32987_v1  ;;  %28611 = vmatprep.mubr.msk.bf16.mxu0 %vm960_vm0, %v910_v26  ;;  %v33007_v26 = vld [vmem:[%s42543_s8] sm:$0xff]  }
 0x2ab   :  { %28605 = vmatprep.subr.bf16.mxu0 %v32988_v3  ;;  %28667 = vmatprep.mubr.msk.bf16.mxu1 %vm3346_vm1, %v33007_v26 }
 0x2ae   :  { %28606 = vmatpush3.bf16.msra.mxu0 %v32988_v3  ;;  %v2380_v3 = vld [vmem:[%s42546_s7] sm:$0x1] }
 0x2af   :  { %28607 = vmatprep.subr.bf16.mxu0 %v32989_v5 }
 0x2b2   :  { %28608 = vmatpush3.bf16.msra.mxu0 %v32989_v5 }
 0x2b3   :  { %28609 = vmatprep.subr.bf16.mxu0 %v32990_v6 }
 0x2b6   :  { %28610 = vmatpush3.bf16.msra.mxu0 %v32990_v6 }
 0x2b7   :  { %28615 = vmatprep.subr.bf16.mxu0 %v32991_v7 }
 0x2b9   :  { %28612 = vmatmul.mubr.msk.bf16.vlgmr.msra.gmra.mrb[16].mxu0 %vm960_vm0, %v911_v24  ;;  %v33005_v24 = vld [vmem:[%s42542_s4 + $0x1f0] sm:$0xff]  }
 0x2ba   :  { %28616 = vmatpush3.bf16.msra.mxu0 %v32991_v7  ;;  %28623 = vmatprep.mubr.msk.bf16.mxu0 %vm960_vm0, %v912_v33 }
 0x2bb   :  { %28617 = vmatprep.subr.bf16.mxu0 %v32992_v8 }
 0x2be   :  { %28618 = vmatpush3.bf16.msra.mxu0 %v32992_v8 }
 0x2bf   :  { %28619 = vmatprep.subr.bf16.mxu0 %v32993_v9 }
 0x2c2   :  { %28620 = vmatpush3.bf16.msra.mxu0 %v32993_v9 }
 0x2c3   :  { %28621 = vmatprep.subr.bf16.mxu0 %v32994_v11 }
 0x2c6   :  { %28622 = vmatpush3.bf16.msra.mxu0 %v32994_v11 }
 0x2c7   :  { %28627 = vmatprep.subr.bf16.mxu0 %v32995_v13 }
 0x2c9   :  { %28624 = vmatmul.mubr.msk.bf16.vlgmr.msra.gmra.mrb[16].mxu0 %vm960_vm0, %v913_v31 }
 0x2ca   :  { %28628 = vmatpush3.bf16.msra.mxu0 %v32995_v13  ;;  %28635 = vmatprep.mubr.msk.bf16.mxu0 %vm960_vm0, %v914_v41 }
 0x2cb   :  { %28629 = vmatprep.subr.bf16.mxu0 %v32996_v14 }
 0x2ce   :  { %28630 = vmatpush3.bf16.msra.mxu0 %v32996_v14 }
 0x2cf   :  { %28631 = vmatprep.subr.bf16.mxu0 %v32997_v15 }
 0x2d2   :  { %28632 = vmatpush3.bf16.msra.mxu0 %v32997_v15 }
 0x2d3   :  { %28633 = vmatprep.subr.bf16.mxu0 %v32998_v16 }
 0x2d6   :  { %28634 = vmatpush3.bf16.msra.mxu0 %v32998_v16 }
 0x2d7   :  { %28639 = vmatprep.subr.bf16.mxu0 %v32999_v18 }
 0x2d9   :  { %28636 = vmatmul.mubr.msk.bf16.vlgmr.msra.gmra.mrb[16].mxu0 %vm960_vm0, %v915_v39 }
 0x2da   :  { %28640 = vmatpush3.bf16.msra.mxu0 %v32999_v18  ;;  %28647 = vmatprep.mubr.msk.bf16.mxu0 %vm960_vm0, %v916_v47 }
 0x2db   :  { %28641 = vmatprep.subr.bf16.mxu0 %v33000_v19 }
 0x2de   :  { %28642 = vmatpush3.bf16.msra.mxu0 %v33000_v19 }
 0x2df   :  { %28643 = vmatprep.subr.bf16.mxu0 %v33001_v20 }
 0x2e2   :  { %28644 = vmatpush3.bf16.msra.mxu0 %v33001_v20 }
 0x2e3   :  { %28645 = vmatprep.subr.bf16.mxu0 %v33002_v21 }
 0x2e6   :  { %28646 = vmatpush3.bf16.msra.mxu0 %v33002_v21 }
 0x2e7   :  { %28651 = vmatprep.subr.bf16.mxu0 %v33003_v22 }
 0x2e9   :  { %28648 = vmatmul.mubr.msk.bf16.vlgmr.msra.gmra.mrb[16].mxu0 %vm960_vm0, %v917_v43 }
 0x2ea   :  { %28652 = vmatpush3.bf16.msra.mxu0 %v33003_v22  ;;  %28659 = vmatprep.mubr.msk.bf16.mxu0 %vm960_vm0, %v918_v2 }
 0x2eb   :  { %28653 = vmatprep.subr.bf16.mxu0 %v33004_v23 }
 0x2ee   :  { %28654 = vmatpush3.bf16.msra.mxu0 %v33004_v23 }
 0x2ef   :  { %28655 = vmatprep.subr.bf16.mxu0 %v33005_v24 }
 0x2f2   :  { %28656 = vmatpush3.bf16.msra.mxu0 %v33005_v24 }
 0x2f3   :  { %28657 = vmatprep.subr.bf16.mxu0 %v33006_v25 }
 0x2f6   :  { %28658 = vmatpush3.bf16.msra.mxu0 %v33006_v25 }
 0x2f9   :  { %28660 = vmatmul.mubr.msk.bf16.vlgmr.msra.gmra.mrb[16].mxu0 %vm960_vm0, %v919_v58 }
 0x3cc   :  { %v28661_v17 = vpop.f32.mrb[16].mxu0 }
 0x3cd   :  { %v2350_v28 = vpop.f32.mrb[17].mxu0  ;;  %v2377_v33 = vadd.f32 %v28661_v17, %v25250_v27 }
 0x3ce   :  { %v28662_v29 = vpop.f32.mrb[18].mxu0  ;;  %v2375_v31 = vadd.f32 %v25250_v27, %v2350_v28 }
 0x3cf   :  { %v2353_v30 = vpop.f32.mrb[19].mxu0  ;;  %v2378_v35 = vadd.f32 %v28662_v29, %v25250_v27  ;;  %v33008_v29 = vld [vmem:[%s42543_s8 + $0x8] sm:$0xff]  }
 0x3d0   :  { %v2376_v32 = vadd.f32 %v25250_v27, %v2353_v30  ;;  %v33009_v30 = vld [vmem:[%s42543_s8 + $0x10] sm:$0xff]  }
 0x3d2   :  { %v2381_v34 = vadd.f32 %v2376_v32, %v2375_v31 }
 0x3d4   :  { %v2382_v36 = vadd.f32 %v2381_v34, %v2377_v33  ;;  %v33013_v34 = vld [vmem:[%s42543_s8 + $0x30] sm:$0xff]  }
 0x3d6   :  { %v2383_v37 = vadd.f32 %v2382_v36, %v2378_v35  ;;  %v33015_v36 = vld [vmem:[%s42543_s8 + $0x40] sm:$0xff]  }
 0x3d8   :  { %v2384_v38 = vrot.slane %v2383_v37, 4 }
 0x3da   :  { %v2385_v39 = vadd.f32 %v2384_v38, %v2383_v37  ;;  %v33016_v37 = vld [vmem:[%s42543_s8 + $0x48] sm:$0xff]   ;;  %v33017_v38 = vld [vmem:[%s42543_s8 + $0x50] sm:$0xff]  }
 0x3dc   :  { %v2386_v40 = vrot.slane %v2385_v39, 2 }
 0x3de   :  { %v2387_v41 = vadd.f32 %v2386_v40, %v2385_v39  ;;  %v33018_v39 = vld [vmem:[%s42543_s8 + $0x58] sm:$0xff]   ;;  %v33019_v40 = vld [vmem:[%s42543_s8 + $0x60] sm:$0xff]  }
 0x3e0   :  { %v2388_v42 = vrot.slane %v2387_v41, 1 }
 0x3e2   :  { %v2389_v44 = vadd.f32 %v2388_v42, %v2387_v41  ;;  %v33020_v41 = vld [vmem:[%s42543_s8 + $0x68] sm:$0xff]   ;;  %v33021_v42 = vld [vmem:[%s42543_s8 + $0x70] sm:$0xff]  }
 0x3e4   :  { %v2391_v45 = vmul.f32 0.03125, %v2389_v44  ;;  %v33022_v44 = vld [vmem:[%s42543_s8 + $0x78] sm:$0xff]  }
 0x3e6   :  { %v2392_v48 = vsub.f32 %v2375_v31, %v2391_v45  ;;  %v2393_v49 = vsub.f32 %v2376_v32, %v2391_v45  ;;  %v2394_v43 = vsub.f32 %v2377_v33, %v2391_v45  ;;  %v2395_v46 = vsub.f32 %v2378_v35, %v2391_v45 }
 0x3e8   :  { %v2396_v47 = vmul.f32 %v2392_v48, %v2392_v48  ;;  %v2397_v50 = vmul.f32 %v2393_v49, %v2393_v49  ;;  %v2398_v52 = vmul.f32 %v2394_v43, %v2394_v43  ;;  %v2399_v56 = vmul.f32 %v2395_v46, %v2395_v46  ;;  %v33024_v48 = vld [vmem:[%s42543_s8 + $0x88] sm:$0xff]   ;;  %v33025_v49 = vld [vmem:[%s42543_s8 + $0x90] sm:$0xff]   ;;  %v33026_v43 = vld [vmem:[%s42543_s8 + $0x98] sm:$0xff]  }
 0x3e9   :  { %v33027_v46 = vld [vmem:[%s42543_s8 + $0xa0] sm:$0xff]  }
 0x3ea   :  { %v2400_v53 = vadd.f32 %v2397_v50, %v2396_v47  ;;  %v33028_v47 = vld [vmem:[%s42543_s8 + $0xa8] sm:$0xff]   ;;  %v33029_v50 = vld [vmem:[%s42543_s8 + $0xb0] sm:$0xff]  }
 0x3ec   :  { %v2401_v57 = vadd.f32 %v2400_v53, %v2398_v52  ;;  %v33030_v52 = vld [vmem:[%s42543_s8 + $0xb8] sm:$0xff]   ;;  %v33031_v53 = vld [vmem:[%s42543_s8 + $0xc0] sm:$0xff]  }
 0x3ee   :  { %v2402_v58 = vadd.f32 %v2401_v57, %v2399_v56  ;;  %v33055_v56 = vld [vmem:[%s42547_s9 + $0x40] sm:$0xff]   ;;  %v33032_v57 = vld [vmem:[%s42543_s8 + $0xc8] sm:$0xff]  }
 0x3ef   :  { %28923 = vmatprep.subr.bf16.mxu0 %v33055_v56 }
 0x3f0   :  { %v2403_v60 = vrot.slane %v2402_v58, 4  ;;  %28924 = vmatpush3.bf16.msra.mxu0 %v33055_v56 }
 0x3f2   :  { %v2404_v2 = vadd.f32 %v2403_v60, %v2402_v58  ;;  %v33033_v58 = vld [vmem:[%s42543_s8 + $0xd0] sm:$0xff]   ;;  %v33058_v60 = vld [vmem:[%s42547_s9 + $0x48] sm:$0xff]  }
 0x3f3   :  { %28925 = vmatprep.subr.bf16.mxu0 %v33058_v60 }
 0x3f4   :  { %v2405_v4 = vrot.slane %v2404_v2, 2  ;;  %28926 = vmatpush3.bf16.msra.mxu0 %v33058_v60  ;;  %v33081_v60 = vld [vmem:[%s42543_s8 + $0x1e8] sm:$0xff]  }
 0x3f6   :  { %v2406_v10 = vadd.f32 %v2405_v4, %v2404_v2  ;;  %v33059_v2 = vld [vmem:[%s42547_s9 + $0x50] sm:$0xff]   ;;  %v33034_v4 = vld [vmem:[%s42543_s8 + $0xd8] sm:$0xff]  }
 0x3f7   :  { %28927 = vmatprep.subr.bf16.mxu0 %v33059_v2 }
 0x3f8   :  { %v2407_v12 = vrot.slane %v2406_v10, 1  ;;  %28928 = vmatpush3.bf16.msra.mxu0 %v33059_v2 }
 0x3fa   :  { %v2408_v51 = vadd.f32 %v2407_v12, %v2406_v10  ;;  %v33035_v10 = vld [vmem:[%s42543_s8 + $0xe0] sm:$0xff]   ;;  %v33062_v12 = vld [vmem:[%s42547_s9 + $0x58] sm:$0xff]  }
 0x3fb   :  { %28929 = vmatprep.subr.bf16.mxu0 %v33062_v12 }
 0x3fc   :  { %v2409_v54 = vmul.f32 0.03125, %v2408_v51  ;;  %v33063_v51 = vld [vmem:[%s42547_s9 + $0x60] sm:$0xff]   ;;  %28930 = vmatpush3.bf16.msra.mxu0 %v33062_v12 }
 0x3fd   :  { %28931 = vmatprep.subr.bf16.mxu0 %v33063_v51 }
 0x3fe   :  { %v2410_v55 = vadd.f32 1e-05, %v2409_v54  ;;  %v33036_v54 = vld [vmem:[%s42543_s8 + $0xe8] sm:$0xff]  }
 0x400   :  { %33839 = vrsqrt.f32 %v2410_v55  ;;  %v33037_v55 = vld [vmem:[%s42543_s8 + $0xf0] sm:$0xff]   ;;  %28932 = vmatpush3.bf16.msra.mxu0 %v33063_v51 }
 0x401   :  { %28933 = vmatprep.subr.bf16.mxu0 %v33066_v59 }
 0x404   :  { %28934 = vmatpush3.bf16.msra.mxu0 %v33066_v59  ;;  %v33085_v59 = vld [vmem:[%s42543_s8 + $0x1f8] sm:$0xff]  }
 0x40a   :  { %v33840_v0 = vpop.eup %33839 }
 0x40b   :  { %v2412_v1 = vmul.f32 %v33840_v0, %v2379_v62  ;;  %v33067_v62 = vld [vmem:[%s42547_s9 + $0x70] sm:$0xff]   ;;  %v33038_v0 = vld [vmem:[%s42543_s8 + $0xf8] sm:$0xff]  }
 0x40c   :  { %28935 = vmatprep.subr.bf16.mxu0 %v33067_v62 }
 0x40d   :  { %v2417_v5 = vrot.slane %v2412_v1, %v34788_v63  ;;  %v2423_v6 = vmul.f32 %v2412_v1, %v2391_v45  ;;  %v33023_v45 = vld [vmem:[%s42543_s8 + $0x80] sm:$0xff]   ;;  %28936 = vmatpush3.bf16.msra.mxu0 %v33067_v62 }
 0x40e   :  { %v33039_v1 = vld [vmem:[%s42543_s8 + $0x100] sm:$0xff]  }
 0x40f   :  { %v2420_v7 = vmul.f32 %v2417_v5, %v2376_v32  ;;  %v2424_v8 = vsub.f32 %v2380_v3, %v2423_v6  ;;  %v2419_v9 = vmul.f32 %v2417_v5, %v2375_v31  ;;  %v2421_v11 = vmul.f32 %v2417_v5, %v2377_v33  ;;  %v33010_v31 = vld [vmem:[%s42543_s8 + $0x18] sm:$0xff]   ;;  %v33011_v32 = vld [vmem:[%s42543_s8 + $0x20] sm:$0xff]   ;;  %v33012_v33 = vld [vmem:[%s42543_s8 + $0x28] sm:$0xff]  }
 0x410   :  { %v2422_v13 = vmul.f32 %v2417_v5, %v2378_v35  ;;  %v33014_v35 = vld [vmem:[%s42543_s8 + $0x38] sm:$0xff]   ;;  %v34950_v5 = vld [vmem:[%s42547_s9] sm:$0xff]   ;;  %v33040_v6 = vld [vmem:[%s42543_s8 + $0x108] sm:$0xff]  }
 0x411   :  { %v2429_v14 = vrot.slane %v2424_v8, %v34788_v63  ;;  %v33070_v3 = vld [vmem:[%s42547_s9 + $0x78] sm:$0xff]  }
 0x412   :  { %28937 = vmatprep.subr.bf16.mxu0 %v33070_v3  ;;  %v33042_v8 = vld [vmem:[%s42543_s8 + $0x118] sm:$0xff]  }
 0x413   :  { %v2432_v15 = vadd.f32 %v2429_v14, %v2420_v7  ;;  %v2431_v16 = vadd.f32 %v2429_v14, %v2419_v9  ;;  %v2433_v18 = vadd.f32 %v2429_v14, %v2421_v11  ;;  %v2434_v19 = vadd.f32 %v2429_v14, %v2422_v13  ;;  %28938 = vmatpush3.bf16.msra.mxu0 %v33070_v3  ;;  %v33041_v7 = vld [vmem:[%s42543_s8 + $0x110] sm:$0xff]   ;;  %v33043_v9 = vld [vmem:[%s42543_s8 + $0x120] sm:$0xff]   ;;  %v33044_v11 = vld [vmem:[%s42543_s8 + $0x128] sm:$0xff]  }
 0x414   :  { %28955 = vmatprep.subr.bf16.mxu0 %v34950_v5  ;;  %v33045_v13 = vld [vmem:[%s42543_s8 + $0x130] sm:$0xff]   ;;  %v33046_v14 = vld [vmem:[%s42543_s8 + $0x138] sm:$0xff]  }
 0x415   :  { %vm2435_vm2 = vcmp.ge.f32.partialorder %v2431_v16, 0.0  ;;  %vm2436_vm3 = vcmp.ge.f32.partialorder %v2432_v15, 0.0  ;;  %v2439_v20 = vmul.f32 0.2, %v2431_v16  ;;  %v2440_v21 = vmul.f32 0.2, %v2432_v15 }
 0x416   :  { %vm2437_vm4 = vcmp.ge.f32.partialorder %v2433_v18, 0.0  ;;  %vm2438_vm5 = vcmp.ge.f32.partialorder %v2434_v19, 0.0  ;;  %v2441_v22 = vmul.f32 0.2, %v2433_v18  ;;  %v2442_v23 = vmul.f32 0.2, %v2434_v19 }
 0x417   :  { %v2443_v24 = vsel %vm2435_vm2, %v2431_v16, %v2439_v20  ;;  %v2444_v25 = vsel %vm2436_vm3, %v2432_v15, %v2440_v21  ;;  %v33047_v15 = vld [vmem:[%s42543_s8 + $0x140] sm:$0xff]   ;;  %v33048_v16 = vld [vmem:[%s42543_s8 + $0x148] sm:$0xff]  }
 0x418   :  { %v2447_v26 = vpack.c.bf16 %v2444_v25, %v2443_v24  ;;  %v2445_v27 = vsel %vm2437_vm4, %v2433_v18, %v2441_v22  ;;  %v2446_v17 = vsel %vm2438_vm5, %v2434_v19, %v2442_v23  ;;  %v33049_v18 = vld [vmem:[%s42543_s8 + $0x150] sm:$0xff]   ;;  %v33050_v19 = vld [vmem:[%s42543_s8 + $0x158] sm:$0xff]   ;;  %v33051_v20 = vld [vmem:[%s42543_s8 + $0x160] sm:$0xff]  }
 0x419   :  { %v2448_v28 = vpack.c.bf16 %v2446_v17, %v2445_v27  ;;  %v33052_v21 = vld [vmem:[%s42543_s8 + $0x168] sm:$0xff]   ;;  %v33053_v22 = vld [vmem:[%s42543_s8 + $0x170] sm:$0xff]   ;;  %v33054_v23 = vld [vmem:[%s42543_s8 + $0x178] sm:$0xff]  }
 0x41a   :  { %28663 = vmatprep.subr.bf16.mxu1 %v2447_v26  ;;  %v33056_v24 = vld [vmem:[%s42543_s8 + $0x180] sm:$0xff]   ;;  %v33057_v25 = vld [vmem:[%s42543_s8 + $0x188] sm:$0xff]   ;;  %v33061_v27 = vld [vmem:[%s42543_s8 + $0x198] sm:$0xff]  }
 0x41b   :  { %28664 = vmatpush3.bf16.msra.mxu1 %v2447_v26  ;;  %v33060_v26 = vld [vmem:[%s42543_s8 + $0x190] sm:$0xff]   ;;  %v33064_v17 = vld [vmem:[%s42543_s8 + $0x1a0] sm:$0xff]  }
 0x41c   :  { %28665 = vmatprep.subr.bf16.mxu1 %v2448_v28 }
 0x41f   :  { %28666 = vmatpush3.bf16.msra.mxu1 %v2448_v28  ;;  %v33065_v28 = vld [vmem:[%s42543_s8 + $0x1a8] sm:$0xff]  }
 0x422   :  { %28668 = vmatmul.mubr.msk.bf16.vlgmr.msra.gmra.mrb[64].mxu1 %vm3346_vm1, %v33008_v29  ;;  %v33068_v29 = vld [vmem:[%s42543_s8 + $0x1b0] sm:$0xff]  }
 0x423   :  { %28671 = vmatprep.mubr.msk.bf16.mxu1 %vm3346_vm1, %v33009_v30 }
 0x42a   :  { %28672 = vmatmul.mubr.msk.bf16.gmra.mrb[68].mxu1 %vm3346_vm1, %v33010_v31 }
 0x42b   :  { %28675 = vmatprep.mubr.msk.bf16.mxu1 %vm3346_vm1, %v33011_v32  ;;  %v33069_v32 = vld [vmem:[%s42543_s8 + $0x1b8] sm:$0xff]  }
 0x432   :  { %28676 = vmatmul.mubr.msk.bf16.gmra.mrb[72].mxu1 %vm3346_vm1, %v33012_v33 }
 0x433   :  { %28679 = vmatprep.mubr.msk.bf16.mxu1 %vm3346_vm1, %v33013_v34  ;;  %v33072_v34 = vld [vmem:[%s42543_s8 + $0x1c0] sm:$0xff]  }
 0x43a   :  { %28680 = vmatmul.mubr.msk.bf16.gmra.mrb[76].mxu1 %vm3346_vm1, %v33014_v35 }
 0x43b   :  { %28683 = vmatprep.mubr.msk.bf16.mxu1 %vm3346_vm1, %v33015_v36 }
 0x442   :  { %28684 = vmatmul.mubr.msk.bf16.gmra.mrb[80].mxu1 %vm3346_vm1, %v33016_v37 }
 0x443   :  { %28687 = vmatprep.mubr.msk.bf16.mxu1 %vm3346_vm1, %v33017_v38 }
 0x44a   :  { %28688 = vmatmul.mubr.msk.bf16.gmra.mrb[84].mxu1 %vm3346_vm1, %v33018_v39 }
 0x44b   :  { %28691 = vmatprep.mubr.msk.bf16.mxu1 %vm3346_vm1, %v33019_v40  ;;  %v33073_v40 = vld [vmem:[%s42543_s8 + $0x1c8] sm:$0xff]  }
 0x452   :  { %28692 = vmatmul.mubr.msk.bf16.gmra.mrb[88].mxu1 %vm3346_vm1, %v33020_v41 }
 0x453   :  { %28695 = vmatprep.mubr.msk.bf16.mxu1 %vm3346_vm1, %v33021_v42  ;;  %v33076_v42 = vld [vmem:[%s42543_s8 + $0x1d0] sm:$0xff]  }
 0x45a   :  { %28696 = vmatmul.mubr.msk.bf16.gmra.mrb[92].mxu1 %vm3346_vm1, %v33022_v44 }
 0x45b   :  { %28699 = vmatprep.mubr.msk.bf16.mxu1 %vm3346_vm1, %v33023_v45 }
 0x462   :  { %28700 = vmatmul.mubr.msk.bf16.gmra.mrb[96].mxu1 %vm3346_vm1, %v33024_v48 }
 0x463   :  { %28703 = vmatprep.mubr.msk.bf16.mxu1 %vm3346_vm1, %v33025_v49 }
 0x46a   :  { %28704 = vmatmul.mubr.msk.bf16.gmra.mrb[100].mxu1 %vm3346_vm1, %v33026_v43 }
 0x46b   :  { %28707 = vmatprep.mubr.msk.bf16.mxu1 %vm3346_vm1, %v33027_v46  ;;  %v33077_v46 = vld [vmem:[%s42543_s8 + $0x1d8] sm:$0xff]  }
 0x472   :  { %28708 = vmatmul.mubr.msk.bf16.gmra.mrb[104].mxu1 %vm3346_vm1, %v33028_v47 }
 0x473   :  { %28711 = vmatprep.mubr.msk.bf16.mxu1 %vm3346_vm1, %v33029_v50  ;;  %v33080_v50 = vld [vmem:[%s42543_s8 + $0x1e0] sm:$0xff]  }
 0x47a   :  { %28712 = vmatmul.mubr.msk.bf16.gmra.mrb[108].mxu1 %vm3346_vm1, %v33030_v52 }
 0x47b   :  { %28715 = vmatprep.mubr.msk.bf16.mxu1 %vm3346_vm1, %v33031_v53 }
 0x482   :  { %28716 = vmatmul.mubr.msk.bf16.gmra.mrb[112].mxu1 %vm3346_vm1, %v33032_v57 }
 0x483   :  { %28719 = vmatprep.mubr.msk.bf16.mxu1 %vm3346_vm1, %v33033_v58 }
 0x48a   :  { %28720 = vmatmul.mubr.msk.bf16.gmra.mrb[116].mxu1 %vm3346_vm1, %v33034_v4  ;;  %v33084_v4 = vld [vmem:[%s42543_s8 + $0x1f0] sm:$0xff]  }
 0x48b   :  { %28723 = vmatprep.mubr.msk.bf16.mxu1 %vm3346_vm1, %v33035_v10 }
 0x492   :  { %28724 = vmatmul.mubr.msk.bf16.gmra.mrb[120].mxu1 %vm3346_vm1, %v33036_v54 }
 0x493   :  { %28727 = vmatprep.mubr.msk.bf16.mxu1 %vm3346_vm1, %v33037_v55 }
 0x49a   :  { %28728 = vmatmul.mubr.msk.bf16.gmra.mrb[124].mxu1 %vm3346_vm1, %v33038_v0  ;;  %v33088_v0 = vld [vmem:[%s42543_s8 + $0x200] sm:$0xff]  }
 0x49b   :  { %28731 = vmatprep.mubr.msk.bf16.mxu1 %vm3346_vm1, %v33039_v1 }
 0x4a2   :  { %28732 = vmatmul.mubr.msk.bf16.gmra.mrb[128].mxu1 %vm3346_vm1, %v33040_v6 }
 0x4a3   :  { %28735 = vmatprep.mubr.msk.bf16.mxu1 %vm3346_vm1, %v33041_v7  ;;  %v33074_v7 = vld [vmem:[%s42547_s9 + $0x8] sm:$0xff]  }
 0x4aa   :  { %28736 = vmatmul.mubr.msk.bf16.gmra.mrb[132].mxu1 %vm3346_vm1, %v33042_v8 }
 0x4ab   :  { %28739 = vmatprep.mubr.msk.bf16.mxu1 %vm3346_vm1, %v33043_v9 }
 0x4b2   :  { %28740 = vmatmul.mubr.msk.bf16.gmra.mrb[136].mxu1 %vm3346_vm1, %v33044_v11  ;;  %v33075_v11 = vld [vmem:[%s42547_s9 + $0x10] sm:$0xff]  }
 0x4b3   :  { %28743 = vmatprep.mubr.msk.bf16.mxu1 %vm3346_vm1, %v33045_v13  ;;  %v33089_v13 = vld [vmem:[%s42543_s8 + $0x208] sm:$0xff]  }
 0x4ba   :  { %28744 = vmatmul.mubr.msk.bf16.gmra.mrb[140].mxu1 %vm3346_vm1, %v33046_v14 }
 0x4bb   :  { %28747 = vmatprep.mubr.msk.bf16.mxu1 %vm3346_vm1, %v33047_v15  ;;  %v33092_v15 = vld [vmem:[%s42543_s8 + $0x210] sm:$0xff]  }
 0x4c2   :  { %28748 = vmatmul.mubr.msk.bf16.gmra.mrb[144].mxu1 %vm3346_vm1, %v33048_v16 }
 0x4c3   :  { %28751 = vmatprep.mubr.msk.bf16.mxu1 %vm3346_vm1, %v33049_v18 }
 0x4ca   :  { %28752 = vmatmul.mubr.msk.bf16.gmra.mrb[148].mxu1 %vm3346_vm1, %v33050_v19 }
 0x4cb   :  { %28755 = vmatprep.mubr.msk.bf16.mxu1 %vm3346_vm1, %v33051_v20 }
 0x4d2   :  { %28756 = vmatmul.mubr.msk.bf16.gmra.mrb[152].mxu1 %vm3346_vm1, %v33052_v21 }
 0x4d3   :  { %28759 = vmatprep.mubr.msk.bf16.mxu1 %vm3346_vm1, %v33053_v22  ;;  %v33079_v22 = vld [vmem:[%s42547_s9 + $0x20] sm:$0xff]  }
 0x4da   :  { %28760 = vmatmul.mubr.msk.bf16.gmra.mrb[156].mxu1 %vm3346_vm1, %v33054_v23  ;;  %v33093_v23 = vld [vmem:[%s42543_s8 + $0x218] sm:$0xff]  }
 0x4db   :  { %28763 = vmatprep.mubr.msk.bf16.mxu1 %vm3346_vm1, %v33056_v24 }
 0x4e2   :  { %28764 = vmatmul.mubr.msk.bf16.gmra.mrb[160].mxu1 %vm3346_vm1, %v33057_v25  ;;  %v33096_v25 = vld [vmem:[%s42543_s8 + $0x220] sm:$0xff]  }
 0x4e3   :  { %28767 = vmatprep.mubr.msk.bf16.mxu1 %vm3346_vm1, %v33060_v26 }
 0x4ea   :  { %28768 = vmatmul.mubr.msk.bf16.gmra.mrb[164].mxu1 %vm3346_vm1, %v33061_v27 }
 0x4eb   :  { %28771 = vmatprep.mubr.msk.bf16.mxu1 %vm3346_vm1, %v33064_v17 }
 0x4f2   :  { %28772 = vmatmul.mubr.msk.bf16.gmra.mrb[168].mxu1 %vm3346_vm1, %v33065_v28  ;;  %v33082_v28 = vld [vmem:[%s42547_s9 + $0x28] sm:$0xff]  }
 0x4f3   :  { %28775 = vmatprep.mubr.msk.bf16.mxu1 %vm3346_vm1, %v33068_v29 }
 0x4f5   :  { %v35041_v30 = vpop.f32.mrb[64].mxu1 }
 0x4f6   :  { %v35043_v31 = vpop.f32.mrb[65].mxu1 }
 0x4f7   :  { %v35048_v33 = vpop.f32.mrb[66].mxu1 }
 0x4f8   :  { %v4789_v35 = vpack.c.bf16 %v35048_v33, %v35041_v30  ;;  %v35055_v36 = vpop.f32.mrb[67].mxu1  ;;  %v33108_v33 = vld [vmem:[%s42543_s8 + $0x250] sm:$0xff]  }
 0x4f9   :  { %v4788_v37 = vpack.c.bf16 %v35055_v36, %v35043_v31  ;;  %v33104_v31 = vld [vmem:[%s42543_s8 + $0x240] sm:$0xff]  }
 0x4fa   :  { %28776 = vmatmul.mubr.msk.bf16.gmra.mrb[172].mxu1 %vm3346_vm1, %v33069_v32 }
 0x4fb   :  { %28779 = vmatprep.mubr.msk.bf16.mxu1 %vm3346_vm1, %v33072_v34  ;;  %v33083_v34 = vld [vmem:[%s42547_s9 + $0x30] sm:$0xff]  }
 0x4fd   :  { %v35061_v38 = vpop.f32.mrb[68].mxu1 }
 0x4fe   :  { %v35063_v39 = vpop.f32.mrb[69].mxu1 }
 0x4ff   :  { %v35068_v41 = vpop.f32.mrb[70].mxu1 }
 0x500   :  { %v4791_v44 = vpack.c.bf16 %v35068_v41, %v35061_v38  ;;  %v35075_v45 = vpop.f32.mrb[71].mxu1  ;;  %v33112_v41 = vld [vmem:[%s42543_s8 + $0x260] sm:$0xff]  }
 0x501   :  { %v4790_v48 = vpack.c.bf16 %v35075_v45, %v35063_v39 }
 0x502   :  { %28780 = vmatmul.mubr.msk.bf16.gmra.mrb[176].mxu1 %vm3346_vm1, %v33073_v40  ;;  %v33097_v40 = vld [vmem:[%s42543_s8 + $0x228] sm:$0xff]  }
 0x503   :  { %28783 = vmatprep.mubr.msk.bf16.mxu1 %vm3346_vm1, %v33076_v42 }
 0x505   :  { %v35081_v49 = vpop.f32.mrb[72].mxu1 }
 0x506   :  { %v35083_v43 = vpop.f32.mrb[73].mxu1 }
 0x507   :  { %v35088_v47 = vpop.f32.mrb[74].mxu1 }
 0x508   :  { %v4793_v52 = vpack.c.bf16 %v35088_v47, %v35081_v49  ;;  %v35095_v53 = vpop.f32.mrb[75].mxu1  ;;  %v33116_v47 = vld [vmem:[%s42543_s8 + $0x270] sm:$0xff]  }
 0x509   :  { %v4792_v56 = vpack.c.bf16 %v35095_v53, %v35083_v43 }
 0x50a   :  { %28784 = vmatmul.mubr.msk.bf16.gmra.mrb[180].mxu1 %vm3346_vm1, %v33077_v46  ;;  %v33100_v46 = vld [vmem:[%s42543_s8 + $0x230] sm:$0xff]  }
 0x50b   :  { %28787 = vmatprep.mubr.msk.bf16.mxu1 %vm3346_vm1, %v33080_v50 }
 0x50d   :  { %v35101_v57 = vpop.f32.mrb[76].mxu1 }
 0x50e   :  { %v35103_v58 = vpop.f32.mrb[77].mxu1 }
 0x50f   :  { %v35108_v2 = vpop.f32.mrb[78].mxu1 }
 0x510   :  { %v4795_v10 = vpack.c.bf16 %v35108_v2, %v35101_v57  ;;  %v35115_v12 = vpop.f32.mrb[79].mxu1  ;;  %v33120_v57 = vld [vmem:[%s42543_s8 + $0x280] sm:$0xff]  }
 0x511   :  { %v4794_v51 = vpack.c.bf16 %v35115_v12, %v35103_v58 }
 0x512   :  { %28788 = vmatmul.mubr.msk.bf16.gmra.mrb[184].mxu1 %vm3346_vm1, %v33081_v60 }
 0x513   :  { %28791 = vmatprep.mubr.msk.bf16.mxu1 %vm3346_vm1, %v33084_v4 }
 0x515   :  { %v28685_v54 = vpop.f32.mrb[80].mxu1 }
 0x516   :  { %v3829_v55 = vpop.f32.mrb[81].mxu1 }
 0x517   :  { %v28686_v62 = vpop.f32.mrb[82].mxu1 }
 0x518   :  { %v4797_v1 = vpack.c.bf16 %v28686_v62, %v28685_v54  ;;  %v3832_v3 = vpop.f32.mrb[83].mxu1  ;;  %v33086_v54 = vld [vmem:[%s42547_s9 + $0x38] sm:$0xff]  }
 0x519   :  { %v4796_v6 = vpack.c.bf16 %v3832_v3, %v3829_v55 }
 0x51a   :  { %28792 = vmatmul.mubr.msk.bf16.gmra.mrb[188].mxu1 %vm3346_vm1, %v33085_v59  ;;  %v33087_v59 = vld [vmem:[%s42547_s9 + $0x80] sm:$0xff]  }
 0x51b   :  { %28939 = vmatprep.mubr.bf16.mxu0 %v4796_v6  ;;  %28795 = vmatprep.mubr.msk.bf16.mxu1 %vm3346_vm1, %v33088_v0  ;;  %v33101_v0 = vld [vmem:[%s42543_s8 + $0x238] sm:$0xff]   ;;  %v33090_v6 = vld [vmem:[%s42547_s9 + $0x88] sm:$0xff]  }
 0x51c   :  { %28940 = vmatmul.mubr.bf16.vlgmr.msra.gmra.mrb[20].mxu0 %v4797_v1 }
 0x51d   :  { %v28689_v8 = vpop.f32.mrb[84].mxu1  ;;  %28956 = vmatpush3.bf16.msra.mxu0 %v34950_v5  ;;  %v33078_v5 = vld [vmem:[%s42547_s9 + $0x18] sm:$0xff]  }
 0x51e   :  { %v3845_v9 = vpop.f32.mrb[85].mxu1  ;;  %28957 = vmatprep.subr.bf16.mxu0 %v33074_v7 }
 0x51f   :  { %v28690_v14 = vpop.f32.mrb[86].mxu1 }
 0x520   :  { %v4799_v16 = vpack.c.bf16 %v28690_v14, %v28689_v8  ;;  %v3848_v18 = vpop.f32.mrb[87].mxu1  ;;  %v33091_v8 = vld [vmem:[%s42547_s9 + $0x90] sm:$0xff]   ;;  %v33095_v14 = vld [vmem:[%s42547_s9 + $0xa0] sm:$0xff]  }
 0x521   :  { %v4798_v19 = vpack.c.bf16 %v3848_v18, %v3845_v9  ;;  %28958 = vmatpush3.bf16.msra.mxu0 %v33074_v7 }
 0x522   :  { %28959 = vmatprep.subr.bf16.mxu0 %v33075_v11  ;;  %28796 = vmatmul.mubr.msk.bf16.gmra.mrb[192].mxu1 %vm3346_vm1, %v33089_v13 }
 0x523   :  { %28943 = vmatprep.mubr.bf16.mxu0 %v4798_v19  ;;  %28799 = vmatprep.mubr.msk.bf16.mxu1 %vm3346_vm1, %v33092_v15  ;;  %v33099_v19 = vld [vmem:[%s42547_s9 + $0xb0] sm:$0xff]  }
 0x524   :  { %28944 = vmatmul.mubr.bf16.gmra.mrb[24].mxu0 %v4799_v16  ;;  %v33109_v16 = vld [vmem:[%s42543_s8 + $0x258] sm:$0xff]  }
 0x525   :  { %v28693_v20 = vpop.f32.mrb[88].mxu1  ;;  %28960 = vmatpush3.bf16.msra.mxu0 %v33075_v11  ;;  %v33105_v11 = vld [vmem:[%s42543_s8 + $0x248] sm:$0xff]  }
 0x526   :  { %v3861_v21 = vpop.f32.mrb[89].mxu1  ;;  %28961 = vmatprep.subr.bf16.mxu0 %v33078_v5 }
 0x527   :  { %v28694_v24 = vpop.f32.mrb[90].mxu1 }
 0x528   :  { %v4801_v26 = vpack.c.bf16 %v28694_v24, %v28693_v20  ;;  %v3864_v27 = vpop.f32.mrb[91].mxu1  ;;  %v33113_v20 = vld [vmem:[%s42543_s8 + $0x268] sm:$0xff]   ;;  %v33117_v24 = vld [vmem:[%s42543_s8 + $0x278] sm:$0xff]  }
 0x529   :  { %v4800_v17 = vpack.c.bf16 %v3864_v27, %v3861_v21  ;;  %28962 = vmatpush3.bf16.msra.mxu0 %v33078_v5  ;;  %v33106_v27 = vld [vmem:[%s42547_s9 + $0xc8] sm:$0xff]  }
 0x52a   :  { %28963 = vmatprep.subr.bf16.mxu0 %v33079_v22  ;;  %28800 = vmatmul.mubr.msk.bf16.gmra.mrb[196].mxu1 %vm3346_vm1, %v33093_v23 }
 0x52b   :  { %28947 = vmatprep.mubr.bf16.mxu0 %v4800_v17  ;;  %28803 = vmatprep.mubr.msk.bf16.mxu1 %vm3346_vm1, %v33096_v25 }
 0x52c   :  { %28948 = vmatmul.mubr.bf16.gmra.mrb[28].mxu0 %v4801_v26 }
 0x52d   :  { %v28697_v29 = vpop.f32.mrb[92].mxu1  ;;  %28964 = vmatpush3.bf16.msra.mxu0 %v33079_v22  ;;  %v33103_v22 = vld [vmem:[%s42547_s9 + $0xc0] sm:$0xff]  }
 0x52e   :  { %v3877_v32 = vpop.f32.mrb[93].mxu1  ;;  %28965 = vmatprep.subr.bf16.mxu0 %v33082_v28 }
 0x52f   :  { %v28698_v42 = vpop.f32.mrb[94].mxu1 }
 0x530   :  { %v4803_v50 = vpack.c.bf16 %v28698_v42, %v28697_v29  ;;  %v3880_v60 = vpop.f32.mrb[95].mxu1 }
 0x531   :  { %v4802_v4 = vpack.c.bf16 %v3880_v60, %v3877_v32  ;;  %28966 = vmatpush3.bf16.msra.mxu0 %v33082_v28  ;;  %v33107_v28 = vld [vmem:[%s42547_s9 + $0xd0] sm:$0xff]   ;;  %v33121_v32 = vld [vmem:[%s42543_s8 + $0x288] sm:$0xff]   ;;  %v33110_v60 = vld [vmem:[%s42547_s9 + $0xd8] sm:$0xff]  }
 0x532   :  { %28967 = vmatprep.subr.bf16.mxu0 %v33083_v34  ;;  %28804 = vmatmul.mubr.msk.bf16.gmra.mrb[200].mxu1 %vm3346_vm1, %v33097_v40  ;;  %v33124_v40 = vld [vmem:[%s42543_s8 + $0x290] sm:$0xff]  }
 0x533   :  { %28951 = vmatprep.mubr.bf16.mxu0 %v4802_v4  ;;  %28807 = vmatprep.mubr.msk.bf16.mxu1 %vm3346_vm1, %v33100_v46 }
 0x534   :  { %28952 = vmatmul.mubr.bf16.gmra.mrb[32].mxu0 %v4803_v50 }
 0x535   :  { %28968 = vmatpush3.bf16.msra.mxu0 %v33083_v34  ;;  %28971 = vmatprep.mubr.bf16.mxu0 %v4788_v37  ;;  %v35178_v55 = vpop.f32.mrb[96].mxu1 }
 0x536   :  { %28969 = vmatprep.subr.bf16.mxu0 %v33086_v54  ;;  %v35183_v62 = vpop.f32.mrb[97].mxu1 }
 0x537   :  { %v35188_v1 = vpop.f32.mrb[98].mxu1 }
 0x538   :  { %v4805_v36 = vpack.c.bf16 %v35188_v1, %v35178_v55  ;;  %v35195_v37 = vpop.f32.mrb[99].mxu1 }
 0x539   :  { %28970 = vmatpush3.bf16.msra.mxu0 %v33086_v54  ;;  %v4804_v3 = vpack.c.bf16 %v35195_v37, %v35183_v62  ;;  %v33111_v54 = vld [vmem:[%s42547_s9 + $0xe0] sm:$0xff]   ;;  %v33114_v37 = vld [vmem:[%s42547_s9 + $0xe8] sm:$0xff]  }
 0x53a   :  { %28987 = vmatprep.subr.bf16.mxu0 %v33087_v59  ;;  %28808 = vmatmul.mubr.msk.bf16.gmra.mrb[204].mxu1 %vm3346_vm1, %v33101_v0  ;;  %v33128_v0 = vld [vmem:[%s42543_s8 + $0x2a0] sm:$0xff]  }
 0x53b   :  { %28811 = vmatprep.mubr.msk.bf16.mxu1 %vm3346_vm1, %v33104_v31 }
 0x53c   :  { %28972 = vmatmul.mubr.bf16.vlgmr.msra.gmra.mrb[20].mxu0 %v4789_v35 }
 0x53d   :  { %28975 = vmatprep.mubr.bf16.mxu0 %v4790_v48  ;;  %28988 = vmatpush3.bf16.msra.mxu0 %v33087_v59  ;;  %v35210_v7 = vpop.f32.mrb[100].mxu1  ;;  %v33094_v48 = vld [vmem:[%s42547_s9 + $0x98] sm:$0xff]  }
 0x53e   :  { %28989 = vmatprep.subr.bf16.mxu0 %v33090_v6  ;;  %v35215_v9 = vpop.f32.mrb[101].mxu1  ;;  %v33125_v59 = vld [vmem:[%s42543_s8 + $0x298] sm:$0xff]  }
 0x53f   :  { %v35220_v30 = vpop.f32.mrb[102].mxu1 }
 0x540   :  { %v4807_v35 = vpack.c.bf16 %v35220_v30, %v35210_v7  ;;  %v35227_v39 = vpop.f32.mrb[103].mxu1 }
 0x541   :  { %28990 = vmatpush3.bf16.msra.mxu0 %v33090_v6  ;;  %v4806_v45 = vpack.c.bf16 %v35227_v39, %v35215_v9  ;;  %v33115_v6 = vld [vmem:[%s42547_s9 + $0xf0] sm:$0xff]   ;;  %v33118_v39 = vld [vmem:[%s42547_s9 + $0xf8] sm:$0xff]  }
 0x542   :  { %28991 = vmatprep.subr.bf16.mxu0 %v33091_v8  ;;  %28812 = vmatmul.mubr.msk.bf16.gmra.mrb[208].mxu1 %vm3346_vm1, %v33105_v11  ;;  %v33132_v11 = vld [vmem:[%s42543_s8 + $0x2b0] sm:$0xff]  }
 0x543   :  { %28815 = vmatprep.mubr.msk.bf16.mxu1 %vm3346_vm1, %v33108_v33 }
 0x544   :  { %28976 = vmatmul.mubr.bf16.gmra.mrb[24].mxu0 %v4791_v44 }
 0x545   :  { %28979 = vmatprep.mubr.bf16.mxu0 %v4792_v56  ;;  %28992 = vmatpush3.bf16.msra.mxu0 %v33091_v8  ;;  %v35242_v13 = vpop.f32.mrb[104].mxu1  ;;  %v33098_v56 = vld [vmem:[%s42547_s9 + $0xa8] sm:$0xff]  }
 0x546   :  { %28993 = vmatprep.subr.bf16.mxu0 %v33094_v48  ;;  %v35247_v15 = vpop.f32.mrb[105].mxu1  ;;  %v33129_v8 = vld [vmem:[%s42543_s8 + $0x2a8] sm:$0xff]  }
 0x547   :  { %v35252_v38 = vpop.f32.mrb[106].mxu1 }
 0x548   :  { %v4809_v44 = vpack.c.bf16 %v35252_v38, %v35242_v13  ;;  %v35259_v43 = vpop.f32.mrb[107].mxu1 }
 0x549   :  { %28994 = vmatpush3.bf16.msra.mxu0 %v33094_v48  ;;  %v4808_v53 = vpack.c.bf16 %v35259_v43, %v35247_v15  ;;  %v33119_v48 = vld [vmem:[%s42547_s9 + $0x100] sm:$0xff]   ;;  %v33122_v43 = vld [vmem:[%s42547_s9 + $0x108] sm:$0xff]  }
 0x54a   :  { %28995 = vmatprep.subr.bf16.mxu0 %v33095_v14  ;;  %28816 = vmatmul.mubr.msk.bf16.gmra.mrb[212].mxu1 %vm3346_vm1, %v33109_v16  ;;  %v33136_v16 = vld [vmem:[%s42543_s8 + $0x2c0] sm:$0xff]  }
 0x54b   :  { %28819 = vmatprep.mubr.msk.bf16.mxu1 %vm3346_vm1, %v33112_v41 }
 0x54c   :  { %28980 = vmatmul.mubr.bf16.gmra.mrb[28].mxu0 %v4793_v52 }
 0x54d   :  { %28983 = vmatprep.mubr.bf16.mxu0 %v4794_v51  ;;  %28996 = vmatpush3.bf16.msra.mxu0 %v33095_v14  ;;  %v35274_v18 = vpop.f32.mrb[108].mxu1  ;;  %v33102_v51 = vld [vmem:[%s42547_s9 + $0xb8] sm:$0xff]  }
 0x54e   :  { %28997 = vmatprep.subr.bf16.mxu0 %v33098_v56  ;;  %v35279_v5 = vpop.f32.mrb[109].mxu1  ;;  %v33133_v14 = vld [vmem:[%s42543_s8 + $0x2b8] sm:$0xff]  }
 0x54f   :  { %v35284_v49 = vpop.f32.mrb[110].mxu1 }
 0x550   :  { %v4811_v52 = vpack.c.bf16 %v35284_v49, %v35274_v18  ;;  %v35291_v58 = vpop.f32.mrb[111].mxu1 }
 0x551   :  { %28998 = vmatpush3.bf16.msra.mxu0 %v33098_v56  ;;  %v4810_v12 = vpack.c.bf16 %v35291_v58, %v35279_v5  ;;  %v33123_v56 = vld [vmem:[%s42547_s9 + $0x110] sm:$0xff]   ;;  %v33126_v58 = vld [vmem:[%s42547_s9 + $0x118] sm:$0xff]  }
 0x552   :  { %28999 = vmatprep.subr.bf16.mxu0 %v33099_v19  ;;  %28820 = vmatmul.mubr.msk.bf16.gmra.mrb[216].mxu1 %vm3346_vm1, %v33113_v20  ;;  %v33140_v20 = vld [vmem:[%s42543_s8 + $0x2d0] sm:$0xff]  }
 0x553   :  { %28823 = vmatprep.mubr.msk.bf16.mxu1 %vm3346_vm1, %v33116_v47 }
 0x554   :  { %28984 = vmatmul.mubr.bf16.gmra.mrb[32].mxu0 %v4795_v10 }
 0x555   :  { %29000 = vmatpush3.bf16.msra.mxu0 %v33099_v19  ;;  %29003 = vmatprep.mubr.bf16.mxu0 %v4804_v3  ;;  %v35303_v21 = vpop.f32.mrb[112].mxu1  ;;  %v33137_v19 = vld [vmem:[%s42543_s8 + $0x2c8] sm:$0xff]  }
 0x556   :  { %29001 = vmatprep.subr.bf16.mxu0 %v33102_v51  ;;  %v35308_v23 = vpop.f32.mrb[113].mxu1 }
 0x557   :  { %v35313_v25 = vpop.f32.mrb[114].mxu1 }
 0x558   :  { %v4813_v2 = vpack.c.bf16 %v35313_v25, %v35303_v21  ;;  %v35320_v10 = vpop.f32.mrb[115].mxu1 }
 0x559   :  { %29002 = vmatpush3.bf16.msra.mxu0 %v33102_v51  ;;  %v4812_v26 = vpack.c.bf16 %v35320_v10, %v35308_v23  ;;  %v33127_v51 = vld [vmem:[%s42547_s9 + $0x120] sm:$0xff]   ;;  %v33130_v10 = vld [vmem:[%s42547_s9 + $0x128] sm:$0xff]  }
 0x55a   :  { %29019 = vmatprep.subr.bf16.mxu0 %v33103_v22  ;;  %28824 = vmatmul.mubr.msk.bf16.gmra.mrb[220].mxu1 %vm3346_vm1, %v33117_v24  ;;  %v33144_v24 = vld [vmem:[%s42543_s8 + $0x2e0] sm:$0xff]  }
 0x55b   :  { %28827 = vmatprep.mubr.msk.bf16.mxu1 %vm3346_vm1, %v33120_v57 }
 0x55c   :  { %29004 = vmatmul.mubr.bf16.vlgmr.msra.gmra.mrb[20].mxu0 %v4805_v36 }
 0x55d   :  { %29020 = vmatpush3.bf16.msra.mxu0 %v33103_v22  ;;  %29007 = vmatprep.mubr.bf16.mxu0 %v4806_v45  ;;  %v35332_v17 = vpop.f32.mrb[116].mxu1  ;;  %v33141_v22 = vld [vmem:[%s42543_s8 + $0x2d8] sm:$0xff]  }
 0x55e   :  { %29021 = vmatprep.subr.bf16.mxu0 %v33106_v27  ;;  %v35337_v29 = vpop.f32.mrb[117].mxu1 }
 0x55f   :  { %v35342_v34 = vpop.f32.mrb[118].mxu1 }
 0x560   :  { %v4815_v42 = vpack.c.bf16 %v35342_v34, %v35332_v17  ;;  %v35349_v46 = vpop.f32.mrb[119].mxu1 }
 0x561   :  { %29022 = vmatpush3.bf16.msra.mxu0 %v33106_v27  ;;  %v4814_v50 = vpack.c.bf16 %v35349_v46, %v35337_v29  ;;  %v33131_v27 = vld [vmem:[%s42547_s9 + $0x130] sm:$0xff]   ;;  %v33134_v46 = vld [vmem:[%s42547_s9 + $0x138] sm:$0xff]  }
 0x562   :  { %29023 = vmatprep.subr.bf16.mxu0 %v33107_v28  ;;  %28828 = vmatmul.mubr.msk.bf16.gmra.mrb[224].mxu1 %vm3346_vm1, %v33121_v32  ;;  %v33148_v32 = vld [vmem:[%s42543_s8 + $0x2f0] sm:$0xff]  }
 0x563   :  { %28831 = vmatprep.mubr.msk.bf16.mxu1 %vm3346_vm1, %v33124_v40 }
 0x564   :  { %29008 = vmatmul.mubr.bf16.gmra.mrb[24].mxu0 %v4807_v35 }
 0x565   :  { %29024 = vmatpush3.bf16.msra.mxu0 %v33107_v28  ;;  %29011 = vmatprep.mubr.bf16.mxu0 %v4808_v53  ;;  %v35361_v4 = vpop.f32.mrb[120].mxu1  ;;  %v33145_v28 = vld [vmem:[%s42543_s8 + $0x2e8] sm:$0xff]  }
 0x566   :  { %29025 = vmatprep.subr.bf16.mxu0 %v33110_v60  ;;  %v35366_v55 = vpop.f32.mrb[121].mxu1 }
 0x567   :  { %v35371_v62 = vpop.f32.mrb[122].mxu1 }
 0x568   :  { %v4817_v1 = vpack.c.bf16 %v35371_v62, %v35361_v4  ;;  %v35378_v31 = vpop.f32.mrb[123].mxu1 }
 0x569   :  { %29026 = vmatpush3.bf16.msra.mxu0 %v33110_v60  ;;  %v4816_v36 = vpack.c.bf16 %v35378_v31, %v35366_v55  ;;  %v33135_v60 = vld [vmem:[%s42547_s9 + $0x140] sm:$0xff]   ;;  %v33138_v31 = vld [vmem:[%s42547_s9 + $0x148] sm:$0xff]  }
 0x56a   :  { %29027 = vmatprep.subr.bf16.mxu0 %v33111_v54  ;;  %28832 = vmatmul.mubr.msk.bf16.gmra.mrb[228].mxu1 %vm3346_vm1, %v33125_v59  ;;  %v33152_v59 = vld [vmem:[%s42543_s8 + $0x300] sm:$0xff]  }
 0x56b   :  { %28835 = vmatprep.mubr.msk.bf16.mxu1 %vm3346_vm1, %v33128_v0 }
 0x56c   :  { %29012 = vmatmul.mubr.bf16.gmra.mrb[28].mxu0 %v4809_v44 }
 0x56d   :  { %29028 = vmatpush3.bf16.msra.mxu0 %v33111_v54  ;;  %29015 = vmatprep.mubr.bf16.mxu0 %v4810_v12  ;;  %v35390_v3 = vpop.f32.mrb[124].mxu1  ;;  %v33149_v54 = vld [vmem:[%s42543_s8 + $0x2f8] sm:$0xff]  }
 0x56e   :  { %29029 = vmatprep.subr.bf16.mxu0 %v33114_v37  ;;  %v35395_v7 = vpop.f32.mrb[125].mxu1 }
 0x56f   :  { %v35400_v9 = vpop.f32.mrb[126].mxu1 }
 0x570   :  { %v4819_v30 = vpack.c.bf16 %v35400_v9, %v35390_v3  ;;  %v35407_v33 = vpop.f32.mrb[127].mxu1 }
 0x571   :  { %29030 = vmatpush3.bf16.msra.mxu0 %v33114_v37  ;;  %v4818_v35 = vpack.c.bf16 %v35407_v33, %v35395_v7  ;;  %v33139_v37 = vld [vmem:[%s42547_s9 + $0x150] sm:$0xff]   ;;  %v33142_v33 = vld [vmem:[%s42547_s9 + $0x158] sm:$0xff]  }
 0x572   :  { %29031 = vmatprep.subr.bf16.mxu0 %v33115_v6  ;;  %28836 = vmatmul.mubr.msk.bf16.gmra.mrb[232].mxu1 %vm3346_vm1, %v33129_v8  ;;  %v33156_v8 = vld [vmem:[%s42543_s8 + $0x310] sm:$0xff]  }
 0x573   :  { %28839 = vmatprep.mubr.msk.bf16.mxu1 %vm3346_vm1, %v33132_v11 }
 0x574   :  { %29016 = vmatmul.mubr.bf16.gmra.mrb[32].mxu0 %v4811_v52 }
 0x575   :  { %29032 = vmatpush3.bf16.msra.mxu0 %v33115_v6  ;;  %29035 = vmatprep.mubr.bf16.mxu0 %v4812_v26  ;;  %v35419_v45 = vpop.f32.mrb[128].mxu1  ;;  %v33153_v6 = vld [vmem:[%s42543_s8 + $0x308] sm:$0xff]  }
 0x576   :  { %29033 = vmatprep.subr.bf16.mxu0 %v33118_v39  ;;  %v35424_v13 = vpop.f32.mrb[129].mxu1 }
 0x577   :  { %v35429_v15 = vpop.f32.mrb[130].mxu1 }
 0x578   :  { %v4821_v38 = vpack.c.bf16 %v35429_v15, %v35419_v45  ;;  %v35436_v41 = vpop.f32.mrb[131].mxu1 }
 0x579   :  { %29034 = vmatpush3.bf16.msra.mxu0 %v33118_v39  ;;  %v4820_v44 = vpack.c.bf16 %v35436_v41, %v35424_v13  ;;  %v33143_v39 = vld [vmem:[%s42547_s9 + $0x160] sm:$0xff]   ;;  %v33146_v41 = vld [vmem:[%s42547_s9 + $0x168] sm:$0xff]  }
 0x57a   :  { %29051 = vmatprep.subr.bf16.mxu0 %v33119_v48  ;;  %28840 = vmatmul.mubr.msk.bf16.gmra.mrb[236].mxu1 %vm3346_vm1, %v33133_v14  ;;  %v33160_v14 = vld [vmem:[%s42543_s8 + $0x320] sm:$0xff]  }
 0x57b   :  { %28843 = vmatprep.mubr.msk.bf16.mxu1 %vm3346_vm1, %v33136_v16 }
 0x57c   :  { %29036 = vmatmul.mubr.bf16.vlgmr.msra.gmra.mrb[20].mxu0 %v4813_v2 }
 0x57d   :  { %29052 = vmatpush3.bf16.msra.mxu0 %v33119_v48  ;;  %29039 = vmatprep.mubr.bf16.mxu0 %v4814_v50  ;;  %v35448_v53 = vpop.f32.mrb[132].mxu1  ;;  %v33157_v48 = vld [vmem:[%s42543_s8 + $0x318] sm:$0xff]  }
 0x57e   :  { %29053 = vmatprep.subr.bf16.mxu0 %v33122_v43  ;;  %v35453_v18 = vpop.f32.mrb[133].mxu1 }
 0x57f   :  { %v35458_v5 = vpop.f32.mrb[134].mxu1 }
 0x580   :  { %v4823_v49 = vpack.c.bf16 %v35458_v5, %v35448_v53  ;;  %v35465_v47 = vpop.f32.mrb[135].mxu1 }
 0x581   :  { %29054 = vmatpush3.bf16.msra.mxu0 %v33122_v43  ;;  %v4822_v52 = vpack.c.bf16 %v35465_v47, %v35453_v18  ;;  %v33147_v43 = vld [vmem:[%s42547_s9 + $0x170] sm:$0xff]   ;;  %v33150_v47 = vld [vmem:[%s42547_s9 + $0x178] sm:$0xff]  }
 0x582   :  { %29055 = vmatprep.subr.bf16.mxu0 %v33123_v56  ;;  %28844 = vmatmul.mubr.msk.bf16.gmra.mrb[240].mxu1 %vm3346_vm1, %v33137_v19  ;;  %v33164_v19 = vld [vmem:[%s42543_s8 + $0x330] sm:$0xff]  }
 0x583   :  { %28847 = vmatprep.mubr.msk.bf16.mxu1 %vm3346_vm1, %v33140_v20 }
 0x584   :  { %29040 = vmatmul.mubr.bf16.gmra.mrb[24].mxu0 %v4815_v42 }
 0x585   :  { %29056 = vmatpush3.bf16.msra.mxu0 %v33123_v56  ;;  %29043 = vmatprep.mubr.bf16.mxu0 %v4816_v36  ;;  %v35477_v12 = vpop.f32.mrb[136].mxu1  ;;  %v33161_v56 = vld [vmem:[%s42543_s8 + $0x328] sm:$0xff]  }
 0x586   :  { %29057 = vmatprep.subr.bf16.mxu0 %v33126_v58  ;;  %v35482_v21 = vpop.f32.mrb[137].mxu1 }
 0x587   :  { %v35487_v23 = vpop.f32.mrb[138].mxu1 }
 0x588   :  { %v4825_v25 = vpack.c.bf16 %v35487_v23, %v35477_v12  ;;  %v35494_v57 = vpop.f32.mrb[139].mxu1 }
 0x589   :  { %29058 = vmatpush3.bf16.msra.mxu0 %v33126_v58  ;;  %v4824_v2 = vpack.c.bf16 %v35494_v57, %v35482_v21  ;;  %v33151_v58 = vld [vmem:[%s42547_s9 + $0x180] sm:$0xff]   ;;  %v33154_v57 = vld [vmem:[%s42547_s9 + $0x188] sm:$0xff]  }
 0x58a   :  { %29059 = vmatprep.subr.bf16.mxu0 %v33127_v51  ;;  %28848 = vmatmul.mubr.msk.bf16.gmra.mrb[244].mxu1 %vm3346_vm1, %v33141_v22  ;;  %v33168_v22 = vld [vmem:[%s42543_s8 + $0x340] sm:$0xff]  }
 0x58b   :  { %28851 = vmatprep.mubr.msk.bf16.mxu1 %vm3346_vm1, %v33144_v24 }
 0x58c   :  { %29044 = vmatmul.mubr.bf16.gmra.mrb[28].mxu0 %v4817_v1 }
 0x58d   :  { %29060 = vmatpush3.bf16.msra.mxu0 %v33127_v51  ;;  %29047 = vmatprep.mubr.bf16.mxu0 %v4818_v35  ;;  %v35506_v26 = vpop.f32.mrb[140].mxu1  ;;  %v33165_v51 = vld [vmem:[%s42543_s8 + $0x338] sm:$0xff]  }
 0x58e   :  { %29061 = vmatprep.subr.bf16.mxu0 %v33130_v10  ;;  %v35511_v17 = vpop.f32.mrb[141].mxu1 }
 0x58f   :  { %v35516_v29 = vpop.f32.mrb[142].mxu1 }
 0x590   :  { %v4827_v34 = vpack.c.bf16 %v35516_v29, %v35506_v26  ;;  %v35523_v40 = vpop.f32.mrb[143].mxu1 }
 0x591   :  { %29062 = vmatpush3.bf16.msra.mxu0 %v33130_v10  ;;  %v4826_v42 = vpack.c.bf16 %v35523_v40, %v35511_v17  ;;  %v33155_v10 = vld [vmem:[%s42547_s9 + $0x190] sm:$0xff]   ;;  %v33158_v40 = vld [vmem:[%s42547_s9 + $0x198] sm:$0xff]  }
 0x592   :  { %29063 = vmatprep.subr.bf16.mxu0 %v33131_v27  ;;  %28852 = vmatmul.mubr.msk.bf16.gmra.mrb[248].mxu1 %vm3346_vm1, %v33145_v28  ;;  %v33172_v28 = vld [vmem:[%s42543_s8 + $0x350] sm:$0xff]  }
 0x593   :  { %28855 = vmatprep.mubr.msk.bf16.mxu1 %vm3346_vm1, %v33148_v32 }
 0x594   :  { %29048 = vmatmul.mubr.bf16.gmra.mrb[32].mxu0 %v4819_v30 }
 0x595   :  { %29064 = vmatpush3.bf16.msra.mxu0 %v33131_v27  ;;  %29067 = vmatprep.mubr.bf16.mxu0 %v4820_v44  ;;  %v35535_v50 = vpop.f32.mrb[144].mxu1  ;;  %v33169_v27 = vld [vmem:[%s42543_s8 + $0x348] sm:$0xff]  }
 0x596   :  { %29065 = vmatprep.subr.bf16.mxu0 %v33134_v46  ;;  %v35540_v4 = vpop.f32.mrb[145].mxu1 }
 0x597   :  { %v35545_v55 = vpop.f32.mrb[146].mxu1 }
 0x598   :  { %v4829_v62 = vpack.c.bf16 %v35545_v55, %v35535_v50  ;;  %v35552_v0 = vpop.f32.mrb[147].mxu1 }
 0x599   :  { %29066 = vmatpush3.bf16.msra.mxu0 %v33134_v46  ;;  %v4828_v1 = vpack.c.bf16 %v35552_v0, %v35540_v4  ;;  %v33159_v46 = vld [vmem:[%s42547_s9 + $0x1a0] sm:$0xff]   ;;  %v33162_v0 = vld [vmem:[%s42547_s9 + $0x1a8] sm:$0xff]  }
 0x59a   :  { %29083 = vmatprep.subr.bf16.mxu0 %v33135_v60  ;;  %28856 = vmatmul.mubr.msk.bf16.gmra.mrb[252].mxu1 %vm3346_vm1, %v33149_v54  ;;  %v33176_v54 = vld [vmem:[%s42543_s8 + $0x360] sm:$0xff]  }
 0x59b   :  { %28859 = vmatprep.mubr.msk.bf16.mxu1 %vm3346_vm1, %v33152_v59 }
 0x59c   :  { %29068 = vmatmul.mubr.bf16.vlgmr.msra.gmra.mrb[20].mxu0 %v4821_v38 }
 0x59d   :  { %29084 = vmatpush3.bf16.msra.mxu0 %v33135_v60  ;;  %29071 = vmatprep.mubr.bf16.mxu0 %v4822_v52  ;;  %v35564_v36 = vpop.f32.mrb[148].mxu1  ;;  %v33173_v60 = vld [vmem:[%s42543_s8 + $0x358] sm:$0xff]  }
 0x59e   :  { %29085 = vmatprep.subr.bf16.mxu0 %v33138_v31  ;;  %v35569_v3 = vpop.f32.mrb[149].mxu1 }
 0x59f   :  { %v35574_v7 = vpop.f32.mrb[150].mxu1 }
 0x5a0   :  { %v4831_v9 = vpack.c.bf16 %v35574_v7, %v35564_v36  ;;  %v35581_v11 = vpop.f32.mrb[151].mxu1 }
 0x5a1   :  { %29086 = vmatpush3.bf16.msra.mxu0 %v33138_v31  ;;  %v4830_v30 = vpack.c.bf16 %v35581_v11, %v35569_v3  ;;  %v33163_v31 = vld [vmem:[%s42547_s9 + $0x1b0] sm:$0xff]   ;;  %v33166_v11 = vld [vmem:[%s42547_s9 + $0x1b8] sm:$0xff]  }
 0x5a2   :  { %29087 = vmatprep.subr.bf16.mxu0 %v33139_v37  ;;  %28860 = vmatmul.mubr.msk.bf16.gmra.mrb[0].mxu1 %vm3346_vm1, %v33153_v6  ;;  %v33180_v6 = vld [vmem:[%s42543_s8 + $0x370] sm:$0xff]  }
 0x5a3   :  { %28863 = vmatprep.mubr.msk.bf16.mxu1 %vm3346_vm1, %v33156_v8 }
 0x5a4   :  { %29072 = vmatmul.mubr.bf16.gmra.mrb[24].mxu0 %v4823_v49 }
 0x5a5   :  { %29088 = vmatpush3.bf16.msra.mxu0 %v33139_v37  ;;  %29075 = vmatprep.mubr.bf16.mxu0 %v4824_v2  ;;  %v35593_v35 = vpop.f32.mrb[152].mxu1  ;;  %v33177_v37 = vld [vmem:[%s42543_s8 + $0x368] sm:$0xff]  }
 0x5a6   :  { %29089 = vmatprep.subr.bf16.mxu0 %v33142_v33  ;;  %v35598_v45 = vpop.f32.mrb[153].mxu1 }
 0x5a7   :  { %v35603_v13 = vpop.f32.mrb[154].mxu1 }
 0x5a8   :  { %v4833_v15 = vpack.c.bf16 %v35603_v13, %v35593_v35  ;;  %v35610_v16 = vpop.f32.mrb[155].mxu1 }
 0x5a9   :  { %29090 = vmatpush3.bf16.msra.mxu0 %v33142_v33  ;;  %v4832_v38 = vpack.c.bf16 %v35610_v16, %v35598_v45  ;;  %v33167_v33 = vld [vmem:[%s42547_s9 + $0x1c0] sm:$0xff]   ;;  %v33170_v16 = vld [vmem:[%s42547_s9 + $0x1c8] sm:$0xff]  }
 0x5aa   :  { %29091 = vmatprep.subr.bf16.mxu0 %v33143_v39  ;;  %28864 = vmatmul.mubr.msk.bf16.gmra.mrb[4].mxu1 %vm3346_vm1, %v33157_v48  ;;  %v33184_v48 = vld [vmem:[%s42543_s8 + $0x380] sm:$0xff]  }
 0x5ab   :  { %28867 = vmatprep.mubr.msk.bf16.mxu1 %vm3346_vm1, %v33160_v14 }
 0x5ac   :  { %29076 = vmatmul.mubr.bf16.gmra.mrb[28].mxu0 %v4825_v25 }
 0x5ad   :  { %29092 = vmatpush3.bf16.msra.mxu0 %v33143_v39  ;;  %29079 = vmatprep.mubr.bf16.mxu0 %v4826_v42  ;;  %v35622_v44 = vpop.f32.mrb[156].mxu1  ;;  %v33181_v39 = vld [vmem:[%s42543_s8 + $0x378] sm:$0xff]  }
 0x5ae   :  { %29093 = vmatprep.subr.bf16.mxu0 %v33146_v41  ;;  %v35627_v53 = vpop.f32.mrb[157].mxu1 }
 0x5af   :  { %v35632_v18 = vpop.f32.mrb[158].mxu1 }
 0x5b0   :  { %v4835_v5 = vpack.c.bf16 %v35632_v18, %v35622_v44  ;;  %v35639_v20 = vpop.f32.mrb[159].mxu1 }
 0x5b1   :  { %29094 = vmatpush3.bf16.msra.mxu0 %v33146_v41  ;;  %v4834_v49 = vpack.c.bf16 %v35639_v20, %v35627_v53  ;;  %v33171_v41 = vld [vmem:[%s42547_s9 + $0x1d0] sm:$0xff]   ;;  %v33174_v20 = vld [vmem:[%s42547_s9 + $0x1d8] sm:$0xff]  }
 0x5b2   :  { %29095 = vmatprep.subr.bf16.mxu0 %v33147_v43  ;;  %28868 = vmatmul.mubr.msk.bf16.gmra.mrb[8].mxu1 %vm3346_vm1, %v33161_v56  ;;  %v33188_v56 = vld [vmem:[%s42543_s8 + $0x390] sm:$0xff]  }
 0x5b3   :  { %28871 = vmatprep.mubr.msk.bf16.mxu1 %vm3346_vm1, %v33164_v19 }
 0x5b4   :  { %29080 = vmatmul.mubr.bf16.gmra.mrb[32].mxu0 %v4827_v34 }
 0x5b5   :  { %29096 = vmatpush3.bf16.msra.mxu0 %v33147_v43  ;;  %29099 = vmatprep.mubr.bf16.mxu0 %v4828_v1  ;;  %v35651_v52 = vpop.f32.mrb[160].mxu1  ;;  %v33185_v43 = vld [vmem:[%s42543_s8 + $0x388] sm:$0xff]  }
 0x5b6   :  { %29097 = vmatprep.subr.bf16.mxu0 %v33150_v47  ;;  %v35656_v12 = vpop.f32.mrb[161].mxu1 }
 0x5b7   :  { %v35661_v21 = vpop.f32.mrb[162].mxu1 }
 0x5b8   :  { %v4837_v23 = vpack.c.bf16 %v35661_v21, %v35651_v52  ;;  %v35668_v24 = vpop.f32.mrb[163].mxu1 }
 0x5b9   :  { %29098 = vmatpush3.bf16.msra.mxu0 %v33150_v47  ;;  %v4836_v25 = vpack.c.bf16 %v35668_v24, %v35656_v12  ;;  %v33175_v47 = vld [vmem:[%s42547_s9 + $0x1e0] sm:$0xff]   ;;  %v33178_v24 = vld [vmem:[%s42547_s9 + $0x1e8] sm:$0xff]  }
 0x5ba   :  { %29115 = vmatprep.subr.bf16.mxu0 %v33151_v58  ;;  %28872 = vmatmul.mubr.msk.bf16.gmra.mrb[12].mxu1 %vm3346_vm1, %v33165_v51  ;;  %v33192_v51 = vld [vmem:[%s42543_s8 + $0x3a0] sm:$0xff]  }
 0x5bb   :  { %28875 = vmatprep.mubr.msk.bf16.mxu1 %vm3346_vm1, %v33168_v22 }
 0x5bc   :  { %29100 = vmatmul.mubr.bf16.vlgmr.msra.gmra.mrb[20].mxu0 %v4829_v62 }
 0x5bd   :  { %29116 = vmatpush3.bf16.msra.mxu0 %v33151_v58  ;;  %29103 = vmatprep.mubr.bf16.mxu0 %v4830_v30  ;;  %v35680_v2 = vpop.f32.mrb[164].mxu1  ;;  %v33189_v58 = vld [vmem:[%s42543_s8 + $0x398] sm:$0xff]  }
 0x5be   :  { %29117 = vmatprep.subr.bf16.mxu0 %v33154_v57  ;;  %v35685_v26 = vpop.f32.mrb[165].mxu1 }
 0x5bf   :  { %v35690_v17 = vpop.f32.mrb[166].mxu1 }
 0x5c0   :  { %v4839_v29 = vpack.c.bf16 %v35690_v17, %v35680_v2  ;;  %v35697_v32 = vpop.f32.mrb[167].mxu1 }
 0x5c1   :  { %29118 = vmatpush3.bf16.msra.mxu0 %v33154_v57  ;;  %v4838_v34 = vpack.c.bf16 %v35697_v32, %v35685_v26  ;;  %v33179_v57 = vld [vmem:[%s42547_s9 + $0x1f0] sm:$0xff]   ;;  %v33182_v32 = vld [vmem:[%s42547_s9 + $0x1f8] sm:$0xff]  }
 0x5c2   :  { %29119 = vmatprep.subr.bf16.mxu0 %v33155_v10  ;;  %28876 = vmatmul.mubr.msk.bf16.gmra.mrb[16].mxu1 %vm3346_vm1, %v33169_v27  ;;  %v33196_v27 = vld [vmem:[%s42543_s8 + $0x3b0] sm:$0xff]  }
 0x5c3   :  { %28879 = vmatprep.mubr.msk.bf16.mxu1 %vm3346_vm1, %v33172_v28 }
 0x5c4   :  { %29104 = vmatmul.mubr.bf16.gmra.mrb[24].mxu0 %v4831_v9 }
 0x5c5   :  { %29120 = vmatpush3.bf16.msra.mxu0 %v33155_v10  ;;  %29107 = vmatprep.mubr.bf16.mxu0 %v4832_v38  ;;  %v35709_v42 = vpop.f32.mrb[168].mxu1  ;;  %v33193_v10 = vld [vmem:[%s42543_s8 + $0x3a8] sm:$0xff]  }
 0x5c6   :  { %29121 = vmatprep.subr.bf16.mxu0 %v33158_v40  ;;  %v35714_v50 = vpop.f32.mrb[169].mxu1 }
 0x5c7   :  { %v35719_v4 = vpop.f32.mrb[170].mxu1 }
 0x5c8   :  { %v4841_v55 = vpack.c.bf16 %v35719_v4, %v35709_v42  ;;  %v35726_v59 = vpop.f32.mrb[171].mxu1 }
 0x5c9   :  { %29122 = vmatpush3.bf16.msra.mxu0 %v33158_v40  ;;  %v4840_v62 = vpack.c.bf16 %v35726_v59, %v35714_v50  ;;  %v33183_v40 = vld [vmem:[%s42547_s9 + $0x200] sm:$0xff]   ;;  %v33186_v59 = vld [vmem:[%s42547_s9 + $0x208] sm:$0xff]  }
 0x5ca   :  { %29123 = vmatprep.subr.bf16.mxu0 %v33159_v46  ;;  %28880 = vmatmul.mubr.msk.bf16.gmra.mrb[20].mxu1 %vm3346_vm1, %v33173_v60  ;;  %v33200_v60 = vld [vmem:[%s42543_s8 + $0x3c0] sm:$0xff]  }
 0x5cb   :  { %28883 = vmatprep.mubr.msk.bf16.mxu1 %vm3346_vm1, %v33176_v54 }
 0x5cc   :  { %29108 = vmatmul.mubr.bf16.gmra.mrb[28].mxu0 %v4833_v15 }
 0x5cd   :  { %29124 = vmatpush3.bf16.msra.mxu0 %v33159_v46  ;;  %29111 = vmatprep.mubr.bf16.mxu0 %v4834_v49  ;;  %v35738_v1 = vpop.f32.mrb[172].mxu1  ;;  %v33197_v46 = vld [vmem:[%s42543_s8 + $0x3b8] sm:$0xff]  }
 0x5ce   :  { %29125 = vmatprep.subr.bf16.mxu0 %v33162_v0  ;;  %v35743_v36 = vpop.f32.mrb[173].mxu1 }
 0x5cf   :  { %v35748_v3 = vpop.f32.mrb[174].mxu1 }
 0x5d0   :  { %v4843_v7 = vpack.c.bf16 %v35748_v3, %v35738_v1  ;;  %v35755_v8 = vpop.f32.mrb[175].mxu1 }
 0x5d1   :  { %29126 = vmatpush3.bf16.msra.mxu0 %v33162_v0  ;;  %v4842_v9 = vpack.c.bf16 %v35755_v8, %v35743_v36  ;;  %v33187_v0 = vld [vmem:[%s42547_s9 + $0x210] sm:$0xff]   ;;  %v33190_v8 = vld [vmem:[%s42547_s9 + $0x218] sm:$0xff]  }
 0x5d2   :  { %29127 = vmatprep.subr.bf16.mxu0 %v33163_v31  ;;  %28884 = vmatmul.mubr.msk.bf16.gmra.mrb[24].mxu1 %vm3346_vm1, %v33177_v37  ;;  %v33204_v37 = vld [vmem:[%s42543_s8 + $0x3d0] sm:$0xff]  }
 0x5d3   :  { %28887 = vmatprep.mubr.msk.bf16.mxu1 %vm3346_vm1, %v33180_v6 }
 0x5d4   :  { %29112 = vmatmul.mubr.bf16.gmra.mrb[32].mxu0 %v4835_v5 }
 0x5d5   :  { %29128 = vmatpush3.bf16.msra.mxu0 %v33163_v31  ;;  %29131 = vmatprep.mubr.bf16.mxu0 %v4836_v25  ;;  %v35767_v30 = vpop.f32.mrb[176].mxu1  ;;  %v33201_v31 = vld [vmem:[%s42543_s8 + $0x3c8] sm:$0xff]  }
 0x5d6   :  { %29129 = vmatprep.subr.bf16.mxu0 %v33166_v11  ;;  %v35772_v35 = vpop.f32.mrb[177].mxu1 }
 0x5d7   :  { %v35777_v45 = vpop.f32.mrb[178].mxu1 }
 0x5d8   :  { %v4845_v13 = vpack.c.bf16 %v35777_v45, %v35767_v30  ;;  %v35784_v14 = vpop.f32.mrb[179].mxu1 }
 0x5d9   :  { %29130 = vmatpush3.bf16.msra.mxu0 %v33166_v11  ;;  %v4844_v15 = vpack.c.bf16 %v35784_v14, %v35772_v35  ;;  %v33191_v11 = vld [vmem:[%s42547_s9 + $0x220] sm:$0xff]   ;;  %v33194_v14 = vld [vmem:[%s42547_s9 + $0x228] sm:$0xff]  }
 0x5da   :  { %29147 = vmatprep.subr.bf16.mxu0 %v33167_v33  ;;  %28888 = vmatmul.mubr.msk.bf16.gmra.mrb[28].mxu1 %vm3346_vm1, %v33181_v39  ;;  %v33208_v39 = vld [vmem:[%s42543_s8 + $0x3e0] sm:$0xff]  }
 0x5db   :  { %28891 = vmatprep.mubr.msk.bf16.mxu1 %vm3346_vm1, %v33184_v48 }
 0x5dc   :  { %29132 = vmatmul.mubr.bf16.vlgmr.msra.gmra.mrb[20].mxu0 %v4837_v23 }
 0x5dd   :  { %29148 = vmatpush3.bf16.msra.mxu0 %v33167_v33  ;;  %29135 = vmatprep.mubr.bf16.mxu0 %v4838_v34  ;;  %v35796_v38 = vpop.f32.mrb[180].mxu1  ;;  %v33205_v33 = vld [vmem:[%s42543_s8 + $0x3d8] sm:$0xff]  }
 0x5de   :  { %29149 = vmatprep.subr.bf16.mxu0 %v33170_v16  ;;  %v35801_v44 = vpop.f32.mrb[181].mxu1 }
 0x5df   :  { %v35806_v53 = vpop.f32.mrb[182].mxu1 }
 0x5e0   :  { %v4847_v18 = vpack.c.bf16 %v35806_v53, %v35796_v38  ;;  %v35813_v19 = vpop.f32.mrb[183].mxu1 }
 0x5e1   :  { %29150 = vmatpush3.bf16.msra.mxu0 %v33170_v16  ;;  %v4846_v5 = vpack.c.bf16 %v35813_v19, %v35801_v44  ;;  %v33195_v16 = vld [vmem:[%s42547_s9 + $0x230] sm:$0xff]   ;;  %v33198_v19 = vld [vmem:[%s42547_s9 + $0x238] sm:$0xff]  }
 0x5e2   :  { %29151 = vmatprep.subr.bf16.mxu0 %v33171_v41  ;;  %28892 = vmatmul.mubr.msk.bf16.gmra.mrb[32].mxu1 %vm3346_vm1, %v33185_v43  ;;  %v33212_v43 = vld [vmem:[%s42543_s8 + $0x3f0] sm:$0xff]  }
 0x5e3   :  { %28895 = vmatprep.mubr.msk.bf16.mxu1 %vm3346_vm1, %v33188_v56 }
 0x5e4   :  { %29136 = vmatmul.mubr.bf16.gmra.mrb[24].mxu0 %v4839_v29 }
 0x5e5   :  { %29152 = vmatpush3.bf16.msra.mxu0 %v33171_v41  ;;  %29139 = vmatprep.mubr.bf16.mxu0 %v4840_v62  ;;  %v35825_v49 = vpop.f32.mrb[184].mxu1  ;;  %v33209_v41 = vld [vmem:[%s42543_s8 + $0x3e8] sm:$0xff]  }
 0x5e6   :  { %29153 = vmatprep.subr.bf16.mxu0 %v33174_v20  ;;  %v35830_v52 = vpop.f32.mrb[185].mxu1 }
 0x5e7   :  { %v35835_v12 = vpop.f32.mrb[186].mxu1 }
 0x5e8   :  { %v4849_v21 = vpack.c.bf16 %v35835_v12, %v35825_v49  ;;  %v35842_v22 = vpop.f32.mrb[187].mxu1 }
 0x5e9   :  { %29154 = vmatpush3.bf16.msra.mxu0 %v33174_v20  ;;  %v4848_v23 = vpack.c.bf16 %v35842_v22, %v35830_v52  ;;  %v33199_v20 = vld [vmem:[%s42547_s9 + $0x240] sm:$0xff]  }
 0x5ea   :  { %29155 = vmatprep.subr.bf16.mxu0 %v33175_v47  ;;  %28896 = vmatmul.mubr.msk.bf16.gmra.mrb[36].mxu1 %vm3346_vm1, %v33189_v58 }
 0x5eb   :  { %28899 = vmatprep.mubr.msk.bf16.mxu1 %vm3346_vm1, %v33192_v51 }
 0x5ec   :  { %29140 = vmatmul.mubr.bf16.gmra.mrb[28].mxu0 %v4841_v55 }
 0x5ed   :  { %29156 = vmatpush3.bf16.msra.mxu0 %v33175_v47  ;;  %29143 = vmatprep.mubr.bf16.mxu0 %v4842_v9  ;;  %v35854_v25 = vpop.f32.mrb[188].mxu1  ;;  %v33213_v47 = vld [vmem:[%s42543_s8 + $0x3f8] sm:$0xff]  }
 0x5ee   :  { %29157 = vmatprep.subr.bf16.mxu0 %v33178_v24  ;;  %v35859_v2 = vpop.f32.mrb[189].mxu1 }
 0x5ef   :  { %v35864_v26 = vpop.f32.mrb[190].mxu1 }
 0x5f0   :  { %v4851_v17 = vpack.c.bf16 %v35864_v26, %v35854_v25  ;;  %v35871_v28 = vpop.f32.mrb[191].mxu1  ;;  %v33206_v26 = vld [vmem:[%s42547_s9 + $0x258] sm:$0xff]  }
 0x5f1   :  { %29158 = vmatpush3.bf16.msra.mxu0 %v33178_v24  ;;  %v4850_v29 = vpack.c.bf16 %v35871_v28, %v35859_v2 }
 0x5f2   :  { %29159 = vmatprep.subr.bf16.mxu0 %v33179_v57  ;;  %28900 = vmatmul.mubr.msk.bf16.gmra.mrb[40].mxu1 %vm3346_vm1, %v33193_v10 }
 0x5f3   :  { %28903 = vmatprep.mubr.msk.bf16.mxu1 %vm3346_vm1, %v33196_v27 }
 0x5f4   :  { %29144 = vmatmul.mubr.bf16.gmra.mrb[32].mxu0 %v4843_v7 }
 0x5f5   :  { %29160 = vmatpush3.bf16.msra.mxu0 %v33179_v57  ;;  %29163 = vmatprep.mubr.bf16.mxu0 %v4844_v15  ;;  %v35883_v34 = vpop.f32.mrb[192].mxu1 }
 0x5f6   :  { %29161 = vmatprep.subr.bf16.mxu0 %v33182_v32  ;;  %v35888_v42 = vpop.f32.mrb[193].mxu1 }
 0x5f7   :  { %v35893_v50 = vpop.f32.mrb[194].mxu1 }
 0x5f8   :  { %v4853_v4 = vpack.c.bf16 %v35893_v50, %v35883_v34  ;;  %v35900_v54 = vpop.f32.mrb[195].mxu1  ;;  %v33211_v50 = vld [vmem:[%s42547_s9 + $0x270] sm:$0xff]  }
 0x5f9   :  { %29162 = vmatpush3.bf16.msra.mxu0 %v33182_v32  ;;  %v4852_v55 = vpack.c.bf16 %v35900_v54, %v35888_v42  ;;  %v33210_v42 = vld [vmem:[%s42547_s9 + $0x268] sm:$0xff]  }
 0x5fa   :  { %29179 = vmatprep.subr.bf16.mxu0 %v33183_v40  ;;  %28904 = vmatmul.mubr.msk.bf16.gmra.mrb[44].mxu1 %vm3346_vm1, %v33197_v46 }
 0x5fb   :  { %28907 = vmatprep.mubr.msk.bf16.mxu1 %vm3346_vm1, %v33200_v60 }
 0x5fc   :  { %29164 = vmatmul.mubr.bf16.vlgmr.msra.gmra.mrb[20].mxu0 %v4845_v13 }
 0x5fd   :  { %29180 = vmatpush3.bf16.msra.mxu0 %v33183_v40  ;;  %29167 = vmatprep.mubr.bf16.mxu0 %v4846_v5  ;;  %v35912_v62 = vpop.f32.mrb[196].mxu1 }
 0x5fe   :  { %29181 = vmatprep.subr.bf16.mxu0 %v33186_v59  ;;  %v35917_v1 = vpop.f32.mrb[197].mxu1 }
 0x5ff   :  { %v35922_v36 = vpop.f32.mrb[198].mxu1 }
 0x600   :  { %v4855_v3 = vpack.c.bf16 %v35922_v36, %v35912_v62  ;;  %v4296_v6 = vpop.f32.mrb[199].mxu1  ;;  %v33214_v62 = vld [vmem:[%s42547_s9 + $0x278] sm:$0xff]  }
 0x601   :  { %29182 = vmatpush3.bf16.msra.mxu0 %v33186_v59  ;;  %v4854_v7 = vpack.c.bf16 %v4296_v6, %v35917_v1  ;;  %v33215_v1 = vld [vmem:[%s42547_s9 + $0x280] sm:$0xff]  }
 0x602   :  { %29183 = vmatprep.subr.bf16.mxu0 %v33187_v0  ;;  %28908 = vmatmul.mubr.msk.bf16.gmra.mrb[48].mxu1 %vm3346_vm1, %v33201_v31 }
 0x603   :  { %28911 = vmatprep.mubr.msk.bf16.mxu1 %vm3346_vm1, %v33204_v37 }
 0x604   :  { %29168 = vmatmul.mubr.bf16.gmra.mrb[24].mxu0 %v4847_v18 }
 0x605   :  { %29184 = vmatpush3.bf16.msra.mxu0 %v33187_v0  ;;  %29171 = vmatprep.mubr.bf16.mxu0 %v4848_v23  ;;  %v35938_v9 = vpop.f32.mrb[200].mxu1  ;;  %v33203_v23 = vld [vmem:[%s42547_s9 + $0x250] sm:$0xff]  }
 0x606   :  { %29185 = vmatprep.subr.bf16.mxu0 %v33190_v8  ;;  %v4309_v30 = vpop.f32.mrb[201].mxu1 }
 0x607   :  { %v35946_v35 = vpop.f32.mrb[202].mxu1 }
 0x608   :  { %v4857_v45 = vpack.c.bf16 %v35946_v35, %v35938_v9  ;;  %v4312_v48 = vpop.f32.mrb[203].mxu1  ;;  %v33217_v9 = vld [vmem:[%s42547_s9 + $0x290] sm:$0xff]  }
 0x609   :  { %29186 = vmatpush3.bf16.msra.mxu0 %v33190_v8  ;;  %v4856_v13 = vpack.c.bf16 %v4312_v48, %v4309_v30 }
 0x60a   :  { %29187 = vmatprep.subr.bf16.mxu0 %v33191_v11  ;;  %28912 = vmatmul.mubr.msk.bf16.gmra.mrb[52].mxu1 %vm3346_vm1, %v33205_v33 }
 0x60b   :  { %28915 = vmatprep.mubr.msk.bf16.mxu1 %vm3346_vm1, %v33208_v39 }
 0x60c   :  { %29172 = vmatmul.mubr.bf16.gmra.mrb[28].mxu0 %v4849_v21  ;;  %v33202_v21 = vld [vmem:[%s42547_s9 + $0x248] sm:$0xff]  }
 0x60d   :  { %29188 = vmatpush3.bf16.msra.mxu0 %v33191_v11  ;;  %29175 = vmatprep.mubr.bf16.mxu0 %v4850_v29  ;;  %v35961_v15 = vpop.f32.mrb[204].mxu1 }
 0x60e   :  { %29189 = vmatprep.subr.bf16.mxu0 %v33194_v14  ;;  %v4325_v38 = vpop.f32.mrb[205].mxu1 }
 0x60f   :  { %v35969_v44 = vpop.f32.mrb[206].mxu1 }
 0x610   :  { %v4859_v53 = vpack.c.bf16 %v35969_v44, %v35961_v15  ;;  %v4328_v56 = vpop.f32.mrb[207].mxu1  ;;  %v33220_v44 = vld [vmem:[%s42547_s9 + $0x2a8] sm:$0xff]  }
 0x611   :  { %29190 = vmatpush3.bf16.msra.mxu0 %v33194_v14  ;;  %v4858_v18 = vpack.c.bf16 %v4328_v56, %v4325_v38 }
 0x612   :  { %29191 = vmatprep.subr.bf16.mxu0 %v33195_v16  ;;  %28916 = vmatmul.mubr.msk.bf16.gmra.mrb[56].mxu1 %vm3346_vm1, %v33209_v41 }
 0x613   :  { %28919 = vmatprep.mubr.msk.bf16.mxu1 %vm3346_vm1, %v33212_v43 }
 0x614   :  { %29176 = vmatmul.mubr.bf16.gmra.mrb[32].mxu0 %v4851_v17  ;;  %v33207_v17 = vld [vmem:[%s42547_s9 + $0x260] sm:$0xff]  }
 0x615   :  { %29192 = vmatpush3.bf16.msra.mxu0 %v33195_v16  ;;  %29195 = vmatprep.mubr.bf16.mxu0 %v4852_v55  ;;  %v35984_v5 = vpop.f32.mrb[208].mxu1 }
 0x616   :  { %29193 = vmatprep.subr.bf16.mxu0 %v33198_v19  ;;  %v4341_v49 = vpop.f32.mrb[209].mxu1 }
 0x617   :  { %v35992_v52 = vpop.f32.mrb[210].mxu1 }
 0x618   :  { %v4861_v58 = vpack.c.bf16 %v35992_v52, %v35984_v5  ;;  %v4344_v12 = vpop.f32.mrb[211].mxu1  ;;  %v33223_v52 = vld [vmem:[%s42547_s9 + $0x2c0] sm:$0xff]  }
 0x619   :  { %29194 = vmatpush3.bf16.msra.mxu0 %v33198_v19  ;;  %v4860_v51 = vpack.c.bf16 %v4344_v12, %v4341_v49  ;;  %v33222_v49 = vld [vmem:[%s42547_s9 + $0x2b8] sm:$0xff]  }
 0x61a   :  { %29211 = vmatprep.subr.bf16.mxu0 %v33199_v20  ;;  %28920 = vmatmul.mubr.msk.bf16.gmra.mrb[60].mxu1 %vm3346_vm1, %v33213_v47 }
 0x61c   :  { %29196 = vmatmul.mubr.bf16.vlgmr.msra.gmra.mrb[20].mxu0 %v4853_v4 }
 0x61d   :  { %29212 = vmatpush3.bf16.msra.mxu0 %v33199_v20  ;;  %29199 = vmatprep.mubr.bf16.mxu0 %v4854_v7  ;;  %v36003_v22 = vpop.f32.mrb[212].mxu1  ;;  %v33216_v7 = vld [vmem:[%s42547_s9 + $0x288] sm:$0xff]  }
 0x61e   :  { %29213 = vmatprep.subr.bf16.mxu0 %v33202_v21  ;;  %v4357_v24 = vpop.f32.mrb[213].mxu1 }
 0x61f   :  { %v36008_v25 = vpop.f32.mrb[214].mxu1 }
 0x620   :  { %v4863_v57 = vpack.c.bf16 %v36008_v25, %v36003_v22  ;;  %v4360_v2 = vpop.f32.mrb[215].mxu1  ;;  %v33225_v25 = vld [vmem:[%s42547_s9 + $0x2d0] sm:$0xff]  }
 0x621   :  { %29214 = vmatpush3.bf16.msra.mxu0 %v33202_v21  ;;  %v4862_v10 = vpack.c.bf16 %v4360_v2, %v4357_v24 }
 0x622   :  { %29215 = vmatprep.subr.bf16.mxu0 %v33203_v23 }
 0x624   :  { %29200 = vmatmul.mubr.bf16.gmra.mrb[24].mxu0 %v4855_v3 }
 0x625   :  { %29216 = vmatpush3.bf16.msra.mxu0 %v33203_v23  ;;  %29203 = vmatprep.mubr.bf16.mxu0 %v4856_v13  ;;  %v36018_v27 = vpop.f32.mrb[216].mxu1  ;;  %v33219_v13 = vld [vmem:[%s42547_s9 + $0x2a0] sm:$0xff]   ;;  %v33224_v23 = vld [vmem:[%s42547_s9 + $0x2c8] sm:$0xff]  }
 0x626   :  { %29217 = vmatprep.subr.bf16.mxu0 %v33206_v26  ;;  %v4373_v28 = vpop.f32.mrb[217].mxu1 }
 0x627   :  { %v36023_v29 = vpop.f32.mrb[218].mxu1 }
 0x628   :  { %v4865_v32 = vpack.c.bf16 %v36023_v29, %v36018_v27  ;;  %v4376_v34 = vpop.f32.mrb[219].mxu1  ;;  %v33227_v29 = vld [vmem:[%s42547_s9 + $0x2e0] sm:$0xff]  }
 0x629   :  { %29218 = vmatpush3.bf16.msra.mxu0 %v33206_v26  ;;  %v4864_v40 = vpack.c.bf16 %v4376_v34, %v4373_v28 }
 0x62a   :  { %29219 = vmatprep.subr.bf16.mxu0 %v33207_v17 }
 0x62c   :  { %29204 = vmatmul.mubr.bf16.gmra.mrb[28].mxu0 %v4857_v45  ;;  %v33218_v45 = vld [vmem:[%s42547_s9 + $0x298] sm:$0xff]  }
 0x62d   :  { %29220 = vmatpush3.bf16.msra.mxu0 %v33207_v17  ;;  %29207 = vmatprep.mubr.bf16.mxu0 %v4858_v18  ;;  %v36033_v46 = vpop.f32.mrb[220].mxu1  ;;  %v33226_v17 = vld [vmem:[%s42547_s9 + $0x2d8] sm:$0xff]  }
 0x62e   :  { %29221 = vmatprep.subr.bf16.mxu0 %v33210_v42  ;;  %v4389_v60 = vpop.f32.mrb[221].mxu1 }
 0x62f   :  { %v36038_v4 = vpop.f32.mrb[222].mxu1 }
 0x630   :  { %v4867_v54 = vpack.c.bf16 %v36038_v4, %v36033_v46  ;;  %v4392_v55 = vpop.f32.mrb[223].mxu1  ;;  %v33229_v4 = vld [vmem:[%s42547_s9 + $0x2f0] sm:$0xff]  }
 0x631   :  { %29222 = vmatpush3.bf16.msra.mxu0 %v33210_v42  ;;  %v4866_v59 = vpack.c.bf16 %v4392_v55, %v4389_v60 }
 0x632   :  { %29223 = vmatprep.subr.bf16.mxu0 %v33211_v50 }
 0x634   :  { %29208 = vmatmul.mubr.bf16.gmra.mrb[32].mxu0 %v4859_v53  ;;  %v33221_v53 = vld [vmem:[%s42547_s9 + $0x2b0] sm:$0xff]  }
 0x635   :  { %29224 = vmatpush3.bf16.msra.mxu0 %v33211_v50  ;;  %29227 = vmatprep.mubr.bf16.mxu0 %v4860_v51  ;;  %v36048_v0 = vpop.f32.mrb[224].mxu1  ;;  %v33228_v50 = vld [vmem:[%s42547_s9 + $0x2e8] sm:$0xff]  }
 0x636   :  { %29225 = vmatprep.subr.bf16.mxu0 %v33214_v62  ;;  %v4405_v31 = vpop.f32.mrb[225].mxu1 }
 0x637   :  { %v36053_v36 = vpop.f32.mrb[226].mxu1 }
 0x638   :  { %v4869_v37 = vpack.c.bf16 %v36053_v36, %v36048_v0  ;;  %v4408_v3 = vpop.f32.mrb[227].mxu1  ;;  %v33231_v36 = vld [vmem:[%s42547_s9 + $0x300] sm:$0xff]  }
 0x639   :  { %29226 = vmatpush3.bf16.msra.mxu0 %v33214_v62  ;;  %v4868_v6 = vpack.c.bf16 %v4408_v3, %v4405_v31 }
 0x63a   :  { %29243 = vmatprep.subr.bf16.mxu0 %v33215_v1 }
 0x63c   :  { %29228 = vmatmul.mubr.bf16.vlgmr.msra.gmra.mrb[20].mxu0 %v4861_v58 }
 0x63d   :  { %29244 = vmatpush3.bf16.msra.mxu0 %v33215_v1  ;;  %29231 = vmatprep.mubr.bf16.mxu0 %v4862_v10  ;;  %v36060_v8 = vpop.f32.mrb[228].mxu1  ;;  %v33230_v1 = vld [vmem:[%s42547_s9 + $0x2f8] sm:$0xff]  }
 0x63e   :  { %29245 = vmatprep.subr.bf16.mxu0 %v33216_v7  ;;  %v4421_v11 = vpop.f32.mrb[229].mxu1 }
 0x63f   :  { %v36065_v30 = vpop.f32.mrb[230].mxu1 }
 0x640   :  { %v4871_v33 = vpack.c.bf16 %v36065_v30, %v36060_v8  ;;  %v4424_v35 = vpop.f32.mrb[231].mxu1  ;;  %v33233_v30 = vld [vmem:[%s42547_s9 + $0x310] sm:$0xff]  }
 0x641   :  { %29246 = vmatpush3.bf16.msra.mxu0 %v33216_v7  ;;  %v4870_v39 = vpack.c.bf16 %v4424_v35, %v4421_v11 }
 0x642   :  { %29247 = vmatprep.subr.bf16.mxu0 %v33217_v9 }
 0x644   :  { %29232 = vmatmul.mubr.bf16.gmra.mrb[24].mxu0 %v4863_v57 }
 0x645   :  { %29248 = vmatpush3.bf16.msra.mxu0 %v33217_v9  ;;  %29235 = vmatprep.mubr.bf16.mxu0 %v4864_v40  ;;  %v36072_v48 = vpop.f32.mrb[232].mxu1  ;;  %v33232_v9 = vld [vmem:[%s42547_s9 + $0x308] sm:$0xff]  }
 0x646   :  { %29249 = vmatprep.subr.bf16.mxu0 %v33218_v45  ;;  %v4437_v14 = vpop.f32.mrb[233].mxu1 }
 0x647   :  { %v36077_v15 = vpop.f32.mrb[234].mxu1 }
 0x648   :  { %v4873_v16 = vpack.c.bf16 %v36077_v15, %v36072_v48  ;;  %v4440_v38 = vpop.f32.mrb[235].mxu1  ;;  %v33235_v15 = vld [vmem:[%s42547_s9 + $0x320] sm:$0xff]  }
 0x649   :  { %29250 = vmatpush3.bf16.msra.mxu0 %v33218_v45  ;;  %v4872_v41 = vpack.c.bf16 %v4440_v38, %v4437_v14 }
 0x64a   :  { %29251 = vmatprep.subr.bf16.mxu0 %v33219_v13 }
 0x64c   :  { %29236 = vmatmul.mubr.bf16.gmra.mrb[28].mxu0 %v4865_v32 }
 0x64d   :  { %29252 = vmatpush3.bf16.msra.mxu0 %v33219_v13  ;;  %29239 = vmatprep.mubr.bf16.mxu0 %v4866_v59  ;;  %v36084_v43 = vpop.f32.mrb[236].mxu1  ;;  %v33234_v13 = vld [vmem:[%s42547_s9 + $0x318] sm:$0xff]  }
 0x64e   :  { %29253 = vmatprep.subr.bf16.mxu0 %v33220_v44  ;;  %v4453_v56 = vpop.f32.mrb[237].mxu1 }
 0x64f   :  { %v36089_v18 = vpop.f32.mrb[238].mxu1 }
 0x650   :  { %v4875_v19 = vpack.c.bf16 %v36089_v18, %v36084_v43  ;;  %v4456_v5 = vpop.f32.mrb[239].mxu1  ;;  %v33237_v18 = vld [vmem:[%s42547_s9 + $0x330] sm:$0xff]  }
 0x651   :  { %29254 = vmatpush3.bf16.msra.mxu0 %v33220_v44  ;;  %v4874_v20 = vpack.c.bf16 %v4456_v5, %v4453_v56 }
 0x652   :  { %29255 = vmatprep.subr.bf16.mxu0 %v33221_v53 }
 0x654   :  { %29240 = vmatmul.mubr.bf16.gmra.mrb[32].mxu0 %v4867_v54 }
 0x655   :  { %29256 = vmatpush3.bf16.msra.mxu0 %v33221_v53  ;;  %29259 = vmatprep.mubr.bf16.mxu0 %v4868_v6  ;;  %v36096_v47 = vpop.f32.mrb[240].mxu1  ;;  %v33236_v53 = vld [vmem:[%s42547_s9 + $0x328] sm:$0xff]  }
 0x656   :  { %29257 = vmatprep.subr.bf16.mxu0 %v33222_v49  ;;  %v4469_v58 = vpop.f32.mrb[241].mxu1 }
 0x657   :  { %v36101_v12 = vpop.f32.mrb[242].mxu1 }
 0x658   :  { %v4877_v51 = vpack.c.bf16 %v36101_v12, %v36096_v47  ;;  %v4472_v21 = vpop.f32.mrb[243].mxu1  ;;  %v33239_v12 = vld [vmem:[%s42547_s9 + $0x340] sm:$0xff]  }
 0x659   :  { %29258 = vmatpush3.bf16.msra.mxu0 %v33222_v49  ;;  %v4876_v22 = vpack.c.bf16 %v4472_v21, %v4469_v58 }
 0x65a   :  { %29275 = vmatprep.subr.bf16.mxu0 %v33223_v52 }
 0x65c   :  { %29260 = vmatmul.mubr.bf16.vlgmr.msra.gmra.mrb[20].mxu0 %v4869_v37 }
 0x65d   :  { %29276 = vmatpush3.bf16.msra.mxu0 %v33223_v52  ;;  %29263 = vmatprep.mubr.bf16.mxu0 %v4870_v39  ;;  %v36108_v24 = vpop.f32.mrb[244].mxu1  ;;  %v33238_v52 = vld [vmem:[%s42547_s9 + $0x338] sm:$0xff]  }
 0x65e   :  { %29277 = vmatprep.subr.bf16.mxu0 %v33224_v23  ;;  %v4485_v57 = vpop.f32.mrb[245].mxu1 }
 0x65f   :  { %v36113_v2 = vpop.f32.mrb[246].mxu1 }
 0x660   :  { %v4879_v10 = vpack.c.bf16 %v36113_v2, %v36108_v24  ;;  %v4488_v26 = vpop.f32.mrb[247].mxu1  ;;  %v33241_v2 = vld [vmem:[%s42547_s9 + $0x350] sm:$0xff]  }
 0x661   :  { %29278 = vmatpush3.bf16.msra.mxu0 %v33224_v23  ;;  %v4878_v27 = vpack.c.bf16 %v4488_v26, %v4485_v57 }
 0x662   :  { %29279 = vmatprep.subr.bf16.mxu0 %v33225_v25 }
 0x664   :  { %29264 = vmatmul.mubr.bf16.gmra.mrb[24].mxu0 %v4871_v33 }
 0x665   :  { %29280 = vmatpush3.bf16.msra.mxu0 %v33225_v25  ;;  %29267 = vmatprep.mubr.bf16.mxu0 %v4872_v41  ;;  %v36120_v28 = vpop.f32.mrb[248].mxu1  ;;  %v33240_v25 = vld [vmem:[%s42547_s9 + $0x348] sm:$0xff]  }
 0x666   :  { %29281 = vmatprep.subr.bf16.mxu0 %v33226_v17  ;;  %v4501_v32 = vpop.f32.mrb[249].mxu1 }
 0x667   :  { %v36125_v34 = vpop.f32.mrb[250].mxu1 }
 0x668   :  { %v4881_v40 = vpack.c.bf16 %v36125_v34, %v36120_v28  ;;  %v4504_v42 = vpop.f32.mrb[251].mxu1  ;;  %v33243_v34 = vld [vmem:[%s42547_s9 + $0x360] sm:$0xff]  }
 0x669   :  { %29282 = vmatpush3.bf16.msra.mxu0 %v33226_v17  ;;  %v4880_v46 = vpack.c.bf16 %v4504_v42, %v4501_v32 }
 0x66a   :  { %29283 = vmatprep.subr.bf16.mxu0 %v33227_v29 }
 0x66c   :  { %29268 = vmatmul.mubr.bf16.gmra.mrb[28].mxu0 %v4873_v16 }
 0x66d   :  { %29284 = vmatpush3.bf16.msra.mxu0 %v33227_v29  ;;  %29271 = vmatprep.mubr.bf16.mxu0 %v4874_v20  ;;  %v36132_v60 = vpop.f32.mrb[252].mxu1  ;;  %v33242_v29 = vld [vmem:[%s42547_s9 + $0x358] sm:$0xff]  }
 0x66e   :  { %29285 = vmatprep.subr.bf16.mxu0 %v33228_v50  ;;  %v4517_v54 = vpop.f32.mrb[253].mxu1 }
 0x66f   :  { %v36137_v55 = vpop.f32.mrb[254].mxu1 }
 0x670   :  { %v4883_v59 = vpack.c.bf16 %v36137_v55, %v36132_v60  ;;  %v4520_v62 = vpop.f32.mrb[255].mxu1  ;;  %v33245_v55 = vld [vmem:[%s42547_s9 + $0x370] sm:$0xff]  }
 0x671   :  { %29286 = vmatpush3.bf16.msra.mxu0 %v33228_v50  ;;  %v4882_v0 = vpack.c.bf16 %v4520_v62, %v4517_v54 }
 0x672   :  { %29287 = vmatprep.subr.bf16.mxu0 %v33229_v4 }
 0x674   :  { %29272 = vmatmul.mubr.bf16.gmra.mrb[32].mxu0 %v4875_v19 }
 0x675   :  { %29288 = vmatpush3.bf16.msra.mxu0 %v33229_v4  ;;  %29291 = vmatprep.mubr.bf16.mxu0 %v4876_v22  ;;  %v36144_v31 = vpop.f32.mrb[0].mxu1  ;;  %v33244_v4 = vld [vmem:[%s42547_s9 + $0x368] sm:$0xff]  }
 0x676   :  { %29289 = vmatprep.subr.bf16.mxu0 %v33230_v1  ;;  %v4533_v37 = vpop.f32.mrb[1].mxu1 }
 0x677   :  { %v36149_v3 = vpop.f32.mrb[2].mxu1 }
 0x678   :  { %v4885_v6 = vpack.c.bf16 %v36149_v3, %v36144_v31  ;;  %v4536_v7 = vpop.f32.mrb[3].mxu1  ;;  %v33247_v3 = vld [vmem:[%s42547_s9 + $0x380] sm:$0xff]  }
 0x679   :  { %29290 = vmatpush3.bf16.msra.mxu0 %v33230_v1  ;;  %v4884_v8 = vpack.c.bf16 %v4536_v7, %v4533_v37 }
 0x67a   :  { %29307 = vmatprep.subr.bf16.mxu0 %v33231_v36 }
 0x67c   :  { %29292 = vmatmul.mubr.bf16.vlgmr.msra.gmra.mrb[20].mxu0 %v4877_v51 }
 0x67d   :  { %29308 = vmatpush3.bf16.msra.mxu0 %v33231_v36  ;;  %29295 = vmatprep.mubr.bf16.mxu0 %v4878_v27  ;;  %v36156_v11 = vpop.f32.mrb[4].mxu1  ;;  %v33246_v36 = vld [vmem:[%s42547_s9 + $0x378] sm:$0xff]  }
 0x67e   :  { %29309 = vmatprep.subr.bf16.mxu0 %v33232_v9  ;;  %v4549_v33 = vpop.f32.mrb[5].mxu1 }
 0x67f   :  { %v36161_v35 = vpop.f32.mrb[6].mxu1 }
 0x680   :  { %v4887_v39 = vpack.c.bf16 %v36161_v35, %v36156_v11  ;;  %v4552_v45 = vpop.f32.mrb[7].mxu1  ;;  %v33249_v35 = vld [vmem:[%s42547_s9 + $0x390] sm:$0xff]  }
 0x681   :  { %29310 = vmatpush3.bf16.msra.mxu0 %v33232_v9  ;;  %v4886_v48 = vpack.c.bf16 %v4552_v45, %v4549_v33 }
 0x682   :  { %29311 = vmatprep.subr.bf16.mxu0 %v33233_v30 }
 0x684   :  { %29296 = vmatmul.mubr.bf16.gmra.mrb[24].mxu0 %v4879_v10 }
 0x685   :  { %29312 = vmatpush3.bf16.msra.mxu0 %v33233_v30  ;;  %29299 = vmatprep.mubr.bf16.mxu0 %v4880_v46  ;;  %v36168_v14 = vpop.f32.mrb[8].mxu1  ;;  %v33248_v30 = vld [vmem:[%s42547_s9 + $0x388] sm:$0xff]  }
 0x686   :  { %29313 = vmatprep.subr.bf16.mxu0 %v33234_v13  ;;  %v4565_v16 = vpop.f32.mrb[9].mxu1 }
 0x687   :  { %v36173_v38 = vpop.f32.mrb[10].mxu1 }
 0x688   :  { %v4889_v41 = vpack.c.bf16 %v36173_v38, %v36168_v14  ;;  %v4568_v44 = vpop.f32.mrb[11].mxu1  ;;  %v33251_v38 = vld [vmem:[%s42547_s9 + $0x3a0] sm:$0xff]  }
 0x689   :  { %29314 = vmatpush3.bf16.msra.mxu0 %v33234_v13  ;;  %v4888_v43 = vpack.c.bf16 %v4568_v44, %v4565_v16 }
 0x68a   :  { %29315 = vmatprep.subr.bf16.mxu0 %v33235_v15 }
 0x68c   :  { %29300 = vmatmul.mubr.bf16.gmra.mrb[28].mxu0 %v4881_v40 }
 0x68d   :  { %29316 = vmatpush3.bf16.msra.mxu0 %v33235_v15  ;;  %29303 = vmatprep.mubr.bf16.mxu0 %v4882_v0  ;;  %v36180_v56 = vpop.f32.mrb[12].mxu1  ;;  %v33250_v15 = vld [vmem:[%s42547_s9 + $0x398] sm:$0xff]  }
 0x68e   :  { %29317 = vmatprep.subr.bf16.mxu0 %v33236_v53  ;;  %v4581_v19 = vpop.f32.mrb[13].mxu1 }
 0x68f   :  { %v36185_v5 = vpop.f32.mrb[14].mxu1 }
 0x690   :  { %v4891_v20 = vpack.c.bf16 %v36185_v5, %v36180_v56  ;;  %v4584_v49 = vpop.f32.mrb[15].mxu1  ;;  %v33253_v5 = vld [vmem:[%s42547_s9 + $0x3b0] sm:$0xff]  }
 0x691   :  { %29318 = vmatpush3.bf16.msra.mxu0 %v33236_v53  ;;  %v4890_v47 = vpack.c.bf16 %v4584_v49, %v4581_v19 }
 0x692   :  { %29319 = vmatprep.subr.bf16.mxu0 %v33237_v18 }
 0x694   :  { %29304 = vmatmul.mubr.bf16.gmra.mrb[32].mxu0 %v4883_v59 }
 0x695   :  { %29320 = vmatpush3.bf16.msra.mxu0 %v33237_v18  ;;  %29323 = vmatprep.mubr.bf16.mxu0 %v4884_v8  ;;  %v36192_v58 = vpop.f32.mrb[16].mxu1  ;;  %v33252_v18 = vld [vmem:[%s42547_s9 + $0x3a8] sm:$0xff]  }
 0x696   :  { %29321 = vmatprep.subr.bf16.mxu0 %v33238_v52  ;;  %v4597_v51 = vpop.f32.mrb[17].mxu1 }
 0x697   :  { %v36197_v21 = vpop.f32.mrb[18].mxu1 }
 0x698   :  { %v4893_v22 = vpack.c.bf16 %v36197_v21, %v36192_v58  ;;  %v4600_v23 = vpop.f32.mrb[19].mxu1  ;;  %v33255_v21 = vld [vmem:[%s42547_s9 + $0x3c0] sm:$0xff]  }
 0x699   :  { %29322 = vmatpush3.bf16.msra.mxu0 %v33238_v52  ;;  %v4892_v24 = vpack.c.bf16 %v4600_v23, %v4597_v51 }
 0x69a   :  { %29339 = vmatprep.subr.bf16.mxu0 %v33239_v12 }
 0x69c   :  { %29324 = vmatmul.mubr.bf16.vlgmr.msra.gmra.mrb[20].mxu0 %v4885_v6 }
 0x69d   :  { %29340 = vmatpush3.bf16.msra.mxu0 %v33239_v12  ;;  %29327 = vmatprep.mubr.bf16.mxu0 %v4886_v48  ;;  %v36204_v57 = vpop.f32.mrb[20].mxu1  ;;  %v33254_v12 = vld [vmem:[%s42547_s9 + $0x3b8] sm:$0xff]  }
 0x69e   :  { %29341 = vmatprep.subr.bf16.mxu0 %v33240_v25  ;;  %v4613_v10 = vpop.f32.mrb[21].mxu1 }
 0x69f   :  { %v36209_v26 = vpop.f32.mrb[22].mxu1 }
 0x6a0   :  { %v4895_v27 = vpack.c.bf16 %v36209_v26, %v36204_v57  ;;  %v4616_v17 = vpop.f32.mrb[23].mxu1  ;;  %v33257_v26 = vld [vmem:[%s42547_s9 + $0x3d0] sm:$0xff]  }
 0x6a1   :  { %29342 = vmatpush3.bf16.msra.mxu0 %v33240_v25  ;;  %v4894_v28 = vpack.c.bf16 %v4616_v17, %v4613_v10 }
 0x6a2   :  { %29343 = vmatprep.subr.bf16.mxu0 %v33241_v2 }
 0x6a4   :  { %29328 = vmatmul.mubr.bf16.gmra.mrb[24].mxu0 %v4887_v39 }
 0x6a5   :  { %29344 = vmatpush3.bf16.msra.mxu0 %v33241_v2  ;;  %29331 = vmatprep.mubr.bf16.mxu0 %v4888_v43  ;;  %v36216_v32 = vpop.f32.mrb[24].mxu1  ;;  %v33256_v2 = vld [vmem:[%s42547_s9 + $0x3c8] sm:$0xff]  }
 0x6a6   :  { %29345 = vmatprep.subr.bf16.mxu0 %v33242_v29  ;;  %v4629_v40 = vpop.f32.mrb[25].mxu1 }
 0x6a7   :  { %v36221_v42 = vpop.f32.mrb[26].mxu1 }
 0x6a8   :  { %v4897_v46 = vpack.c.bf16 %v36221_v42, %v36216_v32  ;;  %v4632_v50 = vpop.f32.mrb[27].mxu1  ;;  %v33259_v42 = vld [vmem:[%s42547_s9 + $0x3e0] sm:$0xff]  }
 0x6a9   :  { %29346 = vmatpush3.bf16.msra.mxu0 %v33242_v29  ;;  %v4896_v60 = vpack.c.bf16 %v4632_v50, %v4629_v40 }
 0x6aa   :  { %29347 = vmatprep.subr.bf16.mxu0 %v33243_v34 }
 0x6ac   :  { %29332 = vmatmul.mubr.bf16.gmra.mrb[28].mxu0 %v4889_v41 }
 0x6ad   :  { %29348 = vmatpush3.bf16.msra.mxu0 %v33243_v34  ;;  %29335 = vmatprep.mubr.bf16.mxu0 %v4890_v47  ;;  %v36228_v54 = vpop.f32.mrb[28].mxu1  ;;  %v33258_v34 = vld [vmem:[%s42547_s9 + $0x3d8] sm:$0xff]  }
 0x6ae   :  { %29349 = vmatprep.subr.bf16.mxu0 %v33244_v4  ;;  %v4645_v59 = vpop.f32.mrb[29].mxu1 }
 0x6af   :  { %v36233_v62 = vpop.f32.mrb[30].mxu1 }
 0x6b0   :  { %v4899_v0 = vpack.c.bf16 %v36233_v62, %v36228_v54  ;;  %v4648_v1 = vpop.f32.mrb[31].mxu1  ;;  %v33261_v62 = vld [vmem:[%s42547_s9 + $0x3f0] sm:$0xff]  }
 0x6b1   :  { %29350 = vmatpush3.bf16.msra.mxu0 %v33244_v4  ;;  %v4898_v31 = vpack.c.bf16 %v4648_v1, %v4645_v59 }
 0x6b2   :  { %29351 = vmatprep.subr.bf16.mxu0 %v33245_v55 }
 0x6b4   :  { %29336 = vmatmul.mubr.bf16.gmra.mrb[32].mxu0 %v4891_v20 }
 0x6b5   :  { %29352 = vmatpush3.bf16.msra.mxu0 %v33245_v55  ;;  %29355 = vmatprep.mubr.bf16.mxu0 %v4892_v24  ;;  %v36240_v37 = vpop.f32.mrb[32].mxu1  ;;  %v33260_v55 = vld [vmem:[%s42547_s9 + $0x3e8] sm:$0xff]  }
 0x6b6   :  { %29353 = vmatprep.subr.bf16.mxu0 %v33246_v36  ;;  %v4661_v6 = vpop.f32.mrb[33].mxu1 }
 0x6b7   :  { %v36245_v7 = vpop.f32.mrb[34].mxu1 }
 0x6b8   :  { %v4901_v8 = vpack.c.bf16 %v36245_v7, %v36240_v37  ;;  %v4664_v9 = vpop.f32.mrb[35].mxu1 }
 0x6b9   :  { %29354 = vmatpush3.bf16.msra.mxu0 %v33246_v36  ;;  %v4900_v11 = vpack.c.bf16 %v4664_v9, %v4661_v6  ;;  %v25635_v6 = vld [vmem:[%s42548_s10] ss:$0 sm:$0xff] }
 0x6ba   :  { %29371 = vmatprep.subr.bf16.mxu0 %v33247_v3 }
 0x6bc   :  { %29356 = vmatmul.mubr.bf16.vlgmr.msra.gmra.mrb[20].mxu0 %v4893_v22 }
 0x6bd   :  { %29372 = vmatpush3.bf16.msra.mxu0 %v33247_v3  ;;  %29359 = vmatprep.mubr.bf16.mxu0 %v4894_v28  ;;  %v36252_v33 = vpop.f32.mrb[36].mxu1  ;;  %v33262_v3 = vld [vmem:[%s42547_s9 + $0x3f8] sm:$0xff]  }
 0x6be   :  { %29373 = vmatprep.subr.bf16.mxu0 %v33248_v30  ;;  %v4677_v39 = vpop.f32.mrb[37].mxu1 }
 0x6bf   :  { %v36257_v45 = vpop.f32.mrb[38].mxu1 }
 0x6c0   :  { %v4903_v48 = vpack.c.bf16 %v36257_v45, %v36252_v33  ;;  %v4680_v13 = vpop.f32.mrb[39].mxu1 }
 0x6c1   :  { %29374 = vmatpush3.bf16.msra.mxu0 %v33248_v30  ;;  %v4902_v14 = vpack.c.bf16 %v4680_v13, %v4677_v39 }
 0x6c2   :  { %29375 = vmatprep.subr.bf16.mxu0 %v33249_v35 }
 0x6c4   :  { %29360 = vmatmul.mubr.bf16.gmra.mrb[24].mxu0 %v4895_v27 }
 0x6c5   :  { %29376 = vmatpush3.bf16.msra.mxu0 %v33249_v35  ;;  %29363 = vmatprep.mubr.bf16.mxu0 %v4896_v60  ;;  %v36264_v16 = vpop.f32.mrb[40].mxu1 }
 0x6c6   :  { %29377 = vmatprep.subr.bf16.mxu0 %v33250_v15  ;;  %v4693_v41 = vpop.f32.mrb[41].mxu1 }
 0x6c7   :  { %v36269_v44 = vpop.f32.mrb[42].mxu1 }
 0x6c8   :  { %v4905_v43 = vpack.c.bf16 %v36269_v44, %v36264_v16  ;;  %v4696_v53 = vpop.f32.mrb[43].mxu1 }
 0x6c9   :  { %29378 = vmatpush3.bf16.msra.mxu0 %v33250_v15  ;;  %v4904_v56 = vpack.c.bf16 %v4696_v53, %v4693_v41 }
 0x6ca   :  { %29379 = vmatprep.subr.bf16.mxu0 %v33251_v38 }
 0x6cc   :  { %29364 = vmatmul.mubr.bf16.gmra.mrb[28].mxu0 %v4897_v46 }
 0x6cd   :  { %29380 = vmatpush3.bf16.msra.mxu0 %v33251_v38  ;;  %29367 = vmatprep.mubr.bf16.mxu0 %v4898_v31  ;;  %v36276_v19 = vpop.f32.mrb[44].mxu1 }
 0x6ce   :  { %29381 = vmatprep.subr.bf16.mxu0 %v33252_v18  ;;  %v4709_v20 = vpop.f32.mrb[45].mxu1 }
 0x6cf   :  { %v36281_v49 = vpop.f32.mrb[46].mxu1 }
 0x6d0   :  { %v4907_v47 = vpack.c.bf16 %v36281_v49, %v36276_v19  ;;  %v4712_v52 = vpop.f32.mrb[47].mxu1 }
 0x6d1   :  { %29382 = vmatpush3.bf16.msra.mxu0 %v33252_v18  ;;  %v4906_v58 = vpack.c.bf16 %v4712_v52, %v4709_v20 }
 0x6d2   :  { %29383 = vmatprep.subr.bf16.mxu0 %v33253_v5 }
 0x6d4   :  { %29368 = vmatmul.mubr.bf16.gmra.mrb[32].mxu0 %v4899_v0 }
 0x6d5   :  { %29384 = vmatpush3.bf16.msra.mxu0 %v33253_v5  ;;  %29387 = vmatprep.mubr.bf16.mxu0 %v4900_v11  ;;  %v28909_v51 = vpop.f32.mrb[48].mxu1 }
 0x6d6   :  { %29385 = vmatprep.subr.bf16.mxu0 %v33254_v12  ;;  %v4725_v22 = vpop.f32.mrb[49].mxu1 }
 0x6d7   :  { %v28910_v23 = vpop.f32.mrb[50].mxu1 }
 0x6d8   :  { %v4909_v24 = vpack.c.bf16 %v28910_v23, %v28909_v51  ;;  %v4728_v25 = vpop.f32.mrb[51].mxu1 }
 0x6d9   :  { %29386 = vmatpush3.bf16.msra.mxu0 %v33254_v12  ;;  %v4908_v57 = vpack.c.bf16 %v4728_v25, %v4725_v22 }
 0x6da   :  { %29403 = vmatprep.subr.bf16.mxu0 %v33255_v21 }
 0x6dc   :  { %29388 = vmatmul.mubr.bf16.vlgmr.msra.gmra.mrb[20].mxu0 %v4901_v8 }
 0x6dd   :  { %29404 = vmatpush3.bf16.msra.mxu0 %v33255_v21  ;;  %29391 = vmatprep.mubr.bf16.mxu0 %v4902_v14  ;;  %v28913_v10 = vpop.f32.mrb[52].mxu1 }
 0x6de   :  { %29405 = vmatprep.subr.bf16.mxu0 %v33256_v2  ;;  %v4741_v27 = vpop.f32.mrb[53].mxu1 }
 0x6df   :  { %v28914_v17 = vpop.f32.mrb[54].mxu1 }
 0x6e0   :  { %v4911_v28 = vpack.c.bf16 %v28914_v17, %v28913_v10  ;;  %v4744_v29 = vpop.f32.mrb[55].mxu1 }
 0x6e1   :  { %29406 = vmatpush3.bf16.msra.mxu0 %v33256_v2  ;;  %v4910_v32 = vpack.c.bf16 %v4744_v29, %v4741_v27 }
 0x6e2   :  { %29407 = vmatprep.subr.bf16.mxu0 %v33257_v26 }
 0x6e4   :  { %29392 = vmatmul.mubr.bf16.gmra.mrb[24].mxu0 %v4903_v48 }
 0x6e5   :  { %29408 = vmatpush3.bf16.msra.mxu0 %v33257_v26  ;;  %29395 = vmatprep.mubr.bf16.mxu0 %v4904_v56  ;;  %v28917_v40 = vpop.f32.mrb[56].mxu1 }
 0x6e6   :  { %29409 = vmatprep.subr.bf16.mxu0 %v33258_v34  ;;  %v4757_v46 = vpop.f32.mrb[57].mxu1 }
 0x6e7   :  { %v28918_v50 = vpop.f32.mrb[58].mxu1 }
 0x6e8   :  { %v4913_v60 = vpack.c.bf16 %v28918_v50, %v28917_v40  ;;  %v4760_v4 = vpop.f32.mrb[59].mxu1 }
 0x6e9   :  { %29410 = vmatpush3.bf16.msra.mxu0 %v33258_v34  ;;  %v4912_v54 = vpack.c.bf16 %v4760_v4, %v4757_v46 }
 0x6ea   :  { %29411 = vmatprep.subr.bf16.mxu0 %v33259_v42 }
 0x6ec   :  { %29396 = vmatmul.mubr.bf16.gmra.mrb[28].mxu0 %v4905_v43 }
 0x6ed   :  { %29412 = vmatpush3.bf16.msra.mxu0 %v33259_v42  ;;  %29399 = vmatprep.mubr.bf16.mxu0 %v4906_v58  ;;  %v28921_v59 = vpop.f32.mrb[60].mxu1 }
 0x6ee   :  { %29413 = vmatprep.subr.bf16.mxu0 %v33260_v55  ;;  %v4773_v0 = vpop.f32.mrb[61].mxu1 }
 0x6ef   :  { %v28922_v1 = vpop.f32.mrb[62].mxu1 }
 0x6f0   :  { %v4915_v31 = vpack.c.bf16 %v28922_v1, %v28921_v59  ;;  %v4776_v36 = vpop.f32.mrb[63].mxu1 }
 0x6f1   :  { %29414 = vmatpush3.bf16.msra.mxu0 %v33260_v55  ;;  %v4914_v37 = vpack.c.bf16 %v4776_v36, %v4773_v0 }
 0x6f2   :  { %29415 = vmatprep.subr.bf16.mxu0 %v33261_v62 }
 0x6f4   :  { %29400 = vmatmul.mubr.bf16.gmra.mrb[32].mxu0 %v4907_v47 }
 0x6f5   :  { %29416 = vmatpush3.bf16.msra.mxu0 %v33261_v62  ;;  %29419 = vmatprep.mubr.bf16.mxu0 %v4908_v57 }
 0x6f6   :  { %29417 = vmatprep.subr.bf16.mxu0 %v33262_v3 }
 0x6f9   :  { %29418 = vmatpush3.bf16.msra.mxu0 %v33262_v3 }
 0x6fc   :  { %29420 = vmatmul.mubr.bf16.vlgmr.msra.gmra.mrb[20].mxu0 %v4909_v24 }
 0x6fd   :  { %29423 = vmatprep.mubr.bf16.mxu0 %v4910_v32 }
 0x704   :  { %29424 = vmatmul.mubr.bf16.gmra.mrb[24].mxu0 %v4911_v28 }
 0x705   :  { %29427 = vmatprep.mubr.bf16.mxu0 %v4912_v54 }
 0x70c   :  { %29428 = vmatmul.mubr.bf16.gmra.mrb[28].mxu0 %v4913_v60 }
 0x70d   :  { %29431 = vmatprep.mubr.bf16.mxu0 %v4914_v37 }
 0x714   :  { %29432 = vmatmul.mubr.bf16.gmra.mrb[32].mxu0 %v4915_v31 }
 0x7cf   :  { %v29421_v7 = vpop.f32.mrb[20].mxu0 }
 0x7d0   :  { %v7637_v8 = vpop.f32.mrb[21].mxu0  ;;  %v36317_v33 = vadd.f32 %v29421_v7, %v25635_v6 }
 0x7d1   :  { %v36315_v9 = vadd.f32 %v25635_v6, %v7637_v8  ;;  %v29422_v11 = vpop.f32.mrb[22].mxu0  ;;  %v33263_v8 = vld [vmem:[%s42549_s13] sm:$0xff]  }
 0x7d2   :  { %v7640_v30 = vpop.f32.mrb[23].mxu0  ;;  %v36323_v45 = vadd.f32 %v29422_v11, %v25635_v6  ;;  %v7743_v14 = vsel %vm960_vm0, %v36317_v33, 0.0  ;;  %29451 = vmatprep.mubr.bf16.mxu1 %v33263_v8 }
 0x7d3   :  { %v36319_v35 = vadd.f32 %v25635_v6, %v7640_v30  ;;  %v7740_v39 = vsel %vm960_vm0, %v36315_v9, 0.0 }
 0x7d4   :  { %v7745_v41 = vsel %vm960_vm0, %v36323_v45, 0.0 }
 0x7d5   :  { %v7741_v48 = vsel %vm960_vm0, %v36319_v35, 0.0 }
 0x7d6   :  { %v7742_v13 = vadd.f32 %v7741_v48, %v7740_v39 }
 0x7d7   :  { %v29425_v15 = vpop.f32.mrb[24].mxu0 }
 0x7d8   :  { %v7744_v16 = vadd.f32 %v7743_v14, %v7742_v13  ;;  %v7653_v38 = vpop.f32.mrb[25].mxu0  ;;  %v36333_v18 = vadd.f32 %v29425_v15, %v25635_v6 }
 0x7d9   :  { %v36331_v44 = vadd.f32 %v25635_v6, %v7653_v38  ;;  %v29426_v43 = vpop.f32.mrb[26].mxu0 }
 0x7da   :  { %v7746_v53 = vadd.f32 %v7745_v41, %v7744_v16  ;;  %v7656_v56 = vpop.f32.mrb[27].mxu0  ;;  %v36339_v49 = vadd.f32 %v29426_v43, %v25635_v6  ;;  %v7751_v58 = vsel %vm960_vm0, %v36333_v18, 0.0 }
 0x7db   :  { %v7747_v19 = vsel %vm960_vm0, %v36331_v44, 0.0  ;;  %v36337_v5 = vadd.f32 %v25635_v6, %v7656_v56 }
 0x7dc   :  { %v7748_v20 = vadd.f32 %v7747_v19, %v7746_v53  ;;  %v7753_v22 = vsel %vm960_vm0, %v36339_v49, 0.0 }
 0x7dd   :  { %v7749_v47 = vsel %vm960_vm0, %v36337_v5, 0.0 }
 0x7de   :  { %v7750_v52 = vadd.f32 %v7749_v47, %v7748_v20 }
 0x7df   :  { %v29429_v12 = vpop.f32.mrb[28].mxu0 }
 0x7e0   :  { %v7752_v51 = vadd.f32 %v7751_v58, %v7750_v52  ;;  %v7669_v21 = vpop.f32.mrb[29].mxu0  ;;  %v36349_v2 = vadd.f32 %v29429_v12, %v25635_v6 }
 0x7e1   :  { %v36347_v23 = vadd.f32 %v25635_v6, %v7669_v21  ;;  %v29430_v24 = vpop.f32.mrb[30].mxu0 }
 0x7e2   :  { %v7754_v25 = vadd.f32 %v7753_v22, %v7752_v51  ;;  %v7672_v57 = vpop.f32.mrb[31].mxu0  ;;  %v36355_v17 = vadd.f32 %v29430_v24, %v25635_v6  ;;  %v7759_v32 = vsel %vm960_vm0, %v36349_v2, 0.0 }
 0x7e3   :  { %v7755_v10 = vsel %vm960_vm0, %v36347_v23, 0.0  ;;  %v36353_v26 = vadd.f32 %v25635_v6, %v7672_v57 }
 0x7e4   :  { %v7756_v27 = vadd.f32 %v7755_v10, %v7754_v25  ;;  %v7761_v46 = vsel %vm960_vm0, %v36355_v17, 0.0 }
 0x7e5   :  { %v7757_v28 = vsel %vm960_vm0, %v36353_v26, 0.0 }
 0x7e6   :  { %v7758_v29 = vadd.f32 %v7757_v28, %v7756_v27 }
 0x7e7   :  { %v29433_v34 = vpop.f32.mrb[32].mxu0 }
 0x7e8   :  { %v7760_v40 = vadd.f32 %v7759_v32, %v7758_v29  ;;  %v7685_v42 = vpop.f32.mrb[33].mxu0  ;;  %v36365_v55 = vadd.f32 %v29433_v34, %v25635_v6 }
 0x7e9   :  { %v36363_v50 = vadd.f32 %v25635_v6, %v7685_v42  ;;  %v29434_v60 = vpop.f32.mrb[34].mxu0 }
 0x7ea   :  { %v7762_v4 = vadd.f32 %v7761_v46, %v7760_v40  ;;  %v7688_v54 = vpop.f32.mrb[35].mxu0  ;;  %v36371_v1 = vadd.f32 %v29434_v60, %v25635_v6  ;;  %v7767_v37 = vsel %vm960_vm0, %v36365_v55, 0.0 }
 0x7eb   :  { %v7763_v59 = vsel %vm960_vm0, %v36363_v50, 0.0  ;;  %v36369_v62 = vadd.f32 %v25635_v6, %v7688_v54 }
 0x7ec   :  { %v7764_v0 = vadd.f32 %v7763_v59, %v7762_v4  ;;  %v7769_v7 = vsel %vm960_vm0, %v36371_v1, 0.0 }
 0x7ed   :  { %v7765_v31 = vsel %vm960_vm0, %v36369_v62, 0.0 }
 0x7ee   :  { %v7766_v36 = vadd.f32 %v7765_v31, %v7764_v0 }
 0x7f0   :  { %v7768_v3 = vadd.f32 %v7767_v37, %v7766_v36 }
 0x7f2   :  { %v7770_v11 = vadd.f32 %v7769_v7, %v7768_v3 }
 0x7f4   :  { %v7771_v30 = vrot.slane %v7770_v11, 4 }
 0x7f6   :  { %v7772_v6 = vadd.f32 %v7771_v30, %v7770_v11 }
 0x7f8   :  { %v7773_v39 = vrot.slane %v7772_v6, 2 }
 0x7fa   :  { %v7774_v48 = vadd.f32 %v7773_v39, %v7772_v6 }
 0x7fc   :  { %v7775_v13 = vrot.slane %v7774_v48, 1 }
 0x7fe   :  { %v7776_v14 = vadd.f32 %v7775_v13, %v7774_v48 }
 0x800   :  { %v36382_v15 = vmul.f32 0.0078125, %v7776_v14 }
 0x802   :  { %v7779_v16 = vsub.f32 %v36315_v9, %v36382_v15  ;;  %v7780_v38 = vsub.f32 %v36319_v35, %v36382_v15  ;;  %v7781_v41 = vsub.f32 %v36317_v33, %v36382_v15  ;;  %v7782_v43 = vsub.f32 %v36323_v45, %v36382_v15 }
 0x803   :  { %v7783_v53 = vsub.f32 %v36331_v44, %v36382_v15  ;;  %v7784_v56 = vsub.f32 %v36337_v5, %v36382_v15  ;;  %v7785_v22 = vsub.f32 %v36333_v18, %v36382_v15  ;;  %v7786_v24 = vsub.f32 %v36339_v49, %v36382_v15 }
 0x804   :  { %v7795_v19 = vmul.f32 %v7779_v16, %v7779_v16  ;;  %v7796_v20 = vmul.f32 %v7780_v38, %v7780_v38  ;;  %v7797_v47 = vmul.f32 %v7781_v41, %v7781_v41  ;;  %v7798_v52 = vmul.f32 %v7782_v43, %v7782_v43 }
 0x805   :  { %v7799_v58 = vmul.f32 %v7783_v53, %v7783_v53  ;;  %v7800_v12 = vmul.f32 %v7784_v56, %v7784_v56  ;;  %v7787_v57 = vsub.f32 %v36347_v23, %v36382_v15  ;;  %v7788_v10 = vsub.f32 %v36353_v26, %v36382_v15 }
 0x806   :  { %v7811_v51 = vsel %vm960_vm0, %v7795_v19, 0.0  ;;  %v7812_v21 = vsel %vm960_vm0, %v7796_v20, 0.0  ;;  %v7814_v27 = vsel %vm960_vm0, %v7797_v47, 0.0  ;;  %v7816_v29 = vsel %vm960_vm0, %v7798_v52, 0.0 }
 0x807   :  { %v7813_v25 = vadd.f32 %v7812_v21, %v7811_v51  ;;  %v7818_v32 = vsel %vm960_vm0, %v7799_v58, 0.0  ;;  %v7820_v34 = vsel %vm960_vm0, %v7800_v12, 0.0  ;;  %v7801_v40 = vmul.f32 %v7785_v22, %v7785_v22 }
 0x808   :  { %v7802_v42 = vmul.f32 %v7786_v24, %v7786_v24  ;;  %v7803_v60 = vmul.f32 %v7787_v57, %v7787_v57  ;;  %v7804_v4 = vmul.f32 %v7788_v10, %v7788_v10  ;;  %v7789_v59 = vsub.f32 %v36349_v2, %v36382_v15 }
 0x809   :  { %v7815_v28 = vadd.f32 %v7814_v27, %v7813_v25  ;;  %v7790_v0 = vsub.f32 %v36355_v17, %v36382_v15  ;;  %v7822_v36 = vsel %vm960_vm0, %v7801_v40, 0.0  ;;  %v7791_v3 = vsub.f32 %v36363_v50, %v36382_v15 }
 0x80a   :  { %v7824_v37 = vsel %vm960_vm0, %v7802_v42, 0.0  ;;  %v7792_v7 = vsub.f32 %v36369_v62, %v36382_v15  ;;  %v7826_v8 = vsel %vm960_vm0, %v7803_v60, 0.0  ;;  %v7828_v11 = vsel %vm960_vm0, %v7804_v4, 0.0  ;;  %v7739_v4 = vld [vmem:[%s42551_s12] sm:$0x1] }
 0x80b   :  { %v7817_v46 = vadd.f32 %v7816_v29, %v7815_v28  ;;  %v7805_v6 = vmul.f32 %v7789_v59, %v7789_v59  ;;  %v7806_v39 = vmul.f32 %v7790_v0, %v7790_v0  ;;  %v7807_v13 = vmul.f32 %v7791_v3, %v7791_v3 }
 0x80c   :  { %v7808_v14 = vmul.f32 %v7792_v7, %v7792_v7  ;;  %v7793_v53 = vsub.f32 %v36365_v55, %v36382_v15  ;;  %v7794_v56 = vsub.f32 %v36371_v1, %v36382_v15 }
 0x80d   :  { %v7819_v54 = vadd.f32 %v7818_v32, %v7817_v46  ;;  %v7830_v41 = vsel %vm960_vm0, %v7805_v6, 0.0  ;;  %v7832_v43 = vsel %vm960_vm0, %v7806_v39, 0.0  ;;  %v7834_v19 = vsel %vm960_vm0, %v7807_v13, 0.0  ;;  %v7738_v46 = vld [vmem:[%s42550_s11] sm:$0x1] }
 0x80e   :  { %v7836_v20 = vsel %vm960_vm0, %v7808_v14, 0.0  ;;  %v7809_v58 = vmul.f32 %v7793_v53, %v7793_v53  ;;  %v7810_v12 = vmul.f32 %v7794_v56, %v7794_v56 }
 0x80f   :  { %v7821_v31 = vadd.f32 %v7820_v34, %v7819_v54 }
 0x810   :  { %v7838_v22 = vsel %vm960_vm0, %v7809_v58, 0.0  ;;  %v7840_v24 = vsel %vm960_vm0, %v7810_v12, 0.0 }
 0x811   :  { %v7823_v30 = vadd.f32 %v7822_v36, %v7821_v31 }
 0x813   :  { %v7825_v48 = vadd.f32 %v7824_v37, %v7823_v30 }
 0x815   :  { %v7827_v16 = vadd.f32 %v7826_v8, %v7825_v48 }
 0x817   :  { %v7829_v38 = vadd.f32 %v7828_v11, %v7827_v16 }
 0x819   :  { %v7831_v47 = vadd.f32 %v7830_v41, %v7829_v38 }
 0x81b   :  { %v7833_v52 = vadd.f32 %v7832_v43, %v7831_v47 }
 0x81d   :  { %v7835_v51 = vadd.f32 %v7834_v19, %v7833_v52 }
 0x81f   :  { %v7837_v21 = vadd.f32 %v7836_v20, %v7835_v51 }
 0x821   :  { %v7839_v25 = vadd.f32 %v7838_v22, %v7837_v21 }
 0x823   :  { %v7841_v57 = vadd.f32 %v7840_v24, %v7839_v25 }
 0x825   :  { %v7842_v10 = vrot.slane %v7841_v57, 4 }
 0x827   :  { %v7843_v27 = vadd.f32 %v7842_v10, %v7841_v57 }
 0x829   :  { %v7844_v28 = vrot.slane %v7843_v27, 2 }
 0x82b   :  { %v7845_v29 = vadd.f32 %v7844_v28, %v7843_v27 }
 0x82d   :  { %v7846_v32 = vrot.slane %v7845_v29, 1 }
 0x82f   :  { %v7847_v34 = vadd.f32 %v7846_v32, %v7845_v29 }
 0x831   :  { %v7848_v40 = vmul.f32 0.0078125, %v7847_v34 }
 0x833   :  { %v7849_v42 = vadd.f32 1e-05, %v7848_v40 }
 0x835   :  { %33841 = vrsqrt.f32 %v7849_v42 }
 0x83f   :  { %v33842_v60 = vpop.eup %33841 }
 0x840   :  { %v7851_v54 = vmul.f32 %v33842_v60, %v7738_v46 }
 0x842   :  { %v36439_v59 = vrot.slane %v7851_v54, %v34788_v63  ;;  %v7874_v0 = vmul.f32 %v7851_v54, %v36382_v15 }
 0x844   :  { %v7875_v31 = vsub.f32 %v7739_v4, %v7874_v0  ;;  %v7858_v37 = vmul.f32 %v36439_v59, %v36315_v9  ;;  %v7859_v3 = vmul.f32 %v36439_v59, %v36319_v35  ;;  %v7860_v7 = vmul.f32 %v36439_v59, %v36317_v33 }
 0x845   :  { %v7861_v8 = vmul.f32 %v36439_v59, %v36323_v45  ;;  %v7862_v11 = vmul.f32 %v36439_v59, %v36331_v44  ;;  %v7863_v15 = vmul.f32 %v36439_v59, %v36337_v5  ;;  %v7865_v33 = vmul.f32 %v36439_v59, %v36339_v49 }
 0x846   :  { %v36443_v36 = vrot.slane %v7875_v31, %v34788_v63  ;;  %v7864_v63 = vmul.f32 %v36439_v59, %v36333_v18  ;;  %v7866_v19 = vmul.f32 %v36439_v59, %v36347_v23  ;;  %v7867_v20 = vmul.f32 %v36439_v59, %v36353_v26 }
 0x847   :  { %v7868_v12 = vmul.f32 %v36439_v59, %v36349_v2  ;;  %v7869_v23 = vmul.f32 %v36439_v59, %v36355_v17  ;;  %v7871_v25 = vmul.f32 %v36439_v59, %v36369_v62  ;;  %v7870_v10 = vmul.f32 %v36439_v59, %v36363_v50 }
 0x848   :  { %v7882_v9 = vadd.f32 %v36443_v36, %v7858_v37  ;;  %v7883_v30 = vadd.f32 %v36443_v36, %v7859_v3  ;;  %v7884_v35 = vadd.f32 %v36443_v36, %v7860_v7  ;;  %v7885_v45 = vadd.f32 %v36443_v36, %v7861_v8 }
 0x849   :  { %v7886_v6 = vadd.f32 %v36443_v36, %v7862_v11  ;;  %v7887_v44 = vadd.f32 %v36443_v36, %v7863_v15  ;;  %v7888_v5 = vadd.f32 %v36443_v36, %v7864_v63  ;;  %v7889_v56 = vadd.f32 %v36443_v36, %v7865_v33  ;;  %v33265_v33 = vld [vmem:[%s42549_s13 + $0x10] sm:$0xff]  }
 0x84a   :  { %vm7898_vm6 = vcmp.ge.f32.partialorder %v7882_v9, 0.0  ;;  %vm7899_vm7 = vcmp.ge.f32.partialorder %v7883_v30, 0.0  ;;  %v7914_v18 = vmul.f32 0.01, %v7882_v9  ;;  %v7915_v39 = vmul.f32 0.01, %v7883_v30 }
 0x84b   :  { %vm7900_vm8 = vcmp.ge.f32.partialorder %v7884_v35, 0.0  ;;  %vm7901_vm9 = vcmp.ge.f32.partialorder %v7885_v45, 0.0  ;;  %v7916_v48 = vmul.f32 0.01, %v7884_v35  ;;  %v7917_v13 = vmul.f32 0.01, %v7885_v45 }
 0x84c   :  { %v7930_v14 = vsel %vm7898_vm6, %v7882_v9, %v7914_v18  ;;  %v7931_v16 = vsel %vm7899_vm7, %v7883_v30, %v7915_v39  ;;  %vm7902_vm10 = vcmp.ge.f32.partialorder %v7886_v6, 0.0  ;;  %vm7903_vm11 = vcmp.ge.f32.partialorder %v7887_v44, 0.0  ;;  %v33270_v18 = vld [vmem:[%s42549_s13 + $0x38] sm:$0xff]   ;;  %v33271_v39 = vld [vmem:[%s42549_s13 + $0x40] sm:$0xff]  }
 0x84d   :  { %v7946_v49 = vpack.c.bf16 %v7931_v16, %v7930_v14  ;;  %v7932_v38 = vsel %vm7900_vm8, %v7884_v35, %v7916_v48  ;;  %v7933_v41 = vsel %vm7901_vm9, %v7885_v45, %v7917_v13  ;;  %v7918_v43 = vmul.f32 0.01, %v7886_v6  ;;  %v33264_v35 = vld [vmem:[%s42549_s13 + $0x8] sm:$0xff]   ;;  %v33266_v45 = vld [vmem:[%s42549_s13 + $0x18] sm:$0xff]   ;;  %v33273_v13 = vld [vmem:[%s42549_s13 + $0x50] sm:$0xff]  }
 0x84e   :  { %v7919_v53 = vmul.f32 0.01, %v7887_v44  ;;  %v7947_v47 = vpack.c.bf16 %v7933_v41, %v7932_v38  ;;  %v7920_v58 = vmul.f32 0.01, %v7888_v5  ;;  %v7921_v21 = vmul.f32 0.01, %v7889_v56 }
 0x84f   :  { %29435 = vmatprep.subr.bf16.mxu1 %v7946_v49  ;;  %v7934_v52 = vsel %vm7902_vm10, %v7886_v6, %v7918_v43  ;;  %v7890_v22 = vadd.f32 %v36443_v36, %v7866_v19  ;;  %v7891_v24 = vadd.f32 %v36443_v36, %v7867_v20  ;;  %vm7904_vm12 = vcmp.ge.f32.partialorder %v7888_v5, 0.0  ;;  %v33267_v6 = vld [vmem:[%s42549_s13 + $0x20] sm:$0xff]   ;;  %v33272_v48 = vld [vmem:[%s42549_s13 + $0x48] sm:$0xff]   ;;  %v33274_v14 = vld [vmem:[%s42549_s13 + $0x58] sm:$0xff]  }
 0x850   :  { %29436 = vmatpush3.bf16.msra.mxu1 %v7946_v49  ;;  %v7935_v51 = vsel %vm7903_vm11, %v7887_v44, %v7919_v53  ;;  %vm7905_vm13 = vcmp.ge.f32.partialorder %v7889_v56, 0.0  ;;  %v7892_v26 = vadd.f32 %v36443_v36, %v7868_v12  ;;  %v7893_v2 = vadd.f32 %v36443_v36, %v7869_v23  ;;  %v33268_v44 = vld [vmem:[%s42549_s13 + $0x28] sm:$0xff]   ;;  %v33275_v16 = vld [vmem:[%s42549_s13 + $0x60] sm:$0xff]   ;;  %v33277_v38 = vld [vmem:[%s42549_s13 + $0x70] sm:$0xff]  }
 0x851   :  { %29437 = vmatprep.subr.bf16.mxu1 %v7947_v47  ;;  %v7948_v57 = vpack.c.bf16 %v7935_v51, %v7934_v52  ;;  %v7936_v27 = vsel %vm7904_vm12, %v7888_v5, %v7920_v58  ;;  %v7937_v28 = vsel %vm7905_vm13, %v7889_v56, %v7921_v21  ;;  %v7922_v29 = vmul.f32 0.01, %v7890_v22  ;;  %v33269_v5 = vld [vmem:[%s42549_s13 + $0x30] sm:$0xff]   ;;  %v33276_v49 = vld [vmem:[%s42549_s13 + $0x68] sm:$0xff]   ;;  %v33278_v41 = vld [vmem:[%s42549_s13 + $0x78] sm:$0xff]  }
 0x852   :  { %v7923_v32 = vmul.f32 0.01, %v7891_v24  ;;  %vm7906_vm14 = vcmp.ge.f32.partialorder %v7890_v22, 0.0  ;;  %vm7907_vm15 = vcmp.ge.f32.partialorder %v7891_v24, 0.0  ;;  %v7895_v17 = vadd.f32 %v36443_v36, %v7871_v25  ;;  %v33279_v43 = vld [vmem:[%s42549_s13 + $0x80] sm:$0xff]   ;;  %v33280_v53 = vld [vmem:[%s42549_s13 + $0x88] sm:$0xff]  }
 0x853   :  { %v7924_v34 = vmul.f32 0.01, %v7892_v26  ;;  %v7894_v40 = vadd.f32 %v36443_v36, %v7870_v10  ;;  %v7872_v62 = vmul.f32 %v36439_v59, %v36365_v55  ;;  %v7949_v42 = vpack.c.bf16 %v7937_v28, %v7936_v27  ;;  %v33281_v56 = vld [vmem:[%s42549_s13 + $0x90] sm:$0xff]   ;;  %v33282_v19 = vld [vmem:[%s42549_s13 + $0x98] sm:$0xff]   ;;  %v33283_v20 = vld [vmem:[%s42549_s13 + $0xa0] sm:$0xff]  }
 0x854   :  { %29438 = vmatpush3.bf16.msra.mxu1 %v7947_v47  ;;  %vm7908_vm1 = vcmp.ge.f32.partialorder %v7892_v26, 0.0  ;;  %vm7909_vm2 = vcmp.ge.f32.partialorder %v7893_v2, 0.0  ;;  %v7938_v50 = vsel %vm7906_vm14, %v7890_v22, %v7922_v29  ;;  %v7939_v46 = vsel %vm7907_vm15, %v7891_v24, %v7923_v32  ;;  %v33284_v47 = vld [vmem:[%s42549_s13 + $0xa8] sm:$0xff]   ;;  %v33285_v52 = vld [vmem:[%s42549_s13 + $0xb0] sm:$0xff]   ;;  %v33286_v58 = vld [vmem:[%s42549_s13 + $0xb8] sm:$0xff]  }
 0x855   :  { %29439 = vmatprep.subr.bf16.mxu1 %v7948_v57  ;;  %v7925_v60 = vmul.f32 0.01, %v7893_v2  ;;  %v7896_v4 = vadd.f32 %v36443_v36, %v7872_v62  ;;  %v7873_v54 = vmul.f32 %v36439_v59, %v36371_v1  ;;  %vm7910_vm3 = vcmp.ge.f32.partialorder %v7894_v40, 0.0  ;;  %v33287_v12 = vld [vmem:[%s42549_s13 + $0xc0] sm:$0xff]   ;;  %v33288_v51 = vld [vmem:[%s42549_s13 + $0xc8] sm:$0xff]   ;;  %v33289_v21 = vld [vmem:[%s42549_s13 + $0xd0] sm:$0xff]  }
 0x856   :  { %vm7911_vm4 = vcmp.ge.f32.partialorder %v7895_v17, 0.0  ;;  %v7926_v0 = vmul.f32 0.01, %v7894_v40  ;;  %v7950_v31 = vpack.c.bf16 %v7939_v46, %v7938_v50  ;;  %v7927_v37 = vmul.f32 0.01, %v7895_v17  ;;  %v33290_v22 = vld [vmem:[%s42549_s13 + $0xd8] sm:$0xff]  }
 0x857   :  { %v7897_v55 = vadd.f32 %v36443_v36, %v7873_v54  ;;  %v7928_v3 = vmul.f32 0.01, %v7896_v4  ;;  %v7940_v7 = vsel %vm7908_vm1, %v7892_v26, %v7924_v34  ;;  %v7941_v8 = vsel %vm7909_vm2, %v7893_v2, %v7925_v60  ;;  %v33291_v24 = vld [vmem:[%s42549_s13 + $0xe0] sm:$0xff]   ;;  %v33292_v23 = vld [vmem:[%s42549_s13 + $0xe8] sm:$0xff]   ;;  %v33293_v26 = vld [vmem:[%s42549_s13 + $0xf0] sm:$0xff]  }
 0x858   :  { %29440 = vmatpush3.bf16.msra.mxu1 %v7948_v57  ;;  %v7951_v11 = vpack.c.bf16 %v7941_v8, %v7940_v7  ;;  %vm7912_vm5 = vcmp.ge.f32.partialorder %v7896_v4, 0.0  ;;  %v7942_v15 = vsel %vm7910_vm3, %v7894_v40, %v7926_v0  ;;  %v7943_v1 = vsel %vm7911_vm4, %v7895_v17, %v7927_v37  ;;  %v33294_v25 = vld [vmem:[%s42549_s13 + $0xf8] sm:$0xff]   ;;  %v33295_v57 = vld [vmem:[%s42549_s13 + $0x100] sm:$0xff]   ;;  %v33296_v2 = vld [vmem:[%s42549_s13 + $0x108] sm:$0xff]  }
 0x859   :  { %29441 = vmatprep.subr.bf16.mxu1 %v7949_v42  ;;  %vm7913_vm6 = vcmp.ge.f32.partialorder %v7897_v55, 0.0  ;;  %v7929_v59 = vmul.f32 0.01, %v7897_v55  ;;  %v7952_v63 = vpack.c.bf16 %v7943_v1, %v7942_v15  ;;  %v7944_v9 = vsel %vm7912_vm5, %v7896_v4, %v7928_v3  ;;  %v33297_v10 = vld [vmem:[%s42549_s13 + $0x110] sm:$0xff]   ;;  %v33298_v27 = vld [vmem:[%s42549_s13 + $0x118] sm:$0xff]   ;;  %v33299_v28 = vld [vmem:[%s42549_s13 + $0x120] sm:$0xff]  }
 0x85a   :  { %v33300_v29 = vld [vmem:[%s42549_s13 + $0x128] sm:$0xff]   ;;  %v33301_v32 = vld [vmem:[%s42549_s13 + $0x130] sm:$0xff]   ;;  %v33302_v17 = vld [vmem:[%s42549_s13 + $0x138] sm:$0xff]  }
 0x85b   :  { %v7945_v30 = vsel %vm7913_vm6, %v7897_v55, %v7929_v59  ;;  %v33303_v34 = vld [vmem:[%s42549_s13 + $0x140] sm:$0xff]   ;;  %v33304_v40 = vld [vmem:[%s42549_s13 + $0x148] sm:$0xff]   ;;  %v33305_v62 = vld [vmem:[%s42549_s13 + $0x150] sm:$0xff]  }
 0x85c   :  { %29442 = vmatpush3.bf16.msra.mxu1 %v7949_v42  ;;  %v7953_v36 = vpack.c.bf16 %v7945_v30, %v7944_v9  ;;  %v33306_v42 = vld [vmem:[%s42549_s13 + $0x158] sm:$0xff]   ;;  %v33307_v50 = vld [vmem:[%s42549_s13 + $0x160] sm:$0xff]   ;;  %v33308_v46 = vld [vmem:[%s42549_s13 + $0x168] sm:$0xff]  }
 0x85d   :  { %29443 = vmatprep.subr.bf16.mxu1 %v7950_v31  ;;  %v33309_v60 = vld [vmem:[%s42549_s13 + $0x170] sm:$0xff]   ;;  %v33310_v4 = vld [vmem:[%s42549_s13 + $0x178] sm:$0xff]   ;;  %v33311_v54 = vld [vmem:[%s42549_s13 + $0x180] sm:$0xff]  }
 0x85e   :  { %v33312_v0 = vld [vmem:[%s42549_s13 + $0x188] sm:$0xff]   ;;  %v33314_v37 = vld [vmem:[%s42549_s13 + $0x198] sm:$0xff]   ;;  %v33315_v55 = vld [vmem:[%s42549_s13 + $0x1a0] sm:$0xff]  }
 0x85f   :  { %v33347_v3 = vld [vmem:[%s42552_s14 + $0x20] sm:$0xff]   ;;  %v33348_v7 = vld [vmem:[%s42552_s14 + $0x28] sm:$0xff]   ;;  %v33351_v15 = vld [vmem:[%s42552_s14 + $0x30] sm:$0xff]  }
 0x860   :  { %29444 = vmatpush3.bf16.msra.mxu1 %v7950_v31  ;;  %v33313_v31 = vld [vmem:[%s42549_s13 + $0x190] sm:$0xff]   ;;  %v33316_v8 = vld [vmem:[%s42549_s13 + $0x1a8] sm:$0xff]   ;;  %30475 = vmatprep.subr.bf16.mxu0 %v33347_v3  ;;  %v33318_v59 = vld [vmem:[%s42549_s13 + $0x1b8] sm:$0xff]  }
 0x861   :  { %29445 = vmatprep.subr.bf16.mxu1 %v7951_v11  ;;  %30476 = vmatpush3.bf16.msra.mxu0 %v33347_v3  ;;  %v33319_v9 = vld [vmem:[%s42549_s13 + $0x1c0] sm:$0xff]  }
 0x862   :  { %30477 = vmatprep.subr.bf16.mxu0 %v33348_v7 }
 0x864   :  { %29446 = vmatpush3.bf16.msra.mxu1 %v7951_v11  ;;  %v33317_v11 = vld [vmem:[%s42549_s13 + $0x1b0] sm:$0xff]  }
 0x865   :  { %29447 = vmatprep.subr.bf16.mxu1 %v7952_v63  ;;  %30478 = vmatpush3.bf16.msra.mxu0 %v33348_v7 }
 0x866   :  { %30479 = vmatprep.subr.bf16.mxu0 %v33351_v15 }
 0x868   :  { %29448 = vmatpush3.bf16.msra.mxu1 %v7952_v63 }
 0x869   :  { %29449 = vmatprep.subr.bf16.mxu1 %v7953_v36  ;;  %30480 = vmatpush3.bf16.msra.mxu0 %v33351_v15 }
 0x86c   :  { %29450 = vmatpush3.bf16.msra.mxu1 %v7953_v36  ;;  %v33346_v36 = vld [vmem:[%s42549_s13 + $0x298] sm:$0xff]  }
 0x86d   :  { %31627 = vmatprep.subr.bf16.mxu1 %v33347_v3 }
 0x86f   :  { %29452 = vmatmul.mubr.bf16.vlgmr.msra.gmra.mrb[64].mxu1 %v33264_v35 }
 0x870   :  { %29455 = vmatprep.mubr.bf16.mxu1 %v33265_v33  ;;  %31631 = vmatpush3.bf16.msra.mxu1 %v33347_v3 }
 0x871   :  { %31628 = vmatprep.subr.bf16.mxu1 %v33348_v7 }
 0x874   :  { %31632 = vmatpush3.bf16.msra.mxu1 %v33348_v7  ;;  %v33332_v7 = vld [vmem:[%s42549_s13 + $0x228] sm:$0xff]  }
 0x875   :  { %31629 = vmatprep.subr.bf16.mxu1 %v33351_v15 }
 0x877   :  { %29456 = vmatmul.mubr.bf16.gmra.mrb[68].mxu1 %v33266_v45  ;;  %v33352_v45 = vld [vmem:[%s42552_s14 + $0x38] sm:$0xff]  }
 0x878   :  { %29459 = vmatprep.mubr.bf16.mxu1 %v33267_v6  ;;  %31633 = vmatpush3.bf16.msra.mxu1 %v33351_v15 }
 0x879   :  { %30481 = vmatprep.subr.bf16.mxu0 %v33352_v45  ;;  %31630 = vmatprep.subr.bf16.mxu1 %v33352_v45 }
 0x87a   :  { %30482 = vmatpush3.bf16.msra.mxu0 %v33352_v45 }
 0x87c   :  { %31634 = vmatpush3.bf16.msra.mxu1 %v33352_v45 }
 0x87f   :  { %29460 = vmatmul.mubr.bf16.gmra.mrb[72].mxu1 %v33268_v44  ;;  %v33320_v44 = vld [vmem:[%s42549_s13 + $0x1c8] sm:$0xff]  }
 0x880   :  { %29463 = vmatprep.mubr.bf16.mxu1 %v33269_v5 }
 0x887   :  { %29464 = vmatmul.mubr.bf16.gmra.mrb[76].mxu1 %v33270_v18  ;;  %v33321_v18 = vld [vmem:[%s42549_s13 + $0x1d0] sm:$0xff]  }
 0x888   :  { %29467 = vmatprep.mubr.bf16.mxu1 %v33271_v39 }
 0x88f   :  { %29468 = vmatmul.mubr.bf16.gmra.mrb[80].mxu1 %v33272_v48  ;;  %v33345_v48 = vld [vmem:[%s42549_s13 + $0x290] sm:$0xff]  }
 0x890   :  { %29471 = vmatprep.mubr.bf16.mxu1 %v33273_v13 }
 0x897   :  { %29472 = vmatmul.mubr.bf16.gmra.mrb[84].mxu1 %v33274_v14  ;;  %v33349_v14 = vld [vmem:[%s42549_s13 + $0x2a0] sm:$0xff]  }
 0x898   :  { %29475 = vmatprep.mubr.bf16.mxu1 %v33275_v16 }
 0x89f   :  { %29476 = vmatmul.mubr.bf16.gmra.mrb[88].mxu1 %v33276_v49  ;;  %v33322_v49 = vld [vmem:[%s42549_s13 + $0x1d8] sm:$0xff]  }
 0x8a0   :  { %29479 = vmatprep.mubr.bf16.mxu1 %v33277_v38 }
 0x8a7   :  { %29480 = vmatmul.mubr.bf16.gmra.mrb[92].mxu1 %v33278_v41  ;;  %v33323_v41 = vld [vmem:[%s42549_s13 + $0x1e0] sm:$0xff]  }
 0x8a8   :  { %29483 = vmatprep.mubr.bf16.mxu1 %v33279_v43 }
 0x8af   :  { %29484 = vmatmul.mubr.bf16.gmra.mrb[96].mxu1 %v33280_v53  ;;  %v33344_v53 = vld [vmem:[%s42549_s13 + $0x288] sm:$0xff]  }
 0x8b0   :  { %29487 = vmatprep.mubr.bf16.mxu1 %v33281_v56 }
 0x8b7   :  { %29488 = vmatmul.mubr.bf16.gmra.mrb[100].mxu1 %v33282_v19 }
 0x8b8   :  { %29491 = vmatprep.mubr.bf16.mxu1 %v33283_v20 }
 0x8bf   :  { %29492 = vmatmul.mubr.bf16.gmra.mrb[104].mxu1 %v33284_v47  ;;  %v33324_v47 = vld [vmem:[%s42549_s13 + $0x1e8] sm:$0xff]  }
 0x8c0   :  { %29495 = vmatprep.mubr.bf16.mxu1 %v33285_v52 }
 0x8c7   :  { %29496 = vmatmul.mubr.bf16.gmra.mrb[108].mxu1 %v33286_v58  ;;  %v33325_v58 = vld [vmem:[%s42549_s13 + $0x1f0] sm:$0xff]  }
 0x8c8   :  { %29499 = vmatprep.mubr.bf16.mxu1 %v33287_v12 }
 0x8cf   :  { %29500 = vmatmul.mubr.bf16.gmra.mrb[112].mxu1 %v33288_v51  ;;  %v33343_v51 = vld [vmem:[%s42549_s13 + $0x280] sm:$0xff]  }
 0x8d0   :  { %29503 = vmatprep.mubr.bf16.mxu1 %v33289_v21 }
 0x8d7   :  { %29504 = vmatmul.mubr.bf16.gmra.mrb[116].mxu1 %v33290_v22 }
 0x8d8   :  { %29507 = vmatprep.mubr.bf16.mxu1 %v33291_v24  ;;  %v36744_v24 = vld [vmem:[%s42552_s14] sm:$0xff]  }
 0x8d9   :  { %30547 = vmatprep.subr.bf16.mxu0 %v36744_v24 }
 0x8df   :  { %29508 = vmatmul.mubr.bf16.gmra.mrb[120].mxu1 %v33292_v23 }
 0x8e0   :  { %29511 = vmatprep.mubr.bf16.mxu1 %v33293_v26  ;;  %v33326_v26 = vld [vmem:[%s42549_s13 + $0x1f8] sm:$0xff]  }
 0x8e7   :  { %29512 = vmatmul.mubr.bf16.gmra.mrb[124].mxu1 %v33294_v25 }
 0x8e8   :  { %29515 = vmatprep.mubr.bf16.mxu1 %v33295_v57  ;;  %v33327_v57 = vld [vmem:[%s42549_s13 + $0x200] sm:$0xff]  }
 0x8ef   :  { %29516 = vmatmul.mubr.bf16.gmra.mrb[128].mxu1 %v33296_v2 }
 0x8f0   :  { %29519 = vmatprep.mubr.bf16.mxu1 %v33297_v10  ;;  %v33342_v10 = vld [vmem:[%s42549_s13 + $0x278] sm:$0xff]  }
 0x8f7   :  { %29520 = vmatmul.mubr.bf16.gmra.mrb[132].mxu1 %v33298_v27 }
 0x8f8   :  { %29523 = vmatprep.mubr.bf16.mxu1 %v33299_v28 }
 0x8ff   :  { %29524 = vmatmul.mubr.bf16.gmra.mrb[136].mxu1 %v33300_v29 }
 0x900   :  { %29527 = vmatprep.mubr.bf16.mxu1 %v33301_v32  ;;  %v33328_v32 = vld [vmem:[%s42549_s13 + $0x208] sm:$0xff]  }
 0x907   :  { %29528 = vmatmul.mubr.bf16.gmra.mrb[140].mxu1 %v33302_v17 }
 0x908   :  { %29531 = vmatprep.mubr.bf16.mxu1 %v33303_v34  ;;  %v33329_v34 = vld [vmem:[%s42549_s13 + $0x210] sm:$0xff]  }
 0x90f   :  { %29532 = vmatmul.mubr.bf16.gmra.mrb[144].mxu1 %v33304_v40 }
 0x910   :  { %29535 = vmatprep.mubr.bf16.mxu1 %v33305_v62  ;;  %v33341_v62 = vld [vmem:[%s42549_s13 + $0x270] sm:$0xff]  }
 0x917   :  { %29536 = vmatmul.mubr.bf16.gmra.mrb[148].mxu1 %v33306_v42 }
 0x918   :  { %29539 = vmatprep.mubr.bf16.mxu1 %v33307_v50 }
 0x91f   :  { %29540 = vmatmul.mubr.bf16.gmra.mrb[152].mxu1 %v33308_v46 }
 0x920   :  { %29543 = vmatprep.mubr.bf16.mxu1 %v33309_v60  ;;  %v33330_v60 = vld [vmem:[%s42549_s13 + $0x218] sm:$0xff]  }
 0x927   :  { %29544 = vmatmul.mubr.bf16.gmra.mrb[156].mxu1 %v33310_v4 }
 0x928   :  { %29547 = vmatprep.mubr.bf16.mxu1 %v33311_v54  ;;  %v33331_v54 = vld [vmem:[%s42549_s13 + $0x220] sm:$0xff]  }
 0x92f   :  { %29548 = vmatmul.mubr.bf16.gmra.mrb[160].mxu1 %v33312_v0 }
 0x930   :  { %29551 = vmatprep.mubr.bf16.mxu1 %v33313_v31  ;;  %v33340_v31 = vld [vmem:[%s42549_s13 + $0x268] sm:$0xff]  }
 0x937   :  { %29552 = vmatmul.mubr.bf16.gmra.mrb[164].mxu1 %v33314_v37 }
 0x938   :  { %29555 = vmatprep.mubr.bf16.mxu1 %v33315_v55 }
 0x93f   :  { %29556 = vmatmul.mubr.bf16.gmra.mrb[168].mxu1 %v33316_v8 }
 0x940   :  { %29559 = vmatprep.mubr.bf16.mxu1 %v33317_v11  ;;  %v33333_v11 = vld [vmem:[%s42549_s13 + $0x230] sm:$0xff]  }
 0x942   :  { %v36666_v1 = vpop.f32.mrb[64].mxu1 }
 0x943   :  { %v36671_v63 = vpop.f32.mrb[65].mxu1 }
 0x944   :  { %v36676_v30 = vpop.f32.mrb[66].mxu1 }
 0x945   :  { %v36680_v35 = vpop.f32.mrb[67].mxu1 }
 0x947   :  { %29560 = vmatmul.mubr.bf16.gmra.mrb[172].mxu1 %v33318_v59  ;;  %v33339_v59 = vld [vmem:[%s42549_s13 + $0x260] sm:$0xff]  }
 0x948   :  { %29563 = vmatprep.mubr.bf16.mxu1 %v33319_v9 }
 0x94a   :  { %v36687_v6 = vpop.f32.mrb[68].mxu1 }
 0x94b   :  { %v36692_v5 = vpop.f32.mrb[69].mxu1 }
 0x94c   :  { %v36697_v39 = vpop.f32.mrb[70].mxu1 }
 0x94d   :  { %v36701_v13 = vpop.f32.mrb[71].mxu1 }
 0x94f   :  { %29564 = vmatmul.mubr.bf16.gmra.mrb[176].mxu1 %v33320_v44 }
 0x950   :  { %29567 = vmatprep.mubr.bf16.mxu1 %v33321_v18  ;;  %v33334_v18 = vld [vmem:[%s42549_s13 + $0x238] sm:$0xff]  }
 0x952   :  { %v36705_v16 = vpop.f32.mrb[72].mxu1 }
 0x953   :  { %v36710_v38 = vpop.f32.mrb[73].mxu1 }
 0x954   :  { %v36715_v43 = vpop.f32.mrb[74].mxu1 }
 0x955   :  { %v36719_v56 = vpop.f32.mrb[75].mxu1 }
 0x957   :  { %29568 = vmatmul.mubr.bf16.gmra.mrb[180].mxu1 %v33322_v49 }
 0x958   :  { %29571 = vmatprep.mubr.bf16.mxu1 %v33323_v41  ;;  %v33335_v41 = vld [vmem:[%s42549_s13 + $0x240] sm:$0xff]  }
 0x95a   :  { %v36723_v20 = vpop.f32.mrb[76].mxu1 }
 0x95b   :  { %v36728_v52 = vpop.f32.mrb[77].mxu1 }
 0x95c   :  { %v36733_v12 = vpop.f32.mrb[78].mxu1 }
 0x95d   :  { %v36737_v21 = vpop.f32.mrb[79].mxu1 }
 0x95f   :  { %29572 = vmatmul.mubr.bf16.gmra.mrb[184].mxu1 %v33324_v47 }
 0x960   :  { %29575 = vmatprep.mubr.bf16.mxu1 %v33325_v58  ;;  %v33338_v58 = vld [vmem:[%s42549_s13 + $0x258] sm:$0xff]  }
 0x962   :  { %v36746_v23 = vpop.f32.mrb[80].mxu1 }
 0x963   :  { %v36751_v25 = vpop.f32.mrb[81].mxu1 }
 0x964   :  { %v36757_v2 = vpop.f32.mrb[82].mxu1 }
 0x965   :  { %v36761_v27 = vpop.f32.mrb[83].mxu1 }
 0x967   :  { %29576 = vmatmul.mubr.bf16.gmra.mrb[188].mxu1 %v33326_v26 }
 0x968   :  { %29579 = vmatprep.mubr.bf16.mxu1 %v33327_v57 }
 0x96a   :  { %v36765_v29 = vpop.f32.mrb[84].mxu1 }
 0x96b   :  { %v36770_v17 = vpop.f32.mrb[85].mxu1 }
 0x96c   :  { %v36775_v40 = vpop.f32.mrb[86].mxu1 }
 0x96d   :  { %v36779_v42 = vpop.f32.mrb[87].mxu1 }
 0x96f   :  { %29580 = vmatmul.mubr.bf16.gmra.mrb[192].mxu1 %v33328_v32 }
 0x970   :  { %29583 = vmatprep.mubr.bf16.mxu1 %v33329_v34  ;;  %v33336_v34 = vld [vmem:[%s42549_s13 + $0x248] sm:$0xff]  }
 0x972   :  { %v36783_v46 = vpop.f32.mrb[88].mxu1 }
 0x973   :  { %v36788_v4 = vpop.f32.mrb[89].mxu1 }
 0x974   :  { %v36793_v0 = vpop.f32.mrb[90].mxu1 }
 0x975   :  { %v36797_v37 = vpop.f32.mrb[91].mxu1 }
 0x977   :  { %29584 = vmatmul.mubr.bf16.gmra.mrb[196].mxu1 %v33330_v60 }
 0x978   :  { %29587 = vmatprep.mubr.bf16.mxu1 %v33331_v54  ;;  %v33337_v54 = vld [vmem:[%s42549_s13 + $0x250] sm:$0xff]  }
 0x97a   :  { %v36801_v3 = vpop.f32.mrb[92].mxu1 }
 0x97b   :  { %v36806_v8 = vpop.f32.mrb[93].mxu1 }
 0x97c   :  { %v36811_v15 = vpop.f32.mrb[94].mxu1 }
 0x97d   :  { %v36815_v9 = vpop.f32.mrb[95].mxu1 }
 0x97f   :  { %29588 = vmatmul.mubr.bf16.gmra.mrb[200].mxu1 %v33332_v7 }
 0x980   :  { %29591 = vmatprep.mubr.bf16.mxu1 %v33333_v11 }
 0x982   :  { %v36819_v44 = vpop.f32.mrb[96].mxu1 }
 0x983   :  { %v36824_v49 = vpop.f32.mrb[97].mxu1 }
 0x984   :  { %v36829_v47 = vpop.f32.mrb[98].mxu1 }
 0x985   :  { %v36833_v26 = vpop.f32.mrb[99].mxu1 }
 0x987   :  { %29592 = vmatmul.mubr.bf16.gmra.mrb[204].mxu1 %v33334_v18 }
 0x988   :  { %29595 = vmatprep.mubr.bf16.mxu1 %v33335_v41 }
 0x98a   :  { %v36837_v32 = vpop.f32.mrb[100].mxu1 }
 0x98b   :  { %v36842_v60 = vpop.f32.mrb[101].mxu1 }
 0x98c   :  { %v36847_v7 = vpop.f32.mrb[102].mxu1 }
 0x98d   :  { %v36851_v61 = vpop.f32.mrb[103].mxu1 }
 0x98f   :  { %29596 = vmatmul.mubr.bf16.gmra.mrb[208].mxu1 %v33336_v34 }
 0x990   :  { %29599 = vmatprep.mubr.bf16.mxu1 %v33337_v54 }
 0x992   :  { %v36855_v41 = vpop.f32.mrb[104].mxu1 }
 0x993   :  { %v36860_v57 = vpop.f32.mrb[105].mxu1 }
 0x994   :  { %v36865_v11 = vpop.f32.mrb[106].mxu1 }
 0x995   :  { %v36869_v18 = vpop.f32.mrb[107].mxu1 }
 0x997   :  { %29600 = vmatmul.mubr.bf16.gmra.mrb[212].mxu1 %v33338_v58 }
 0x998   :  { %29603 = vmatprep.mubr.bf16.mxu1 %v33339_v59 }
 0x99a   :  { %v36873_v54 = vpop.f32.mrb[108].mxu1 }
 0x99b   :  { %v36878_v55 = vpop.f32.mrb[109].mxu1 }
 0x99c   :  { %v36883_v45 = vpop.f32.mrb[110].mxu1 }
 0x99d   :  { %v36887_v34 = vpop.f32.mrb[111].mxu1 }
 0x99f   :  { %29604 = vmatmul.mubr.bf16.gmra.mrb[216].mxu1 %v33340_v31 }
 0x9a0   :  { %29607 = vmatprep.mubr.bf16.mxu1 %v33341_v62 }
 0x9a2   :  { %v36891_v58 = vpop.f32.mrb[112].mxu1 }
 0x9a3   :  { %42605 = vst [vmem:[#allocation2_spill] sm:$0xff] %v36891_v58  ;;  %v36896_v28 = vpop.f32.mrb[113].mxu1 }
 0x9a4   :  { %42606 = vst [vmem:[#allocation3_spill] sm:$0xff] %v36896_v28  ;;  %v36901_v50 = vpop.f32.mrb[114].mxu1 }
 0x9a5   :  { %42607 = vst [vmem:[#allocation4_spill] sm:$0xff] %v36901_v50  ;;  %v36905_v59 = vpop.f32.mrb[115].mxu1  ;;  %v33355_v50 = vld [vmem:[%s42549_s13 + $0x2c0] sm:$0xff]  }
 0x9a7   :  { %29608 = vmatmul.mubr.bf16.gmra.mrb[220].mxu1 %v33342_v10 }
 0x9a8   :  { %29611 = vmatprep.mubr.bf16.mxu1 %v33343_v51 }
 0x9aa   :  { %v36909_v31 = vpop.f32.mrb[116].mxu1 }
 0x9ab   :  { %42608 = vst [vmem:[#allocation5_spill] sm:$0xff] %v36909_v31  ;;  %v36914_v19 = vpop.f32.mrb[117].mxu1  ;;  %v33353_v31 = vld [vmem:[%s42549_s13 + $0x2b0] sm:$0xff]  }
 0x9ac   :  { %42609 = vst [vmem:[#allocation6_spill] sm:$0xff] %v36914_v19  ;;  %v36919_v22 = vpop.f32.mrb[118].mxu1  ;;  %v33350_v19 = vld [vmem:[%s42549_s13 + $0x2a8] sm:$0xff]  }
 0x9ad   :  { %42610 = vst [vmem:[#allocation7_spill] sm:$0xff] %v36919_v22  ;;  %v36923_v62 = vpop.f32.mrb[119].mxu1 }
 0x9ae   :  { %42611 = vst [vmem:[#allocation8_spill] sm:$0xff] %v36923_v62 }
 0x9af   :  { %29612 = vmatmul.mubr.bf16.gmra.mrb[224].mxu1 %v33344_v53 }
 0x9b0   :  { %29615 = vmatprep.mubr.bf16.mxu1 %v33345_v48 }
 0x9b2   :  { %v36927_v10 = vpop.f32.mrb[120].mxu1 }
 0x9b3   :  { %42612 = vst [vmem:[#allocation9_spill] sm:$0xff] %v36927_v10  ;;  %v36932_v33 = vpop.f32.mrb[121].mxu1 }
 0x9b4   :  { %42613 = vst [vmem:[#allocation10_spill] sm:$0xff] %v36932_v33  ;;  %v36934_v58 = vpop.f32.mrb[122].mxu1  ;;  %v33354_v33 = vld [vmem:[%s42549_s13 + $0x2b8] sm:$0xff]  }
 0x9b5   :  { %42614 = vst [vmem:[#allocation11_spill] sm:$0xff] %v36934_v58  ;;  %v36941_v51 = vpop.f32.mrb[123].mxu1 }
 0x9b6   :  { %42615 = vst [vmem:[#allocation12_spill] sm:$0xff] %v36941_v51 }
 0x9b7   :  { %29616 = vmatmul.mubr.bf16.gmra.mrb[228].mxu1 %v33346_v36 }
 0x9b8   :  { %29619 = vmatprep.mubr.bf16.mxu1 %v33349_v14 }
 0x9ba   :  { %v36945_v53 = vpop.f32.mrb[124].mxu1 }
 0x9bb   :  { %42616 = vst [vmem:[#allocation13_spill] sm:$0xff] %v36945_v53  ;;  %v36947_v22 = vpop.f32.mrb[125].mxu1 }
 0x9bc   :  { %v36952_v62 = vpop.f32.mrb[126].mxu1 }
 0x9bd   :  { %42617 = vst [vmem:[#allocation14_spill] sm:$0xff] %v36952_v62  ;;  %v36959_v48 = vpop.f32.mrb[127].mxu1 }
 0x9bf   :  { %29620 = vmatmul.mubr.bf16.gmra.mrb[232].mxu1 %v33350_v19  ;;  %v33362_v19 = vld [vmem:[%s42552_s14 + $0x8] sm:$0xff]  }
 0x9c0   :  { %29623 = vmatprep.mubr.bf16.mxu1 %v33353_v31 }
 0x9c2   :  { %v29517_v14 = vpop.f32.mrb[128].mxu1 }
 0x9c3   :  { %v12341_v58 = vpop.f32.mrb[129].mxu1 }
 0x9c4   :  { %v29518_v51 = vpop.f32.mrb[130].mxu1 }
 0x9c5   :  { %v16213_v28 = vpack.c.bf16 %v29518_v51, %v29517_v14  ;;  %v12344_v10 = vpop.f32.mrb[131].mxu1  ;;  %v33356_v51 = vld [vmem:[%s42549_s13 + $0x2c8] sm:$0xff]  }
 0x9c6   :  { %v16212_v53 = vpack.c.bf16 %v12344_v10, %v12341_v58 }
 0x9c7   :  { %29624 = vmatmul.mubr.bf16.gmra.mrb[236].mxu1 %v33354_v33  ;;  %v33365_v33 = vld [vmem:[%s42552_s14 + $0x10] sm:$0xff]  }
 0x9c8   :  { %30483 = vmatprep.mubr.msk.bf16.mxu0 %vm960_vm0, %v16212_v53  ;;  %29627 = vmatprep.mubr.bf16.mxu1 %v33355_v50  ;;  %v33357_v50 = vld [vmem:[%s42549_s13 + $0x2d0] sm:$0xff]  }
 0x9c9   :  { %30484 = vmatmul.mubr.msk.bf16.vlgmr.msra.gmra.mrb[36].mxu0 %vm960_vm0, %v16213_v28 }
 0x9ca   :  { %v29521_v31 = vpop.f32.mrb[132].mxu1  ;;  %30548 = vmatpush3.bf16.msra.mxu0 %v36744_v24  ;;  %v33366_v24 = vld [vmem:[%s42552_s14 + $0x18] sm:$0xff]  }
 0x9cb   :  { %v12357_v36 = vpop.f32.mrb[133].mxu1  ;;  %30549 = vmatprep.subr.bf16.mxu0 %v33362_v19 }
 0x9cc   :  { %v29522_v58 = vpop.f32.mrb[134].mxu1 }
 0x9cd   :  { %v16215_v10 = vpack.c.bf16 %v29522_v58, %v29521_v31  ;;  %v12360_v28 = vpop.f32.mrb[135].mxu1  ;;  %v33358_v31 = vld [vmem:[%s42549_s13 + $0x2d8] sm:$0xff]  }
 0x9ce   :  { %v16214_v53 = vpack.c.bf16 %v12360_v28, %v12357_v36  ;;  %30550 = vmatpush3.bf16.msra.mxu0 %v33362_v19  ;;  %v33359_v19 = vld [vmem:[%s42549_s13 + $0x2e0] sm:$0xff]  }
 0x9cf   :  { %29628 = vmatmul.mubr.bf16.gmra.mrb[240].mxu1 %v33356_v51  ;;  %30551 = vmatprep.subr.bf16.mxu0 %v33365_v33 }
 0x9d0   :  { %30487 = vmatprep.mubr.msk.bf16.mxu0 %vm960_vm0, %v16214_v53  ;;  %29631 = vmatprep.mubr.bf16.mxu1 %v33357_v50 }
 0x9d1   :  { %30488 = vmatmul.mubr.msk.bf16.gmra.mrb[40].mxu0 %vm960_vm0, %v16215_v10  ;;  %v33360_v10 = vld [vmem:[%s42549_s13 + $0x2e8] sm:$0xff]  }
 0x9d2   :  { %v29525_v14 = vpop.f32.mrb[136].mxu1  ;;  %30552 = vmatpush3.bf16.msra.mxu0 %v33365_v33 }
 0x9d3   :  { %v12373_v62 = vpop.f32.mrb[137].mxu1  ;;  %30553 = vmatprep.subr.bf16.mxu0 %v33366_v24 }
 0x9d4   :  { %v29526_v36 = vpop.f32.mrb[138].mxu1 }
 0x9d5   :  { %v16217_v51 = vpack.c.bf16 %v29526_v36, %v29525_v14  ;;  %v12376_v58 = vpop.f32.mrb[139].mxu1  ;;  %v33363_v14 = vld [vmem:[%s42549_s13 + $0x2f0] sm:$0xff]  }
 0x9d6   :  { %v16216_v28 = vpack.c.bf16 %v12376_v58, %v12373_v62  ;;  %30554 = vmatpush3.bf16.msra.mxu0 %v33366_v24  ;;  %v33364_v58 = vld [vmem:[%s42549_s13 + $0x2f8] sm:$0xff]  }
 0x9d7   :  { %29632 = vmatmul.mubr.bf16.gmra.mrb[244].mxu1 %v33358_v31  ;;  %v33397_v31 = vld [vmem:[%s42552_s14 + $0x40] sm:$0xff]  }
 0x9d8   :  { %30491 = vmatprep.mubr.msk.bf16.mxu0 %vm960_vm0, %v16216_v28  ;;  %29635 = vmatprep.mubr.bf16.mxu1 %v33359_v19 }
 0x9d9   :  { %30492 = vmatmul.mubr.msk.bf16.gmra.mrb[44].mxu0 %vm960_vm0, %v16217_v51  ;;  %30619 = vmatprep.subr.bf16.mxu0 %v33397_v31 }
 0x9da   :  { %v29529_v33 = vpop.f32.mrb[140].mxu1 }
 0x9db   :  { %v12389_v50 = vpop.f32.mrb[141].mxu1 }
 0x9dc   :  { %v29530_v53 = vpop.f32.mrb[142].mxu1 }
 0x9dd   :  { %v16219_v36 = vpack.c.bf16 %v29530_v53, %v29529_v33  ;;  %v12392_v62 = vpop.f32.mrb[143].mxu1  ;;  %v33367_v33 = vld [vmem:[%s42549_s13 + $0x300] sm:$0xff]  }
 0x9de   :  { %v16218_v24 = vpack.c.bf16 %v12392_v62, %v12389_v50  ;;  %v33368_v62 = vld [vmem:[%s42549_s13 + $0x308] sm:$0xff]  }
 0x9df   :  { %29636 = vmatmul.mubr.bf16.gmra.mrb[248].mxu1 %v33360_v10 }
 0x9e0   :  { %30495 = vmatprep.mubr.msk.bf16.mxu0 %vm960_vm0, %v16218_v24  ;;  %29639 = vmatprep.mubr.bf16.mxu1 %v33363_v14  ;;  %v42618_v14 = vpack.c.bf16 %v36680_v35, %v36671_v63 }
 0x9e1   :  { %30496 = vmatmul.mubr.msk.bf16.gmra.mrb[48].mxu0 %vm960_vm0, %v16219_v36 }
 0x9e2   :  { %v29533_v19 = vpop.f32.mrb[144].mxu1 }
 0x9e3   :  { %v12405_v51 = vpop.f32.mrb[145].mxu1 }
 0x9e4   :  { %v29534_v28 = vpop.f32.mrb[146].mxu1 }
 0x9e5   :  { %v16221_v50 = vpack.c.bf16 %v29534_v28, %v29533_v19  ;;  %v12408_v10 = vpop.f32.mrb[147].mxu1  ;;  %v33369_v19 = vld [vmem:[%s42549_s13 + $0x310] sm:$0xff]   ;;  %v33398_v28 = vld [vmem:[%s42552_s14 + $0x48] sm:$0xff]  }
 0x9e6   :  { %v16220_v53 = vpack.c.bf16 %v12408_v10, %v12405_v51 }
 0x9e7   :  { %29640 = vmatmul.mubr.bf16.gmra.mrb[252].mxu1 %v33364_v58 }
 0x9e8   :  { %30499 = vmatprep.mubr.msk.bf16.mxu0 %vm960_vm0, %v16220_v53  ;;  %29643 = vmatprep.mubr.bf16.mxu1 %v33367_v33  ;;  %v42619_v33 = vpack.c.bf16 %v36676_v30, %v36666_v1  ;;  %v33370_v53 = vld [vmem:[%s42549_s13 + $0x318] sm:$0xff]   ;;  %v33401_v1 = vld [vmem:[%s42552_s14 + $0x50] sm:$0xff]   ;;  %v33371_v30 = vld [vmem:[%s42549_s13 + $0x320] sm:$0xff]  }
 0x9e9   :  { %30500 = vmatmul.mubr.msk.bf16.gmra.mrb[52].mxu0 %vm960_vm0, %v16221_v50  ;;  %v42620_v50 = vpack.c.bf16 %v36701_v13, %v36692_v5 }
 0x9ea   :  { %30555 = vmatprep.mubr.msk.bf16.mxu0 %vm960_vm0, %v42618_v14  ;;  %v37020_v36 = vpop.f32.mrb[148].mxu1 }
 0x9eb   :  { %v37025_v24 = vpop.f32.mrb[149].mxu1 }
 0x9ec   :  { %v37030_v51 = vpop.f32.mrb[150].mxu1 }
 0x9ed   :  { %v37034_v63 = vpop.f32.mrb[151].mxu1 }
 0x9ef   :  { %29644 = vmatmul.mubr.bf16.gmra.mrb[0].mxu1 %v33368_v62  ;;  %v33392_v62 = vld [vmem:[%s42549_s13 + $0x3c8] sm:$0xff]  }
 0x9f0   :  { %29647 = vmatprep.mubr.bf16.mxu1 %v33369_v19  ;;  %v33402_v19 = vld [vmem:[%s42552_s14 + $0x58] sm:$0xff]  }
 0x9f1   :  { %30556 = vmatmul.mubr.msk.bf16.vlgmr.msra.gmra.mrb[36].mxu0 %vm960_vm0, %v42619_v33  ;;  %v42621_v33 = vpack.c.bf16 %v36697_v39, %v36687_v6  ;;  %v33373_v6 = vld [vmem:[%s42549_s13 + $0x330] sm:$0xff]  }
 0x9f2   :  { %30559 = vmatprep.mubr.msk.bf16.mxu0 %vm960_vm0, %v42620_v50  ;;  %v37049_v10 = vpop.f32.mrb[152].mxu1  ;;  %30620 = vmatpush3.bf16.msra.mxu0 %v33397_v31  ;;  %v42622_v50 = vpack.c.bf16 %v36719_v56, %v36710_v38  ;;  %v33374_v38 = vld [vmem:[%s42549_s13 + $0x338] sm:$0xff]  }
 0x9f3   :  { %v37054_v14 = vpop.f32.mrb[153].mxu1  ;;  %30621 = vmatprep.subr.bf16.mxu0 %v33398_v28 }
 0x9f4   :  { %v37062_v5 = vpop.f32.mrb[154].mxu1 }
 0x9f5   :  { %v37066_v31 = vpop.f32.mrb[155].mxu1 }
 0x9f6   :  { %30622 = vmatpush3.bf16.msra.mxu0 %v33398_v28  ;;  %v33372_v28 = vld [vmem:[%s42549_s13 + $0x328] sm:$0xff]  }
 0x9f7   :  { %29648 = vmatmul.mubr.bf16.gmra.mrb[4].mxu1 %v33370_v53  ;;  %30623 = vmatprep.subr.bf16.mxu0 %v33401_v1 }
 0x9f8   :  { %29651 = vmatprep.mubr.bf16.mxu1 %v33371_v30  ;;  %v42623_v30 = vpack.c.bf16 %v36715_v43, %v36705_v16 }
 0x9f9   :  { %30560 = vmatmul.mubr.msk.bf16.gmra.mrb[40].mxu0 %vm960_vm0, %v42621_v33  ;;  %v42624_v33 = vpack.c.bf16 %v36737_v21, %v36728_v52 }
 0x9fa   :  { %30563 = vmatprep.mubr.msk.bf16.mxu0 %vm960_vm0, %v42622_v50  ;;  %v37081_v13 = vpop.f32.mrb[156].mxu1  ;;  %30624 = vmatpush3.bf16.msra.mxu0 %v33401_v1 }
 0x9fb   :  { %v37086_v53 = vpop.f32.mrb[157].mxu1  ;;  %30625 = vmatprep.subr.bf16.mxu0 %v33402_v19 }
 0x9fc   :  { %v37091_v39 = vpop.f32.mrb[158].mxu1 }
 0x9fd   :  { %v37095_v56 = vpop.f32.mrb[159].mxu1 }
 0x9fe   :  { %30626 = vmatpush3.bf16.msra.mxu0 %v33402_v19  ;;  %v33375_v19 = vld [vmem:[%s42549_s13 + $0x340] sm:$0xff]  }
 0x9ff   :  { %29652 = vmatmul.mubr.bf16.gmra.mrb[8].mxu1 %v33372_v28  ;;  %v42625_v28 = vpack.c.bf16 %v36733_v12, %v36723_v20  ;;  %v33378_v12 = vld [vmem:[%s42549_s13 + $0x358] sm:$0xff]  }
 0xa00   :  { %29655 = vmatprep.mubr.bf16.mxu1 %v33373_v6  ;;  %v42626_v6 = vpack.c.bf16 %v36761_v27, %v36751_v25 }
 0xa01   :  { %30564 = vmatmul.mubr.msk.bf16.gmra.mrb[44].mxu0 %vm960_vm0, %v42623_v30 }
 0xa02   :  { %30567 = vmatprep.mubr.msk.bf16.mxu0 %vm960_vm0, %v42624_v33  ;;  %v37107_v50 = vpop.f32.mrb[160].mxu1  ;;  %v33376_v33 = vld [vmem:[%s42549_s13 + $0x348] sm:$0xff]  }
 0xa03   :  { %v37112_v1 = vpop.f32.mrb[161].mxu1 }
 0xa04   :  { %v37117_v16 = vpop.f32.mrb[162].mxu1 }
 0xa05   :  { %v37121_v52 = vpop.f32.mrb[163].mxu1 }
 0xa07   :  { %29656 = vmatmul.mubr.bf16.gmra.mrb[12].mxu1 %v33374_v38  ;;  %v33377_v38 = vld [vmem:[%s42549_s13 + $0x350] sm:$0xff]  }
 0xa08   :  { %29659 = vmatprep.mubr.bf16.mxu1 %v33375_v19  ;;  %v42627_v19 = vpack.c.bf16 %v36757_v2, %v36746_v23  ;;  %v33380_v2 = vld [vmem:[%s42549_s13 + $0x368] sm:$0xff]  }
 0xa09   :  { %30568 = vmatmul.mubr.msk.bf16.gmra.mrb[48].mxu0 %vm960_vm0, %v42625_v28  ;;  %v42628_v28 = vpack.c.bf16 %v36779_v42, %v36770_v17 }
 0xa0a   :  { %30571 = vmatprep.mubr.msk.bf16.mxu0 %vm960_vm0, %v42626_v6  ;;  %v37133_v30 = vpop.f32.mrb[164].mxu1 }
 0xa0b   :  { %v37138_v43 = vpop.f32.mrb[165].mxu1 }
 0xa0c   :  { %v37143_v20 = vpop.f32.mrb[166].mxu1 }
 0xa0d   :  { %v37147_v25 = vpop.f32.mrb[167].mxu1 }
 0xa0f   :  { %29660 = vmatmul.mubr.bf16.gmra.mrb[16].mxu1 %v33376_v33  ;;  %v33379_v33 = vld [vmem:[%s42549_s13 + $0x360] sm:$0xff]  }
 0xa10   :  { %29663 = vmatprep.mubr.bf16.mxu1 %v33377_v38  ;;  %v42629_v38 = vpack.c.bf16 %v36775_v40, %v36765_v29  ;;  %v33382_v40 = vld [vmem:[%s42549_s13 + $0x378] sm:$0xff]  }
 0xa11   :  { %30572 = vmatmul.mubr.msk.bf16.gmra.mrb[52].mxu0 %vm960_vm0, %v42627_v19  ;;  %v42630_v19 = vpack.c.bf16 %v36797_v37, %v36788_v4 }
 0xa12   :  { %30575 = vmatprep.mubr.msk.bf16.mxu0 %vm960_vm0, %v42628_v28  ;;  %v37159_v6 = vpop.f32.mrb[168].mxu1 }
 0xa13   :  { %v37164_v21 = vpop.f32.mrb[169].mxu1 }
 0xa14   :  { %v37169_v23 = vpop.f32.mrb[170].mxu1 }
 0xa15   :  { %v37173_v17 = vpop.f32.mrb[171].mxu1 }
 0xa17   :  { %29664 = vmatmul.mubr.bf16.gmra.mrb[20].mxu1 %v33378_v12  ;;  %v33381_v12 = vld [vmem:[%s42549_s13 + $0x370] sm:$0xff]  }
 0xa18   :  { %29667 = vmatprep.mubr.bf16.mxu1 %v33379_v33  ;;  %v42631_v33 = vpack.c.bf16 %v36793_v0, %v36783_v46  ;;  %v33384_v0 = vld [vmem:[%s42549_s13 + $0x388] sm:$0xff]  }
 0xa19   :  { %30576 = vmatmul.mubr.msk.bf16.gmra.mrb[56].mxu0 %vm960_vm0, %v42629_v38  ;;  %v42632_v38 = vpack.c.bf16 %v36815_v9, %v36806_v8 }
 0xa1a   :  { %30579 = vmatprep.mubr.msk.bf16.mxu0 %vm960_vm0, %v42630_v19  ;;  %v37185_v28 = vpop.f32.mrb[172].mxu1 }
 0xa1b   :  { %v37190_v27 = vpop.f32.mrb[173].mxu1 }
 0xa1c   :  { %v37195_v29 = vpop.f32.mrb[174].mxu1 }
 0xa1d   :  { %v37199_v4 = vpop.f32.mrb[175].mxu1 }
 0xa1f   :  { %29668 = vmatmul.mubr.bf16.gmra.mrb[24].mxu1 %v33380_v2  ;;  %v33383_v2 = vld [vmem:[%s42549_s13 + $0x380] sm:$0xff]  }
 0xa20   :  { %29671 = vmatprep.mubr.bf16.mxu1 %v33381_v12  ;;  %v42633_v12 = vpack.c.bf16 %v36811_v15, %v36801_v3  ;;  %v33386_v15 = vld [vmem:[%s42549_s13 + $0x398] sm:$0xff]  }
 0xa21   :  { %30580 = vmatmul.mubr.msk.bf16.gmra.mrb[60].mxu0 %vm960_vm0, %v42631_v33  ;;  %v42634_v33 = vpack.c.bf16 %v36833_v26, %v36824_v49 }
 0xa22   :  { %30583 = vmatprep.mubr.msk.bf16.mxu0 %vm960_vm0, %v42632_v38  ;;  %v37211_v19 = vpop.f32.mrb[176].mxu1 }
 0xa23   :  { %v37216_v42 = vpop.f32.mrb[177].mxu1 }
 0xa24   :  { %v37221_v46 = vpop.f32.mrb[178].mxu1 }
 0xa25   :  { %v37225_v8 = vpop.f32.mrb[179].mxu1 }
 0xa27   :  { %29672 = vmatmul.mubr.bf16.gmra.mrb[28].mxu1 %v33382_v40  ;;  %v33385_v40 = vld [vmem:[%s42549_s13 + $0x390] sm:$0xff]  }
 0xa28   :  { %29675 = vmatprep.mubr.bf16.mxu1 %v33383_v2  ;;  %v42635_v2 = vpack.c.bf16 %v36829_v47, %v36819_v44  ;;  %v33388_v47 = vld [vmem:[%s42549_s13 + $0x3a8] sm:$0xff]  }
 0xa29   :  { %30584 = vmatmul.mubr.msk.bf16.gmra.mrb[64].mxu0 %vm960_vm0, %v42633_v12  ;;  %v42636_v12 = vpack.c.bf16 %v36851_v61, %v36842_v60 }
 0xa2a   :  { %30587 = vmatprep.mubr.msk.bf16.mxu0 %vm960_vm0, %v42634_v33  ;;  %v37237_v38 = vpop.f32.mrb[180].mxu1 }
 0xa2b   :  { %v37242_v37 = vpop.f32.mrb[181].mxu1 }
 0xa2c   :  { %v37247_v3 = vpop.f32.mrb[182].mxu1 }
 0xa2d   :  { %v37251_v49 = vpop.f32.mrb[183].mxu1 }
 0xa2f   :  { %29676 = vmatmul.mubr.bf16.gmra.mrb[32].mxu1 %v33384_v0  ;;  %v33387_v0 = vld [vmem:[%s42549_s13 + $0x3a0] sm:$0xff]  }
 0xa30   :  { %29679 = vmatprep.mubr.bf16.mxu1 %v33385_v40  ;;  %v42641_v40 = vpack.c.bf16 %v36847_v7, %v36837_v32  ;;  %v33390_v7 = vld [vmem:[%s42549_s13 + $0x3b8] sm:$0xff]  }
 0xa31   :  { %30588 = vmatmul.mubr.msk.bf16.gmra.mrb[68].mxu0 %vm960_vm0, %v42635_v2  ;;  %v42642_v2 = vpack.c.bf16 %v36869_v18, %v36860_v57 }
 0xa32   :  { %30591 = vmatprep.mubr.msk.bf16.mxu0 %vm960_vm0, %v42636_v12  ;;  %v37263_v33 = vpop.f32.mrb[184].mxu1 }
 0xa33   :  { %42637 = vst [vmem:[#allocation15_spill] sm:$0xff] %v37263_v33  ;;  %v37268_v9 = vpop.f32.mrb[185].mxu1 }
 0xa34   :  { %42638 = vst [vmem:[#allocation16_spill] sm:$0xff] %v37268_v9  ;;  %v37273_v44 = vpop.f32.mrb[186].mxu1 }
 0xa35   :  { %42639 = vst [vmem:[#allocation17_spill] sm:$0xff] %v37273_v44  ;;  %v37277_v61 = vpop.f32.mrb[187].mxu1 }
 0xa36   :  { %42640 = vst [vmem:[#allocation18_spill] sm:$0xff] %v37277_v61 }
 0xa37   :  { %29680 = vmatmul.mubr.bf16.gmra.mrb[36].mxu1 %v33386_v15  ;;  %v33389_v15 = vld [vmem:[%s42549_s13 + $0x3b0] sm:$0xff]  }
 0xa38   :  { %29683 = vmatprep.mubr.bf16.mxu1 %v33387_v0  ;;  %v42647_v0 = vpack.c.bf16 %v36865_v11, %v36855_v41 }
 0xa39   :  { %30592 = vmatmul.mubr.msk.bf16.gmra.mrb[72].mxu0 %vm960_vm0, %v42641_v40  ;;  %v42648_v40 = vpack.c.bf16 %v36887_v34, %v36878_v55  ;;  %v42649_v34 = vpack.c.bf16 %v36883_v45, %v36873_v54  ;;  %v33394_v45 = vld [vmem:[%s42549_s13 + $0x3d8] sm:$0xff]  }
 0xa3a   :  { %30595 = vmatprep.mubr.msk.bf16.mxu0 %vm960_vm0, %v42642_v2  ;;  %v37289_v12 = vpop.f32.mrb[188].mxu1 }
 0xa3b   :  { %42643 = vst [vmem:[#allocation19_spill] sm:$0xff] %v37289_v12  ;;  %v37294_v26 = vpop.f32.mrb[189].mxu1 }
 0xa3c   :  { %42644 = vst [vmem:[#allocation20_spill] sm:$0xff] %v37294_v26  ;;  %v37299_v32 = vpop.f32.mrb[190].mxu1 }
 0xa3d   :  { %42645 = vst [vmem:[#allocation21_spill] sm:$0xff] %v37299_v32  ;;  %v37303_v57 = vpop.f32.mrb[191].mxu1 }
 0xa3e   :  { %42646 = vst [vmem:[#allocation22_spill] sm:$0xff] %v37303_v57 }
 0xa3f   :  { %29684 = vmatmul.mubr.bf16.gmra.mrb[40].mxu1 %v33388_v47  ;;  %v33391_v47 = vld [vmem:[%s42549_s13 + $0x3c0] sm:$0xff]  }
 0xa40   :  { %29687 = vmatprep.mubr.bf16.mxu1 %v33389_v15 }
 0xa41   :  { %30596 = vmatmul.mubr.msk.bf16.gmra.mrb[76].mxu0 %vm960_vm0, %v42647_v0  ;;  %v42650_v0 = vld [vmem:[#allocation3_spill] sm:$0xff] }
 0xa42   :  { %30599 = vmatprep.mubr.msk.bf16.mxu0 %vm960_vm0, %v42648_v40  ;;  %v37315_v2 = vpop.f32.mrb[192].mxu1  ;;  %v42651_v40 = vpack.c.bf16 %v36905_v59, %v42650_v0  ;;  %v42655_v0 = vld [vmem:[#allocation8_spill] sm:$0xff] }
 0xa43   :  { %v12597_v60 = vpop.f32.mrb[193].mxu1 }
 0xa44   :  { %v37323_v15 = vpop.f32.mrb[194].mxu1 }
 0xa45   :  { %v12600_v41 = vpop.f32.mrb[195].mxu1 }
 0xa46   :  { %v16244_v55 = vpack.c.bf16 %v12600_v41, %v12597_v60  ;;  %v33393_v60 = vld [vmem:[%s42549_s13 + $0x3d0] sm:$0xff]   ;;  %v42653_v41 = vld [vmem:[#allocation2_spill] sm:$0xff] }
 0xa47   :  { %29688 = vmatmul.mubr.bf16.gmra.mrb[44].mxu1 %v33390_v7 }
 0xa48   :  { %29691 = vmatprep.mubr.bf16.mxu1 %v33391_v47  ;;  %v42652_v47 = vld [vmem:[#allocation4_spill] sm:$0xff] }
 0xa49   :  { %30600 = vmatmul.mubr.msk.bf16.gmra.mrb[80].mxu0 %vm960_vm0, %v42649_v34  ;;  %v42654_v34 = vpack.c.bf16 %v42652_v47, %v42653_v41  ;;  %v42658_v47 = vld [vmem:[#allocation7_spill] sm:$0xff]  ;;  %v42659_v41 = vld [vmem:[#allocation5_spill] sm:$0xff] }
 0xa4a   :  { %30603 = vmatprep.mubr.msk.bf16.mxu0 %vm960_vm0, %v42651_v40  ;;  %v37335_v18 = vpop.f32.mrb[196].mxu1  ;;  %v42656_v40 = vld [vmem:[#allocation6_spill] sm:$0xff] }
 0xa4b   :  { %v12613_v58 = vpop.f32.mrb[197].mxu1  ;;  %v42657_v35 = vpack.c.bf16 %v42655_v0, %v42656_v40  ;;  %v42661_v0 = vld [vmem:[#allocation12_spill] sm:$0xff]  ;;  %v42662_v40 = vld [vmem:[#allocation10_spill] sm:$0xff] }
 0xa4c   :  { %v37343_v7 = vpop.f32.mrb[198].mxu1  ;;  %v42663_v32 = vpack.c.bf16 %v42661_v0, %v42662_v40  ;;  %v33433_v0 = vld [vmem:[%s42552_s14 + $0x60] sm:$0xff]   ;;  %v42667_v40 = vpack.c.bf16 %v36959_v48, %v36947_v22  ;;  %v33404_v22 = vld [vmem:[%s42549_s13 + $0x408] sm:$0xff]  }
 0xa4d   :  { %v12616_v54 = vpop.f32.mrb[199].mxu1  ;;  %30691 = vmatprep.subr.bf16.mxu0 %v33433_v0 }
 0xa4e   :  { %v16246_v59 = vpack.c.bf16 %v12616_v54, %v12613_v58  ;;  %v33395_v58 = vld [vmem:[%s42549_s13 + $0x3e0] sm:$0xff]  }
 0xa4f   :  { %29692 = vmatmul.mubr.bf16.gmra.mrb[48].mxu1 %v33392_v62 }
 0xa50   :  { %29695 = vmatprep.mubr.bf16.mxu1 %v33393_v60  ;;  %v33396_v60 = vld [vmem:[%s42549_s13 + $0x3e8] sm:$0xff]  }
 0xa51   :  { %30604 = vmatmul.mubr.msk.bf16.gmra.mrb[84].mxu0 %vm960_vm0, %v42654_v34  ;;  %v42660_v34 = vpack.c.bf16 %v42658_v47, %v42659_v41  ;;  %v42664_v47 = vld [vmem:[#allocation11_spill] sm:$0xff]  ;;  %v42665_v41 = vld [vmem:[#allocation9_spill] sm:$0xff] }
 0xa52   :  { %30607 = vmatprep.mubr.msk.bf16.mxu0 %vm960_vm0, %v42657_v35  ;;  %v37355_v11 = vpop.f32.mrb[200].mxu1 }
 0xa53   :  { %v37360_v12 = vpop.f32.mrb[201].mxu1 }
 0xa54   :  { %v37365_v62 = vpop.f32.mrb[202].mxu1 }
 0xa55   :  { %v37369_v54 = vpop.f32.mrb[203].mxu1 }
 0xa56   :  { %v16248_v35 = vpack.c.bf16 %v37369_v54, %v37360_v12  ;;  %v33399_v12 = vld [vmem:[%s42549_s13 + $0x3f0] sm:$0xff]  }
 0xa57   :  { %29696 = vmatmul.mubr.bf16.gmra.mrb[52].mxu1 %v33394_v45 }
 0xa58   :  { %29699 = vmatprep.mubr.bf16.mxu1 %v33395_v58 }
 0xa59   :  { %30608 = vmatmul.mubr.msk.bf16.gmra.mrb[88].mxu0 %vm960_vm0, %v42660_v34  ;;  %v42666_v34 = vpack.c.bf16 %v42664_v47, %v42665_v41  ;;  %v33403_v47 = vld [vmem:[%s42549_s13 + $0x400] sm:$0xff]  }
 0xa5a   :  { %30611 = vmatprep.mubr.msk.bf16.mxu0 %vm960_vm0, %v42663_v32  ;;  %v37381_v26 = vpop.f32.mrb[204].mxu1  ;;  %v42669_v32 = vld [vmem:[#allocation13_spill] sm:$0xff] }
 0xa5b   :  { %v37386_v57 = vpop.f32.mrb[205].mxu1 }
 0xa5c   :  { %v37391_v45 = vpop.f32.mrb[206].mxu1 }
 0xa5d   :  { %v37395_v54 = vpop.f32.mrb[207].mxu1 }
 0xa5f   :  { %29700 = vmatmul.mubr.bf16.gmra.mrb[56].mxu1 %v33396_v60  ;;  %v33400_v60 = vld [vmem:[%s42549_s13 + $0x3f8] sm:$0xff]  }
 0xa60   :  { %29703 = vmatprep.mubr.bf16.mxu1 %v33399_v12 }
 0xa61   :  { %30612 = vmatmul.mubr.msk.bf16.gmra.mrb[92].mxu0 %vm960_vm0, %v42666_v34 }
 0xa62   :  { %30615 = vmatprep.mubr.msk.bf16.mxu0 %vm960_vm0, %v42667_v40  ;;  %v37410_v58 = vpop.f32.mrb[208].mxu1  ;;  %v42668_v40 = vld [vmem:[#allocation14_spill] sm:$0xff] }
 0xa63   :  { %v37415_v12 = vpop.f32.mrb[209].mxu1  ;;  %v42670_v33 = vpack.c.bf16 %v42668_v40, %v42669_v32  ;;  %v42672_v32 = vpack.c.bf16 %v37343_v7, %v37335_v18  ;;  %v33410_v18 = vld [vmem:[%s42549_s13 + $0x438] sm:$0xff]  }
 0xa64   :  { %v37420_v41 = vpop.f32.mrb[210].mxu1 }
 0xa65   :  { %v37424_v48 = vpop.f32.mrb[211].mxu1 }
 0xa66   :  { %v16252_v34 = vpack.c.bf16 %v37424_v48, %v37415_v12  ;;  %v42671_v48 = vpack.c.bf16 %v37323_v15, %v37315_v2  ;;  %v33407_v2 = vld [vmem:[%s42549_s13 + $0x420] sm:$0xff]  }
 0xa67   :  { %29704 = vmatmul.mubr.bf16.gmra.mrb[60].mxu1 %v33400_v60  ;;  %v33405_v60 = vld [vmem:[%s42549_s13 + $0x410] sm:$0xff]  }
 0xa68   :  { %29707 = vmatprep.mubr.bf16.mxu1 %v33403_v47  ;;  %v33434_v47 = vld [vmem:[%s42552_s14 + $0x68] sm:$0xff]  }
 0xa69   :  { %30616 = vmatmul.mubr.msk.bf16.gmra.mrb[96].mxu0 %vm960_vm0, %v42670_v33 }
 0xa6a   :  { %30627 = vmatprep.mubr.msk.bf16.mxu0 %vm960_vm0, %v16244_v55  ;;  %v37433_v44 = vpop.f32.mrb[212].mxu1 }
 0xa6b   :  { %v37438_v9 = vpop.f32.mrb[213].mxu1 }
 0xa6c   :  { %v37443_v12 = vpop.f32.mrb[214].mxu1 }
 0xa6d   :  { %v37447_v33 = vpop.f32.mrb[215].mxu1 }
 0xa6e   :  { %v16254_v55 = vpack.c.bf16 %v37447_v33, %v37438_v9  ;;  %v33406_v9 = vld [vmem:[%s42549_s13 + $0x418] sm:$0xff]  }
 0xa6f   :  { %29708 = vmatmul.mubr.bf16.gmra.mrb[64].mxu1 %v33404_v22 }
 0xa70   :  { %29711 = vmatprep.mubr.bf16.mxu1 %v33405_v60  ;;  %v33437_v60 = vld [vmem:[%s42552_s14 + $0x70] sm:$0xff]  }
 0xa71   :  { %30628 = vmatmul.mubr.msk.bf16.vlgmr.msra.gmra.mrb[36].mxu0 %vm960_vm0, %v42671_v48  ;;  %v33438_v48 = vld [vmem:[%s42552_s14 + $0x78] sm:$0xff]  }
 0xa72   :  { %30631 = vmatprep.mubr.msk.bf16.mxu0 %vm960_vm0, %v16246_v59  ;;  %v37459_v40 = vpop.f32.mrb[216].mxu1  ;;  %30692 = vmatpush3.bf16.msra.mxu0 %v33433_v0 }
 0xa73   :  { %v37464_v22 = vpop.f32.mrb[217].mxu1  ;;  %30693 = vmatprep.subr.bf16.mxu0 %v33434_v47 }
 0xa74   :  { %v37472_v15 = vpop.f32.mrb[218].mxu1 }
 0xa75   :  { %v16257_v59 = vpack.c.bf16 %v37472_v15, %v37459_v40  ;;  %v12696_v0 = vpop.f32.mrb[219].mxu1 }
 0xa76   :  { %v16256_v33 = vpack.c.bf16 %v12696_v0, %v37464_v22  ;;  %30694 = vmatpush3.bf16.msra.mxu0 %v33434_v47  ;;  %v33408_v47 = vld [vmem:[%s42549_s13 + $0x428] sm:$0xff]   ;;  %v33409_v22 = vld [vmem:[%s42549_s13 + $0x430] sm:$0xff]  }
 0xa77   :  { %29712 = vmatmul.mubr.bf16.gmra.mrb[68].mxu1 %v33406_v9  ;;  %30695 = vmatprep.subr.bf16.mxu0 %v33437_v60 }
 0xa78   :  { %29715 = vmatprep.mubr.bf16.mxu1 %v33407_v2 }
 0xa79   :  { %30632 = vmatmul.mubr.msk.bf16.gmra.mrb[40].mxu0 %vm960_vm0, %v42672_v32  ;;  %v42673_v32 = vpack.c.bf16 %v37365_v62, %v37355_v11 }
 0xa7a   :  { %30635 = vmatprep.mubr.msk.bf16.mxu0 %vm960_vm0, %v16248_v35  ;;  %v37485_v61 = vpop.f32.mrb[220].mxu1  ;;  %30696 = vmatpush3.bf16.msra.mxu0 %v33437_v60  ;;  %v42674_v60 = vpack.c.bf16 %v37395_v54, %v37386_v57  ;;  %v42675_v54 = vpack.c.bf16 %v37391_v45, %v37381_v26 }
 0xa7b   :  { %v12709_v9 = vpop.f32.mrb[221].mxu1  ;;  %30697 = vmatprep.subr.bf16.mxu0 %v33438_v48 }
 0xa7c   :  { %v37493_v2 = vpop.f32.mrb[222].mxu1 }
 0xa7d   :  { %v12712_v7 = vpop.f32.mrb[223].mxu1 }
 0xa7e   :  { %v16258_v35 = vpack.c.bf16 %v12712_v7, %v12709_v9  ;;  %30698 = vmatpush3.bf16.msra.mxu0 %v33438_v48  ;;  %v33411_v48 = vld [vmem:[%s42549_s13 + $0x440] sm:$0xff]   ;;  %v33412_v7 = vld [vmem:[%s42549_s13 + $0x448] sm:$0xff]  }
 0xa7f   :  { %29716 = vmatmul.mubr.bf16.gmra.mrb[72].mxu1 %v33408_v47 }
 0xa80   :  { %29719 = vmatprep.mubr.bf16.mxu1 %v33409_v22 }
 0xa81   :  { %30636 = vmatmul.mubr.msk.bf16.gmra.mrb[44].mxu0 %vm960_vm0, %v42673_v32 }
 0xa82   :  { %30639 = vmatprep.mubr.msk.bf16.mxu0 %vm960_vm0, %v42674_v60  ;;  %v37505_v0 = vpop.f32.mrb[224].mxu1  ;;  %v33413_v60 = vld [vmem:[%s42549_s13 + $0x450] sm:$0xff]  }
 0xa83   :  { %v12725_v9 = vpop.f32.mrb[225].mxu1 }
 0xa84   :  { %v37513_v47 = vpop.f32.mrb[226].mxu1 }
 0xa85   :  { %v16261_v11 = vpack.c.bf16 %v37513_v47, %v37505_v0  ;;  %v12728_v62 = vpop.f32.mrb[227].mxu1 }
 0xa86   :  { %v16260_v57 = vpack.c.bf16 %v12728_v62, %v12725_v9  ;;  %v33414_v62 = vld [vmem:[%s42549_s13 + $0x458] sm:$0xff]  }
 0xa87   :  { %29720 = vmatmul.mubr.bf16.gmra.mrb[76].mxu1 %v33410_v18 }
 0xa88   :  { %29723 = vmatprep.mubr.bf16.mxu1 %v33411_v48 }
 0xa89   :  { %30640 = vmatmul.mubr.msk.bf16.gmra.mrb[48].mxu0 %vm960_vm0, %v42675_v54 }
 0xa8a   :  { %30643 = vmatprep.mubr.msk.bf16.mxu0 %vm960_vm0, %v16252_v34  ;;  %v37522_v22 = vpop.f32.mrb[228].mxu1  ;;  %v42676_v34 = vpack.c.bf16 %v37420_v41, %v37410_v58 }
 0xa8b   :  { %v12741_v32 = vpop.f32.mrb[229].mxu1 }
 0xa8c   :  { %v37530_v18 = vpop.f32.mrb[230].mxu1 }
 0xa8d   :  { %v12744_v45 = vpop.f32.mrb[231].mxu1 }
 0xa8e   :  { %v16262_v9 = vpack.c.bf16 %v12744_v45, %v12741_v32  ;;  %v33415_v32 = vld [vmem:[%s42549_s13 + $0x460] sm:$0xff]  }
 0xa8f   :  { %29724 = vmatmul.mubr.bf16.gmra.mrb[80].mxu1 %v33412_v7 }
 0xa90   :  { %29727 = vmatprep.mubr.bf16.mxu1 %v33413_v60 }
 0xa91   :  { %30644 = vmatmul.mubr.msk.bf16.gmra.mrb[52].mxu0 %vm960_vm0, %v42676_v34  ;;  %v33416_v34 = vld [vmem:[%s42549_s13 + $0x468] sm:$0xff]  }
 0xa92   :  { %30647 = vmatprep.mubr.msk.bf16.mxu0 %vm960_vm0, %v16254_v55  ;;  %v37539_v48 = vpop.f32.mrb[232].mxu1  ;;  %v42677_v55 = vpack.c.bf16 %v37443_v12, %v37433_v44 }
 0xa93   :  { %v12757_v54 = vpop.f32.mrb[233].mxu1 }
 0xa94   :  { %v37547_v7 = vpop.f32.mrb[234].mxu1 }
 0xa95   :  { %v16265_v58 = vpack.c.bf16 %v37547_v7, %v37539_v48  ;;  %v12760_v41 = vpop.f32.mrb[235].mxu1 }
 0xa96   :  { %v16264_v60 = vpack.c.bf16 %v12760_v41, %v12757_v54  ;;  %v33417_v54 = vld [vmem:[%s42549_s13 + $0x470] sm:$0xff]   ;;  %v33418_v41 = vld [vmem:[%s42549_s13 + $0x478] sm:$0xff]  }
 0xa97   :  { %29728 = vmatmul.mubr.bf16.gmra.mrb[84].mxu1 %v33414_v62 }
 0xa98   :  { %29731 = vmatprep.mubr.bf16.mxu1 %v33415_v32 }
 0xa99   :  { %30648 = vmatmul.mubr.msk.bf16.gmra.mrb[56].mxu0 %vm960_vm0, %v42677_v55 }
 0xa9a   :  { %30651 = vmatprep.mubr.msk.bf16.mxu0 %vm960_vm0, %v16256_v33  ;;  %v37556_v45 = vpop.f32.mrb[236].mxu1 }
 0xa9b   :  { %v12773_v26 = vpop.f32.mrb[237].mxu1 }
 0xa9c   :  { %v37564_v62 = vpop.f32.mrb[238].mxu1 }
 0xa9d   :  { %v12776_v12 = vpop.f32.mrb[239].mxu1 }
 0xa9e   :  { %v16266_v32 = vpack.c.bf16 %v12776_v12, %v12773_v26  ;;  %v33419_v26 = vld [vmem:[%s42549_s13 + $0x480] sm:$0xff]   ;;  %v33420_v12 = vld [vmem:[%s42549_s13 + $0x488] sm:$0xff]  }
 0xa9f   :  { %29732 = vmatmul.mubr.bf16.gmra.mrb[88].mxu1 %v33416_v34 }
 0xaa0   :  { %29735 = vmatprep.mubr.bf16.mxu1 %v33417_v54 }
 0xaa1   :  { %30652 = vmatmul.mubr.msk.bf16.gmra.mrb[60].mxu0 %vm960_vm0, %v16257_v59 }
 0xaa2   :  { %30655 = vmatprep.mubr.msk.bf16.mxu0 %vm960_vm0, %v16258_v35  ;;  %v37573_v33 = vpop.f32.mrb[240].mxu1  ;;  %v42678_v35 = vpack.c.bf16 %v37493_v2, %v37485_v61 }
 0xaa3   :  { %v12789_v55 = vpop.f32.mrb[241].mxu1 }
 0xaa4   :  { %v37581_v34 = vpop.f32.mrb[242].mxu1 }
 0xaa5   :  { %v16269_v40 = vpack.c.bf16 %v37581_v34, %v37573_v33  ;;  %v12792_v15 = vpop.f32.mrb[243].mxu1 }
 0xaa6   :  { %v16268_v59 = vpack.c.bf16 %v12792_v15, %v12789_v55  ;;  %v33421_v55 = vld [vmem:[%s42549_s13 + $0x490] sm:$0xff]   ;;  %v33422_v15 = vld [vmem:[%s42549_s13 + $0x498] sm:$0xff]  }
 0xaa7   :  { %29736 = vmatmul.mubr.bf16.gmra.mrb[92].mxu1 %v33418_v41 }
 0xaa8   :  { %29739 = vmatprep.mubr.bf16.mxu1 %v33419_v26 }
 0xaa9   :  { %30656 = vmatmul.mubr.msk.bf16.gmra.mrb[64].mxu0 %vm960_vm0, %v42678_v35 }
 0xaaa   :  { %30659 = vmatprep.mubr.msk.bf16.mxu0 %vm960_vm0, %v16260_v57  ;;  %v37590_v54 = vpop.f32.mrb[244].mxu1 }
 0xaab   :  { %v12805_v44 = vpop.f32.mrb[245].mxu1 }
 0xaac   :  { %v37598_v41 = vpop.f32.mrb[246].mxu1 }
 0xaad   :  { %v12808_v2 = vpop.f32.mrb[247].mxu1 }
 0xaae   :  { %v16270_v26 = vpack.c.bf16 %v12808_v2, %v12805_v44  ;;  %v33423_v44 = vld [vmem:[%s42549_s13 + $0x4a0] sm:$0xff]   ;;  %v33424_v2 = vld [vmem:[%s42549_s13 + $0x4a8] sm:$0xff]  }
 0xaaf   :  { %29740 = vmatmul.mubr.bf16.gmra.mrb[96].mxu1 %v33420_v12 }
 0xab0   :  { %29743 = vmatprep.mubr.bf16.mxu1 %v33421_v55 }
 0xab1   :  { %30660 = vmatmul.mubr.msk.bf16.gmra.mrb[68].mxu0 %vm960_vm0, %v16261_v11 }
 0xab2   :  { %30663 = vmatprep.mubr.msk.bf16.mxu0 %vm960_vm0, %v16262_v9  ;;  %v37607_v57 = vpop.f32.mrb[248].mxu1  ;;  %v42679_v9 = vpack.c.bf16 %v37530_v18, %v37522_v22 }
 0xab3   :  { %v12821_v35 = vpop.f32.mrb[249].mxu1 }
 0xab4   :  { %v37615_v12 = vpop.f32.mrb[250].mxu1 }
 0xab5   :  { %v16273_v0 = vpack.c.bf16 %v37615_v12, %v37607_v57  ;;  %v12824_v47 = vpop.f32.mrb[251].mxu1  ;;  %v33439_v57 = vld [vmem:[%s42549_s13 + $0x500] sm:$0xff]  }
 0xab6   :  { %v16272_v11 = vpack.c.bf16 %v12824_v47, %v12821_v35  ;;  %v33425_v35 = vld [vmem:[%s42549_s13 + $0x4b0] sm:$0xff]   ;;  %v33426_v47 = vld [vmem:[%s42549_s13 + $0x4b8] sm:$0xff]  }
 0xab7   :  { %29744 = vmatmul.mubr.bf16.gmra.mrb[100].mxu1 %v33422_v15 }
 0xab8   :  { %29747 = vmatprep.mubr.bf16.mxu1 %v33423_v44 }
 0xab9   :  { %30664 = vmatmul.mubr.msk.bf16.gmra.mrb[72].mxu0 %vm960_vm0, %v42679_v9 }
 0xaba   :  { %30667 = vmatprep.mubr.msk.bf16.mxu0 %vm960_vm0, %v16264_v60  ;;  %v37624_v55 = vpop.f32.mrb[252].mxu1 }
 0xabb   :  { %v12837_v61 = vpop.f32.mrb[253].mxu1 }
 0xabc   :  { %v37632_v15 = vpop.f32.mrb[254].mxu1 }
 0xabd   :  { %v12840_v18 = vpop.f32.mrb[255].mxu1 }
 0xabe   :  { %v16274_v44 = vpack.c.bf16 %v12840_v18, %v12837_v61  ;;  %v33427_v61 = vld [vmem:[%s42549_s13 + $0x4c0] sm:$0xff]   ;;  %v33428_v18 = vld [vmem:[%s42549_s13 + $0x4c8] sm:$0xff]  }
 0xabf   :  { %29748 = vmatmul.mubr.bf16.gmra.mrb[104].mxu1 %v33424_v2 }
 0xac0   :  { %29751 = vmatprep.mubr.bf16.mxu1 %v33425_v35 }
 0xac1   :  { %30668 = vmatmul.mubr.msk.bf16.gmra.mrb[76].mxu0 %vm960_vm0, %v16265_v58 }
 0xac2   :  { %30671 = vmatprep.mubr.msk.bf16.mxu0 %vm960_vm0, %v16266_v32  ;;  %v37641_v60 = vpop.f32.mrb[0].mxu1  ;;  %v42680_v32 = vpack.c.bf16 %v37564_v62, %v37556_v45 }
 0xac3   :  { %v12853_v9 = vpop.f32.mrb[1].mxu1 }
 0xac4   :  { %v37649_v2 = vpop.f32.mrb[2].mxu1 }
 0xac5   :  { %v16277_v48 = vpack.c.bf16 %v37649_v2, %v37641_v60  ;;  %v12856_v7 = vpop.f32.mrb[3].mxu1  ;;  %v33443_v60 = vld [vmem:[%s42549_s13 + $0x520] sm:$0xff]  }
 0xac6   :  { %v16276_v58 = vpack.c.bf16 %v12856_v7, %v12853_v9  ;;  %v33429_v9 = vld [vmem:[%s42549_s13 + $0x4d0] sm:$0xff]   ;;  %v33430_v7 = vld [vmem:[%s42549_s13 + $0x4d8] sm:$0xff]  }
 0xac7   :  { %29752 = vmatmul.mubr.bf16.gmra.mrb[108].mxu1 %v33426_v47 }
 0xac8   :  { %29755 = vmatprep.mubr.bf16.mxu1 %v33427_v61 }
 0xac9   :  { %30672 = vmatmul.mubr.msk.bf16.gmra.mrb[80].mxu0 %vm960_vm0, %v42680_v32 }
 0xaca   :  { %30675 = vmatprep.mubr.msk.bf16.mxu0 %vm960_vm0, %v16268_v59  ;;  %v37658_v35 = vpop.f32.mrb[4].mxu1 }
 0xacb   :  { %v12869_v22 = vpop.f32.mrb[5].mxu1 }
 0xacc   :  { %v37666_v47 = vpop.f32.mrb[6].mxu1 }
 0xacd   :  { %v12872_v62 = vpop.f32.mrb[7].mxu1 }
 0xace   :  { %v16278_v61 = vpack.c.bf16 %v12872_v62, %v12869_v22  ;;  %v33431_v22 = vld [vmem:[%s42549_s13 + $0x4e0] sm:$0xff]   ;;  %v33432_v62 = vld [vmem:[%s42549_s13 + $0x4e8] sm:$0xff]  }
 0xacf   :  { %29756 = vmatmul.mubr.bf16.gmra.mrb[112].mxu1 %v33428_v18 }
 0xad0   :  { %29759 = vmatprep.mubr.bf16.mxu1 %v33429_v9 }
 0xad1   :  { %30676 = vmatmul.mubr.msk.bf16.gmra.mrb[84].mxu0 %vm960_vm0, %v16269_v40 }
 0xad2   :  { %30679 = vmatprep.mubr.msk.bf16.mxu0 %vm960_vm0, %v16270_v26  ;;  %v37675_v59 = vpop.f32.mrb[8].mxu1  ;;  %v42681_v26 = vpack.c.bf16 %v37598_v41, %v37590_v54 }
 0xad3   :  { %v37680_v32 = vpop.f32.mrb[9].mxu1 }
 0xad4   :  { %v37685_v18 = vpop.f32.mrb[10].mxu1 }
 0xad5   :  { %v37689_v34 = vpop.f32.mrb[11].mxu1 }
 0xad6   :  { %v16280_v40 = vpack.c.bf16 %v37689_v34, %v37680_v32 }
 0xad7   :  { %29760 = vmatmul.mubr.bf16.gmra.mrb[116].mxu1 %v33430_v7  ;;  %v33435_v7 = vld [vmem:[%s42549_s13 + $0x4f0] sm:$0xff]  }
 0xad8   :  { %29763 = vmatprep.mubr.bf16.mxu1 %v33431_v22  ;;  %v33469_v22 = vld [vmem:[%s42552_s14 + $0x80] sm:$0xff]  }
 0xad9   :  { %30680 = vmatmul.mubr.msk.bf16.gmra.mrb[88].mxu0 %vm960_vm0, %v42681_v26  ;;  %v33436_v26 = vld [vmem:[%s42549_s13 + $0x4f8] sm:$0xff]   ;;  %30763 = vmatprep.subr.bf16.mxu0 %v33469_v22 }
 0xada   :  { %30683 = vmatprep.mubr.msk.bf16.mxu0 %vm960_vm0, %v16272_v11  ;;  %v37698_v9 = vpop.f32.mrb[12].mxu1 }
 0xadb   :  { %v37703_v33 = vpop.f32.mrb[13].mxu1 }
 0xadc   :  { %v37708_v32 = vpop.f32.mrb[14].mxu1 }
 0xadd   :  { %v37712_v41 = vpop.f32.mrb[15].mxu1 }
 0xadf   :  { %29764 = vmatmul.mubr.bf16.gmra.mrb[120].mxu1 %v33432_v62 }
 0xae0   :  { %29767 = vmatprep.mubr.bf16.mxu1 %v33435_v7  ;;  %v42682_v7 = vpack.c.bf16 %v37632_v15, %v37624_v55 }
 0xae1   :  { %30684 = vmatmul.mubr.msk.bf16.gmra.mrb[92].mxu0 %vm960_vm0, %v16273_v0  ;;  %v33440_v0 = vld [vmem:[%s42549_s13 + $0x508] sm:$0xff]  }
 0xae2   :  { %30687 = vmatprep.mubr.msk.bf16.mxu0 %vm960_vm0, %v16274_v44  ;;  %v37724_v34 = vpop.f32.mrb[16].mxu1 }
 0xae3   :  { %v37729_v54 = vpop.f32.mrb[17].mxu1 }
 0xae4   :  { %v37734_v12 = vpop.f32.mrb[18].mxu1 }
 0xae5   :  { %v37738_v62 = vpop.f32.mrb[19].mxu1 }
 0xae6   :  { %v16284_v44 = vpack.c.bf16 %v37738_v62, %v37729_v54  ;;  %v33441_v54 = vld [vmem:[%s42549_s13 + $0x510] sm:$0xff]  }
 0xae7   :  { %29768 = vmatmul.mubr.bf16.gmra.mrb[124].mxu1 %v33436_v26 }
 0xae8   :  { %29771 = vmatprep.mubr.bf16.mxu1 %v33439_v57  ;;  %v33470_v57 = vld [vmem:[%s42552_s14 + $0x88] sm:$0xff]  }
 0xae9   :  { %30688 = vmatmul.mubr.msk.bf16.gmra.mrb[96].mxu0 %vm960_vm0, %v42682_v7  ;;  %v33473_v7 = vld [vmem:[%s42552_s14 + $0x90] sm:$0xff]  }
 0xaea   :  { %30699 = vmatprep.mubr.msk.bf16.mxu0 %vm960_vm0, %v16276_v58  ;;  %v37747_v11 = vpop.f32.mrb[20].mxu1 }
 0xaeb   :  { %v37752_v45 = vpop.f32.mrb[21].mxu1 }
 0xaec   :  { %v37757_v26 = vpop.f32.mrb[22].mxu1 }
 0xaed   :  { %v37761_v15 = vpop.f32.mrb[23].mxu1 }
 0xaee   :  { %v16286_v58 = vpack.c.bf16 %v37761_v15, %v37752_v45  ;;  %v33442_v45 = vld [vmem:[%s42549_s13 + $0x518] sm:$0xff]   ;;  %v42683_v15 = vpack.c.bf16 %v37666_v47, %v37658_v35 }
 0xaef   :  { %29772 = vmatmul.mubr.bf16.gmra.mrb[128].mxu1 %v33440_v0  ;;  %v33446_v35 = vld [vmem:[%s42549_s13 + $0x538] sm:$0xff]  }
 0xaf0   :  { %29775 = vmatprep.mubr.bf16.mxu1 %v33441_v54  ;;  %v33474_v54 = vld [vmem:[%s42552_s14 + $0x98] sm:$0xff]  }
 0xaf1   :  { %30700 = vmatmul.mubr.msk.bf16.vlgmr.msra.gmra.mrb[36].mxu0 %vm960_vm0, %v16277_v48 }
 0xaf2   :  { %30703 = vmatprep.mubr.msk.bf16.mxu0 %vm960_vm0, %v16278_v61  ;;  %v37773_v62 = vpop.f32.mrb[24].mxu1  ;;  %30764 = vmatpush3.bf16.msra.mxu0 %v33469_v22 }
 0xaf3   :  { %v37778_v0 = vpop.f32.mrb[25].mxu1  ;;  %30765 = vmatprep.subr.bf16.mxu0 %v33470_v57 }
 0xaf4   :  { %v37786_v2 = vpop.f32.mrb[26].mxu1 }
 0xaf5   :  { %v16289_v48 = vpack.c.bf16 %v37786_v2, %v37773_v62  ;;  %v12952_v61 = vpop.f32.mrb[27].mxu1 }
 0xaf6   :  { %v16288_v22 = vpack.c.bf16 %v12952_v61, %v37778_v0  ;;  %30766 = vmatpush3.bf16.msra.mxu0 %v33470_v57  ;;  %v33444_v57 = vld [vmem:[%s42549_s13 + $0x528] sm:$0xff]   ;;  %v33445_v0 = vld [vmem:[%s42549_s13 + $0x530] sm:$0xff]   ;;  %v42685_v61 = vpack.c.bf16 %v37712_v41, %v37703_v33  ;;  %v42686_v41 = vpack.c.bf16 %v37708_v32, %v37698_v9 }
 0xaf7   :  { %29776 = vmatmul.mubr.bf16.gmra.mrb[132].mxu1 %v33442_v45  ;;  %30767 = vmatprep.subr.bf16.mxu0 %v33473_v7 }
 0xaf8   :  { %29779 = vmatprep.mubr.bf16.mxu1 %v33443_v60 }
 0xaf9   :  { %30704 = vmatmul.mubr.msk.bf16.gmra.mrb[40].mxu0 %vm960_vm0, %v42683_v15 }
 0xafa   :  { %30707 = vmatprep.mubr.msk.bf16.mxu0 %vm960_vm0, %v16280_v40  ;;  %v37799_v55 = vpop.f32.mrb[28].mxu1  ;;  %30768 = vmatpush3.bf16.msra.mxu0 %v33473_v7  ;;  %v42684_v7 = vpack.c.bf16 %v37685_v18, %v37675_v59 }
 0xafb   :  { %v12965_v45 = vpop.f32.mrb[29].mxu1  ;;  %30769 = vmatprep.subr.bf16.mxu0 %v33474_v54 }
 0xafc   :  { %v37807_v60 = vpop.f32.mrb[30].mxu1 }
 0xafd   :  { %v12968_v47 = vpop.f32.mrb[31].mxu1 }
 0xafe   :  { %v16290_v40 = vpack.c.bf16 %v12968_v47, %v12965_v45  ;;  %30770 = vmatpush3.bf16.msra.mxu0 %v33474_v54  ;;  %v33447_v54 = vld [vmem:[%s42549_s13 + $0x540] sm:$0xff]   ;;  %v33448_v47 = vld [vmem:[%s42549_s13 + $0x548] sm:$0xff]  }
 0xaff   :  { %29780 = vmatmul.mubr.bf16.gmra.mrb[136].mxu1 %v33444_v57 }
 0xb00   :  { %29783 = vmatprep.mubr.bf16.mxu1 %v33445_v0 }
 0xb01   :  { %30708 = vmatmul.mubr.msk.bf16.gmra.mrb[44].mxu0 %vm960_vm0, %v42684_v7 }
 0xb02   :  { %30711 = vmatprep.mubr.msk.bf16.mxu0 %vm960_vm0, %v42685_v61  ;;  %v37819_v15 = vpop.f32.mrb[32].mxu1  ;;  %v33449_v61 = vld [vmem:[%s42549_s13 + $0x550] sm:$0xff]  }
 0xb03   :  { %v12981_v45 = vpop.f32.mrb[33].mxu1 }
 0xb04   :  { %v37827_v57 = vpop.f32.mrb[34].mxu1 }
 0xb05   :  { %v16293_v59 = vpack.c.bf16 %v37827_v57, %v37819_v15  ;;  %v12984_v18 = vpop.f32.mrb[35].mxu1 }
 0xb06   :  { %v16292_v33 = vpack.c.bf16 %v12984_v18, %v12981_v45  ;;  %v33450_v18 = vld [vmem:[%s42549_s13 + $0x558] sm:$0xff]  }
 0xb07   :  { %29784 = vmatmul.mubr.bf16.gmra.mrb[140].mxu1 %v33446_v35 }
 0xb08   :  { %29787 = vmatprep.mubr.bf16.mxu1 %v33447_v54 }
 0xb09   :  { %30712 = vmatmul.mubr.msk.bf16.gmra.mrb[48].mxu0 %vm960_vm0, %v42686_v41 }
 0xb0a   :  { %30715 = vmatprep.mubr.msk.bf16.mxu0 %vm960_vm0, %v16284_v44  ;;  %v37836_v0 = vpop.f32.mrb[36].mxu1  ;;  %v42687_v44 = vpack.c.bf16 %v37734_v12, %v37724_v34 }
 0xb0b   :  { %v12997_v7 = vpop.f32.mrb[37].mxu1 }
 0xb0c   :  { %v37844_v35 = vpop.f32.mrb[38].mxu1 }
 0xb0d   :  { %v13000_v32 = vpop.f32.mrb[39].mxu1 }
 0xb0e   :  { %v16294_v45 = vpack.c.bf16 %v13000_v32, %v12997_v7  ;;  %v33451_v7 = vld [vmem:[%s42549_s13 + $0x560] sm:$0xff]  }
 0xb0f   :  { %29788 = vmatmul.mubr.bf16.gmra.mrb[144].mxu1 %v33448_v47 }
 0xb10   :  { %29791 = vmatprep.mubr.bf16.mxu1 %v33449_v61 }
 0xb11   :  { %30716 = vmatmul.mubr.msk.bf16.gmra.mrb[52].mxu0 %vm960_vm0, %v42687_v44  ;;  %v33452_v44 = vld [vmem:[%s42549_s13 + $0x568] sm:$0xff]  }
 0xb12   :  { %30719 = vmatprep.mubr.msk.bf16.mxu0 %vm960_vm0, %v16286_v58  ;;  %v37853_v54 = vpop.f32.mrb[40].mxu1  ;;  %v42688_v58 = vpack.c.bf16 %v37757_v26, %v37747_v11 }
 0xb13   :  { %v13013_v41 = vpop.f32.mrb[41].mxu1 }
 0xb14   :  { %v37861_v47 = vpop.f32.mrb[42].mxu1 }
 0xb15   :  { %v16297_v34 = vpack.c.bf16 %v37861_v47, %v37853_v54  ;;  %v13016_v12 = vpop.f32.mrb[43].mxu1 }
 0xb16   :  { %v16296_v61 = vpack.c.bf16 %v13016_v12, %v13013_v41  ;;  %v33453_v41 = vld [vmem:[%s42549_s13 + $0x570] sm:$0xff]   ;;  %v33454_v12 = vld [vmem:[%s42549_s13 + $0x578] sm:$0xff]  }
 0xb17   :  { %29792 = vmatmul.mubr.bf16.gmra.mrb[148].mxu1 %v33450_v18 }
 0xb18   :  { %29795 = vmatprep.mubr.bf16.mxu1 %v33451_v7 }
 0xb19   :  { %30720 = vmatmul.mubr.msk.bf16.gmra.mrb[56].mxu0 %vm960_vm0, %v42688_v58 }
 0xb1a   :  { %30723 = vmatprep.mubr.msk.bf16.mxu0 %vm960_vm0, %v16288_v22  ;;  %v37870_v32 = vpop.f32.mrb[44].mxu1 }
 0xb1b   :  { %v13029_v9 = vpop.f32.mrb[45].mxu1 }
 0xb1c   :  { %v37878_v18 = vpop.f32.mrb[46].mxu1 }
 0xb1d   :  { %v13032_v26 = vpop.f32.mrb[47].mxu1 }
 0xb1e   :  { %v16298_v7 = vpack.c.bf16 %v13032_v26, %v13029_v9  ;;  %v33455_v9 = vld [vmem:[%s42549_s13 + $0x580] sm:$0xff]   ;;  %v33456_v26 = vld [vmem:[%s42549_s13 + $0x588] sm:$0xff]  }
 0xb1f   :  { %29796 = vmatmul.mubr.bf16.gmra.mrb[152].mxu1 %v33452_v44 }
 0xb20   :  { %29799 = vmatprep.mubr.bf16.mxu1 %v33453_v41 }
 0xb21   :  { %30724 = vmatmul.mubr.msk.bf16.gmra.mrb[60].mxu0 %vm960_vm0, %v16289_v48 }
 0xb22   :  { %30727 = vmatprep.mubr.msk.bf16.mxu0 %vm960_vm0, %v16290_v40  ;;  %v37887_v22 = vpop.f32.mrb[48].mxu1  ;;  %v42689_v40 = vpack.c.bf16 %v37807_v60, %v37799_v55 }
 0xb23   :  { %v13045_v58 = vpop.f32.mrb[49].mxu1 }
 0xb24   :  { %v37895_v44 = vpop.f32.mrb[50].mxu1 }
 0xb25   :  { %v16301_v62 = vpack.c.bf16 %v37895_v44, %v37887_v22  ;;  %v13048_v2 = vpop.f32.mrb[51].mxu1 }
 0xb26   :  { %v16300_v48 = vpack.c.bf16 %v13048_v2, %v13045_v58  ;;  %v33457_v58 = vld [vmem:[%s42549_s13 + $0x590] sm:$0xff]   ;;  %v33458_v2 = vld [vmem:[%s42549_s13 + $0x598] sm:$0xff]  }
 0xb27   :  { %29800 = vmatmul.mubr.bf16.gmra.mrb[156].mxu1 %v33454_v12 }
 0xb28   :  { %29803 = vmatprep.mubr.bf16.mxu1 %v33455_v9 }
 0xb29   :  { %30728 = vmatmul.mubr.msk.bf16.gmra.mrb[64].mxu0 %vm960_vm0, %v42689_v40 }
 0xb2a   :  { %30731 = vmatprep.mubr.msk.bf16.mxu0 %vm960_vm0, %v16292_v33  ;;  %v37904_v41 = vpop.f32.mrb[52].mxu1 }
 0xb2b   :  { %v13061_v11 = vpop.f32.mrb[53].mxu1 }
 0xb2c   :  { %v37912_v12 = vpop.f32.mrb[54].mxu1 }
 0xb2d   :  { %v13064_v60 = vpop.f32.mrb[55].mxu1 }
 0xb2e   :  { %v16302_v9 = vpack.c.bf16 %v13064_v60, %v13061_v11  ;;  %v33459_v11 = vld [vmem:[%s42549_s13 + $0x5a0] sm:$0xff]   ;;  %v33460_v60 = vld [vmem:[%s42549_s13 + $0x5a8] sm:$0xff]  }
 0xb2f   :  { %29804 = vmatmul.mubr.bf16.gmra.mrb[160].mxu1 %v33456_v26 }
 0xb30   :  { %29807 = vmatprep.mubr.bf16.mxu1 %v33457_v58 }
 0xb31   :  { %30732 = vmatmul.mubr.msk.bf16.gmra.mrb[68].mxu0 %vm960_vm0, %v16293_v59 }
 0xb32   :  { %30735 = vmatprep.mubr.msk.bf16.mxu0 %vm960_vm0, %v16294_v45  ;;  %v37921_v33 = vpop.f32.mrb[56].mxu1  ;;  %v42690_v45 = vpack.c.bf16 %v37844_v35, %v37836_v0 }
 0xb33   :  { %v13077_v40 = vpop.f32.mrb[57].mxu1 }
 0xb34   :  { %v37929_v26 = vpop.f32.mrb[58].mxu1 }
 0xb35   :  { %v16305_v15 = vpack.c.bf16 %v37929_v26, %v37921_v33  ;;  %v13080_v57 = vpop.f32.mrb[59].mxu1  ;;  %v33475_v33 = vld [vmem:[%s42549_s13 + $0x600] sm:$0xff]  }
 0xb36   :  { %v16304_v59 = vpack.c.bf16 %v13080_v57, %v13077_v40  ;;  %v33461_v40 = vld [vmem:[%s42549_s13 + $0x5b0] sm:$0xff]   ;;  %v33462_v57 = vld [vmem:[%s42549_s13 + $0x5b8] sm:$0xff]  }
 0xb37   :  { %29808 = vmatmul.mubr.bf16.gmra.mrb[164].mxu1 %v33458_v2 }
 0xb38   :  { %29811 = vmatprep.mubr.bf16.mxu1 %v33459_v11 }
 0xb39   :  { %30736 = vmatmul.mubr.msk.bf16.gmra.mrb[72].mxu0 %vm960_vm0, %v42690_v45 }
 0xb3a   :  { %30739 = vmatprep.mubr.msk.bf16.mxu0 %vm960_vm0, %v16296_v61  ;;  %v37938_v58 = vpop.f32.mrb[60].mxu1 }
 0xb3b   :  { %v13093_v55 = vpop.f32.mrb[61].mxu1 }
 0xb3c   :  { %v37946_v2 = vpop.f32.mrb[62].mxu1 }
 0xb3d   :  { %v13096_v35 = vpop.f32.mrb[63].mxu1 }
 0xb3e   :  { %v16306_v11 = vpack.c.bf16 %v13096_v35, %v13093_v55  ;;  %v33463_v55 = vld [vmem:[%s42549_s13 + $0x5c0] sm:$0xff]   ;;  %v33464_v35 = vld [vmem:[%s42549_s13 + $0x5c8] sm:$0xff]  }
 0xb3f   :  { %29812 = vmatmul.mubr.bf16.gmra.mrb[168].mxu1 %v33460_v60 }
 0xb40   :  { %29815 = vmatprep.mubr.bf16.mxu1 %v33461_v40 }
 0xb41   :  { %30740 = vmatmul.mubr.msk.bf16.gmra.mrb[76].mxu0 %vm960_vm0, %v16297_v34 }
 0xb42   :  { %30743 = vmatprep.mubr.msk.bf16.mxu0 %vm960_vm0, %v16298_v7  ;;  %v37955_v61 = vpop.f32.mrb[64].mxu1  ;;  %v42691_v7 = vpack.c.bf16 %v37878_v18, %v37870_v32 }
 0xb43   :  { %v13109_v45 = vpop.f32.mrb[65].mxu1 }
 0xb44   :  { %v37963_v60 = vpop.f32.mrb[66].mxu1 }
 0xb45   :  { %v16309_v54 = vpack.c.bf16 %v37963_v60, %v37955_v61  ;;  %v13112_v47 = vpop.f32.mrb[67].mxu1  ;;  %v33479_v61 = vld [vmem:[%s42549_s13 + $0x620] sm:$0xff]  }
 0xb46   :  { %v16308_v34 = vpack.c.bf16 %v13112_v47, %v13109_v45  ;;  %v33465_v45 = vld [vmem:[%s42549_s13 + $0x5d0] sm:$0xff]   ;;  %v33466_v47 = vld [vmem:[%s42549_s13 + $0x5d8] sm:$0xff]  }
 0xb47   :  { %29816 = vmatmul.mubr.bf16.gmra.mrb[172].mxu1 %v33462_v57 }
 0xb48   :  { %29819 = vmatprep.mubr.bf16.mxu1 %v33463_v55 }
 0xb49   :  { %30744 = vmatmul.mubr.msk.bf16.gmra.mrb[80].mxu0 %vm960_vm0, %v42691_v7 }
 0xb4a   :  { %30747 = vmatprep.mubr.msk.bf16.mxu0 %vm960_vm0, %v16300_v48  ;;  %v37972_v40 = vpop.f32.mrb[68].mxu1 }
 0xb4b   :  { %v13125_v0 = vpop.f32.mrb[69].mxu1 }
 0xb4c   :  { %v37980_v57 = vpop.f32.mrb[70].mxu1 }
 0xb4d   :  { %v13128_v18 = vpop.f32.mrb[71].mxu1 }
 0xb4e   :  { %v16310_v55 = vpack.c.bf16 %v13128_v18, %v13125_v0  ;;  %v33467_v0 = vld [vmem:[%s42549_s13 + $0x5e0] sm:$0xff]   ;;  %v33468_v18 = vld [vmem:[%s42549_s13 + $0x5e8] sm:$0xff]  }
 0xb4f   :  { %29820 = vmatmul.mubr.bf16.gmra.mrb[176].mxu1 %v33464_v35 }
 0xb50   :  { %29823 = vmatprep.mubr.bf16.mxu1 %v33465_v45 }
 0xb51   :  { %30748 = vmatmul.mubr.msk.bf16.gmra.mrb[84].mxu0 %vm960_vm0, %v16301_v62 }
 0xb52   :  { %30751 = vmatprep.mubr.msk.bf16.mxu0 %vm960_vm0, %v16302_v9  ;;  %v37989_v48 = vpop.f32.mrb[72].mxu1  ;;  %v42692_v9 = vpack.c.bf16 %v37912_v12, %v37904_v41 }
 0xb53   :  { %v37994_v7 = vpop.f32.mrb[73].mxu1 }
 0xb54   :  { %v37999_v35 = vpop.f32.mrb[74].mxu1 }
 0xb55   :  { %v38003_v44 = vpop.f32.mrb[75].mxu1 }
 0xb56   :  { %v16312_v62 = vpack.c.bf16 %v38003_v44, %v37994_v7 }
 0xb57   :  { %29824 = vmatmul.mubr.bf16.gmra.mrb[180].mxu1 %v33466_v47  ;;  %v33471_v47 = vld [vmem:[%s42549_s13 + $0x5f0] sm:$0xff]  }
 0xb58   :  { %29827 = vmatprep.mubr.bf16.mxu1 %v33467_v0  ;;  %v33505_v0 = vld [vmem:[%s42552_s14 + $0xa0] sm:$0xff]  }
 0xb59   :  { %30752 = vmatmul.mubr.msk.bf16.gmra.mrb[88].mxu0 %vm960_vm0, %v42692_v9  ;;  %v33472_v9 = vld [vmem:[%s42549_s13 + $0x5f8] sm:$0xff]   ;;  %30835 = vmatprep.subr.bf16.mxu0 %v33505_v0 }
 0xb5a   :  { %30755 = vmatprep.mubr.msk.bf16.mxu0 %vm960_vm0, %v16304_v59  ;;  %v38012_v45 = vpop.f32.mrb[76].mxu1 }
 0xb5b   :  { %v38017_v22 = vpop.f32.mrb[77].mxu1 }
 0xb5c   :  { %v38022_v7 = vpop.f32.mrb[78].mxu1 }
 0xb5d   :  { %v38026_v12 = vpop.f32.mrb[79].mxu1 }
 0xb5f   :  { %29828 = vmatmul.mubr.bf16.gmra.mrb[184].mxu1 %v33468_v18 }
 0xb60   :  { %29831 = vmatprep.mubr.bf16.mxu1 %v33471_v47  ;;  %v42693_v47 = vpack.c.bf16 %v37946_v2, %v37938_v58 }
 0xb61   :  { %30756 = vmatmul.mubr.msk.bf16.gmra.mrb[92].mxu0 %vm960_vm0, %v16305_v15  ;;  %v33476_v15 = vld [vmem:[%s42549_s13 + $0x608] sm:$0xff]  }
 0xb62   :  { %30759 = vmatprep.mubr.msk.bf16.mxu0 %vm960_vm0, %v16306_v11  ;;  %v38038_v44 = vpop.f32.mrb[80].mxu1 }
 0xb63   :  { %v38043_v41 = vpop.f32.mrb[81].mxu1 }
 0xb64   :  { %v38048_v26 = vpop.f32.mrb[82].mxu1 }
 0xb65   :  { %v38052_v18 = vpop.f32.mrb[83].mxu1 }
 0xb66   :  { %v16316_v11 = vpack.c.bf16 %v38052_v18, %v38043_v41  ;;  %v33477_v41 = vld [vmem:[%s42549_s13 + $0x610] sm:$0xff]  }
 0xb67   :  { %29832 = vmatmul.mubr.bf16.gmra.mrb[188].mxu1 %v33472_v9 }
 0xb68   :  { %29835 = vmatprep.mubr.bf16.mxu1 %v33475_v33  ;;  %v33506_v33 = vld [vmem:[%s42552_s14 + $0xa8] sm:$0xff]  }
 0xb69   :  { %30760 = vmatmul.mubr.msk.bf16.gmra.mrb[96].mxu0 %vm960_vm0, %v42693_v47  ;;  %v33509_v47 = vld [vmem:[%s42552_s14 + $0xb0] sm:$0xff]  }
 0xb6a   :  { %30771 = vmatprep.mubr.msk.bf16.mxu0 %vm960_vm0, %v16308_v34  ;;  %v38061_v59 = vpop.f32.mrb[84].mxu1 }
 0xb6b   :  { %v38066_v32 = vpop.f32.mrb[85].mxu1 }
 0xb6c   :  { %v38071_v9 = vpop.f32.mrb[86].mxu1 }
 0xb6d   :  { %v38075_v2 = vpop.f32.mrb[87].mxu1 }
 0xb6e   :  { %v16318_v34 = vpack.c.bf16 %v38075_v2, %v38066_v32  ;;  %v33478_v32 = vld [vmem:[%s42549_s13 + $0x618] sm:$0xff]   ;;  %v42694_v2 = vpack.c.bf16 %v37980_v57, %v37972_v40 }
 0xb6f   :  { %29836 = vmatmul.mubr.bf16.gmra.mrb[192].mxu1 %v33476_v15  ;;  %v33482_v40 = vld [vmem:[%s42549_s13 + $0x638] sm:$0xff]  }
 0xb70   :  { %29839 = vmatprep.mubr.bf16.mxu1 %v33477_v41  ;;  %v33510_v41 = vld [vmem:[%s42552_s14 + $0xb8] sm:$0xff]  }
 0xb71   :  { %30772 = vmatmul.mubr.msk.bf16.vlgmr.msra.gmra.mrb[36].mxu0 %vm960_vm0, %v16309_v54 }
 0xb72   :  { %30775 = vmatprep.mubr.msk.bf16.mxu0 %vm960_vm0, %v16310_v55  ;;  %v38087_v18 = vpop.f32.mrb[88].mxu1  ;;  %30836 = vmatpush3.bf16.msra.mxu0 %v33505_v0 }
 0xb73   :  { %v38092_v15 = vpop.f32.mrb[89].mxu1  ;;  %30837 = vmatprep.subr.bf16.mxu0 %v33506_v33 }
 0xb74   :  { %v38100_v60 = vpop.f32.mrb[90].mxu1 }
 0xb75   :  { %v16321_v54 = vpack.c.bf16 %v38100_v60, %v38087_v18  ;;  %v13208_v55 = vpop.f32.mrb[91].mxu1 }
 0xb76   :  { %v16320_v0 = vpack.c.bf16 %v13208_v55, %v38092_v15  ;;  %30838 = vmatpush3.bf16.msra.mxu0 %v33506_v33  ;;  %v33480_v33 = vld [vmem:[%s42549_s13 + $0x628] sm:$0xff]   ;;  %v33481_v15 = vld [vmem:[%s42549_s13 + $0x630] sm:$0xff]   ;;  %v42696_v55 = vpack.c.bf16 %v38026_v12, %v38017_v22  ;;  %v42697_v12 = vpack.c.bf16 %v38022_v7, %v38012_v45 }
 0xb77   :  { %29840 = vmatmul.mubr.bf16.gmra.mrb[196].mxu1 %v33478_v32  ;;  %30839 = vmatprep.subr.bf16.mxu0 %v33509_v47 }
 0xb78   :  { %29843 = vmatprep.mubr.bf16.mxu1 %v33479_v61 }
 0xb79   :  { %30776 = vmatmul.mubr.msk.bf16.gmra.mrb[40].mxu0 %vm960_vm0, %v42694_v2 }
 0xb7a   :  { %30779 = vmatprep.mubr.msk.bf16.mxu0 %vm960_vm0, %v16312_v62  ;;  %v38113_v58 = vpop.f32.mrb[92].mxu1  ;;  %30840 = vmatpush3.bf16.msra.mxu0 %v33509_v47  ;;  %v42695_v47 = vpack.c.bf16 %v37999_v35, %v37989_v48 }
 0xb7b   :  { %v13221_v32 = vpop.f32.mrb[93].mxu1  ;;  %30841 = vmatprep.subr.bf16.mxu0 %v33510_v41 }
 0xb7c   :  { %v38121_v61 = vpop.f32.mrb[94].mxu1 }
 0xb7d   :  { %v13224_v57 = vpop.f32.mrb[95].mxu1 }
 0xb7e   :  { %v16322_v62 = vpack.c.bf16 %v13224_v57, %v13221_v32  ;;  %30842 = vmatpush3.bf16.msra.mxu0 %v33510_v41  ;;  %v33483_v41 = vld [vmem:[%s42549_s13 + $0x640] sm:$0xff]   ;;  %v33484_v57 = vld [vmem:[%s42549_s13 + $0x648] sm:$0xff]  }
 0xb7f   :  { %29844 = vmatmul.mubr.bf16.gmra.mrb[200].mxu1 %v33480_v33 }
 0xb80   :  { %29847 = vmatprep.mubr.bf16.mxu1 %v33481_v15 }
 0xb81   :  { %30780 = vmatmul.mubr.msk.bf16.gmra.mrb[44].mxu0 %vm960_vm0, %v42695_v47 }
 0xb82   :  { %30783 = vmatprep.mubr.msk.bf16.mxu0 %vm960_vm0, %v42696_v55  ;;  %v38133_v2 = vpop.f32.mrb[96].mxu1  ;;  %v33485_v55 = vld [vmem:[%s42549_s13 + $0x650] sm:$0xff]  }
 0xb83   :  { %v13237_v32 = vpop.f32.mrb[97].mxu1 }
 0xb84   :  { %v38141_v33 = vpop.f32.mrb[98].mxu1 }
 0xb85   :  { %v16325_v48 = vpack.c.bf16 %v38141_v33, %v38133_v2  ;;  %v13240_v35 = vpop.f32.mrb[99].mxu1 }
 0xb86   :  { %v16324_v22 = vpack.c.bf16 %v13240_v35, %v13237_v32  ;;  %v33486_v35 = vld [vmem:[%s42549_s13 + $0x658] sm:$0xff]  }
 0xb87   :  { %29848 = vmatmul.mubr.bf16.gmra.mrb[204].mxu1 %v33482_v40 }
 0xb88   :  { %29851 = vmatprep.mubr.bf16.mxu1 %v33483_v41 }
 0xb89   :  { %30784 = vmatmul.mubr.msk.bf16.gmra.mrb[48].mxu0 %vm960_vm0, %v42697_v12 }
 0xb8a   :  { %30787 = vmatprep.mubr.msk.bf16.mxu0 %vm960_vm0, %v16316_v11  ;;  %v38150_v15 = vpop.f32.mrb[100].mxu1  ;;  %v42698_v11 = vpack.c.bf16 %v38048_v26, %v38038_v44 }
 0xb8b   :  { %v13253_v47 = vpop.f32.mrb[101].mxu1 }
 0xb8c   :  { %v38158_v40 = vpop.f32.mrb[102].mxu1 }
 0xb8d   :  { %v13256_v7 = vpop.f32.mrb[103].mxu1 }
 0xb8e   :  { %v16326_v32 = vpack.c.bf16 %v13256_v7, %v13253_v47  ;;  %v33487_v47 = vld [vmem:[%s42549_s13 + $0x660] sm:$0xff]  }
 0xb8f   :  { %29852 = vmatmul.mubr.bf16.gmra.mrb[208].mxu1 %v33484_v57 }
 0xb90   :  { %29855 = vmatprep.mubr.bf16.mxu1 %v33485_v55 }
 0xb91   :  { %30788 = vmatmul.mubr.msk.bf16.gmra.mrb[52].mxu0 %vm960_vm0, %v42698_v11  ;;  %v33488_v11 = vld [vmem:[%s42549_s13 + $0x668] sm:$0xff]  }
 0xb92   :  { %30791 = vmatprep.mubr.msk.bf16.mxu0 %vm960_vm0, %v16318_v34  ;;  %v38167_v41 = vpop.f32.mrb[104].mxu1  ;;  %v42699_v34 = vpack.c.bf16 %v38071_v9, %v38061_v59 }
 0xb93   :  { %v13269_v12 = vpop.f32.mrb[105].mxu1 }
 0xb94   :  { %v38175_v57 = vpop.f32.mrb[106].mxu1 }
 0xb95   :  { %v16329_v44 = vpack.c.bf16 %v38175_v57, %v38167_v41  ;;  %v13272_v26 = vpop.f32.mrb[107].mxu1 }
 0xb96   :  { %v16328_v55 = vpack.c.bf16 %v13272_v26, %v13269_v12  ;;  %v33489_v12 = vld [vmem:[%s42549_s13 + $0x670] sm:$0xff]   ;;  %v33490_v26 = vld [vmem:[%s42549_s13 + $0x678] sm:$0xff]  }
 0xb97   :  { %29856 = vmatmul.mubr.bf16.gmra.mrb[212].mxu1 %v33486_v35 }
 0xb98   :  { %29859 = vmatprep.mubr.bf16.mxu1 %v33487_v47 }
 0xb99   :  { %30792 = vmatmul.mubr.msk.bf16.gmra.mrb[56].mxu0 %vm960_vm0, %v42699_v34 }
 0xb9a   :  { %30795 = vmatprep.mubr.msk.bf16.mxu0 %vm960_vm0, %v16320_v0  ;;  %v38184_v7 = vpop.f32.mrb[108].mxu1 }
 0xb9b   :  { %v13285_v45 = vpop.f32.mrb[109].mxu1 }
 0xb9c   :  { %v38192_v35 = vpop.f32.mrb[110].mxu1 }
 0xb9d   :  { %v13288_v9 = vpop.f32.mrb[111].mxu1 }
 0xb9e   :  { %v16330_v47 = vpack.c.bf16 %v13288_v9, %v13285_v45  ;;  %v33491_v45 = vld [vmem:[%s42549_s13 + $0x680] sm:$0xff]   ;;  %v33492_v9 = vld [vmem:[%s42549_s13 + $0x688] sm:$0xff]  }
 0xb9f   :  { %29860 = vmatmul.mubr.bf16.gmra.mrb[216].mxu1 %v33488_v11 }
 0xba0   :  { %29863 = vmatprep.mubr.bf16.mxu1 %v33489_v12 }
 0xba1   :  { %30796 = vmatmul.mubr.msk.bf16.gmra.mrb[60].mxu0 %vm960_vm0, %v16321_v54 }
 0xba2   :  { %30799 = vmatprep.mubr.msk.bf16.mxu0 %vm960_vm0, %v16322_v62  ;;  %v38201_v0 = vpop.f32.mrb[112].mxu1  ;;  %v42700_v62 = vpack.c.bf16 %v38121_v61, %v38113_v58 }
 0xba3   :  { %v13301_v34 = vpop.f32.mrb[113].mxu1 }
 0xba4   :  { %v38209_v11 = vpop.f32.mrb[114].mxu1 }
 0xba5   :  { %v16333_v18 = vpack.c.bf16 %v38209_v11, %v38201_v0  ;;  %v13304_v60 = vpop.f32.mrb[115].mxu1 }
 0xba6   :  { %v16332_v54 = vpack.c.bf16 %v13304_v60, %v13301_v34  ;;  %v33493_v34 = vld [vmem:[%s42549_s13 + $0x690] sm:$0xff]   ;;  %v33494_v60 = vld [vmem:[%s42549_s13 + $0x698] sm:$0xff]  }
 0xba7   :  { %29864 = vmatmul.mubr.bf16.gmra.mrb[220].mxu1 %v33490_v26 }
 0xba8   :  { %29867 = vmatprep.mubr.bf16.mxu1 %v33491_v45 }
 0xba9   :  { %30800 = vmatmul.mubr.msk.bf16.gmra.mrb[64].mxu0 %vm960_vm0, %v42700_v62 }
 0xbaa   :  { %30803 = vmatprep.mubr.msk.bf16.mxu0 %vm960_vm0, %v16324_v22  ;;  %v38218_v12 = vpop.f32.mrb[116].mxu1 }
 0xbab   :  { %v13317_v59 = vpop.f32.mrb[117].mxu1 }
 0xbac   :  { %v38226_v26 = vpop.f32.mrb[118].mxu1 }
 0xbad   :  { %v13320_v61 = vpop.f32.mrb[119].mxu1 }
 0xbae   :  { %v16334_v45 = vpack.c.bf16 %v13320_v61, %v13317_v59  ;;  %v33495_v59 = vld [vmem:[%s42549_s13 + $0x6a0] sm:$0xff]   ;;  %v33496_v61 = vld [vmem:[%s42549_s13 + $0x6a8] sm:$0xff]  }
 0xbaf   :  { %29868 = vmatmul.mubr.bf16.gmra.mrb[224].mxu1 %v33492_v9 }
 0xbb0   :  { %29871 = vmatprep.mubr.bf16.mxu1 %v33493_v34 }
 0xbb1   :  { %30804 = vmatmul.mubr.msk.bf16.gmra.mrb[68].mxu0 %vm960_vm0, %v16325_v48 }
 0xbb2   :  { %30807 = vmatprep.mubr.msk.bf16.mxu0 %vm960_vm0, %v16326_v32  ;;  %v38235_v22 = vpop.f32.mrb[120].mxu1  ;;  %v42701_v32 = vpack.c.bf16 %v38158_v40, %v38150_v15 }
 0xbb3   :  { %v13333_v62 = vpop.f32.mrb[121].mxu1 }
 0xbb4   :  { %v38243_v9 = vpop.f32.mrb[122].mxu1 }
 0xbb5   :  { %v16337_v2 = vpack.c.bf16 %v38243_v9, %v38235_v22  ;;  %v13336_v33 = vpop.f32.mrb[123].mxu1  ;;  %v33511_v22 = vld [vmem:[%s42549_s13 + $0x700] sm:$0xff]  }
 0xbb6   :  { %v16336_v48 = vpack.c.bf16 %v13336_v33, %v13333_v62  ;;  %v33497_v62 = vld [vmem:[%s42549_s13 + $0x6b0] sm:$0xff]   ;;  %v33498_v33 = vld [vmem:[%s42549_s13 + $0x6b8] sm:$0xff]  }
 0xbb7   :  { %29872 = vmatmul.mubr.bf16.gmra.mrb[228].mxu1 %v33494_v60 }
 0xbb8   :  { %29875 = vmatprep.mubr.bf16.mxu1 %v33495_v59 }
 0xbb9   :  { %30808 = vmatmul.mubr.msk.bf16.gmra.mrb[72].mxu0 %vm960_vm0, %v42701_v32 }
 0xbba   :  { %30811 = vmatprep.mubr.msk.bf16.mxu0 %vm960_vm0, %v16328_v55  ;;  %v38252_v34 = vpop.f32.mrb[124].mxu1 }
 0xbbb   :  { %v13349_v58 = vpop.f32.mrb[125].mxu1 }
 0xbbc   :  { %v38260_v60 = vpop.f32.mrb[126].mxu1 }
 0xbbd   :  { %v13352_v40 = vpop.f32.mrb[127].mxu1 }
 0xbbe   :  { %v16338_v59 = vpack.c.bf16 %v13352_v40, %v13349_v58  ;;  %v33499_v58 = vld [vmem:[%s42549_s13 + $0x6c0] sm:$0xff]   ;;  %v33500_v40 = vld [vmem:[%s42549_s13 + $0x6c8] sm:$0xff]  }
 0xbbf   :  { %29876 = vmatmul.mubr.bf16.gmra.mrb[232].mxu1 %v33496_v61 }
 0xbc0   :  { %29879 = vmatprep.mubr.bf16.mxu1 %v33497_v62 }
 0xbc1   :  { %30812 = vmatmul.mubr.msk.bf16.gmra.mrb[76].mxu0 %vm960_vm0, %v16329_v44 }
 0xbc2   :  { %30815 = vmatprep.mubr.msk.bf16.mxu0 %vm960_vm0, %v16330_v47  ;;  %v38269_v55 = vpop.f32.mrb[128].mxu1  ;;  %v42702_v47 = vpack.c.bf16 %v38192_v35, %v38184_v7 }
 0xbc3   :  { %v13365_v32 = vpop.f32.mrb[129].mxu1 }
 0xbc4   :  { %v38277_v61 = vpop.f32.mrb[130].mxu1 }
 0xbc5   :  { %v16341_v41 = vpack.c.bf16 %v38277_v61, %v38269_v55  ;;  %v13368_v57 = vpop.f32.mrb[131].mxu1  ;;  %v33515_v55 = vld [vmem:[%s42549_s13 + $0x720] sm:$0xff]  }
 0xbc6   :  { %v16340_v44 = vpack.c.bf16 %v13368_v57, %v13365_v32  ;;  %v33501_v32 = vld [vmem:[%s42549_s13 + $0x6d0] sm:$0xff]   ;;  %v33502_v57 = vld [vmem:[%s42549_s13 + $0x6d8] sm:$0xff]  }
 0xbc7   :  { %29880 = vmatmul.mubr.bf16.gmra.mrb[236].mxu1 %v33498_v33 }
 0xbc8   :  { %29883 = vmatprep.mubr.bf16.mxu1 %v33499_v58 }
 0xbc9   :  { %30816 = vmatmul.mubr.msk.bf16.gmra.mrb[80].mxu0 %vm960_vm0, %v42702_v47 }
 0xbca   :  { %30819 = vmatprep.mubr.msk.bf16.mxu0 %vm960_vm0, %v16332_v54  ;;  %v38286_v62 = vpop.f32.mrb[132].mxu1 }
 0xbcb   :  { %v13381_v15 = vpop.f32.mrb[133].mxu1 }
 0xbcc   :  { %v38294_v33 = vpop.f32.mrb[134].mxu1 }
 0xbcd   :  { %v13384_v35 = vpop.f32.mrb[135].mxu1 }
 0xbce   :  { %v16342_v58 = vpack.c.bf16 %v13384_v35, %v13381_v15  ;;  %v33503_v15 = vld [vmem:[%s42549_s13 + $0x6e0] sm:$0xff]   ;;  %v33504_v35 = vld [vmem:[%s42549_s13 + $0x6e8] sm:$0xff]  }
 0xbcf   :  { %29884 = vmatmul.mubr.bf16.gmra.mrb[240].mxu1 %v33500_v40 }
 0xbd0   :  { %29887 = vmatprep.mubr.bf16.mxu1 %v33501_v32 }
 0xbd1   :  { %30820 = vmatmul.mubr.msk.bf16.gmra.mrb[84].mxu0 %vm960_vm0, %v16333_v18 }
 0xbd2   :  { %30823 = vmatprep.mubr.msk.bf16.mxu0 %vm960_vm0, %v16334_v45  ;;  %v38303_v54 = vpop.f32.mrb[136].mxu1  ;;  %v42703_v45 = vpack.c.bf16 %v38226_v26, %v38218_v12 }
 0xbd3   :  { %v38308_v47 = vpop.f32.mrb[137].mxu1 }
 0xbd4   :  { %v38313_v40 = vpop.f32.mrb[138].mxu1 }
 0xbd5   :  { %v38317_v11 = vpop.f32.mrb[139].mxu1 }
 0xbd6   :  { %v16344_v18 = vpack.c.bf16 %v38317_v11, %v38308_v47 }
 0xbd7   :  { %29888 = vmatmul.mubr.bf16.gmra.mrb[244].mxu1 %v33502_v57  ;;  %v33507_v57 = vld [vmem:[%s42549_s13 + $0x6f0] sm:$0xff]  }
 0xbd8   :  { %29891 = vmatprep.mubr.bf16.mxu1 %v33503_v15  ;;  %v33541_v15 = vld [vmem:[%s42552_s14 + $0xc0] sm:$0xff]  }
 0xbd9   :  { %30824 = vmatmul.mubr.msk.bf16.gmra.mrb[88].mxu0 %vm960_vm0, %v42703_v45  ;;  %v33508_v45 = vld [vmem:[%s42549_s13 + $0x6f8] sm:$0xff]   ;;  %30907 = vmatprep.subr.bf16.mxu0 %v33541_v15 }
 0xbda   :  { %30827 = vmatprep.mubr.msk.bf16.mxu0 %vm960_vm0, %v16336_v48  ;;  %v38326_v32 = vpop.f32.mrb[140].mxu1 }
 0xbdb   :  { %v38331_v0 = vpop.f32.mrb[141].mxu1 }
 0xbdc   :  { %v38336_v47 = vpop.f32.mrb[142].mxu1 }
 0xbdd   :  { %v38340_v26 = vpop.f32.mrb[143].mxu1 }
 0xbdf   :  { %29892 = vmatmul.mubr.bf16.gmra.mrb[248].mxu1 %v33504_v35 }
 0xbe0   :  { %29895 = vmatprep.mubr.bf16.mxu1 %v33507_v57  ;;  %v42704_v57 = vpack.c.bf16 %v38260_v60, %v38252_v34 }
 0xbe1   :  { %30828 = vmatmul.mubr.msk.bf16.gmra.mrb[92].mxu0 %vm960_vm0, %v16337_v2  ;;  %v33512_v2 = vld [vmem:[%s42549_s13 + $0x708] sm:$0xff]  }
 0xbe2   :  { %30831 = vmatprep.mubr.msk.bf16.mxu0 %vm960_vm0, %v16338_v59  ;;  %v38352_v11 = vpop.f32.mrb[144].mxu1 }
 0xbe3   :  { %v38357_v12 = vpop.f32.mrb[145].mxu1 }
 0xbe4   :  { %v38362_v9 = vpop.f32.mrb[146].mxu1 }
 0xbe5   :  { %v38366_v35 = vpop.f32.mrb[147].mxu1 }
 0xbe6   :  { %v16348_v59 = vpack.c.bf16 %v38366_v35, %v38357_v12  ;;  %v33513_v12 = vld [vmem:[%s42549_s13 + $0x710] sm:$0xff]  }
 0xbe7   :  { %29896 = vmatmul.mubr.bf16.gmra.mrb[252].mxu1 %v33508_v45 }
 0xbe8   :  { %29899 = vmatprep.mubr.bf16.mxu1 %v33511_v22  ;;  %v33542_v22 = vld [vmem:[%s42552_s14 + $0xc8] sm:$0xff]  }
 0xbe9   :  { %30832 = vmatmul.mubr.msk.bf16.gmra.mrb[96].mxu0 %vm960_vm0, %v42704_v57  ;;  %v33545_v57 = vld [vmem:[%s42552_s14 + $0xd0] sm:$0xff]  }
 0xbea   :  { %30843 = vmatprep.mubr.msk.bf16.mxu0 %vm960_vm0, %v16340_v44  ;;  %v38375_v48 = vpop.f32.mrb[148].mxu1 }
 0xbeb   :  { %v38380_v7 = vpop.f32.mrb[149].mxu1 }
 0xbec   :  { %v38385_v45 = vpop.f32.mrb[150].mxu1 }
 0xbed   :  { %v38389_v60 = vpop.f32.mrb[151].mxu1 }
 0xbee   :  { %v16350_v44 = vpack.c.bf16 %v38389_v60, %v38380_v7  ;;  %v33514_v7 = vld [vmem:[%s42549_s13 + $0x718] sm:$0xff]   ;;  %v42705_v60 = vpack.c.bf16 %v38294_v33, %v38286_v62 }
 0xbef   :  { %29900 = vmatmul.mubr.bf16.gmra.mrb[0].mxu1 %v33512_v2  ;;  %v33518_v62 = vld [vmem:[%s42549_s13 + $0x738] sm:$0xff]  }
 0xbf0   :  { %29903 = vmatprep.mubr.bf16.mxu1 %v33513_v12  ;;  %v33546_v12 = vld [vmem:[%s42552_s14 + $0xd8] sm:$0xff]  }
 0xbf1   :  { %30844 = vmatmul.mubr.msk.bf16.vlgmr.msra.gmra.mrb[36].mxu0 %vm960_vm0, %v16341_v41 }
 0xbf2   :  { %30847 = vmatprep.mubr.msk.bf16.mxu0 %vm960_vm0, %v16342_v58  ;;  %v38401_v35 = vpop.f32.mrb[152].mxu1  ;;  %30908 = vmatpush3.bf16.msra.mxu0 %v33541_v15 }
 0xbf3   :  { %v38406_v2 = vpop.f32.mrb[153].mxu1  ;;  %30909 = vmatprep.subr.bf16.mxu0 %v33542_v22 }
 0xbf4   :  { %v38414_v61 = vpop.f32.mrb[154].mxu1 }
 0xbf5   :  { %v16353_v41 = vpack.c.bf16 %v38414_v61, %v38401_v35  ;;  %v13464_v58 = vpop.f32.mrb[155].mxu1 }
 0xbf6   :  { %v16352_v15 = vpack.c.bf16 %v13464_v58, %v38406_v2  ;;  %30910 = vmatpush3.bf16.msra.mxu0 %v33542_v22  ;;  %v33516_v22 = vld [vmem:[%s42549_s13 + $0x728] sm:$0xff]   ;;  %v33517_v2 = vld [vmem:[%s42549_s13 + $0x730] sm:$0xff]   ;;  %v42707_v58 = vpack.c.bf16 %v38340_v26, %v38331_v0  ;;  %v42708_v26 = vpack.c.bf16 %v38336_v47, %v38326_v32 }
 0xbf7   :  { %29904 = vmatmul.mubr.bf16.gmra.mrb[4].mxu1 %v33514_v7  ;;  %30911 = vmatprep.subr.bf16.mxu0 %v33545_v57 }
 0xbf8   :  { %29907 = vmatprep.mubr.bf16.mxu1 %v33515_v55 }
 0xbf9   :  { %30848 = vmatmul.mubr.msk.bf16.gmra.mrb[40].mxu0 %vm960_vm0, %v42705_v60 }
 0xbfa   :  { %30851 = vmatprep.mubr.msk.bf16.mxu0 %vm960_vm0, %v16344_v18  ;;  %v38427_v34 = vpop.f32.mrb[156].mxu1  ;;  %30912 = vmatpush3.bf16.msra.mxu0 %v33545_v57  ;;  %v42706_v57 = vpack.c.bf16 %v38313_v40, %v38303_v54 }
 0xbfb   :  { %v13477_v7 = vpop.f32.mrb[157].mxu1  ;;  %30913 = vmatprep.subr.bf16.mxu0 %v33546_v12 }
 0xbfc   :  { %v38435_v55 = vpop.f32.mrb[158].mxu1 }
 0xbfd   :  { %v13480_v33 = vpop.f32.mrb[159].mxu1 }
 0xbfe   :  { %v16354_v18 = vpack.c.bf16 %v13480_v33, %v13477_v7  ;;  %30914 = vmatpush3.bf16.msra.mxu0 %v33546_v12  ;;  %v33519_v12 = vld [vmem:[%s42549_s13 + $0x740] sm:$0xff]   ;;  %v33520_v33 = vld [vmem:[%s42549_s13 + $0x748] sm:$0xff]  }
 0xbff   :  { %29908 = vmatmul.mubr.bf16.gmra.mrb[8].mxu1 %v33516_v22 }
 0xc00   :  { %29911 = vmatprep.mubr.bf16.mxu1 %v33517_v2 }
 0xc01   :  { %30852 = vmatmul.mubr.msk.bf16.gmra.mrb[44].mxu0 %vm960_vm0, %v42706_v57 }
 0xc02   :  { %30855 = vmatprep.mubr.msk.bf16.mxu0 %vm960_vm0, %v42707_v58  ;;  %v38447_v60 = vpop.f32.mrb[160].mxu1  ;;  %v33521_v58 = vld [vmem:[%s42549_s13 + $0x750] sm:$0xff]  }
 0xc03   :  { %v13493_v7 = vpop.f32.mrb[161].mxu1 }
 0xc04   :  { %v38455_v22 = vpop.f32.mrb[162].mxu1 }
 0xc05   :  { %v16357_v54 = vpack.c.bf16 %v38455_v22, %v38447_v60  ;;  %v13496_v40 = vpop.f32.mrb[163].mxu1 }
 0xc06   :  { %v16356_v0 = vpack.c.bf16 %v13496_v40, %v13493_v7  ;;  %v33522_v40 = vld [vmem:[%s42549_s13 + $0x758] sm:$0xff]  }
 0xc07   :  { %29912 = vmatmul.mubr.bf16.gmra.mrb[12].mxu1 %v33518_v62 }
 0xc08   :  { %29915 = vmatprep.mubr.bf16.mxu1 %v33519_v12 }
 0xc09   :  { %30856 = vmatmul.mubr.msk.bf16.gmra.mrb[48].mxu0 %vm960_vm0, %v42708_v26 }
 0xc0a   :  { %30859 = vmatprep.mubr.msk.bf16.mxu0 %vm960_vm0, %v16348_v59  ;;  %v38464_v2 = vpop.f32.mrb[164].mxu1  ;;  %v42709_v59 = vpack.c.bf16 %v38362_v9, %v38352_v11 }
 0xc0b   :  { %v13509_v57 = vpop.f32.mrb[165].mxu1 }
 0xc0c   :  { %v38472_v62 = vpop.f32.mrb[166].mxu1 }
 0xc0d   :  { %v13512_v47 = vpop.f32.mrb[167].mxu1 }
 0xc0e   :  { %v16358_v7 = vpack.c.bf16 %v13512_v47, %v13509_v57  ;;  %v33523_v57 = vld [vmem:[%s42549_s13 + $0x760] sm:$0xff]  }
 0xc0f   :  { %29916 = vmatmul.mubr.bf16.gmra.mrb[16].mxu1 %v33520_v33 }
 0xc10   :  { %29919 = vmatprep.mubr.bf16.mxu1 %v33521_v58 }
 0xc11   :  { %30860 = vmatmul.mubr.msk.bf16.gmra.mrb[52].mxu0 %vm960_vm0, %v42709_v59  ;;  %v33524_v59 = vld [vmem:[%s42549_s13 + $0x768] sm:$0xff]  }
 0xc12   :  { %30863 = vmatprep.mubr.msk.bf16.mxu0 %vm960_vm0, %v16350_v44  ;;  %v38481_v12 = vpop.f32.mrb[168].mxu1  ;;  %v42710_v44 = vpack.c.bf16 %v38385_v45, %v38375_v48 }
 0xc13   :  { %v13525_v26 = vpop.f32.mrb[169].mxu1 }
 0xc14   :  { %v38489_v33 = vpop.f32.mrb[170].mxu1 }
 0xc15   :  { %v16361_v11 = vpack.c.bf16 %v38489_v33, %v38481_v12  ;;  %v13528_v9 = vpop.f32.mrb[171].mxu1 }
 0xc16   :  { %v16360_v58 = vpack.c.bf16 %v13528_v9, %v13525_v26  ;;  %v33525_v26 = vld [vmem:[%s42549_s13 + $0x770] sm:$0xff]   ;;  %v33526_v9 = vld [vmem:[%s42549_s13 + $0x778] sm:$0xff]  }
 0xc17   :  { %29920 = vmatmul.mubr.bf16.gmra.mrb[20].mxu1 %v33522_v40 }
 0xc18   :  { %29923 = vmatprep.mubr.bf16.mxu1 %v33523_v57 }
 0xc19   :  { %30864 = vmatmul.mubr.msk.bf16.gmra.mrb[56].mxu0 %vm960_vm0, %v42710_v44 }
 0xc1a   :  { %30867 = vmatprep.mubr.msk.bf16.mxu0 %vm960_vm0, %v16352_v15  ;;  %v38498_v47 = vpop.f32.mrb[172].mxu1 }
 0xc1b   :  { %v13541_v32 = vpop.f32.mrb[173].mxu1 }
 0xc1c   :  { %v38506_v40 = vpop.f32.mrb[174].mxu1 }
 0xc1d   :  { %v13544_v45 = vpop.f32.mrb[175].mxu1 }
 0xc1e   :  { %v16362_v57 = vpack.c.bf16 %v13544_v45, %v13541_v32  ;;  %v33527_v32 = vld [vmem:[%s42549_s13 + $0x780] sm:$0xff]   ;;  %v33528_v45 = vld [vmem:[%s42549_s13 + $0x788] sm:$0xff]  }
 0xc1f   :  { %29924 = vmatmul.mubr.bf16.gmra.mrb[24].mxu1 %v33524_v59 }
 0xc20   :  { %29927 = vmatprep.mubr.bf16.mxu1 %v33525_v26 }
 0xc21   :  { %30868 = vmatmul.mubr.msk.bf16.gmra.mrb[60].mxu0 %vm960_vm0, %v16353_v41 }
 0xc22   :  { %30871 = vmatprep.mubr.msk.bf16.mxu0 %vm960_vm0, %v16354_v18  ;;  %v38515_v15 = vpop.f32.mrb[176].mxu1  ;;  %v42711_v18 = vpack.c.bf16 %v38435_v55, %v38427_v34 }
 0xc23   :  { %v13557_v44 = vpop.f32.mrb[177].mxu1 }
 0xc24   :  { %v38523_v59 = vpop.f32.mrb[178].mxu1 }
 0xc25   :  { %v16365_v35 = vpack.c.bf16 %v38523_v59, %v38515_v15  ;;  %v13560_v61 = vpop.f32.mrb[179].mxu1 }
 0xc26   :  { %v16364_v41 = vpack.c.bf16 %v13560_v61, %v13557_v44  ;;  %v33529_v44 = vld [vmem:[%s42549_s13 + $0x790] sm:$0xff]   ;;  %v33530_v61 = vld [vmem:[%s42549_s13 + $0x798] sm:$0xff]  }
 0xc27   :  { %29928 = vmatmul.mubr.bf16.gmra.mrb[28].mxu1 %v33526_v9 }
 0xc28   :  { %29931 = vmatprep.mubr.bf16.mxu1 %v33527_v32 }
 0xc29   :  { %30872 = vmatmul.mubr.msk.bf16.gmra.mrb[64].mxu0 %vm960_vm0, %v42711_v18 }
 0xc2a   :  { %30875 = vmatprep.mubr.msk.bf16.mxu0 %vm960_vm0, %v16356_v0  ;;  %v38532_v26 = vpop.f32.mrb[180].mxu1 }
 0xc2b   :  { %v13573_v48 = vpop.f32.mrb[181].mxu1 }
 0xc2c   :  { %v38540_v9 = vpop.f32.mrb[182].mxu1 }
 0xc2d   :  { %v13576_v55 = vpop.f32.mrb[183].mxu1 }
 0xc2e   :  { %v16366_v32 = vpack.c.bf16 %v13576_v55, %v13573_v48  ;;  %v33531_v48 = vld [vmem:[%s42549_s13 + $0x7a0] sm:$0xff]   ;;  %v33532_v55 = vld [vmem:[%s42549_s13 + $0x7a8] sm:$0xff]  }
 0xc2f   :  { %29932 = vmatmul.mubr.bf16.gmra.mrb[32].mxu1 %v33528_v45 }
 0xc30   :  { %29935 = vmatprep.mubr.bf16.mxu1 %v33529_v44 }
 0xc31   :  { %30876 = vmatmul.mubr.msk.bf16.gmra.mrb[68].mxu0 %vm960_vm0, %v16357_v54 }
 0xc32   :  { %30879 = vmatprep.mubr.msk.bf16.mxu0 %vm960_vm0, %v16358_v7  ;;  %v38549_v0 = vpop.f32.mrb[184].mxu1  ;;  %v42712_v7 = vpack.c.bf16 %v38472_v62, %v38464_v2 }
 0xc33   :  { %v13589_v18 = vpop.f32.mrb[185].mxu1 }
 0xc34   :  { %v38557_v45 = vpop.f32.mrb[186].mxu1 }
 0xc35   :  { %v16369_v60 = vpack.c.bf16 %v38557_v45, %v38549_v0  ;;  %v13592_v22 = vpop.f32.mrb[187].mxu1  ;;  %v33547_v0 = vld [vmem:[%s42549_s13 + $0x800] sm:$0xff]  }
 0xc36   :  { %v16368_v54 = vpack.c.bf16 %v13592_v22, %v13589_v18  ;;  %v33533_v18 = vld [vmem:[%s42549_s13 + $0x7b0] sm:$0xff]   ;;  %v33534_v22 = vld [vmem:[%s42549_s13 + $0x7b8] sm:$0xff]  }
 0xc37   :  { %29936 = vmatmul.mubr.bf16.gmra.mrb[36].mxu1 %v33530_v61 }
 0xc38   :  { %29939 = vmatprep.mubr.bf16.mxu1 %v33531_v48 }
 0xc39   :  { %30880 = vmatmul.mubr.msk.bf16.gmra.mrb[72].mxu0 %vm960_vm0, %v42712_v7 }
 0xc3a   :  { %30883 = vmatprep.mubr.msk.bf16.mxu0 %vm960_vm0, %v16360_v58  ;;  %v38566_v44 = vpop.f32.mrb[188].mxu1 }
 0xc3b   :  { %v13605_v34 = vpop.f32.mrb[189].mxu1 }
 0xc3c   :  { %v38574_v61 = vpop.f32.mrb[190].mxu1 }
 0xc3d   :  { %v13608_v62 = vpop.f32.mrb[191].mxu1 }
 0xc3e   :  { %v16370_v48 = vpack.c.bf16 %v13608_v62, %v13605_v34  ;;  %v33535_v34 = vld [vmem:[%s42549_s13 + $0x7c0] sm:$0xff]   ;;  %v33536_v62 = vld [vmem:[%s42549_s13 + $0x7c8] sm:$0xff]  }
 0xc3f   :  { %29940 = vmatmul.mubr.bf16.gmra.mrb[40].mxu1 %v33532_v55 }
 0xc40   :  { %29943 = vmatprep.mubr.bf16.mxu1 %v33533_v18 }
 0xc41   :  { %30884 = vmatmul.mubr.msk.bf16.gmra.mrb[76].mxu0 %vm960_vm0, %v16361_v11 }
 0xc42   :  { %30887 = vmatprep.mubr.msk.bf16.mxu0 %vm960_vm0, %v16362_v57  ;;  %v38583_v58 = vpop.f32.mrb[192].mxu1  ;;  %v42713_v57 = vpack.c.bf16 %v38506_v40, %v38498_v47 }
 0xc43   :  { %v13621_v7 = vpop.f32.mrb[193].mxu1 }
 0xc44   :  { %v38591_v55 = vpop.f32.mrb[194].mxu1 }
 0xc45   :  { %v16373_v12 = vpack.c.bf16 %v38591_v55, %v38583_v58  ;;  %v13624_v33 = vpop.f32.mrb[195].mxu1  ;;  %v33551_v58 = vld [vmem:[%s42549_s13 + $0x820] sm:$0xff]  }
 0xc46   :  { %v16372_v11 = vpack.c.bf16 %v13624_v33, %v13621_v7  ;;  %v33537_v7 = vld [vmem:[%s42549_s13 + $0x7d0] sm:$0xff]   ;;  %v33538_v33 = vld [vmem:[%s42549_s13 + $0x7d8] sm:$0xff]  }
 0xc47   :  { %29944 = vmatmul.mubr.bf16.gmra.mrb[44].mxu1 %v33534_v22 }
 0xc48   :  { %29947 = vmatprep.mubr.bf16.mxu1 %v33535_v34 }
 0xc49   :  { %30888 = vmatmul.mubr.msk.bf16.gmra.mrb[80].mxu0 %vm960_vm0, %v42713_v57 }
 0xc4a   :  { %30891 = vmatprep.mubr.msk.bf16.mxu0 %vm960_vm0, %v16364_v41  ;;  %v38600_v18 = vpop.f32.mrb[196].mxu1 }
 0xc4b   :  { %v13637_v2 = vpop.f32.mrb[197].mxu1 }
 0xc4c   :  { %v38608_v22 = vpop.f32.mrb[198].mxu1 }
 0xc4d   :  { %v13640_v40 = vpop.f32.mrb[199].mxu1 }
 0xc4e   :  { %v16374_v34 = vpack.c.bf16 %v13640_v40, %v13637_v2  ;;  %v33539_v2 = vld [vmem:[%s42549_s13 + $0x7e0] sm:$0xff]   ;;  %v33540_v40 = vld [vmem:[%s42549_s13 + $0x7e8] sm:$0xff]  }
 0xc4f   :  { %29948 = vmatmul.mubr.bf16.gmra.mrb[48].mxu1 %v33536_v62 }
 0xc50   :  { %29951 = vmatprep.mubr.bf16.mxu1 %v33537_v7 }
 0xc51   :  { %30892 = vmatmul.mubr.msk.bf16.gmra.mrb[84].mxu0 %vm960_vm0, %v16365_v35 }
 0xc52   :  { %30895 = vmatprep.mubr.msk.bf16.mxu0 %vm960_vm0, %v16366_v32  ;;  %v38617_v41 = vpop.f32.mrb[200].mxu1  ;;  %v42714_v32 = vpack.c.bf16 %v38540_v9, %v38532_v26 }
 0xc53   :  { %v38622_v57 = vpop.f32.mrb[201].mxu1 }
 0xc54   :  { %v38627_v62 = vpop.f32.mrb[202].mxu1 }
 0xc55   :  { %v38631_v59 = vpop.f32.mrb[203].mxu1 }
 0xc56   :  { %v16376_v35 = vpack.c.bf16 %v38631_v59, %v38622_v57 }
 0xc57   :  { %29952 = vmatmul.mubr.bf16.gmra.mrb[52].mxu1 %v33538_v33  ;;  %v33543_v33 = vld [vmem:[%s42549_s13 + $0x7f0] sm:$0xff]  }
 0xc58   :  { %29955 = vmatprep.mubr.bf16.mxu1 %v33539_v2  ;;  %v33577_v2 = vld [vmem:[%s42552_s14 + $0xe0] sm:$0xff]  }
 0xc59   :  { %30896 = vmatmul.mubr.msk.bf16.gmra.mrb[88].mxu0 %vm960_vm0, %v42714_v32  ;;  %v33544_v32 = vld [vmem:[%s42549_s13 + $0x7f8] sm:$0xff]   ;;  %30979 = vmatprep.subr.bf16.mxu0 %v33577_v2 }
 0xc5a   :  { %30899 = vmatprep.mubr.msk.bf16.mxu0 %vm960_vm0, %v16368_v54  ;;  %v38640_v7 = vpop.f32.mrb[204].mxu1 }
 0xc5b   :  { %v38645_v15 = vpop.f32.mrb[205].mxu1 }
 0xc5c   :  { %v38650_v57 = vpop.f32.mrb[206].mxu1 }
 0xc5d   :  { %v38654_v9 = vpop.f32.mrb[207].mxu1 }
 0xc5f   :  { %29956 = vmatmul.mubr.bf16.gmra.mrb[56].mxu1 %v33540_v40 }
 0xc60   :  { %29959 = vmatprep.mubr.bf16.mxu1 %v33543_v33  ;;  %v42715_v33 = vpack.c.bf16 %v38574_v61, %v38566_v44 }
 0xc61   :  { %30900 = vmatmul.mubr.msk.bf16.gmra.mrb[92].mxu0 %vm960_vm0, %v16369_v60  ;;  %v33548_v60 = vld [vmem:[%s42549_s13 + $0x808] sm:$0xff]  }
 0xc62   :  { %30903 = vmatprep.mubr.msk.bf16.mxu0 %vm960_vm0, %v16370_v48  ;;  %v38666_v59 = vpop.f32.mrb[208].mxu1 }
 0xc63   :  { %v38671_v26 = vpop.f32.mrb[209].mxu1 }
 0xc64   :  { %v38676_v45 = vpop.f32.mrb[210].mxu1 }
 0xc65   :  { %v38680_v40 = vpop.f32.mrb[211].mxu1 }
 0xc66   :  { %v16380_v48 = vpack.c.bf16 %v38680_v40, %v38671_v26  ;;  %v33549_v26 = vld [vmem:[%s42549_s13 + $0x810] sm:$0xff]  }
 0xc67   :  { %29960 = vmatmul.mubr.bf16.gmra.mrb[60].mxu1 %v33544_v32 }
 0xc68   :  { %29963 = vmatprep.mubr.bf16.mxu1 %v33547_v0  ;;  %v33578_v0 = vld [vmem:[%s42552_s14 + $0xe8] sm:$0xff]  }
 0xc69   :  { %30904 = vmatmul.mubr.msk.bf16.gmra.mrb[96].mxu0 %vm960_vm0, %v42715_v33  ;;  %v33581_v33 = vld [vmem:[%s42552_s14 + $0xf0] sm:$0xff]  }
 0xc6a   :  { %30915 = vmatprep.mubr.msk.bf16.mxu0 %vm960_vm0, %v16372_v11  ;;  %v38689_v54 = vpop.f32.mrb[212].mxu1 }
 0xc6b   :  { %v38694_v47 = vpop.f32.mrb[213].mxu1 }
 0xc6c   :  { %v38699_v32 = vpop.f32.mrb[214].mxu1 }
 0xc6d   :  { %v38703_v61 = vpop.f32.mrb[215].mxu1 }
 0xc6e   :  { %v16382_v11 = vpack.c.bf16 %v38703_v61, %v38694_v47  ;;  %v33550_v47 = vld [vmem:[%s42549_s13 + $0x818] sm:$0xff]   ;;  %v42716_v61 = vpack.c.bf16 %v38608_v22, %v38600_v18 }
 0xc6f   :  { %29964 = vmatmul.mubr.bf16.gmra.mrb[64].mxu1 %v33548_v60  ;;  %v33554_v18 = vld [vmem:[%s42549_s13 + $0x838] sm:$0xff]  }
 0xc70   :  { %29967 = vmatprep.mubr.bf16.mxu1 %v33549_v26  ;;  %v33582_v26 = vld [vmem:[%s42552_s14 + $0xf8] sm:$0xff]  }
 0xc71   :  { %30916 = vmatmul.mubr.msk.bf16.vlgmr.msra.gmra.mrb[36].mxu0 %vm960_vm0, %v16373_v12 }
 0xc72   :  { %30919 = vmatprep.mubr.msk.bf16.mxu0 %vm960_vm0, %v16374_v34  ;;  %v38715_v40 = vpop.f32.mrb[216].mxu1  ;;  %30980 = vmatpush3.bf16.msra.mxu0 %v33577_v2 }
 0xc73   :  { %v38720_v60 = vpop.f32.mrb[217].mxu1  ;;  %30981 = vmatprep.subr.bf16.mxu0 %v33578_v0 }
 0xc74   :  { %v38728_v55 = vpop.f32.mrb[218].mxu1 }
 0xc75   :  { %v16385_v12 = vpack.c.bf16 %v38728_v55, %v38715_v40  ;;  %v13720_v34 = vpop.f32.mrb[219].mxu1 }
 0xc76   :  { %v16384_v2 = vpack.c.bf16 %v13720_v34, %v38720_v60  ;;  %30982 = vmatpush3.bf16.msra.mxu0 %v33578_v0  ;;  %v33552_v0 = vld [vmem:[%s42549_s13 + $0x828] sm:$0xff]   ;;  %v33553_v60 = vld [vmem:[%s42549_s13 + $0x830] sm:$0xff]   ;;  %v42718_v34 = vpack.c.bf16 %v38654_v9, %v38645_v15  ;;  %v42719_v9 = vpack.c.bf16 %v38650_v57, %v38640_v7 }
 0xc77   :  { %29968 = vmatmul.mubr.bf16.gmra.mrb[68].mxu1 %v33550_v47  ;;  %30983 = vmatprep.subr.bf16.mxu0 %v33581_v33 }
 0xc78   :  { %29971 = vmatprep.mubr.bf16.mxu1 %v33551_v58 }
 0xc79   :  { %30920 = vmatmul.mubr.msk.bf16.gmra.mrb[40].mxu0 %vm960_vm0, %v42716_v61 }
 0xc7a   :  { %30923 = vmatprep.mubr.msk.bf16.mxu0 %vm960_vm0, %v16376_v35  ;;  %v38741_v44 = vpop.f32.mrb[220].mxu1  ;;  %30984 = vmatpush3.bf16.msra.mxu0 %v33581_v33  ;;  %v42717_v33 = vpack.c.bf16 %v38627_v62, %v38617_v41 }
 0xc7b   :  { %v13733_v47 = vpop.f32.mrb[221].mxu1  ;;  %30985 = vmatprep.subr.bf16.mxu0 %v33582_v26 }
 0xc7c   :  { %v38749_v58 = vpop.f32.mrb[222].mxu1 }
 0xc7d   :  { %v13736_v22 = vpop.f32.mrb[223].mxu1 }
 0xc7e   :  { %v16386_v35 = vpack.c.bf16 %v13736_v22, %v13733_v47  ;;  %30986 = vmatpush3.bf16.msra.mxu0 %v33582_v26  ;;  %v33555_v26 = vld [vmem:[%s42549_s13 + $0x840] sm:$0xff]   ;;  %v33556_v22 = vld [vmem:[%s42549_s13 + $0x848] sm:$0xff]  }
 0xc7f   :  { %29972 = vmatmul.mubr.bf16.gmra.mrb[72].mxu1 %v33552_v0 }
 0xc80   :  { %29975 = vmatprep.mubr.bf16.mxu1 %v33553_v60 }
 0xc81   :  { %30924 = vmatmul.mubr.msk.bf16.gmra.mrb[44].mxu0 %vm960_vm0, %v42717_v33 }
 0xc82   :  { %30927 = vmatprep.mubr.msk.bf16.mxu0 %vm960_vm0, %v42718_v34  ;;  %v38761_v61 = vpop.f32.mrb[224].mxu1  ;;  %v33557_v34 = vld [vmem:[%s42549_s13 + $0x850] sm:$0xff]  }
 0xc83   :  { %v13749_v47 = vpop.f32.mrb[225].mxu1 }
 0xc84   :  { %v38769_v0 = vpop.f32.mrb[226].mxu1 }
 0xc85   :  { %v16389_v41 = vpack.c.bf16 %v38769_v0, %v38761_v61  ;;  %v13752_v62 = vpop.f32.mrb[227].mxu1 }
 0xc86   :  { %v16388_v15 = vpack.c.bf16 %v13752_v62, %v13749_v47  ;;  %v33558_v62 = vld [vmem:[%s42549_s13 + $0x858] sm:$0xff]  }
 0xc87   :  { %29976 = vmatmul.mubr.bf16.gmra.mrb[76].mxu1 %v33554_v18 }
 0xc88   :  { %29979 = vmatprep.mubr.bf16.mxu1 %v33555_v26 }
 0xc89   :  { %30928 = vmatmul.mubr.msk.bf16.gmra.mrb[48].mxu0 %vm960_vm0, %v42719_v9 }
 0xc8a   :  { %30931 = vmatprep.mubr.msk.bf16.mxu0 %vm960_vm0, %v16380_v48  ;;  %v38778_v60 = vpop.f32.mrb[228].mxu1  ;;  %v42720_v48 = vpack.c.bf16 %v38676_v45, %v38666_v59 }
 0xc8b   :  { %v13765_v33 = vpop.f32.mrb[229].mxu1 }
 0xc8c   :  { %v38786_v18 = vpop.f32.mrb[230].mxu1 }
 0xc8d   :  { %v13768_v57 = vpop.f32.mrb[231].mxu1 }
 0xc8e   :  { %v16390_v47 = vpack.c.bf16 %v13768_v57, %v13765_v33  ;;  %v33559_v33 = vld [vmem:[%s42549_s13 + $0x860] sm:$0xff]  }
 0xc8f   :  { %29980 = vmatmul.mubr.bf16.gmra.mrb[80].mxu1 %v33556_v22 }
 0xc90   :  { %29983 = vmatprep.mubr.bf16.mxu1 %v33557_v34 }
 0xc91   :  { %30932 = vmatmul.mubr.msk.bf16.gmra.mrb[52].mxu0 %vm960_vm0, %v42720_v48  ;;  %v33560_v48 = vld [vmem:[%s42549_s13 + $0x868] sm:$0xff]  }
 0xc92   :  { %30935 = vmatprep.mubr.msk.bf16.mxu0 %vm960_vm0, %v16382_v11  ;;  %v38795_v26 = vpop.f32.mrb[232].mxu1  ;;  %v42721_v11 = vpack.c.bf16 %v38699_v32, %v38689_v54 }
 0xc93   :  { %v13781_v9 = vpop.f32.mrb[233].mxu1 }
 0xc94   :  { %v38803_v22 = vpop.f32.mrb[234].mxu1 }
 0xc95   :  { %v16393_v59 = vpack.c.bf16 %v38803_v22, %v38795_v26  ;;  %v13784_v45 = vpop.f32.mrb[235].mxu1 }
 0xc96   :  { %v16392_v34 = vpack.c.bf16 %v13784_v45, %v13781_v9  ;;  %v33561_v9 = vld [vmem:[%s42549_s13 + $0x870] sm:$0xff]   ;;  %v33562_v45 = vld [vmem:[%s42549_s13 + $0x878] sm:$0xff]  }
 0xc97   :  { %29984 = vmatmul.mubr.bf16.gmra.mrb[84].mxu1 %v33558_v62 }
 0xc98   :  { %29987 = vmatprep.mubr.bf16.mxu1 %v33559_v33 }
 0xc99   :  { %30936 = vmatmul.mubr.msk.bf16.gmra.mrb[56].mxu0 %vm960_vm0, %v42721_v11 }
 0xc9a   :  { %30939 = vmatprep.mubr.msk.bf16.mxu0 %vm960_vm0, %v16384_v2  ;;  %v38812_v57 = vpop.f32.mrb[236].mxu1 }
 0xc9b   :  { %v13797_v7 = vpop.f32.mrb[237].mxu1 }
 0xc9c   :  { %v38820_v62 = vpop.f32.mrb[238].mxu1 }
 0xc9d   :  { %v13800_v32 = vpop.f32.mrb[239].mxu1 }
 0xc9e   :  { %v16394_v33 = vpack.c.bf16 %v13800_v32, %v13797_v7  ;;  %v33563_v7 = vld [vmem:[%s42549_s13 + $0x880] sm:$0xff]   ;;  %v33564_v32 = vld [vmem:[%s42549_s13 + $0x888] sm:$0xff]  }
 0xc9f   :  { %29988 = vmatmul.mubr.bf16.gmra.mrb[88].mxu1 %v33560_v48 }
 0xca0   :  { %29991 = vmatprep.mubr.bf16.mxu1 %v33561_v9 }
 0xca1   :  { %30940 = vmatmul.mubr.msk.bf16.gmra.mrb[60].mxu0 %vm960_vm0, %v16385_v12 }
 0xca2   :  { %30943 = vmatprep.mubr.msk.bf16.mxu0 %vm960_vm0, %v16386_v35  ;;  %v38829_v2 = vpop.f32.mrb[240].mxu1  ;;  %v42722_v35 = vpack.c.bf16 %v38749_v58, %v38741_v44 }
 0xca3   :  { %v13813_v11 = vpop.f32.mrb[241].mxu1 }
 0xca4   :  { %v38837_v48 = vpop.f32.mrb[242].mxu1 }
 0xca5   :  { %v16397_v40 = vpack.c.bf16 %v38837_v48, %v38829_v2  ;;  %v13816_v55 = vpop.f32.mrb[243].mxu1 }
 0xca6   :  { %v16396_v12 = vpack.c.bf16 %v13816_v55, %v13813_v11  ;;  %v33565_v11 = vld [vmem:[%s42549_s13 + $0x890] sm:$0xff]   ;;  %v33566_v55 = vld [vmem:[%s42549_s13 + $0x898] sm:$0xff]  }
 0xca7   :  { %29992 = vmatmul.mubr.bf16.gmra.mrb[92].mxu1 %v33562_v45 }
 0xca8   :  { %29995 = vmatprep.mubr.bf16.mxu1 %v33563_v7 }
 0xca9   :  { %30944 = vmatmul.mubr.msk.bf16.gmra.mrb[64].mxu0 %vm960_vm0, %v42722_v35 }
 0xcaa   :  { %30947 = vmatprep.mubr.msk.bf16.mxu0 %vm960_vm0, %v16388_v15  ;;  %v38846_v9 = vpop.f32.mrb[244].mxu1 }
 0xcab   :  { %v13829_v54 = vpop.f32.mrb[245].mxu1 }
 0xcac   :  { %v38854_v45 = vpop.f32.mrb[246].mxu1 }
 0xcad   :  { %v13832_v58 = vpop.f32.mrb[247].mxu1 }
 0xcae   :  { %v16398_v7 = vpack.c.bf16 %v13832_v58, %v13829_v54  ;;  %v33567_v54 = vld [vmem:[%s42549_s13 + $0x8a0] sm:$0xff]   ;;  %v33568_v58 = vld [vmem:[%s42549_s13 + $0x8a8] sm:$0xff]  }
 0xcaf   :  { %29996 = vmatmul.mubr.bf16.gmra.mrb[96].mxu1 %v33564_v32 }
 0xcb0   :  { %29999 = vmatprep.mubr.bf16.mxu1 %v33565_v11 }
 0xcb1   :  { %30948 = vmatmul.mubr.msk.bf16.gmra.mrb[68].mxu0 %vm960_vm0, %v16389_v41 }
 0xcb2   :  { %30951 = vmatprep.mubr.msk.bf16.mxu0 %vm960_vm0, %v16390_v47  ;;  %v38863_v15 = vpop.f32.mrb[248].mxu1  ;;  %v42723_v47 = vpack.c.bf16 %v38786_v18, %v38778_v60 }
 0xcb3   :  { %v13845_v35 = vpop.f32.mrb[249].mxu1 }
 0xcb4   :  { %v38871_v32 = vpop.f32.mrb[250].mxu1 }
 0xcb5   :  { %v16401_v61 = vpack.c.bf16 %v38871_v32, %v38863_v15  ;;  %v13848_v0 = vpop.f32.mrb[251].mxu1  ;;  %v33583_v15 = vld [vmem:[%s42549_s13 + $0x900] sm:$0xff]  }
 0xcb6   :  { %v16400_v41 = vpack.c.bf16 %v13848_v0, %v13845_v35  ;;  %v33569_v35 = vld [vmem:[%s42549_s13 + $0x8b0] sm:$0xff]   ;;  %v33570_v0 = vld [vmem:[%s42549_s13 + $0x8b8] sm:$0xff]  }
 0xcb7   :  { %30000 = vmatmul.mubr.bf16.gmra.mrb[100].mxu1 %v33566_v55 }
 0xcb8   :  { %30003 = vmatprep.mubr.bf16.mxu1 %v33567_v54 }
 0xcb9   :  { %30952 = vmatmul.mubr.msk.bf16.gmra.mrb[72].mxu0 %vm960_vm0, %v42723_v47 }
 0xcba   :  { %30955 = vmatprep.mubr.msk.bf16.mxu0 %vm960_vm0, %v16392_v34  ;;  %v38880_v11 = vpop.f32.mrb[252].mxu1 }
 0xcbb   :  { %v13861_v44 = vpop.f32.mrb[253].mxu1 }
 0xcbc   :  { %v38888_v55 = vpop.f32.mrb[254].mxu1 }
 0xcbd   :  { %v13864_v18 = vpop.f32.mrb[255].mxu1 }
 0xcbe   :  { %v16402_v54 = vpack.c.bf16 %v13864_v18, %v13861_v44  ;;  %v33571_v44 = vld [vmem:[%s42549_s13 + $0x8c0] sm:$0xff]   ;;  %v33572_v18 = vld [vmem:[%s42549_s13 + $0x8c8] sm:$0xff]  }
 0xcbf   :  { %30004 = vmatmul.mubr.bf16.gmra.mrb[104].mxu1 %v33568_v58 }
 0xcc0   :  { %30007 = vmatprep.mubr.bf16.mxu1 %v33569_v35 }
 0xcc1   :  { %30956 = vmatmul.mubr.msk.bf16.gmra.mrb[76].mxu0 %vm960_vm0, %v16393_v59 }
 0xcc2   :  { %30959 = vmatprep.mubr.msk.bf16.mxu0 %vm960_vm0, %v16394_v33  ;;  %v38897_v34 = vpop.f32.mrb[0].mxu1  ;;  %v42724_v33 = vpack.c.bf16 %v38820_v62, %v38812_v57 }
 0xcc3   :  { %v13877_v47 = vpop.f32.mrb[1].mxu1 }
 0xcc4   :  { %v38905_v58 = vpop.f32.mrb[2].mxu1 }
 0xcc5   :  { %v16405_v26 = vpack.c.bf16 %v38905_v58, %v38897_v34  ;;  %v13880_v22 = vpop.f32.mrb[3].mxu1  ;;  %v33587_v34 = vld [vmem:[%s42549_s13 + $0x920] sm:$0xff]  }
 0xcc6   :  { %v16404_v59 = vpack.c.bf16 %v13880_v22, %v13877_v47  ;;  %v33573_v47 = vld [vmem:[%s42549_s13 + $0x8d0] sm:$0xff]   ;;  %v33574_v22 = vld [vmem:[%s42549_s13 + $0x8d8] sm:$0xff]  }
 0xcc7   :  { %30008 = vmatmul.mubr.bf16.gmra.mrb[108].mxu1 %v33570_v0 }
 0xcc8   :  { %30011 = vmatprep.mubr.bf16.mxu1 %v33571_v44 }
 0xcc9   :  { %30960 = vmatmul.mubr.msk.bf16.gmra.mrb[80].mxu0 %vm960_vm0, %v42724_v33 }
 0xcca   :  { %30963 = vmatprep.mubr.msk.bf16.mxu0 %vm960_vm0, %v16396_v12  ;;  %v38914_v35 = vpop.f32.mrb[4].mxu1 }
 0xccb   :  { %v13893_v60 = vpop.f32.mrb[5].mxu1 }
 0xccc   :  { %v38922_v0 = vpop.f32.mrb[6].mxu1 }
 0xccd   :  { %v13896_v62 = vpop.f32.mrb[7].mxu1 }
 0xcce   :  { %v16406_v44 = vpack.c.bf16 %v13896_v62, %v13893_v60  ;;  %v33575_v60 = vld [vmem:[%s42549_s13 + $0x8e0] sm:$0xff]   ;;  %v33576_v62 = vld [vmem:[%s42549_s13 + $0x8e8] sm:$0xff]  }
 0xccf   :  { %30012 = vmatmul.mubr.bf16.gmra.mrb[112].mxu1 %v33572_v18 }
 0xcd0   :  { %30015 = vmatprep.mubr.bf16.mxu1 %v33573_v47 }
 0xcd1   :  { %30964 = vmatmul.mubr.msk.bf16.gmra.mrb[84].mxu0 %vm960_vm0, %v16397_v40 }
 0xcd2   :  { %30967 = vmatprep.mubr.msk.bf16.mxu0 %vm960_vm0, %v16398_v7  ;;  %v38931_v12 = vpop.f32.mrb[8].mxu1  ;;  %v42725_v7 = vpack.c.bf16 %v38854_v45, %v38846_v9 }
 0xcd3   :  { %v38936_v33 = vpop.f32.mrb[9].mxu1 }
 0xcd4   :  { %v38941_v18 = vpop.f32.mrb[10].mxu1 }
 0xcd5   :  { %v38945_v48 = vpop.f32.mrb[11].mxu1 }
 0xcd6   :  { %v16408_v40 = vpack.c.bf16 %v38945_v48, %v38936_v33 }
 0xcd7   :  { %30016 = vmatmul.mubr.bf16.gmra.mrb[116].mxu1 %v33574_v22  ;;  %v33579_v22 = vld [vmem:[%s42549_s13 + $0x8f0] sm:$0xff]  }
 0xcd8   :  { %30019 = vmatprep.mubr.bf16.mxu1 %v33575_v60  ;;  %v33613_v60 = vld [vmem:[%s42552_s14 + $0x100] sm:$0xff]  }
 0xcd9   :  { %30968 = vmatmul.mubr.msk.bf16.gmra.mrb[88].mxu0 %vm960_vm0, %v42725_v7  ;;  %v33580_v7 = vld [vmem:[%s42549_s13 + $0x8f8] sm:$0xff]   ;;  %31051 = vmatprep.subr.bf16.mxu0 %v33613_v60 }
 0xcda   :  { %30971 = vmatprep.mubr.msk.bf16.mxu0 %vm960_vm0, %v16400_v41  ;;  %v38954_v47 = vpop.f32.mrb[12].mxu1 }
 0xcdb   :  { %v38959_v2 = vpop.f32.mrb[13].mxu1 }
 0xcdc   :  { %v38964_v33 = vpop.f32.mrb[14].mxu1 }
 0xcdd   :  { %v38968_v45 = vpop.f32.mrb[15].mxu1 }
 0xcdf   :  { %30020 = vmatmul.mubr.bf16.gmra.mrb[120].mxu1 %v33576_v62 }
 0xce0   :  { %30023 = vmatprep.mubr.bf16.mxu1 %v33579_v22  ;;  %v42726_v22 = vpack.c.bf16 %v38888_v55, %v38880_v11 }
 0xce1   :  { %30972 = vmatmul.mubr.msk.bf16.gmra.mrb[92].mxu0 %vm960_vm0, %v16401_v61  ;;  %v33584_v61 = vld [vmem:[%s42549_s13 + $0x908] sm:$0xff]  }
 0xce2   :  { %30975 = vmatprep.mubr.msk.bf16.mxu0 %vm960_vm0, %v16402_v54  ;;  %v38980_v48 = vpop.f32.mrb[16].mxu1 }
 0xce3   :  { %v38985_v9 = vpop.f32.mrb[17].mxu1 }
 0xce4   :  { %v38990_v32 = vpop.f32.mrb[18].mxu1 }
 0xce5   :  { %v38994_v62 = vpop.f32.mrb[19].mxu1 }
 0xce6   :  { %v16412_v54 = vpack.c.bf16 %v38994_v62, %v38985_v9  ;;  %v33585_v9 = vld [vmem:[%s42549_s13 + $0x910] sm:$0xff]  }
 0xce7   :  { %30024 = vmatmul.mubr.bf16.gmra.mrb[124].mxu1 %v33580_v7 }
 0xce8   :  { %30027 = vmatprep.mubr.bf16.mxu1 %v33583_v15  ;;  %v33614_v15 = vld [vmem:[%s42552_s14 + $0x108] sm:$0xff]  }
 0xce9   :  { %30976 = vmatmul.mubr.msk.bf16.gmra.mrb[96].mxu0 %vm960_vm0, %v42726_v22  ;;  %v33617_v22 = vld [vmem:[%s42552_s14 + $0x110] sm:$0xff]  }
 0xcea   :  { %30987 = vmatprep.mubr.msk.bf16.mxu0 %vm960_vm0, %v16404_v59  ;;  %v39003_v41 = vpop.f32.mrb[20].mxu1 }
 0xceb   :  { %v39008_v57 = vpop.f32.mrb[21].mxu1 }
 0xcec   :  { %v39013_v7 = vpop.f32.mrb[22].mxu1 }
 0xced   :  { %v39017_v55 = vpop.f32.mrb[23].mxu1 }
 0xcee   :  { %v16414_v59 = vpack.c.bf16 %v39017_v55, %v39008_v57  ;;  %v33586_v57 = vld [vmem:[%s42549_s13 + $0x918] sm:$0xff]   ;;  %v42727_v55 = vpack.c.bf16 %v38922_v0, %v38914_v35 }
 0xcef   :  { %30028 = vmatmul.mubr.bf16.gmra.mrb[128].mxu1 %v33584_v61  ;;  %v33590_v35 = vld [vmem:[%s42549_s13 + $0x938] sm:$0xff]  }
 0xcf0   :  { %30031 = vmatprep.mubr.bf16.mxu1 %v33585_v9  ;;  %v33618_v9 = vld [vmem:[%s42552_s14 + $0x118] sm:$0xff]  }
 0xcf1   :  { %30988 = vmatmul.mubr.msk.bf16.vlgmr.msra.gmra.mrb[36].mxu0 %vm960_vm0, %v16405_v26 }
 0xcf2   :  { %30991 = vmatprep.mubr.msk.bf16.mxu0 %vm960_vm0, %v16406_v44  ;;  %v39029_v62 = vpop.f32.mrb[24].mxu1  ;;  %31052 = vmatpush3.bf16.msra.mxu0 %v33613_v60 }
 0xcf3   :  { %v39034_v61 = vpop.f32.mrb[25].mxu1  ;;  %31053 = vmatprep.subr.bf16.mxu0 %v33614_v15 }
 0xcf4   :  { %v39042_v58 = vpop.f32.mrb[26].mxu1 }
 0xcf5   :  { %v16417_v26 = vpack.c.bf16 %v39042_v58, %v39029_v62  ;;  %v13976_v44 = vpop.f32.mrb[27].mxu1 }
 0xcf6   :  { %v16416_v60 = vpack.c.bf16 %v13976_v44, %v39034_v61  ;;  %31054 = vmatpush3.bf16.msra.mxu0 %v33614_v15  ;;  %v33588_v15 = vld [vmem:[%s42549_s13 + $0x928] sm:$0xff]   ;;  %v33589_v61 = vld [vmem:[%s42549_s13 + $0x930] sm:$0xff]   ;;  %v42729_v44 = vpack.c.bf16 %v38968_v45, %v38959_v2  ;;  %v42730_v45 = vpack.c.bf16 %v38964_v33, %v38954_v47 }
 0xcf7   :  { %30032 = vmatmul.mubr.bf16.gmra.mrb[132].mxu1 %v33586_v57  ;;  %31055 = vmatprep.subr.bf16.mxu0 %v33617_v22 }
 0xcf8   :  { %30035 = vmatprep.mubr.bf16.mxu1 %v33587_v34 }
 0xcf9   :  { %30992 = vmatmul.mubr.msk.bf16.gmra.mrb[40].mxu0 %vm960_vm0, %v42727_v55 }
 0xcfa   :  { %30995 = vmatprep.mubr.msk.bf16.mxu0 %vm960_vm0, %v16408_v40  ;;  %v39055_v11 = vpop.f32.mrb[28].mxu1  ;;  %31056 = vmatpush3.bf16.msra.mxu0 %v33617_v22  ;;  %v42728_v22 = vpack.c.bf16 %v38941_v18, %v38931_v12 }
 0xcfb   :  { %v13989_v57 = vpop.f32.mrb[29].mxu1  ;;  %31057 = vmatprep.subr.bf16.mxu0 %v33618_v9 }
 0xcfc   :  { %v39063_v34 = vpop.f32.mrb[30].mxu1 }
 0xcfd   :  { %v13992_v0 = vpop.f32.mrb[31].mxu1 }
 0xcfe   :  { %v16418_v40 = vpack.c.bf16 %v13992_v0, %v13989_v57  ;;  %31058 = vmatpush3.bf16.msra.mxu0 %v33618_v9  ;;  %v33591_v9 = vld [vmem:[%s42549_s13 + $0x940] sm:$0xff]   ;;  %v33592_v0 = vld [vmem:[%s42549_s13 + $0x948] sm:$0xff]  }
 0xcff   :  { %30036 = vmatmul.mubr.bf16.gmra.mrb[136].mxu1 %v33588_v15 }
 0xd00   :  { %30039 = vmatprep.mubr.bf16.mxu1 %v33589_v61 }
 0xd01   :  { %30996 = vmatmul.mubr.msk.bf16.gmra.mrb[44].mxu0 %vm960_vm0, %v42728_v22 }
 0xd02   :  { %30999 = vmatprep.mubr.msk.bf16.mxu0 %vm960_vm0, %v42729_v44  ;;  %v39075_v55 = vpop.f32.mrb[32].mxu1  ;;  %v33593_v44 = vld [vmem:[%s42549_s13 + $0x950] sm:$0xff]  }
 0xd03   :  { %v14005_v57 = vpop.f32.mrb[33].mxu1 }
 0xd04   :  { %v39083_v15 = vpop.f32.mrb[34].mxu1 }
 0xd05   :  { %v16421_v12 = vpack.c.bf16 %v39083_v15, %v39075_v55  ;;  %v14008_v18 = vpop.f32.mrb[35].mxu1 }
 0xd06   :  { %v16420_v2 = vpack.c.bf16 %v14008_v18, %v14005_v57  ;;  %v33594_v18 = vld [vmem:[%s42549_s13 + $0x958] sm:$0xff]  }
 0xd07   :  { %30040 = vmatmul.mubr.bf16.gmra.mrb[140].mxu1 %v33590_v35 }
 0xd08   :  { %30043 = vmatprep.mubr.bf16.mxu1 %v33591_v9 }
 0xd09   :  { %31000 = vmatmul.mubr.msk.bf16.gmra.mrb[48].mxu0 %vm960_vm0, %v42730_v45 }
 0xd0a   :  { %31003 = vmatprep.mubr.msk.bf16.mxu0 %vm960_vm0, %v16412_v54  ;;  %v39092_v61 = vpop.f32.mrb[36].mxu1  ;;  %v42731_v54 = vpack.c.bf16 %v38990_v32, %v38980_v48 }
 0xd0b   :  { %v14021_v22 = vpop.f32.mrb[37].mxu1 }
 0xd0c   :  { %v39100_v35 = vpop.f32.mrb[38].mxu1 }
 0xd0d   :  { %v14024_v33 = vpop.f32.mrb[39].mxu1 }
 0xd0e   :  { %v16422_v57 = vpack.c.bf16 %v14024_v33, %v14021_v22  ;;  %v33595_v22 = vld [vmem:[%s42549_s13 + $0x960] sm:$0xff]  }
 0xd0f   :  { %30044 = vmatmul.mubr.bf16.gmra.mrb[144].mxu1 %v33592_v0 }
 0xd10   :  { %30047 = vmatprep.mubr.bf16.mxu1 %v33593_v44 }
 0xd11   :  { %31004 = vmatmul.mubr.msk.bf16.gmra.mrb[52].mxu0 %vm960_vm0, %v42731_v54  ;;  %v33596_v54 = vld [vmem:[%s42549_s13 + $0x968] sm:$0xff]  }
 0xd12   :  { %31007 = vmatprep.mubr.msk.bf16.mxu0 %vm960_vm0, %v16414_v59  ;;  %v39109_v9 = vpop.f32.mrb[40].mxu1  ;;  %v42732_v59 = vpack.c.bf16 %v39013_v7, %v39003_v41 }
 0xd13   :  { %v14037_v45 = vpop.f32.mrb[41].mxu1 }
 0xd14   :  { %v39117_v0 = vpop.f32.mrb[42].mxu1 }
 0xd15   :  { %v16425_v48 = vpack.c.bf16 %v39117_v0, %v39109_v9  ;;  %v14040_v32 = vpop.f32.mrb[43].mxu1 }
 0xd16   :  { %v16424_v44 = vpack.c.bf16 %v14040_v32, %v14037_v45  ;;  %v33597_v45 = vld [vmem:[%s42549_s13 + $0x970] sm:$0xff]   ;;  %v33598_v32 = vld [vmem:[%s42549_s13 + $0x978] sm:$0xff]  }
 0xd17   :  { %30048 = vmatmul.mubr.bf16.gmra.mrb[148].mxu1 %v33594_v18 }
 0xd18   :  { %30051 = vmatprep.mubr.bf16.mxu1 %v33595_v22 }
 0xd19   :  { %31008 = vmatmul.mubr.msk.bf16.gmra.mrb[56].mxu0 %vm960_vm0, %v42732_v59 }
 0xd1a   :  { %31011 = vmatprep.mubr.msk.bf16.mxu0 %vm960_vm0, %v16416_v60  ;;  %v39126_v33 = vpop.f32.mrb[44].mxu1 }
 0xd1b   :  { %v14053_v47 = vpop.f32.mrb[45].mxu1 }
 0xd1c   :  { %v39134_v18 = vpop.f32.mrb[46].mxu1 }
 0xd1d   :  { %v14056_v7 = vpop.f32.mrb[47].mxu1 }
 0xd1e   :  { %v16426_v22 = vpack.c.bf16 %v14056_v7, %v14053_v47  ;;  %v33599_v47 = vld [vmem:[%s42549_s13 + $0x980] sm:$0xff]   ;;  %v33600_v7 = vld [vmem:[%s42549_s13 + $0x988] sm:$0xff]  }
 0xd1f   :  { %30052 = vmatmul.mubr.bf16.gmra.mrb[152].mxu1 %v33596_v54 }
 0xd20   :  { %30055 = vmatprep.mubr.bf16.mxu1 %v33597_v45 }
 0xd21   :  { %31012 = vmatmul.mubr.msk.bf16.gmra.mrb[60].mxu0 %vm960_vm0, %v16417_v26 }
 0xd22   :  { %31015 = vmatprep.mubr.msk.bf16.mxu0 %vm960_vm0, %v16418_v40  ;;  %v39143_v60 = vpop.f32.mrb[48].mxu1  ;;  %v42733_v40 = vpack.c.bf16 %v39063_v34, %v39055_v11 }
 0xd23   :  { %v14069_v59 = vpop.f32.mrb[49].mxu1 }
 0xd24   :  { %v39151_v54 = vpop.f32.mrb[50].mxu1 }
 0xd25   :  { %v16429_v62 = vpack.c.bf16 %v39151_v54, %v39143_v60  ;;  %v14072_v58 = vpop.f32.mrb[51].mxu1 }
 0xd26   :  { %v16428_v26 = vpack.c.bf16 %v14072_v58, %v14069_v59  ;;  %v33601_v59 = vld [vmem:[%s42549_s13 + $0x990] sm:$0xff]   ;;  %v33602_v58 = vld [vmem:[%s42549_s13 + $0x998] sm:$0xff]  }
 0xd27   :  { %30056 = vmatmul.mubr.bf16.gmra.mrb[156].mxu1 %v33598_v32 }
 0xd28   :  { %30059 = vmatprep.mubr.bf16.mxu1 %v33599_v47 }
 0xd29   :  { %31016 = vmatmul.mubr.msk.bf16.gmra.mrb[64].mxu0 %vm960_vm0, %v42733_v40 }
 0xd2a   :  { %31019 = vmatprep.mubr.msk.bf16.mxu0 %vm960_vm0, %v16420_v2  ;;  %v39160_v45 = vpop.f32.mrb[52].mxu1 }
 0xd2b   :  { %v14085_v41 = vpop.f32.mrb[53].mxu1 }
 0xd2c   :  { %v39168_v32 = vpop.f32.mrb[54].mxu1 }
 0xd2d   :  { %v14088_v34 = vpop.f32.mrb[55].mxu1 }
 0xd2e   :  { %v16430_v47 = vpack.c.bf16 %v14088_v34, %v14085_v41  ;;  %v33603_v41 = vld [vmem:[%s42549_s13 + $0x9a0] sm:$0xff]   ;;  %v33604_v34 = vld [vmem:[%s42549_s13 + $0x9a8] sm:$0xff]  }
 0xd2f   :  { %30060 = vmatmul.mubr.bf16.gmra.mrb[160].mxu1 %v33600_v7 }
 0xd30   :  { %30063 = vmatprep.mubr.bf16.mxu1 %v33601_v59 }
 0xd31   :  { %31020 = vmatmul.mubr.msk.bf16.gmra.mrb[68].mxu0 %vm960_vm0, %v16421_v12 }
 0xd32   :  { %31023 = vmatprep.mubr.msk.bf16.mxu0 %vm960_vm0, %v16422_v57  ;;  %v39177_v2 = vpop.f32.mrb[56].mxu1  ;;  %v42734_v57 = vpack.c.bf16 %v39100_v35, %v39092_v61 }
 0xd33   :  { %v14101_v40 = vpop.f32.mrb[57].mxu1 }
 0xd34   :  { %v39185_v7 = vpop.f32.mrb[58].mxu1 }
 0xd35   :  { %v16433_v55 = vpack.c.bf16 %v39185_v7, %v39177_v2  ;;  %v14104_v15 = vpop.f32.mrb[59].mxu1  ;;  %v33619_v2 = vld [vmem:[%s42549_s13 + $0xa00] sm:$0xff]  }
 0xd36   :  { %v16432_v12 = vpack.c.bf16 %v14104_v15, %v14101_v40  ;;  %v33605_v40 = vld [vmem:[%s42549_s13 + $0x9b0] sm:$0xff]   ;;  %v33606_v15 = vld [vmem:[%s42549_s13 + $0x9b8] sm:$0xff]  }
 0xd37   :  { %30064 = vmatmul.mubr.bf16.gmra.mrb[164].mxu1 %v33602_v58 }
 0xd38   :  { %30067 = vmatprep.mubr.bf16.mxu1 %v33603_v41 }
 0xd39   :  { %31024 = vmatmul.mubr.msk.bf16.gmra.mrb[72].mxu0 %vm960_vm0, %v42734_v57 }
 0xd3a   :  { %31027 = vmatprep.mubr.msk.bf16.mxu0 %vm960_vm0, %v16424_v44  ;;  %v39194_v59 = vpop.f32.mrb[60].mxu1 }
 0xd3b   :  { %v14117_v11 = vpop.f32.mrb[61].mxu1 }
 0xd3c   :  { %v39202_v58 = vpop.f32.mrb[62].mxu1 }
 0xd3d   :  { %v14120_v35 = vpop.f32.mrb[63].mxu1 }
 0xd3e   :  { %v16434_v41 = vpack.c.bf16 %v14120_v35, %v14117_v11  ;;  %v33607_v11 = vld [vmem:[%s42549_s13 + $0x9c0] sm:$0xff]   ;;  %v33608_v35 = vld [vmem:[%s42549_s13 + $0x9c8] sm:$0xff]  }
 0xd3f   :  { %30068 = vmatmul.mubr.bf16.gmra.mrb[168].mxu1 %v33604_v34 }
 0xd40   :  { %30071 = vmatprep.mubr.bf16.mxu1 %v33605_v40 }
 0xd41   :  { %31028 = vmatmul.mubr.msk.bf16.gmra.mrb[76].mxu0 %vm960_vm0, %v16425_v48 }
 0xd42   :  { %31031 = vmatprep.mubr.msk.bf16.mxu0 %vm960_vm0, %v16426_v22  ;;  %v39211_v44 = vpop.f32.mrb[64].mxu1  ;;  %v42735_v22 = vpack.c.bf16 %v39134_v18, %v39126_v33 }
 0xd43   :  { %v14133_v57 = vpop.f32.mrb[65].mxu1 }
 0xd44   :  { %v39219_v34 = vpop.f32.mrb[66].mxu1 }
 0xd45   :  { %v16437_v9 = vpack.c.bf16 %v39219_v34, %v39211_v44  ;;  %v14136_v0 = vpop.f32.mrb[67].mxu1  ;;  %v33623_v44 = vld [vmem:[%s42549_s13 + $0xa20] sm:$0xff]  }
 0xd46   :  { %v16436_v48 = vpack.c.bf16 %v14136_v0, %v14133_v57  ;;  %v33609_v57 = vld [vmem:[%s42549_s13 + $0x9d0] sm:$0xff]   ;;  %v33610_v0 = vld [vmem:[%s42549_s13 + $0x9d8] sm:$0xff]  }
 0xd47   :  { %30072 = vmatmul.mubr.bf16.gmra.mrb[172].mxu1 %v33606_v15 }
 0xd48   :  { %30075 = vmatprep.mubr.bf16.mxu1 %v33607_v11 }
 0xd49   :  { %31032 = vmatmul.mubr.msk.bf16.gmra.mrb[80].mxu0 %vm960_vm0, %v42735_v22 }
 0xd4a   :  { %31035 = vmatprep.mubr.msk.bf16.mxu0 %vm960_vm0, %v16428_v26  ;;  %v39228_v40 = vpop.f32.mrb[68].mxu1 }
 0xd4b   :  { %v14149_v61 = vpop.f32.mrb[69].mxu1 }
 0xd4c   :  { %v39236_v15 = vpop.f32.mrb[70].mxu1 }
 0xd4d   :  { %v14152_v18 = vpop.f32.mrb[71].mxu1 }
 0xd4e   :  { %v16438_v11 = vpack.c.bf16 %v14152_v18, %v14149_v61  ;;  %v33611_v61 = vld [vmem:[%s42549_s13 + $0x9e0] sm:$0xff]   ;;  %v33612_v18 = vld [vmem:[%s42549_s13 + $0x9e8] sm:$0xff]  }
 0xd4f   :  { %30076 = vmatmul.mubr.bf16.gmra.mrb[176].mxu1 %v33608_v35 }
 0xd50   :  { %30079 = vmatprep.mubr.bf16.mxu1 %v33609_v57 }
 0xd51   :  { %31036 = vmatmul.mubr.msk.bf16.gmra.mrb[84].mxu0 %vm960_vm0, %v16429_v62 }
 0xd52   :  { %31039 = vmatprep.mubr.msk.bf16.mxu0 %vm960_vm0, %v16430_v47  ;;  %v39245_v26 = vpop.f32.mrb[72].mxu1  ;;  %v42736_v47 = vpack.c.bf16 %v39168_v32, %v39160_v45 }
 0xd53   :  { %v39250_v22 = vpop.f32.mrb[73].mxu1 }
 0xd54   :  { %v39255_v35 = vpop.f32.mrb[74].mxu1 }
 0xd55   :  { %v39259_v54 = vpop.f32.mrb[75].mxu1 }
 0xd56   :  { %v16440_v62 = vpack.c.bf16 %v39259_v54, %v39250_v22 }
 0xd57   :  { %30080 = vmatmul.mubr.bf16.gmra.mrb[180].mxu1 %v33610_v0  ;;  %v33615_v0 = vld [vmem:[%s42549_s13 + $0x9f0] sm:$0xff]  }
 0xd58   :  { %30083 = vmatprep.mubr.bf16.mxu1 %v33611_v61  ;;  %v33649_v61 = vld [vmem:[%s42552_s14 + $0x120] sm:$0xff]  }
 0xd59   :  { %31040 = vmatmul.mubr.msk.bf16.gmra.mrb[88].mxu0 %vm960_vm0, %v42736_v47  ;;  %v33616_v47 = vld [vmem:[%s42549_s13 + $0x9f8] sm:$0xff]   ;;  %31123 = vmatprep.subr.bf16.mxu0 %v33649_v61 }
 0xd5a   :  { %31043 = vmatprep.mubr.msk.bf16.mxu0 %vm960_vm0, %v16432_v12  ;;  %v39268_v57 = vpop.f32.mrb[76].mxu1 }
 0xd5b   :  { %v39273_v60 = vpop.f32.mrb[77].mxu1 }
 0xd5c   :  { %v39278_v22 = vpop.f32.mrb[78].mxu1 }
 0xd5d   :  { %v39282_v32 = vpop.f32.mrb[79].mxu1 }
 0xd5f   :  { %30084 = vmatmul.mubr.bf16.gmra.mrb[184].mxu1 %v33612_v18 }
 0xd60   :  { %30087 = vmatprep.mubr.bf16.mxu1 %v33615_v0  ;;  %v42737_v0 = vpack.c.bf16 %v39202_v58, %v39194_v59 }
 0xd61   :  { %31044 = vmatmul.mubr.msk.bf16.gmra.mrb[92].mxu0 %vm960_vm0, %v16433_v55  ;;  %v33620_v55 = vld [vmem:[%s42549_s13 + $0xa08] sm:$0xff]  }
 0xd62   :  { %31047 = vmatprep.mubr.msk.bf16.mxu0 %vm960_vm0, %v16434_v41  ;;  %v39294_v54 = vpop.f32.mrb[80].mxu1 }
 0xd63   :  { %v39299_v45 = vpop.f32.mrb[81].mxu1 }
 0xd64   :  { %v39304_v7 = vpop.f32.mrb[82].mxu1 }
 0xd65   :  { %v39308_v18 = vpop.f32.mrb[83].mxu1 }
 0xd66   :  { %v16444_v41 = vpack.c.bf16 %v39308_v18, %v39299_v45  ;;  %v33621_v45 = vld [vmem:[%s42549_s13 + $0xa10] sm:$0xff]  }
 0xd67   :  { %30088 = vmatmul.mubr.bf16.gmra.mrb[188].mxu1 %v33616_v47 }
 0xd68   :  { %30091 = vmatprep.mubr.bf16.mxu1 %v33619_v2  ;;  %v33650_v2 = vld [vmem:[%s42552_s14 + $0x128] sm:$0xff]  }
 0xd69   :  { %31048 = vmatmul.mubr.msk.bf16.gmra.mrb[96].mxu0 %vm960_vm0, %v42737_v0  ;;  %v33653_v0 = vld [vmem:[%s42552_s14 + $0x130] sm:$0xff]  }
 0xd6a   :  { %31059 = vmatprep.mubr.msk.bf16.mxu0 %vm960_vm0, %v16436_v48  ;;  %v39317_v12 = vpop.f32.mrb[84].mxu1 }
 0xd6b   :  { %v39322_v33 = vpop.f32.mrb[85].mxu1 }
 0xd6c   :  { %v39327_v47 = vpop.f32.mrb[86].mxu1 }
 0xd6d   :  { %v39331_v58 = vpop.f32.mrb[87].mxu1 }
 0xd6e   :  { %v16446_v48 = vpack.c.bf16 %v39331_v58, %v39322_v33  ;;  %v33622_v33 = vld [vmem:[%s42549_s13 + $0xa18] sm:$0xff]   ;;  %v42738_v58 = vpack.c.bf16 %v39236_v15, %v39228_v40 }
 0xd6f   :  { %30092 = vmatmul.mubr.bf16.gmra.mrb[192].mxu1 %v33620_v55  ;;  %v33626_v40 = vld [vmem:[%s42549_s13 + $0xa38] sm:$0xff]  }
 0xd70   :  { %30095 = vmatprep.mubr.bf16.mxu1 %v33621_v45  ;;  %v33654_v45 = vld [vmem:[%s42552_s14 + $0x138] sm:$0xff]  }
 0xd71   :  { %31060 = vmatmul.mubr.msk.bf16.vlgmr.msra.gmra.mrb[36].mxu0 %vm960_vm0, %v16437_v9 }
 0xd72   :  { %31063 = vmatprep.mubr.msk.bf16.mxu0 %vm960_vm0, %v16438_v11  ;;  %v39343_v18 = vpop.f32.mrb[88].mxu1  ;;  %31124 = vmatpush3.bf16.msra.mxu0 %v33649_v61 }
 0xd73   :  { %v39348_v55 = vpop.f32.mrb[89].mxu1  ;;  %31125 = vmatprep.subr.bf16.mxu0 %v33650_v2 }
 0xd74   :  { %v39356_v34 = vpop.f32.mrb[90].mxu1 }
 0xd75   :  { %v16449_v9 = vpack.c.bf16 %v39356_v34, %v39343_v18  ;;  %v14232_v11 = vpop.f32.mrb[91].mxu1 }
 0xd76   :  { %v16448_v61 = vpack.c.bf16 %v14232_v11, %v39348_v55  ;;  %31126 = vmatpush3.bf16.msra.mxu0 %v33650_v2  ;;  %v33624_v2 = vld [vmem:[%s42549_s13 + $0xa28] sm:$0xff]   ;;  %v33625_v55 = vld [vmem:[%s42549_s13 + $0xa30] sm:$0xff]   ;;  %v42740_v11 = vpack.c.bf16 %v39282_v32, %v39273_v60  ;;  %v42741_v32 = vpack.c.bf16 %v39278_v22, %v39268_v57 }
 0xd77   :  { %30096 = vmatmul.mubr.bf16.gmra.mrb[196].mxu1 %v33622_v33  ;;  %31127 = vmatprep.subr.bf16.mxu0 %v33653_v0 }
 0xd78   :  { %30099 = vmatprep.mubr.bf16.mxu1 %v33623_v44 }
 0xd79   :  { %31064 = vmatmul.mubr.msk.bf16.gmra.mrb[40].mxu0 %vm960_vm0, %v42738_v58 }
 0xd7a   :  { %31067 = vmatprep.mubr.msk.bf16.mxu0 %vm960_vm0, %v16440_v62  ;;  %v39369_v59 = vpop.f32.mrb[92].mxu1  ;;  %31128 = vmatpush3.bf16.msra.mxu0 %v33653_v0  ;;  %v42739_v0 = vpack.c.bf16 %v39255_v35, %v39245_v26 }
 0xd7b   :  { %v14245_v33 = vpop.f32.mrb[93].mxu1  ;;  %31129 = vmatprep.subr.bf16.mxu0 %v33654_v45 }
 0xd7c   :  { %v39377_v44 = vpop.f32.mrb[94].mxu1 }
 0xd7d   :  { %v14248_v15 = vpop.f32.mrb[95].mxu1 }
 0xd7e   :  { %v16450_v62 = vpack.c.bf16 %v14248_v15, %v14245_v33  ;;  %31130 = vmatpush3.bf16.msra.mxu0 %v33654_v45  ;;  %v33627_v45 = vld [vmem:[%s42549_s13 + $0xa40] sm:$0xff]   ;;  %v33628_v15 = vld [vmem:[%s42549_s13 + $0xa48] sm:$0xff]  }
 0xd7f   :  { %30100 = vmatmul.mubr.bf16.gmra.mrb[200].mxu1 %v33624_v2 }
 0xd80   :  { %30103 = vmatprep.mubr.bf16.mxu1 %v33625_v55 }
 0xd81   :  { %31068 = vmatmul.mubr.msk.bf16.gmra.mrb[44].mxu0 %vm960_vm0, %v42739_v0 }
 0xd82   :  { %31071 = vmatprep.mubr.msk.bf16.mxu0 %vm960_vm0, %v42740_v11  ;;  %v39389_v58 = vpop.f32.mrb[96].mxu1  ;;  %v33629_v11 = vld [vmem:[%s42549_s13 + $0xa50] sm:$0xff]  }
 0xd83   :  { %v14261_v33 = vpop.f32.mrb[97].mxu1 }
 0xd84   :  { %v39397_v2 = vpop.f32.mrb[98].mxu1 }
 0xd85   :  { %v16453_v26 = vpack.c.bf16 %v39397_v2, %v39389_v58  ;;  %v14264_v35 = vpop.f32.mrb[99].mxu1 }
 0xd86   :  { %v16452_v60 = vpack.c.bf16 %v14264_v35, %v14261_v33  ;;  %v33630_v35 = vld [vmem:[%s42549_s13 + $0xa58] sm:$0xff]  }
 0xd87   :  { %30104 = vmatmul.mubr.bf16.gmra.mrb[204].mxu1 %v33626_v40 }
 0xd88   :  { %30107 = vmatprep.mubr.bf16.mxu1 %v33627_v45 }
 0xd89   :  { %31072 = vmatmul.mubr.msk.bf16.gmra.mrb[48].mxu0 %vm960_vm0, %v42741_v32 }
 0xd8a   :  { %31075 = vmatprep.mubr.msk.bf16.mxu0 %vm960_vm0, %v16444_v41  ;;  %v39406_v55 = vpop.f32.mrb[100].mxu1  ;;  %v42742_v41 = vpack.c.bf16 %v39304_v7, %v39294_v54 }
 0xd8b   :  { %v14277_v0 = vpop.f32.mrb[101].mxu1 }
 0xd8c   :  { %v39414_v40 = vpop.f32.mrb[102].mxu1 }
 0xd8d   :  { %v14280_v22 = vpop.f32.mrb[103].mxu1 }
 0xd8e   :  { %v16454_v33 = vpack.c.bf16 %v14280_v22, %v14277_v0  ;;  %v33631_v0 = vld [vmem:[%s42549_s13 + $0xa60] sm:$0xff]  }
 0xd8f   :  { %30108 = vmatmul.mubr.bf16.gmra.mrb[208].mxu1 %v33628_v15 }
 0xd90   :  { %30111 = vmatprep.mubr.bf16.mxu1 %v33629_v11 }
 0xd91   :  { %31076 = vmatmul.mubr.msk.bf16.gmra.mrb[52].mxu0 %vm960_vm0, %v42742_v41  ;;  %v33632_v41 = vld [vmem:[%s42549_s13 + $0xa68] sm:$0xff]  }
 0xd92   :  { %31079 = vmatprep.mubr.msk.bf16.mxu0 %vm960_vm0, %v16446_v48  ;;  %v39423_v45 = vpop.f32.mrb[104].mxu1  ;;  %v42743_v48 = vpack.c.bf16 %v39327_v47, %v39317_v12 }
 0xd93   :  { %v14293_v32 = vpop.f32.mrb[105].mxu1 }
 0xd94   :  { %v39431_v15 = vpop.f32.mrb[106].mxu1 }
 0xd95   :  { %v16457_v54 = vpack.c.bf16 %v39431_v15, %v39423_v45  ;;  %v14296_v7 = vpop.f32.mrb[107].mxu1 }
 0xd96   :  { %v16456_v11 = vpack.c.bf16 %v14296_v7, %v14293_v32  ;;  %v33633_v32 = vld [vmem:[%s42549_s13 + $0xa70] sm:$0xff]   ;;  %v33634_v7 = vld [vmem:[%s42549_s13 + $0xa78] sm:$0xff]  }
 0xd97   :  { %30112 = vmatmul.mubr.bf16.gmra.mrb[212].mxu1 %v33630_v35 }
 0xd98   :  { %30115 = vmatprep.mubr.bf16.mxu1 %v33631_v0 }
 0xd99   :  { %31080 = vmatmul.mubr.msk.bf16.gmra.mrb[56].mxu0 %vm960_vm0, %v42743_v48 }
 0xd9a   :  { %31083 = vmatprep.mubr.msk.bf16.mxu0 %vm960_vm0, %v16448_v61  ;;  %v39440_v22 = vpop.f32.mrb[108].mxu1 }
 0xd9b   :  { %v14309_v57 = vpop.f32.mrb[109].mxu1 }
 0xd9c   :  { %v39448_v35 = vpop.f32.mrb[110].mxu1 }
 0xd9d   :  { %v14312_v47 = vpop.f32.mrb[111].mxu1 }
 0xd9e   :  { %v16458_v0 = vpack.c.bf16 %v14312_v47, %v14309_v57  ;;  %v33635_v57 = vld [vmem:[%s42549_s13 + $0xa80] sm:$0xff]   ;;  %v33636_v47 = vld [vmem:[%s42549_s13 + $0xa88] sm:$0xff]  }
 0xd9f   :  { %30116 = vmatmul.mubr.bf16.gmra.mrb[216].mxu1 %v33632_v41 }
 0xda0   :  { %30119 = vmatprep.mubr.bf16.mxu1 %v33633_v32 }
 0xda1   :  { %31084 = vmatmul.mubr.msk.bf16.gmra.mrb[60].mxu0 %vm960_vm0, %v16449_v9 }
 0xda2   :  { %31087 = vmatprep.mubr.msk.bf16.mxu0 %vm960_vm0, %v16450_v62  ;;  %v39457_v61 = vpop.f32.mrb[112].mxu1  ;;  %v42744_v62 = vpack.c.bf16 %v39377_v44, %v39369_v59 }
 0xda3   :  { %v14325_v48 = vpop.f32.mrb[113].mxu1 }
 0xda4   :  { %v39465_v41 = vpop.f32.mrb[114].mxu1 }
 0xda5   :  { %v16461_v18 = vpack.c.bf16 %v39465_v41, %v39457_v61  ;;  %v14328_v34 = vpop.f32.mrb[115].mxu1 }
 0xda6   :  { %v16460_v9 = vpack.c.bf16 %v14328_v34, %v14325_v48  ;;  %v33637_v48 = vld [vmem:[%s42549_s13 + $0xa90] sm:$0xff]   ;;  %v33638_v34 = vld [vmem:[%s42549_s13 + $0xa98] sm:$0xff]  }
 0xda7   :  { %30120 = vmatmul.mubr.bf16.gmra.mrb[220].mxu1 %v33634_v7 }
 0xda8   :  { %30123 = vmatprep.mubr.bf16.mxu1 %v33635_v57 }
 0xda9   :  { %31088 = vmatmul.mubr.msk.bf16.gmra.mrb[64].mxu0 %vm960_vm0, %v42744_v62 }
 0xdaa   :  { %31091 = vmatprep.mubr.msk.bf16.mxu0 %vm960_vm0, %v16452_v60  ;;  %v39474_v32 = vpop.f32.mrb[116].mxu1 }
 0xdab   :  { %v14341_v12 = vpop.f32.mrb[117].mxu1 }
 0xdac   :  { %v39482_v7 = vpop.f32.mrb[118].mxu1 }
 0xdad   :  { %v14344_v44 = vpop.f32.mrb[119].mxu1 }
 0xdae   :  { %v16462_v57 = vpack.c.bf16 %v14344_v44, %v14341_v12  ;;  %v33639_v12 = vld [vmem:[%s42549_s13 + $0xaa0] sm:$0xff]   ;;  %v33640_v44 = vld [vmem:[%s42549_s13 + $0xaa8] sm:$0xff]  }
 0xdaf   :  { %30124 = vmatmul.mubr.bf16.gmra.mrb[224].mxu1 %v33636_v47 }
 0xdb0   :  { %30127 = vmatprep.mubr.bf16.mxu1 %v33637_v48 }
 0xdb1   :  { %31092 = vmatmul.mubr.msk.bf16.gmra.mrb[68].mxu0 %vm960_vm0, %v16453_v26 }
 0xdb2   :  { %31095 = vmatprep.mubr.msk.bf16.mxu0 %vm960_vm0, %v16454_v33  ;;  %v39491_v60 = vpop.f32.mrb[120].mxu1  ;;  %v42745_v33 = vpack.c.bf16 %v39414_v40, %v39406_v55 }
 0xdb3   :  { %v14357_v62 = vpop.f32.mrb[121].mxu1 }
 0xdb4   :  { %v39499_v47 = vpop.f32.mrb[122].mxu1 }
 0xdb5   :  { %v16465_v58 = vpack.c.bf16 %v39499_v47, %v39491_v60  ;;  %v14360_v2 = vpop.f32.mrb[123].mxu1  ;;  %v33655_v60 = vld [vmem:[%s42549_s13 + $0xb00] sm:$0xff]  }
 0xdb6   :  { %v16464_v26 = vpack.c.bf16 %v14360_v2, %v14357_v62  ;;  %v33641_v62 = vld [vmem:[%s42549_s13 + $0xab0] sm:$0xff]   ;;  %v33642_v2 = vld [vmem:[%s42549_s13 + $0xab8] sm:$0xff]  }
 0xdb7   :  { %30128 = vmatmul.mubr.bf16.gmra.mrb[228].mxu1 %v33638_v34 }
 0xdb8   :  { %30131 = vmatprep.mubr.bf16.mxu1 %v33639_v12 }
 0xdb9   :  { %31096 = vmatmul.mubr.msk.bf16.gmra.mrb[72].mxu0 %vm960_vm0, %v42745_v33 }
 0xdba   :  { %31099 = vmatprep.mubr.msk.bf16.mxu0 %vm960_vm0, %v16456_v11  ;;  %v39508_v48 = vpop.f32.mrb[124].mxu1 }
 0xdbb   :  { %v14373_v59 = vpop.f32.mrb[125].mxu1 }
 0xdbc   :  { %v39516_v34 = vpop.f32.mrb[126].mxu1 }
 0xdbd   :  { %v14376_v40 = vpop.f32.mrb[127].mxu1 }
 0xdbe   :  { %v16466_v12 = vpack.c.bf16 %v14376_v40, %v14373_v59  ;;  %v33643_v59 = vld [vmem:[%s42549_s13 + $0xac0] sm:$0xff]   ;;  %v33644_v40 = vld [vmem:[%s42549_s13 + $0xac8] sm:$0xff]  }
 0xdbf   :  { %30132 = vmatmul.mubr.bf16.gmra.mrb[232].mxu1 %v33640_v44 }
 0xdc0   :  { %30135 = vmatprep.mubr.bf16.mxu1 %v33641_v62 }
 0xdc1   :  { %31100 = vmatmul.mubr.msk.bf16.gmra.mrb[76].mxu0 %vm960_vm0, %v16457_v54 }
 0xdc2   :  { %31103 = vmatprep.mubr.msk.bf16.mxu0 %vm960_vm0, %v16458_v0  ;;  %v39525_v11 = vpop.f32.mrb[128].mxu1  ;;  %v42746_v0 = vpack.c.bf16 %v39448_v35, %v39440_v22 }
 0xdc3   :  { %v14389_v33 = vpop.f32.mrb[129].mxu1 }
 0xdc4   :  { %v39533_v44 = vpop.f32.mrb[130].mxu1 }
 0xdc5   :  { %v16469_v45 = vpack.c.bf16 %v39533_v44, %v39525_v11  ;;  %v14392_v15 = vpop.f32.mrb[131].mxu1  ;;  %v33659_v11 = vld [vmem:[%s42549_s13 + $0xb20] sm:$0xff]  }
 0xdc6   :  { %v16468_v54 = vpack.c.bf16 %v14392_v15, %v14389_v33  ;;  %v33645_v33 = vld [vmem:[%s42549_s13 + $0xad0] sm:$0xff]   ;;  %v33646_v15 = vld [vmem:[%s42549_s13 + $0xad8] sm:$0xff]  }
 0xdc7   :  { %30136 = vmatmul.mubr.bf16.gmra.mrb[236].mxu1 %v33642_v2 }
 0xdc8   :  { %30139 = vmatprep.mubr.bf16.mxu1 %v33643_v59 }
 0xdc9   :  { %31104 = vmatmul.mubr.msk.bf16.gmra.mrb[80].mxu0 %vm960_vm0, %v42746_v0 }
 0xdca   :  { %31107 = vmatprep.mubr.msk.bf16.mxu0 %vm960_vm0, %v16460_v9  ;;  %v39542_v62 = vpop.f32.mrb[132].mxu1 }
 0xdcb   :  { %v14405_v55 = vpop.f32.mrb[133].mxu1 }
 0xdcc   :  { %v39550_v2 = vpop.f32.mrb[134].mxu1 }
 0xdcd   :  { %v14408_v35 = vpop.f32.mrb[135].mxu1 }
 0xdce   :  { %v16470_v59 = vpack.c.bf16 %v14408_v35, %v14405_v55  ;;  %v33647_v55 = vld [vmem:[%s42549_s13 + $0xae0] sm:$0xff]   ;;  %v33648_v35 = vld [vmem:[%s42549_s13 + $0xae8] sm:$0xff]  }
 0xdcf   :  { %30140 = vmatmul.mubr.bf16.gmra.mrb[240].mxu1 %v33644_v40 }
 0xdd0   :  { %30143 = vmatprep.mubr.bf16.mxu1 %v33645_v33 }
 0xdd1   :  { %31108 = vmatmul.mubr.msk.bf16.gmra.mrb[84].mxu0 %vm960_vm0, %v16461_v18 }
 0xdd2   :  { %31111 = vmatprep.mubr.msk.bf16.mxu0 %vm960_vm0, %v16462_v57  ;;  %v39559_v9 = vpop.f32.mrb[136].mxu1  ;;  %v42747_v57 = vpack.c.bf16 %v39482_v7, %v39474_v32 }
 0xdd3   :  { %v39564_v0 = vpop.f32.mrb[137].mxu1 }
 0xdd4   :  { %v39569_v40 = vpop.f32.mrb[138].mxu1 }
 0xdd5   :  { %v39573_v41 = vpop.f32.mrb[139].mxu1 }
 0xdd6   :  { %v16472_v18 = vpack.c.bf16 %v39573_v41, %v39564_v0 }
 0xdd7   :  { %30144 = vmatmul.mubr.bf16.gmra.mrb[244].mxu1 %v33646_v15  ;;  %v33651_v15 = vld [vmem:[%s42549_s13 + $0xaf0] sm:$0xff]  }
 0xdd8   :  { %30147 = vmatprep.mubr.bf16.mxu1 %v33647_v55  ;;  %v33685_v55 = vld [vmem:[%s42552_s14 + $0x140] sm:$0xff]  }
 0xdd9   :  { %31112 = vmatmul.mubr.msk.bf16.gmra.mrb[88].mxu0 %vm960_vm0, %v42747_v57  ;;  %v33652_v57 = vld [vmem:[%s42549_s13 + $0xaf8] sm:$0xff]   ;;  %31195 = vmatprep.subr.bf16.mxu0 %v33685_v55 }
 0xdda   :  { %31115 = vmatprep.mubr.msk.bf16.mxu0 %vm960_vm0, %v16464_v26  ;;  %v39582_v33 = vpop.f32.mrb[140].mxu1 }
 0xddb   :  { %v39587_v61 = vpop.f32.mrb[141].mxu1 }
 0xddc   :  { %v39592_v0 = vpop.f32.mrb[142].mxu1 }
 0xddd   :  { %v39596_v7 = vpop.f32.mrb[143].mxu1 }
 0xddf   :  { %30148 = vmatmul.mubr.bf16.gmra.mrb[248].mxu1 %v33648_v35 }
 0xde0   :  { %30151 = vmatprep.mubr.bf16.mxu1 %v33651_v15  ;;  %v42748_v15 = vpack.c.bf16 %v39516_v34, %v39508_v48 }
 0xde1   :  { %31116 = vmatmul.mubr.msk.bf16.gmra.mrb[92].mxu0 %vm960_vm0, %v16465_v58  ;;  %v33656_v58 = vld [vmem:[%s42549_s13 + $0xb08] sm:$0xff]  }
 0xde2   :  { %31119 = vmatprep.mubr.msk.bf16.mxu0 %vm960_vm0, %v16466_v12  ;;  %v39608_v41 = vpop.f32.mrb[144].mxu1 }
 0xde3   :  { %v39613_v32 = vpop.f32.mrb[145].mxu1 }
 0xde4   :  { %v39618_v47 = vpop.f32.mrb[146].mxu1 }
 0xde5   :  { %v39622_v35 = vpop.f32.mrb[147].mxu1 }
 0xde6   :  { %v16476_v12 = vpack.c.bf16 %v39622_v35, %v39613_v32  ;;  %v33657_v32 = vld [vmem:[%s42549_s13 + $0xb10] sm:$0xff]  }
 0xde7   :  { %30152 = vmatmul.mubr.bf16.gmra.mrb[252].mxu1 %v33652_v57 }
 0xde8   :  { %30155 = vmatprep.mubr.bf16.mxu1 %v33655_v60  ;;  %v33686_v60 = vld [vmem:[%s42552_s14 + $0x148] sm:$0xff]  }
 0xde9   :  { %31120 = vmatmul.mubr.msk.bf16.gmra.mrb[96].mxu0 %vm960_vm0, %v42748_v15  ;;  %v33689_v15 = vld [vmem:[%s42552_s14 + $0x150] sm:$0xff]  }
 0xdea   :  { %31131 = vmatprep.mubr.msk.bf16.mxu0 %vm960_vm0, %v16468_v54  ;;  %v39631_v26 = vpop.f32.mrb[148].mxu1 }
 0xdeb   :  { %v39636_v22 = vpop.f32.mrb[149].mxu1 }
 0xdec   :  { %v39641_v57 = vpop.f32.mrb[150].mxu1 }
 0xded   :  { %v39645_v34 = vpop.f32.mrb[151].mxu1 }
 0xdee   :  { %v16478_v54 = vpack.c.bf16 %v39645_v34, %v39636_v22  ;;  %v33658_v22 = vld [vmem:[%s42549_s13 + $0xb18] sm:$0xff]   ;;  %v42749_v34 = vpack.c.bf16 %v39550_v2, %v39542_v62 }
 0xdef   :  { %30156 = vmatmul.mubr.bf16.gmra.mrb[0].mxu1 %v33656_v58  ;;  %v33662_v62 = vld [vmem:[%s42549_s13 + $0xb38] sm:$0xff]  }
 0xdf0   :  { %30159 = vmatprep.mubr.bf16.mxu1 %v33657_v32  ;;  %v33690_v32 = vld [vmem:[%s42552_s14 + $0x158] sm:$0xff]  }
 0xdf1   :  { %31132 = vmatmul.mubr.msk.bf16.vlgmr.msra.gmra.mrb[36].mxu0 %vm960_vm0, %v16469_v45 }
 0xdf2   :  { %31135 = vmatprep.mubr.msk.bf16.mxu0 %vm960_vm0, %v16470_v59  ;;  %v39657_v35 = vpop.f32.mrb[152].mxu1  ;;  %31196 = vmatpush3.bf16.msra.mxu0 %v33685_v55 }
 0xdf3   :  { %v39662_v58 = vpop.f32.mrb[153].mxu1  ;;  %31197 = vmatprep.subr.bf16.mxu0 %v33686_v60 }
 0xdf4   :  { %v39670_v44 = vpop.f32.mrb[154].mxu1 }
 0xdf5   :  { %v16481_v45 = vpack.c.bf16 %v39670_v44, %v39657_v35  ;;  %v14488_v59 = vpop.f32.mrb[155].mxu1 }
 0xdf6   :  { %v16480_v55 = vpack.c.bf16 %v14488_v59, %v39662_v58  ;;  %31198 = vmatpush3.bf16.msra.mxu0 %v33686_v60  ;;  %v33660_v60 = vld [vmem:[%s42549_s13 + $0xb28] sm:$0xff]   ;;  %v33661_v58 = vld [vmem:[%s42549_s13 + $0xb30] sm:$0xff]   ;;  %v42751_v59 = vpack.c.bf16 %v39596_v7, %v39587_v61  ;;  %v42752_v7 = vpack.c.bf16 %v39592_v0, %v39582_v33 }
 0xdf7   :  { %30160 = vmatmul.mubr.bf16.gmra.mrb[4].mxu1 %v33658_v22  ;;  %31199 = vmatprep.subr.bf16.mxu0 %v33689_v15 }
 0xdf8   :  { %30163 = vmatprep.mubr.bf16.mxu1 %v33659_v11 }
 0xdf9   :  { %31136 = vmatmul.mubr.msk.bf16.gmra.mrb[40].mxu0 %vm960_vm0, %v42749_v34 }
 0xdfa   :  { %31139 = vmatprep.mubr.msk.bf16.mxu0 %vm960_vm0, %v16472_v18  ;;  %v39683_v48 = vpop.f32.mrb[156].mxu1  ;;  %31200 = vmatpush3.bf16.msra.mxu0 %v33689_v15  ;;  %v42750_v15 = vpack.c.bf16 %v39569_v40, %v39559_v9 }
 0xdfb   :  { %v14501_v22 = vpop.f32.mrb[157].mxu1  ;;  %31201 = vmatprep.subr.bf16.mxu0 %v33690_v32 }
 0xdfc   :  { %v39691_v11 = vpop.f32.mrb[158].mxu1 }
 0xdfd   :  { %v14504_v2 = vpop.f32.mrb[159].mxu1 }
 0xdfe   :  { %v16482_v18 = vpack.c.bf16 %v14504_v2, %v14501_v22  ;;  %31202 = vmatpush3.bf16.msra.mxu0 %v33690_v32  ;;  %v33663_v32 = vld [vmem:[%s42549_s13 + $0xb40] sm:$0xff]   ;;  %v33664_v2 = vld [vmem:[%s42549_s13 + $0xb48] sm:$0xff]  }
 0xdff   :  { %30164 = vmatmul.mubr.bf16.gmra.mrb[8].mxu1 %v33660_v60 }
 0xe00   :  { %30167 = vmatprep.mubr.bf16.mxu1 %v33661_v58 }
 0xe01   :  { %31140 = vmatmul.mubr.msk.bf16.gmra.mrb[44].mxu0 %vm960_vm0, %v42750_v15 }
 0xe02   :  { %31143 = vmatprep.mubr.msk.bf16.mxu0 %vm960_vm0, %v42751_v59  ;;  %v39703_v34 = vpop.f32.mrb[160].mxu1  ;;  %v33665_v59 = vld [vmem:[%s42549_s13 + $0xb50] sm:$0xff]  }
 0xe03   :  { %v14517_v22 = vpop.f32.mrb[161].mxu1 }
 0xe04   :  { %v39711_v60 = vpop.f32.mrb[162].mxu1 }
 0xe05   :  { %v16485_v9 = vpack.c.bf16 %v39711_v60, %v39703_v34  ;;  %v14520_v40 = vpop.f32.mrb[163].mxu1 }
 0xe06   :  { %v16484_v61 = vpack.c.bf16 %v14520_v40, %v14517_v22  ;;  %v33666_v40 = vld [vmem:[%s42549_s13 + $0xb58] sm:$0xff]  }
 0xe07   :  { %30168 = vmatmul.mubr.bf16.gmra.mrb[12].mxu1 %v33662_v62 }
 0xe08   :  { %30171 = vmatprep.mubr.bf16.mxu1 %v33663_v32 }
 0xe09   :  { %31144 = vmatmul.mubr.msk.bf16.gmra.mrb[48].mxu0 %vm960_vm0, %v42752_v7 }
 0xe0a   :  { %31147 = vmatprep.mubr.msk.bf16.mxu0 %vm960_vm0, %v16476_v12  ;;  %v39720_v58 = vpop.f32.mrb[164].mxu1  ;;  %v42753_v12 = vpack.c.bf16 %v39618_v47, %v39608_v41 }
 0xe0b   :  { %v14533_v15 = vpop.f32.mrb[165].mxu1 }
 0xe0c   :  { %v39728_v62 = vpop.f32.mrb[166].mxu1 }
 0xe0d   :  { %v14536_v0 = vpop.f32.mrb[167].mxu1 }
 0xe0e   :  { %v16486_v22 = vpack.c.bf16 %v14536_v0, %v14533_v15  ;;  %v33667_v15 = vld [vmem:[%s42549_s13 + $0xb60] sm:$0xff]  }
 0xe0f   :  { %30172 = vmatmul.mubr.bf16.gmra.mrb[16].mxu1 %v33664_v2 }
 0xe10   :  { %30175 = vmatprep.mubr.bf16.mxu1 %v33665_v59 }
 0xe11   :  { %31148 = vmatmul.mubr.msk.bf16.gmra.mrb[52].mxu0 %vm960_vm0, %v42753_v12  ;;  %v33668_v12 = vld [vmem:[%s42549_s13 + $0xb68] sm:$0xff]  }
 0xe12   :  { %31151 = vmatprep.mubr.msk.bf16.mxu0 %vm960_vm0, %v16478_v54  ;;  %v39737_v32 = vpop.f32.mrb[168].mxu1  ;;  %v42754_v54 = vpack.c.bf16 %v39641_v57, %v39631_v26 }
 0xe13   :  { %v14549_v7 = vpop.f32.mrb[169].mxu1 }
 0xe14   :  { %v39745_v2 = vpop.f32.mrb[170].mxu1 }
 0xe15   :  { %v16489_v41 = vpack.c.bf16 %v39745_v2, %v39737_v32  ;;  %v14552_v47 = vpop.f32.mrb[171].mxu1 }
 0xe16   :  { %v16488_v59 = vpack.c.bf16 %v14552_v47, %v14549_v7  ;;  %v33669_v7 = vld [vmem:[%s42549_s13 + $0xb70] sm:$0xff]   ;;  %v33670_v47 = vld [vmem:[%s42549_s13 + $0xb78] sm:$0xff]  }
 0xe17   :  { %30176 = vmatmul.mubr.bf16.gmra.mrb[20].mxu1 %v33666_v40 }
 0xe18   :  { %30179 = vmatprep.mubr.bf16.mxu1 %v33667_v15 }
 0xe19   :  { %31152 = vmatmul.mubr.msk.bf16.gmra.mrb[56].mxu0 %vm960_vm0, %v42754_v54 }
 0xe1a   :  { %31155 = vmatprep.mubr.msk.bf16.mxu0 %vm960_vm0, %v16480_v55  ;;  %v39754_v0 = vpop.f32.mrb[172].mxu1 }
 0xe1b   :  { %v14565_v33 = vpop.f32.mrb[173].mxu1 }
 0xe1c   :  { %v39762_v40 = vpop.f32.mrb[174].mxu1 }
 0xe1d   :  { %v14568_v57 = vpop.f32.mrb[175].mxu1 }
 0xe1e   :  { %v16490_v15 = vpack.c.bf16 %v14568_v57, %v14565_v33  ;;  %v33671_v33 = vld [vmem:[%s42549_s13 + $0xb80] sm:$0xff]   ;;  %v33672_v57 = vld [vmem:[%s42549_s13 + $0xb88] sm:$0xff]  }
 0xe1f   :  { %30180 = vmatmul.mubr.bf16.gmra.mrb[24].mxu1 %v33668_v12 }
 0xe20   :  { %30183 = vmatprep.mubr.bf16.mxu1 %v33669_v7 }
 0xe21   :  { %31156 = vmatmul.mubr.msk.bf16.gmra.mrb[60].mxu0 %vm960_vm0, %v16481_v45 }
 0xe22   :  { %31159 = vmatprep.mubr.msk.bf16.mxu0 %vm960_vm0, %v16482_v18  ;;  %v39771_v55 = vpop.f32.mrb[176].mxu1  ;;  %v42755_v18 = vpack.c.bf16 %v39691_v11, %v39683_v48 }
 0xe23   :  { %v14581_v54 = vpop.f32.mrb[177].mxu1 }
 0xe24   :  { %v39779_v12 = vpop.f32.mrb[178].mxu1 }
 0xe25   :  { %v16493_v35 = vpack.c.bf16 %v39779_v12, %v39771_v55  ;;  %v14584_v44 = vpop.f32.mrb[179].mxu1 }
 0xe26   :  { %v16492_v45 = vpack.c.bf16 %v14584_v44, %v14581_v54  ;;  %v33673_v54 = vld [vmem:[%s42549_s13 + $0xb90] sm:$0xff]   ;;  %v33674_v44 = vld [vmem:[%s42549_s13 + $0xb98] sm:$0xff]  }
 0xe27   :  { %30184 = vmatmul.mubr.bf16.gmra.mrb[28].mxu1 %v33670_v47 }
 0xe28   :  { %30187 = vmatprep.mubr.bf16.mxu1 %v33671_v33 }
 0xe29   :  { %31160 = vmatmul.mubr.msk.bf16.gmra.mrb[64].mxu0 %vm960_vm0, %v42755_v18 }
 0xe2a   :  { %31163 = vmatprep.mubr.msk.bf16.mxu0 %vm960_vm0, %v16484_v61  ;;  %v39788_v7 = vpop.f32.mrb[180].mxu1 }
 0xe2b   :  { %v14597_v26 = vpop.f32.mrb[181].mxu1 }
 0xe2c   :  { %v39796_v47 = vpop.f32.mrb[182].mxu1 }
 0xe2d   :  { %v14600_v11 = vpop.f32.mrb[183].mxu1 }
 0xe2e   :  { %v16494_v33 = vpack.c.bf16 %v14600_v11, %v14597_v26  ;;  %v33675_v26 = vld [vmem:[%s42549_s13 + $0xba0] sm:$0xff]   ;;  %v33676_v11 = vld [vmem:[%s42549_s13 + $0xba8] sm:$0xff]  }
 0xe2f   :  { %30188 = vmatmul.mubr.bf16.gmra.mrb[32].mxu1 %v33672_v57 }
 0xe30   :  { %30191 = vmatprep.mubr.bf16.mxu1 %v33673_v54 }
 0xe31   :  { %31164 = vmatmul.mubr.msk.bf16.gmra.mrb[68].mxu0 %vm960_vm0, %v16485_v9 }
 0xe32   :  { %31167 = vmatprep.mubr.msk.bf16.mxu0 %vm960_vm0, %v16486_v22  ;;  %v39805_v61 = vpop.f32.mrb[184].mxu1  ;;  %v42756_v22 = vpack.c.bf16 %v39728_v62, %v39720_v58 }
 0xe33   :  { %v14613_v18 = vpop.f32.mrb[185].mxu1 }
 0xe34   :  { %v39813_v57 = vpop.f32.mrb[186].mxu1 }
 0xe35   :  { %v16497_v34 = vpack.c.bf16 %v39813_v57, %v39805_v61  ;;  %v14616_v60 = vpop.f32.mrb[187].mxu1  ;;  %v33691_v61 = vld [vmem:[%s42549_s13 + $0xc00] sm:$0xff]  }
 0xe36   :  { %v16496_v9 = vpack.c.bf16 %v14616_v60, %v14613_v18  ;;  %v33677_v18 = vld [vmem:[%s42549_s13 + $0xbb0] sm:$0xff]   ;;  %v33678_v60 = vld [vmem:[%s42549_s13 + $0xbb8] sm:$0xff]  }
 0xe37   :  { %30192 = vmatmul.mubr.bf16.gmra.mrb[36].mxu1 %v33674_v44 }
 0xe38   :  { %30195 = vmatprep.mubr.bf16.mxu1 %v33675_v26 }
 0xe39   :  { %31168 = vmatmul.mubr.msk.bf16.gmra.mrb[72].mxu0 %vm960_vm0, %v42756_v22 }
 0xe3a   :  { %31171 = vmatprep.mubr.msk.bf16.mxu0 %vm960_vm0, %v16488_v59  ;;  %v39822_v54 = vpop.f32.mrb[188].mxu1 }
 0xe3b   :  { %v14629_v48 = vpop.f32.mrb[189].mxu1 }
 0xe3c   :  { %v39830_v44 = vpop.f32.mrb[190].mxu1 }
 0xe3d   :  { %v14632_v62 = vpop.f32.mrb[191].mxu1 }
 0xe3e   :  { %v16498_v26 = vpack.c.bf16 %v14632_v62, %v14629_v48  ;;  %v33679_v48 = vld [vmem:[%s42549_s13 + $0xbc0] sm:$0xff]   ;;  %v33680_v62 = vld [vmem:[%s42549_s13 + $0xbc8] sm:$0xff]  }
 0xe3f   :  { %30196 = vmatmul.mubr.bf16.gmra.mrb[40].mxu1 %v33676_v11 }
 0xe40   :  { %30199 = vmatprep.mubr.bf16.mxu1 %v33677_v18 }
 0xe41   :  { %31172 = vmatmul.mubr.msk.bf16.gmra.mrb[76].mxu0 %vm960_vm0, %v16489_v41 }
 0xe42   :  { %31175 = vmatprep.mubr.msk.bf16.mxu0 %vm960_vm0, %v16490_v15  ;;  %v39839_v59 = vpop.f32.mrb[192].mxu1  ;;  %v42757_v15 = vpack.c.bf16 %v39762_v40, %v39754_v0 }
 0xe43   :  { %v14645_v22 = vpop.f32.mrb[193].mxu1 }
 0xe44   :  { %v39847_v11 = vpop.f32.mrb[194].mxu1 }
 0xe45   :  { %v16501_v32 = vpack.c.bf16 %v39847_v11, %v39839_v59  ;;  %v14648_v2 = vpop.f32.mrb[195].mxu1  ;;  %v33695_v59 = vld [vmem:[%s42549_s13 + $0xc20] sm:$0xff]  }
 0xe46   :  { %v16500_v41 = vpack.c.bf16 %v14648_v2, %v14645_v22  ;;  %v33681_v22 = vld [vmem:[%s42549_s13 + $0xbd0] sm:$0xff]   ;;  %v33682_v2 = vld [vmem:[%s42549_s13 + $0xbd8] sm:$0xff]  }
 0xe47   :  { %30200 = vmatmul.mubr.bf16.gmra.mrb[44].mxu1 %v33678_v60 }
 0xe48   :  { %30203 = vmatprep.mubr.bf16.mxu1 %v33679_v48 }
 0xe49   :  { %31176 = vmatmul.mubr.msk.bf16.gmra.mrb[80].mxu0 %vm960_vm0, %v42757_v15 }
 0xe4a   :  { %31179 = vmatprep.mubr.msk.bf16.mxu0 %vm960_vm0, %v16492_v45  ;;  %v39856_v18 = vpop.f32.mrb[196].mxu1 }
 0xe4b   :  { %v14661_v58 = vpop.f32.mrb[197].mxu1 }
 0xe4c   :  { %v39864_v60 = vpop.f32.mrb[198].mxu1 }
 0xe4d   :  { %v14664_v40 = vpop.f32.mrb[199].mxu1 }
 0xe4e   :  { %v16502_v48 = vpack.c.bf16 %v14664_v40, %v14661_v58  ;;  %v33683_v58 = vld [vmem:[%s42549_s13 + $0xbe0] sm:$0xff]   ;;  %v33684_v40 = vld [vmem:[%s42549_s13 + $0xbe8] sm:$0xff]  }
 0xe4f   :  { %30204 = vmatmul.mubr.bf16.gmra.mrb[48].mxu1 %v33680_v62 }
 0xe50   :  { %30207 = vmatprep.mubr.bf16.mxu1 %v33681_v22 }
 0xe51   :  { %31180 = vmatmul.mubr.msk.bf16.gmra.mrb[84].mxu0 %vm960_vm0, %v16493_v35 }
 0xe52   :  { %31183 = vmatprep.mubr.msk.bf16.mxu0 %vm960_vm0, %v16494_v33  ;;  %v39873_v45 = vpop.f32.mrb[200].mxu1  ;;  %v42758_v33 = vpack.c.bf16 %v39796_v47, %v39788_v7 }
 0xe53   :  { %v39878_v15 = vpop.f32.mrb[201].mxu1 }
 0xe54   :  { %v39883_v62 = vpop.f32.mrb[202].mxu1 }
 0xe55   :  { %v39887_v12 = vpop.f32.mrb[203].mxu1 }
 0xe56   :  { %v16504_v35 = vpack.c.bf16 %v39887_v12, %v39878_v15 }
 0xe57   :  { %30208 = vmatmul.mubr.bf16.gmra.mrb[52].mxu1 %v33682_v2  ;;  %v33687_v2 = vld [vmem:[%s42549_s13 + $0xbf0] sm:$0xff]  }
 0xe58   :  { %30211 = vmatprep.mubr.bf16.mxu1 %v33683_v58  ;;  %v33721_v58 = vld [vmem:[%s42552_s14 + $0x160] sm:$0xff]  }
 0xe59   :  { %31184 = vmatmul.mubr.msk.bf16.gmra.mrb[88].mxu0 %vm960_vm0, %v42758_v33  ;;  %v33688_v33 = vld [vmem:[%s42549_s13 + $0xbf8] sm:$0xff]   ;;  %31267 = vmatprep.subr.bf16.mxu0 %v33721_v58 }
 0xe5a   :  { %31187 = vmatprep.mubr.msk.bf16.mxu0 %vm960_vm0, %v16496_v9  ;;  %v39896_v22 = vpop.f32.mrb[204].mxu1 }
 0xe5b   :  { %v39901_v55 = vpop.f32.mrb[205].mxu1 }
 0xe5c   :  { %v39906_v15 = vpop.f32.mrb[206].mxu1 }
 0xe5d   :  { %v39910_v47 = vpop.f32.mrb[207].mxu1 }
 0xe5f   :  { %30212 = vmatmul.mubr.bf16.gmra.mrb[56].mxu1 %v33684_v40 }
 0xe60   :  { %30215 = vmatprep.mubr.bf16.mxu1 %v33687_v2  ;;  %v42759_v2 = vpack.c.bf16 %v39830_v44, %v39822_v54 }
 0xe61   :  { %31188 = vmatmul.mubr.msk.bf16.gmra.mrb[92].mxu0 %vm960_vm0, %v16497_v34  ;;  %v33692_v34 = vld [vmem:[%s42549_s13 + $0xc08] sm:$0xff]  }
 0xe62   :  { %31191 = vmatprep.mubr.msk.bf16.mxu0 %vm960_vm0, %v16498_v26  ;;  %v39922_v12 = vpop.f32.mrb[208].mxu1 }
 0xe63   :  { %v39927_v7 = vpop.f32.mrb[209].mxu1 }
 0xe64   :  { %v39932_v57 = vpop.f32.mrb[210].mxu1 }
 0xe65   :  { %v39936_v40 = vpop.f32.mrb[211].mxu1 }
 0xe66   :  { %v16508_v26 = vpack.c.bf16 %v39936_v40, %v39927_v7  ;;  %v33693_v7 = vld [vmem:[%s42549_s13 + $0xc10] sm:$0xff]  }
 0xe67   :  { %30216 = vmatmul.mubr.bf16.gmra.mrb[60].mxu1 %v33688_v33 }
 0xe68   :  { %30219 = vmatprep.mubr.bf16.mxu1 %v33691_v61  ;;  %v33722_v61 = vld [vmem:[%s42552_s14 + $0x168] sm:$0xff]  }
 0xe69   :  { %31192 = vmatmul.mubr.msk.bf16.gmra.mrb[96].mxu0 %vm960_vm0, %v42759_v2  ;;  %v33725_v2 = vld [vmem:[%s42552_s14 + $0x170] sm:$0xff]  }
 0xe6a   :  { %31203 = vmatprep.mubr.msk.bf16.mxu0 %vm960_vm0, %v16500_v41  ;;  %v39945_v9 = vpop.f32.mrb[212].mxu1 }
 0xe6b   :  { %v39950_v0 = vpop.f32.mrb[213].mxu1 }
 0xe6c   :  { %v39955_v33 = vpop.f32.mrb[214].mxu1 }
 0xe6d   :  { %v39959_v44 = vpop.f32.mrb[215].mxu1 }
 0xe6e   :  { %v16510_v41 = vpack.c.bf16 %v39959_v44, %v39950_v0  ;;  %v33694_v0 = vld [vmem:[%s42549_s13 + $0xc18] sm:$0xff]   ;;  %v42760_v44 = vpack.c.bf16 %v39864_v60, %v39856_v18 }
 0xe6f   :  { %30220 = vmatmul.mubr.bf16.gmra.mrb[64].mxu1 %v33692_v34  ;;  %v33698_v18 = vld [vmem:[%s42549_s13 + $0xc38] sm:$0xff]  }
 0xe70   :  { %30223 = vmatprep.mubr.bf16.mxu1 %v33693_v7  ;;  %v33726_v7 = vld [vmem:[%s42552_s14 + $0x178] sm:$0xff]  }
 0xe71   :  { %31204 = vmatmul.mubr.msk.bf16.vlgmr.msra.gmra.mrb[36].mxu0 %vm960_vm0, %v16501_v32 }
 0xe72   :  { %31207 = vmatprep.mubr.msk.bf16.mxu0 %vm960_vm0, %v16502_v48  ;;  %v39971_v40 = vpop.f32.mrb[216].mxu1  ;;  %31268 = vmatpush3.bf16.msra.mxu0 %v33721_v58 }
 0xe73   :  { %v39976_v34 = vpop.f32.mrb[217].mxu1  ;;  %31269 = vmatprep.subr.bf16.mxu0 %v33722_v61 }
 0xe74   :  { %v39984_v11 = vpop.f32.mrb[218].mxu1 }
 0xe75   :  { %v16513_v32 = vpack.c.bf16 %v39984_v11, %v39971_v40  ;;  %v14744_v48 = vpop.f32.mrb[219].mxu1 }
 0xe76   :  { %v16512_v58 = vpack.c.bf16 %v14744_v48, %v39976_v34  ;;  %31270 = vmatpush3.bf16.msra.mxu0 %v33722_v61  ;;  %v33696_v61 = vld [vmem:[%s42549_s13 + $0xc28] sm:$0xff]   ;;  %v33697_v34 = vld [vmem:[%s42549_s13 + $0xc30] sm:$0xff]   ;;  %v42762_v48 = vpack.c.bf16 %v39910_v47, %v39901_v55  ;;  %v42763_v47 = vpack.c.bf16 %v39906_v15, %v39896_v22 }
 0xe77   :  { %30224 = vmatmul.mubr.bf16.gmra.mrb[68].mxu1 %v33694_v0  ;;  %31271 = vmatprep.subr.bf16.mxu0 %v33725_v2 }
 0xe78   :  { %30227 = vmatprep.mubr.bf16.mxu1 %v33695_v59 }
 0xe79   :  { %31208 = vmatmul.mubr.msk.bf16.gmra.mrb[40].mxu0 %vm960_vm0, %v42760_v44 }
 0xe7a   :  { %31211 = vmatprep.mubr.msk.bf16.mxu0 %vm960_vm0, %v16504_v35  ;;  %v39997_v54 = vpop.f32.mrb[220].mxu1  ;;  %31272 = vmatpush3.bf16.msra.mxu0 %v33725_v2  ;;  %v42761_v2 = vpack.c.bf16 %v39883_v62, %v39873_v45 }
 0xe7b   :  { %v14757_v0 = vpop.f32.mrb[221].mxu1  ;;  %31273 = vmatprep.subr.bf16.mxu0 %v33726_v7 }
 0xe7c   :  { %v40005_v59 = vpop.f32.mrb[222].mxu1 }
 0xe7d   :  { %v14760_v60 = vpop.f32.mrb[223].mxu1 }
 0xe7e   :  { %v16514_v35 = vpack.c.bf16 %v14760_v60, %v14757_v0  ;;  %31274 = vmatpush3.bf16.msra.mxu0 %v33726_v7  ;;  %v33699_v7 = vld [vmem:[%s42549_s13 + $0xc40] sm:$0xff]   ;;  %v33700_v60 = vld [vmem:[%s42549_s13 + $0xc48] sm:$0xff]  }
 0xe7f   :  { %30228 = vmatmul.mubr.bf16.gmra.mrb[72].mxu1 %v33696_v61 }
 0xe80   :  { %30231 = vmatprep.mubr.bf16.mxu1 %v33697_v34 }
 0xe81   :  { %31212 = vmatmul.mubr.msk.bf16.gmra.mrb[44].mxu0 %vm960_vm0, %v42761_v2 }
 0xe82   :  { %31215 = vmatprep.mubr.msk.bf16.mxu0 %vm960_vm0, %v42762_v48  ;;  %v40017_v44 = vpop.f32.mrb[224].mxu1  ;;  %v33701_v48 = vld [vmem:[%s42549_s13 + $0xc50] sm:$0xff]  }
 0xe83   :  { %v14773_v0 = vpop.f32.mrb[225].mxu1 }
 0xe84   :  { %v40025_v61 = vpop.f32.mrb[226].mxu1 }
 0xe85   :  { %v16517_v45 = vpack.c.bf16 %v40025_v61, %v40017_v44  ;;  %v14776_v62 = vpop.f32.mrb[227].mxu1 }
 0xe86   :  { %v16516_v55 = vpack.c.bf16 %v14776_v62, %v14773_v0  ;;  %v33702_v62 = vld [vmem:[%s42549_s13 + $0xc58] sm:$0xff]  }
 0xe87   :  { %30232 = vmatmul.mubr.bf16.gmra.mrb[76].mxu1 %v33698_v18 }
 0xe88   :  { %30235 = vmatprep.mubr.bf16.mxu1 %v33699_v7 }
 0xe89   :  { %31216 = vmatmul.mubr.msk.bf16.gmra.mrb[48].mxu0 %vm960_vm0, %v42763_v47 }
 0xe8a   :  { %31219 = vmatprep.mubr.msk.bf16.mxu0 %vm960_vm0, %v16508_v26  ;;  %v40034_v34 = vpop.f32.mrb[228].mxu1  ;;  %v42764_v26 = vpack.c.bf16 %v39932_v57, %v39922_v12 }
 0xe8b   :  { %v14789_v2 = vpop.f32.mrb[229].mxu1 }
 0xe8c   :  { %v40042_v18 = vpop.f32.mrb[230].mxu1 }
 0xe8d   :  { %v14792_v15 = vpop.f32.mrb[231].mxu1 }
 0xe8e   :  { %v16518_v0 = vpack.c.bf16 %v14792_v15, %v14789_v2  ;;  %v33703_v2 = vld [vmem:[%s42549_s13 + $0xc60] sm:$0xff]  }
 0xe8f   :  { %30236 = vmatmul.mubr.bf16.gmra.mrb[80].mxu1 %v33700_v60 }
 0xe90   :  { %30239 = vmatprep.mubr.bf16.mxu1 %v33701_v48 }
 0xe91   :  { %31220 = vmatmul.mubr.msk.bf16.gmra.mrb[52].mxu0 %vm960_vm0, %v42764_v26  ;;  %v33704_v26 = vld [vmem:[%s42549_s13 + $0xc68] sm:$0xff]  }
 0xe92   :  { %31223 = vmatprep.mubr.msk.bf16.mxu0 %vm960_vm0, %v16510_v41  ;;  %v40051_v7 = vpop.f32.mrb[232].mxu1  ;;  %v42765_v41 = vpack.c.bf16 %v39955_v33, %v39945_v9 }
 0xe93   :  { %v14805_v47 = vpop.f32.mrb[233].mxu1 }
 0xe94   :  { %v40059_v60 = vpop.f32.mrb[234].mxu1 }
 0xe95   :  { %v16521_v12 = vpack.c.bf16 %v40059_v60, %v40051_v7  ;;  %v14808_v57 = vpop.f32.mrb[235].mxu1 }
 0xe96   :  { %v16520_v48 = vpack.c.bf16 %v14808_v57, %v14805_v47  ;;  %v33705_v47 = vld [vmem:[%s42549_s13 + $0xc70] sm:$0xff]   ;;  %v33706_v57 = vld [vmem:[%s42549_s13 + $0xc78] sm:$0xff]  }
 0xe97   :  { %30240 = vmatmul.mubr.bf16.gmra.mrb[84].mxu1 %v33702_v62 }
 0xe98   :  { %30243 = vmatprep.mubr.bf16.mxu1 %v33703_v2 }
 0xe99   :  { %31224 = vmatmul.mubr.msk.bf16.gmra.mrb[56].mxu0 %vm960_vm0, %v42765_v41 }
 0xe9a   :  { %31227 = vmatprep.mubr.msk.bf16.mxu0 %vm960_vm0, %v16512_v58  ;;  %v40068_v15 = vpop.f32.mrb[236].mxu1 }
 0xe9b   :  { %v14821_v22 = vpop.f32.mrb[237].mxu1 }
 0xe9c   :  { %v40076_v62 = vpop.f32.mrb[238].mxu1 }
 0xe9d   :  { %v14824_v33 = vpop.f32.mrb[239].mxu1 }
 0xe9e   :  { %v16522_v2 = vpack.c.bf16 %v14824_v33, %v14821_v22  ;;  %v33707_v22 = vld [vmem:[%s42549_s13 + $0xc80] sm:$0xff]   ;;  %v33708_v33 = vld [vmem:[%s42549_s13 + $0xc88] sm:$0xff]  }
 0xe9f   :  { %30244 = vmatmul.mubr.bf16.gmra.mrb[88].mxu1 %v33704_v26 }
 0xea0   :  { %30247 = vmatprep.mubr.bf16.mxu1 %v33705_v47 }
 0xea1   :  { %31228 = vmatmul.mubr.msk.bf16.gmra.mrb[60].mxu0 %vm960_vm0, %v16513_v32 }
 0xea2   :  { %31231 = vmatprep.mubr.msk.bf16.mxu0 %vm960_vm0, %v16514_v35  ;;  %v40085_v58 = vpop.f32.mrb[240].mxu1  ;;  %v42766_v35 = vpack.c.bf16 %v40005_v59, %v39997_v54 }
 0xea3   :  { %v14837_v41 = vpop.f32.mrb[241].mxu1 }
 0xea4   :  { %v40093_v26 = vpop.f32.mrb[242].mxu1 }
 0xea5   :  { %v16525_v40 = vpack.c.bf16 %v40093_v26, %v40085_v58  ;;  %v14840_v11 = vpop.f32.mrb[243].mxu1 }
 0xea6   :  { %v16524_v32 = vpack.c.bf16 %v14840_v11, %v14837_v41  ;;  %v33709_v41 = vld [vmem:[%s42549_s13 + $0xc90] sm:$0xff]   ;;  %v33710_v11 = vld [vmem:[%s42549_s13 + $0xc98] sm:$0xff]  }
 0xea7   :  { %30248 = vmatmul.mubr.bf16.gmra.mrb[92].mxu1 %v33706_v57 }
 0xea8   :  { %30251 = vmatprep.mubr.bf16.mxu1 %v33707_v22 }
 0xea9   :  { %31232 = vmatmul.mubr.msk.bf16.gmra.mrb[64].mxu0 %vm960_vm0, %v42766_v35 }
 0xeaa   :  { %31235 = vmatprep.mubr.msk.bf16.mxu0 %vm960_vm0, %v16516_v55  ;;  %v40102_v47 = vpop.f32.mrb[244].mxu1 }
 0xeab   :  { %v14853_v9 = vpop.f32.mrb[245].mxu1 }
 0xeac   :  { %v40110_v57 = vpop.f32.mrb[246].mxu1 }
 0xead   :  { %v14856_v59 = vpop.f32.mrb[247].mxu1 }
 0xeae   :  { %v16526_v22 = vpack.c.bf16 %v14856_v59, %v14853_v9  ;;  %v33711_v9 = vld [vmem:[%s42549_s13 + $0xca0] sm:$0xff]   ;;  %v33712_v59 = vld [vmem:[%s42549_s13 + $0xca8] sm:$0xff]  }
 0xeaf   :  { %30252 = vmatmul.mubr.bf16.gmra.mrb[96].mxu1 %v33708_v33 }
 0xeb0   :  { %30255 = vmatprep.mubr.bf16.mxu1 %v33709_v41 }
 0xeb1   :  { %31236 = vmatmul.mubr.msk.bf16.gmra.mrb[68].mxu0 %vm960_vm0, %v16517_v45 }
 0xeb2   :  { %31239 = vmatprep.mubr.msk.bf16.mxu0 %vm960_vm0, %v16518_v0  ;;  %v40119_v55 = vpop.f32.mrb[248].mxu1  ;;  %v42767_v0 = vpack.c.bf16 %v40042_v18, %v40034_v34 }
 0xeb3   :  { %v14869_v35 = vpop.f32.mrb[249].mxu1 }
 0xeb4   :  { %v40127_v33 = vpop.f32.mrb[250].mxu1 }
 0xeb5   :  { %v16529_v44 = vpack.c.bf16 %v40127_v33, %v40119_v55  ;;  %v14872_v61 = vpop.f32.mrb[251].mxu1  ;;  %v33727_v55 = vld [vmem:[%s42549_s13 + $0xd00] sm:$0xff]  }
 0xeb6   :  { %v16528_v45 = vpack.c.bf16 %v14872_v61, %v14869_v35  ;;  %v33713_v35 = vld [vmem:[%s42549_s13 + $0xcb0] sm:$0xff]   ;;  %v33714_v61 = vld [vmem:[%s42549_s13 + $0xcb8] sm:$0xff]  }
 0xeb7   :  { %30256 = vmatmul.mubr.bf16.gmra.mrb[100].mxu1 %v33710_v11 }
 0xeb8   :  { %30259 = vmatprep.mubr.bf16.mxu1 %v33711_v9 }
 0xeb9   :  { %31240 = vmatmul.mubr.msk.bf16.gmra.mrb[72].mxu0 %vm960_vm0, %v42767_v0 }
 0xeba   :  { %31243 = vmatprep.mubr.msk.bf16.mxu0 %vm960_vm0, %v16520_v48  ;;  %v40136_v41 = vpop.f32.mrb[252].mxu1 }
 0xebb   :  { %v14885_v54 = vpop.f32.mrb[253].mxu1 }
 0xebc   :  { %v40144_v11 = vpop.f32.mrb[254].mxu1 }
 0xebd   :  { %v14888_v18 = vpop.f32.mrb[255].mxu1 }
 0xebe   :  { %v16530_v9 = vpack.c.bf16 %v14888_v18, %v14885_v54  ;;  %v33715_v54 = vld [vmem:[%s42549_s13 + $0xcc0] sm:$0xff]   ;;  %v33716_v18 = vld [vmem:[%s42549_s13 + $0xcc8] sm:$0xff]  }
 0xebf   :  { %30260 = vmatmul.mubr.bf16.gmra.mrb[104].mxu1 %v33712_v59 }
 0xec0   :  { %30263 = vmatprep.mubr.bf16.mxu1 %v33713_v35 }
 0xec1   :  { %31244 = vmatmul.mubr.msk.bf16.gmra.mrb[76].mxu0 %vm960_vm0, %v16521_v12 }
 0xec2   :  { %31247 = vmatprep.mubr.msk.bf16.mxu0 %vm960_vm0, %v16522_v2  ;;  %v40153_v48 = vpop.f32.mrb[0].mxu1  ;;  %v42768_v2 = vpack.c.bf16 %v40076_v62, %v40068_v15 }
 0xec3   :  { %v14901_v0 = vpop.f32.mrb[1].mxu1 }
 0xec4   :  { %v40161_v59 = vpop.f32.mrb[2].mxu1 }
 0xec5   :  { %v16533_v7 = vpack.c.bf16 %v40161_v59, %v40153_v48  ;;  %v14904_v60 = vpop.f32.mrb[3].mxu1  ;;  %v33731_v48 = vld [vmem:[%s42549_s13 + $0xd20] sm:$0xff]  }
 0xec6   :  { %v16532_v12 = vpack.c.bf16 %v14904_v60, %v14901_v0  ;;  %v33717_v0 = vld [vmem:[%s42549_s13 + $0xcd0] sm:$0xff]   ;;  %v33718_v60 = vld [vmem:[%s42549_s13 + $0xcd8] sm:$0xff]  }
 0xec7   :  { %30264 = vmatmul.mubr.bf16.gmra.mrb[108].mxu1 %v33714_v61 }
 0xec8   :  { %30267 = vmatprep.mubr.bf16.mxu1 %v33715_v54 }
 0xec9   :  { %31248 = vmatmul.mubr.msk.bf16.gmra.mrb[80].mxu0 %vm960_vm0, %v42768_v2 }
 0xeca   :  { %31251 = vmatprep.mubr.msk.bf16.mxu0 %vm960_vm0, %v16524_v32  ;;  %v40170_v35 = vpop.f32.mrb[4].mxu1 }
 0xecb   :  { %v14917_v34 = vpop.f32.mrb[5].mxu1 }
 0xecc   :  { %v40178_v61 = vpop.f32.mrb[6].mxu1 }
 0xecd   :  { %v14920_v62 = vpop.f32.mrb[7].mxu1 }
 0xece   :  { %v16534_v54 = vpack.c.bf16 %v14920_v62, %v14917_v34  ;;  %v33719_v34 = vld [vmem:[%s42549_s13 + $0xce0] sm:$0xff]   ;;  %v33720_v62 = vld [vmem:[%s42549_s13 + $0xce8] sm:$0xff]  }
 0xecf   :  { %30268 = vmatmul.mubr.bf16.gmra.mrb[112].mxu1 %v33716_v18 }
 0xed0   :  { %30271 = vmatprep.mubr.bf16.mxu1 %v33717_v0 }
 0xed1   :  { %31252 = vmatmul.mubr.msk.bf16.gmra.mrb[84].mxu0 %vm960_vm0, %v16525_v40 }
 0xed2   :  { %31255 = vmatprep.mubr.msk.bf16.mxu0 %vm960_vm0, %v16526_v22  ;;  %v40187_v32 = vpop.f32.mrb[8].mxu1  ;;  %v42769_v22 = vpack.c.bf16 %v40110_v57, %v40102_v47 }
 0xed3   :  { %v40192_v2 = vpop.f32.mrb[9].mxu1 }
 0xed4   :  { %v40197_v18 = vpop.f32.mrb[10].mxu1 }
 0xed5   :  { %v40201_v26 = vpop.f32.mrb[11].mxu1 }
 0xed6   :  { %v16536_v40 = vpack.c.bf16 %v40201_v26, %v40192_v2 }
 0xed7   :  { %30272 = vmatmul.mubr.bf16.gmra.mrb[116].mxu1 %v33718_v60  ;;  %v33723_v60 = vld [vmem:[%s42549_s13 + $0xcf0] sm:$0xff]  }
 0xed8   :  { %30275 = vmatprep.mubr.bf16.mxu1 %v33719_v34  ;;  %v33757_v34 = vld [vmem:[%s42552_s14 + $0x180] sm:$0xff]  }
 0xed9   :  { %31256 = vmatmul.mubr.msk.bf16.gmra.mrb[88].mxu0 %vm960_vm0, %v42769_v22  ;;  %v33724_v22 = vld [vmem:[%s42549_s13 + $0xcf8] sm:$0xff]   ;;  %31339 = vmatprep.subr.bf16.mxu0 %v33757_v34 }
 0xeda   :  { %31259 = vmatprep.mubr.msk.bf16.mxu0 %vm960_vm0, %v16528_v45  ;;  %v40210_v0 = vpop.f32.mrb[12].mxu1 }
 0xedb   :  { %v40215_v58 = vpop.f32.mrb[13].mxu1 }
 0xedc   :  { %v40220_v2 = vpop.f32.mrb[14].mxu1 }
 0xedd   :  { %v40224_v57 = vpop.f32.mrb[15].mxu1 }
 0xedf   :  { %30276 = vmatmul.mubr.bf16.gmra.mrb[120].mxu1 %v33720_v62 }
 0xee0   :  { %30279 = vmatprep.mubr.bf16.mxu1 %v33723_v60  ;;  %v42770_v60 = vpack.c.bf16 %v40144_v11, %v40136_v41 }
 0xee1   :  { %31260 = vmatmul.mubr.msk.bf16.gmra.mrb[92].mxu0 %vm960_vm0, %v16529_v44  ;;  %v33728_v44 = vld [vmem:[%s42549_s13 + $0xd08] sm:$0xff]  }
 0xee2   :  { %31263 = vmatprep.mubr.msk.bf16.mxu0 %vm960_vm0, %v16530_v9  ;;  %v40236_v26 = vpop.f32.mrb[16].mxu1 }
 0xee3   :  { %v40241_v47 = vpop.f32.mrb[17].mxu1 }
 0xee4   :  { %v40246_v33 = vpop.f32.mrb[18].mxu1 }
 0xee5   :  { %v40250_v62 = vpop.f32.mrb[19].mxu1 }
 0xee6   :  { %v16540_v9 = vpack.c.bf16 %v40250_v62, %v40241_v47  ;;  %v33729_v47 = vld [vmem:[%s42549_s13 + $0xd10] sm:$0xff]  }
 0xee7   :  { %30280 = vmatmul.mubr.bf16.gmra.mrb[124].mxu1 %v33724_v22 }
 0xee8   :  { %30283 = vmatprep.mubr.bf16.mxu1 %v33727_v55  ;;  %v33758_v55 = vld [vmem:[%s42552_s14 + $0x188] sm:$0xff]  }
 0xee9   :  { %31264 = vmatmul.mubr.msk.bf16.gmra.mrb[96].mxu0 %vm960_vm0, %v42770_v60  ;;  %v33761_v60 = vld [vmem:[%s42552_s14 + $0x190] sm:$0xff]  }
 0xeea   :  { %31275 = vmatprep.mubr.msk.bf16.mxu0 %vm960_vm0, %v16532_v12  ;;  %v40259_v45 = vpop.f32.mrb[20].mxu1 }
 0xeeb   :  { %v40264_v15 = vpop.f32.mrb[21].mxu1 }
 0xeec   :  { %v40269_v22 = vpop.f32.mrb[22].mxu1 }
 0xeed   :  { %v40273_v11 = vpop.f32.mrb[23].mxu1 }
 0xeee   :  { %v16542_v12 = vpack.c.bf16 %v40273_v11, %v40264_v15  ;;  %v33730_v15 = vld [vmem:[%s42549_s13 + $0xd18] sm:$0xff]   ;;  %v42771_v11 = vpack.c.bf16 %v40178_v61, %v40170_v35 }
 0xeef   :  { %30284 = vmatmul.mubr.bf16.gmra.mrb[128].mxu1 %v33728_v44  ;;  %v33734_v35 = vld [vmem:[%s42549_s13 + $0xd38] sm:$0xff]  }
 0xef0   :  { %30287 = vmatprep.mubr.bf16.mxu1 %v33729_v47  ;;  %v33762_v47 = vld [vmem:[%s42552_s14 + $0x198] sm:$0xff]  }
 0xef1   :  { %31276 = vmatmul.mubr.msk.bf16.vlgmr.msra.gmra.mrb[36].mxu0 %vm960_vm0, %v16533_v7 }
 0xef2   :  { %31279 = vmatprep.mubr.msk.bf16.mxu0 %vm960_vm0, %v16534_v54  ;;  %v40285_v62 = vpop.f32.mrb[24].mxu1  ;;  %31340 = vmatpush3.bf16.msra.mxu0 %v33757_v34 }
 0xef3   :  { %v40290_v44 = vpop.f32.mrb[25].mxu1  ;;  %31341 = vmatprep.subr.bf16.mxu0 %v33758_v55 }
 0xef4   :  { %v40298_v59 = vpop.f32.mrb[26].mxu1 }
 0xef5   :  { %v16545_v7 = vpack.c.bf16 %v40298_v59, %v40285_v62  ;;  %v15000_v54 = vpop.f32.mrb[27].mxu1 }
 0xef6   :  { %v16544_v34 = vpack.c.bf16 %v15000_v54, %v40290_v44  ;;  %31342 = vmatpush3.bf16.msra.mxu0 %v33758_v55  ;;  %v33732_v55 = vld [vmem:[%s42549_s13 + $0xd28] sm:$0xff]   ;;  %v33733_v44 = vld [vmem:[%s42549_s13 + $0xd30] sm:$0xff]   ;;  %v42773_v54 = vpack.c.bf16 %v40224_v57, %v40215_v58  ;;  %v42774_v57 = vpack.c.bf16 %v40220_v2, %v40210_v0 }
 0xef7   :  { %30288 = vmatmul.mubr.bf16.gmra.mrb[132].mxu1 %v33730_v15  ;;  %31343 = vmatprep.subr.bf16.mxu0 %v33761_v60 }
 0xef8   :  { %30291 = vmatprep.mubr.bf16.mxu1 %v33731_v48 }
 0xef9   :  { %31280 = vmatmul.mubr.msk.bf16.gmra.mrb[40].mxu0 %vm960_vm0, %v42771_v11 }
 0xefa   :  { %31283 = vmatprep.mubr.msk.bf16.mxu0 %vm960_vm0, %v16536_v40  ;;  %v40311_v41 = vpop.f32.mrb[28].mxu1  ;;  %31344 = vmatpush3.bf16.msra.mxu0 %v33761_v60  ;;  %v42772_v60 = vpack.c.bf16 %v40197_v18, %v40187_v32 }
 0xefb   :  { %v15013_v15 = vpop.f32.mrb[29].mxu1  ;;  %31345 = vmatprep.subr.bf16.mxu0 %v33762_v47 }
 0xefc   :  { %v40319_v48 = vpop.f32.mrb[30].mxu1 }
 0xefd   :  { %v15016_v61 = vpop.f32.mrb[31].mxu1 }
 0xefe   :  { %v16546_v40 = vpack.c.bf16 %v15016_v61, %v15013_v15  ;;  %31346 = vmatpush3.bf16.msra.mxu0 %v33762_v47  ;;  %v33735_v47 = vld [vmem:[%s42549_s13 + $0xd40] sm:$0xff]   ;;  %v33736_v61 = vld [vmem:[%s42549_s13 + $0xd48] sm:$0xff]  }
 0xeff   :  { %30292 = vmatmul.mubr.bf16.gmra.mrb[136].mxu1 %v33732_v55 }
 0xf00   :  { %30295 = vmatprep.mubr.bf16.mxu1 %v33733_v44 }
 0xf01   :  { %31284 = vmatmul.mubr.msk.bf16.gmra.mrb[44].mxu0 %vm960_vm0, %v42772_v60 }
 0xf02   :  { %31287 = vmatprep.mubr.msk.bf16.mxu0 %vm960_vm0, %v42773_v54  ;;  %v40331_v11 = vpop.f32.mrb[32].mxu1  ;;  %v33737_v54 = vld [vmem:[%s42549_s13 + $0xd50] sm:$0xff]  }
 0xf03   :  { %v15029_v15 = vpop.f32.mrb[33].mxu1 }
 0xf04   :  { %v40339_v55 = vpop.f32.mrb[34].mxu1 }
 0xf05   :  { %v16549_v32 = vpack.c.bf16 %v40339_v55, %v40331_v11  ;;  %v15032_v18 = vpop.f32.mrb[35].mxu1 }
 0xf06   :  { %v16548_v58 = vpack.c.bf16 %v15032_v18, %v15029_v15  ;;  %v33738_v18 = vld [vmem:[%s42549_s13 + $0xd58] sm:$0xff]  }
 0xf07   :  { %30296 = vmatmul.mubr.bf16.gmra.mrb[140].mxu1 %v33734_v35 }
 0xf08   :  { %30299 = vmatprep.mubr.bf16.mxu1 %v33735_v47 }
 0xf09   :  { %31288 = vmatmul.mubr.msk.bf16.gmra.mrb[48].mxu0 %vm960_vm0, %v42774_v57 }
 0xf0a   :  { %31291 = vmatprep.mubr.msk.bf16.mxu0 %vm960_vm0, %v16540_v9  ;;  %v40348_v44 = vpop.f32.mrb[36].mxu1  ;;  %v42775_v9 = vpack.c.bf16 %v40246_v33, %v40236_v26 }
 0xf0b   :  { %v15045_v60 = vpop.f32.mrb[37].mxu1 }
 0xf0c   :  { %v40356_v35 = vpop.f32.mrb[38].mxu1 }
 0xf0d   :  { %v15048_v2 = vpop.f32.mrb[39].mxu1 }
 0xf0e   :  { %v16550_v15 = vpack.c.bf16 %v15048_v2, %v15045_v60  ;;  %v33739_v60 = vld [vmem:[%s42549_s13 + $0xd60] sm:$0xff]  }
 0xf0f   :  { %30300 = vmatmul.mubr.bf16.gmra.mrb[144].mxu1 %v33736_v61 }
 0xf10   :  { %30303 = vmatprep.mubr.bf16.mxu1 %v33737_v54 }
 0xf11   :  { %31292 = vmatmul.mubr.msk.bf16.gmra.mrb[52].mxu0 %vm960_vm0, %v42775_v9  ;;  %v33740_v9 = vld [vmem:[%s42549_s13 + $0xd68] sm:$0xff]  }
 0xf12   :  { %31295 = vmatprep.mubr.msk.bf16.mxu0 %vm960_vm0, %v16542_v12  ;;  %v40365_v47 = vpop.f32.mrb[40].mxu1  ;;  %v42776_v12 = vpack.c.bf16 %v40269_v22, %v40259_v45 }
 0xf13   :  { %v15061_v57 = vpop.f32.mrb[41].mxu1 }
 0xf14   :  { %v40373_v61 = vpop.f32.mrb[42].mxu1 }
 0xf15   :  { %v16553_v26 = vpack.c.bf16 %v40373_v61, %v40365_v47  ;;  %v15064_v33 = vpop.f32.mrb[43].mxu1 }
 0xf16   :  { %v16552_v54 = vpack.c.bf16 %v15064_v33, %v15061_v57  ;;  %v33741_v57 = vld [vmem:[%s42549_s13 + $0xd70] sm:$0xff]   ;;  %v33742_v33 = vld [vmem:[%s42549_s13 + $0xd78] sm:$0xff]  }
 0xf17   :  { %30304 = vmatmul.mubr.bf16.gmra.mrb[148].mxu1 %v33738_v18 }
 0xf18   :  { %30307 = vmatprep.mubr.bf16.mxu1 %v33739_v60 }
 0xf19   :  { %31296 = vmatmul.mubr.msk.bf16.gmra.mrb[56].mxu0 %vm960_vm0, %v42776_v12 }
 0xf1a   :  { %31299 = vmatprep.mubr.msk.bf16.mxu0 %vm960_vm0, %v16544_v34  ;;  %v40382_v2 = vpop.f32.mrb[44].mxu1 }
 0xf1b   :  { %v15077_v0 = vpop.f32.mrb[45].mxu1 }
 0xf1c   :  { %v40390_v18 = vpop.f32.mrb[46].mxu1 }
 0xf1d   :  { %v15080_v22 = vpop.f32.mrb[47].mxu1 }
 0xf1e   :  { %v16554_v60 = vpack.c.bf16 %v15080_v22, %v15077_v0  ;;  %v33743_v0 = vld [vmem:[%s42549_s13 + $0xd80] sm:$0xff]   ;;  %v33744_v22 = vld [vmem:[%s42549_s13 + $0xd88] sm:$0xff]  }
 0xf1f   :  { %30308 = vmatmul.mubr.bf16.gmra.mrb[152].mxu1 %v33740_v9 }
 0xf20   :  { %30311 = vmatprep.mubr.bf16.mxu1 %v33741_v57 }
 0xf21   :  { %31300 = vmatmul.mubr.msk.bf16.gmra.mrb[60].mxu0 %vm960_vm0, %v16545_v7 }
 0xf22   :  { %31303 = vmatprep.mubr.msk.bf16.mxu0 %vm960_vm0, %v16546_v40  ;;  %v40399_v34 = vpop.f32.mrb[48].mxu1  ;;  %v42777_v40 = vpack.c.bf16 %v40319_v48, %v40311_v41 }
 0xf23   :  { %v15093_v12 = vpop.f32.mrb[49].mxu1 }
 0xf24   :  { %v40407_v9 = vpop.f32.mrb[50].mxu1 }
 0xf25   :  { %v16557_v62 = vpack.c.bf16 %v40407_v9, %v40399_v34  ;;  %v15096_v59 = vpop.f32.mrb[51].mxu1 }
 0xf26   :  { %v16556_v7 = vpack.c.bf16 %v15096_v59, %v15093_v12  ;;  %v33745_v12 = vld [vmem:[%s42549_s13 + $0xd90] sm:$0xff]   ;;  %v33746_v59 = vld [vmem:[%s42549_s13 + $0xd98] sm:$0xff]  }
 0xf27   :  { %30312 = vmatmul.mubr.bf16.gmra.mrb[156].mxu1 %v33742_v33 }
 0xf28   :  { %30315 = vmatprep.mubr.bf16.mxu1 %v33743_v0 }
 0xf29   :  { %31304 = vmatmul.mubr.msk.bf16.gmra.mrb[64].mxu0 %vm960_vm0, %v42777_v40 }
 0xf2a   :  { %31307 = vmatprep.mubr.msk.bf16.mxu0 %vm960_vm0, %v16548_v58  ;;  %v40416_v57 = vpop.f32.mrb[52].mxu1 }
 0xf2b   :  { %v15109_v45 = vpop.f32.mrb[53].mxu1 }
 0xf2c   :  { %v40424_v33 = vpop.f32.mrb[54].mxu1 }
 0xf2d   :  { %v15112_v48 = vpop.f32.mrb[55].mxu1 }
 0xf2e   :  { %v16558_v0 = vpack.c.bf16 %v15112_v48, %v15109_v45  ;;  %v33747_v45 = vld [vmem:[%s42549_s13 + $0xda0] sm:$0xff]   ;;  %v33748_v48 = vld [vmem:[%s42549_s13 + $0xda8] sm:$0xff]  }
 0xf2f   :  { %30316 = vmatmul.mubr.bf16.gmra.mrb[160].mxu1 %v33744_v22 }
 0xf30   :  { %30319 = vmatprep.mubr.bf16.mxu1 %v33745_v12 }
 0xf31   :  { %31308 = vmatmul.mubr.msk.bf16.gmra.mrb[68].mxu0 %vm960_vm0, %v16549_v32 }
 0xf32   :  { %31311 = vmatprep.mubr.msk.bf16.mxu0 %vm960_vm0, %v16550_v15  ;;  %v40433_v58 = vpop.f32.mrb[56].mxu1  ;;  %v42778_v15 = vpack.c.bf16 %v40356_v35, %v40348_v44 }
 0xf33   :  { %v15125_v40 = vpop.f32.mrb[57].mxu1 }
 0xf34   :  { %v40441_v22 = vpop.f32.mrb[58].mxu1 }
 0xf35   :  { %v16561_v11 = vpack.c.bf16 %v40441_v22, %v40433_v58  ;;  %v15128_v55 = vpop.f32.mrb[59].mxu1  ;;  %v33763_v58 = vld [vmem:[%s42549_s13 + $0xe00] sm:$0xff]  }
 0xf36   :  { %v16560_v32 = vpack.c.bf16 %v15128_v55, %v15125_v40  ;;  %v33749_v40 = vld [vmem:[%s42549_s13 + $0xdb0] sm:$0xff]   ;;  %v33750_v55 = vld [vmem:[%s42549_s13 + $0xdb8] sm:$0xff]  }
 0xf37   :  { %30320 = vmatmul.mubr.bf16.gmra.mrb[164].mxu1 %v33746_v59 }
 0xf38   :  { %30323 = vmatprep.mubr.bf16.mxu1 %v33747_v45 }
 0xf39   :  { %31312 = vmatmul.mubr.msk.bf16.gmra.mrb[72].mxu0 %vm960_vm0, %v42778_v15 }
 0xf3a   :  { %31315 = vmatprep.mubr.msk.bf16.mxu0 %vm960_vm0, %v16552_v54  ;;  %v40450_v12 = vpop.f32.mrb[60].mxu1 }
 0xf3b   :  { %v15141_v41 = vpop.f32.mrb[61].mxu1 }
 0xf3c   :  { %v40458_v59 = vpop.f32.mrb[62].mxu1 }
 0xf3d   :  { %v15144_v35 = vpop.f32.mrb[63].mxu1 }
 0xf3e   :  { %v16562_v45 = vpack.c.bf16 %v15144_v35, %v15141_v41  ;;  %v33751_v41 = vld [vmem:[%s42549_s13 + $0xdc0] sm:$0xff]   ;;  %v33752_v35 = vld [vmem:[%s42549_s13 + $0xdc8] sm:$0xff]  }
 0xf3f   :  { %30324 = vmatmul.mubr.bf16.gmra.mrb[168].mxu1 %v33748_v48 }
 0xf40   :  { %30327 = vmatprep.mubr.bf16.mxu1 %v33749_v40 }
 0xf41   :  { %31316 = vmatmul.mubr.msk.bf16.gmra.mrb[76].mxu0 %vm960_vm0, %v16553_v26 }
 0xf42   :  { %31319 = vmatprep.mubr.msk.bf16.mxu0 %vm960_vm0, %v16554_v60  ;;  %v40467_v54 = vpop.f32.mrb[64].mxu1  ;;  %v42779_v60 = vpack.c.bf16 %v40390_v18, %v40382_v2 }
 0xf43   :  { %v15157_v15 = vpop.f32.mrb[65].mxu1 }
 0xf44   :  { %v40475_v48 = vpop.f32.mrb[66].mxu1 }
 0xf45   :  { %v16565_v47 = vpack.c.bf16 %v40475_v48, %v40467_v54  ;;  %v15160_v61 = vpop.f32.mrb[67].mxu1  ;;  %v33767_v54 = vld [vmem:[%s42549_s13 + $0xe20] sm:$0xff]  }
 0xf46   :  { %v16564_v26 = vpack.c.bf16 %v15160_v61, %v15157_v15  ;;  %v33753_v15 = vld [vmem:[%s42549_s13 + $0xdd0] sm:$0xff]   ;;  %v33754_v61 = vld [vmem:[%s42549_s13 + $0xdd8] sm:$0xff]  }
 0xf47   :  { %30328 = vmatmul.mubr.bf16.gmra.mrb[172].mxu1 %v33750_v55 }
 0xf48   :  { %30331 = vmatprep.mubr.bf16.mxu1 %v33751_v41 }
 0xf49   :  { %31320 = vmatmul.mubr.msk.bf16.gmra.mrb[80].mxu0 %vm960_vm0, %v42779_v60 }
 0xf4a   :  { %31323 = vmatprep.mubr.msk.bf16.mxu0 %vm960_vm0, %v16556_v7  ;;  %v40484_v40 = vpop.f32.mrb[68].mxu1 }
 0xf4b   :  { %v15173_v44 = vpop.f32.mrb[69].mxu1 }
 0xf4c   :  { %v40492_v55 = vpop.f32.mrb[70].mxu1 }
 0xf4d   :  { %v15176_v18 = vpop.f32.mrb[71].mxu1 }
 0xf4e   :  { %v16566_v41 = vpack.c.bf16 %v15176_v18, %v15173_v44  ;;  %v33755_v44 = vld [vmem:[%s42549_s13 + $0xde0] sm:$0xff]   ;;  %v33756_v18 = vld [vmem:[%s42549_s13 + $0xde8] sm:$0xff]  }
 0xf4f   :  { %30332 = vmatmul.mubr.bf16.gmra.mrb[176].mxu1 %v33752_v35 }
 0xf50   :  { %30335 = vmatprep.mubr.bf16.mxu1 %v33753_v15 }
 0xf51   :  { %31324 = vmatmul.mubr.msk.bf16.gmra.mrb[84].mxu0 %vm960_vm0, %v16557_v62 }
 0xf52   :  { %31327 = vmatprep.mubr.msk.bf16.mxu0 %vm960_vm0, %v16558_v0  ;;  %v40501_v7 = vpop.f32.mrb[72].mxu1  ;;  %v42780_v0 = vpack.c.bf16 %v40424_v33, %v40416_v57 }
 0xf53   :  { %v40506_v60 = vpop.f32.mrb[73].mxu1 }
 0xf54   :  { %v40511_v35 = vpop.f32.mrb[74].mxu1 }
 0xf55   :  { %v40515_v9 = vpop.f32.mrb[75].mxu1 }
 0xf56   :  { %v16568_v62 = vpack.c.bf16 %v40515_v9, %v40506_v60 }
 0xf57   :  { %30336 = vmatmul.mubr.bf16.gmra.mrb[180].mxu1 %v33754_v61  ;;  %v33759_v61 = vld [vmem:[%s42549_s13 + $0xdf0] sm:$0xff]  }
 0xf58   :  { %30339 = vmatprep.mubr.bf16.mxu1 %v33755_v44  ;;  %v33793_v44 = vld [vmem:[%s42552_s14 + $0x1a0] sm:$0xff]  }
 0xf59   :  { %31328 = vmatmul.mubr.msk.bf16.gmra.mrb[88].mxu0 %vm960_vm0, %v42780_v0  ;;  %v33760_v0 = vld [vmem:[%s42549_s13 + $0xdf8] sm:$0xff]   ;;  %31411 = vmatprep.subr.bf16.mxu0 %v33793_v44 }
 0xf5a   :  { %31331 = vmatprep.mubr.msk.bf16.mxu0 %vm960_vm0, %v16560_v32  ;;  %v40524_v15 = vpop.f32.mrb[76].mxu1 }
 0xf5b   :  { %v40529_v34 = vpop.f32.mrb[77].mxu1 }
 0xf5c   :  { %v40534_v60 = vpop.f32.mrb[78].mxu1 }
 0xf5d   :  { %v40538_v33 = vpop.f32.mrb[79].mxu1 }
 0xf5f   :  { %30340 = vmatmul.mubr.bf16.gmra.mrb[184].mxu1 %v33756_v18 }
 0xf60   :  { %30343 = vmatprep.mubr.bf16.mxu1 %v33759_v61  ;;  %v42781_v61 = vpack.c.bf16 %v40458_v59, %v40450_v12 }
 0xf61   :  { %31332 = vmatmul.mubr.msk.bf16.gmra.mrb[92].mxu0 %vm960_vm0, %v16561_v11  ;;  %v33764_v11 = vld [vmem:[%s42549_s13 + $0xe08] sm:$0xff]  }
 0xf62   :  { %31335 = vmatprep.mubr.msk.bf16.mxu0 %vm960_vm0, %v16562_v45  ;;  %v40550_v9 = vpop.f32.mrb[80].mxu1 }
 0xf63   :  { %v40555_v57 = vpop.f32.mrb[81].mxu1 }
 0xf64   :  { %v40560_v22 = vpop.f32.mrb[82].mxu1 }
 0xf65   :  { %v40564_v18 = vpop.f32.mrb[83].mxu1 }
 0xf66   :  { %v16572_v45 = vpack.c.bf16 %v40564_v18, %v40555_v57  ;;  %v33765_v57 = vld [vmem:[%s42549_s13 + $0xe10] sm:$0xff]  }
 0xf67   :  { %30344 = vmatmul.mubr.bf16.gmra.mrb[188].mxu1 %v33760_v0 }
 0xf68   :  { %30347 = vmatprep.mubr.bf16.mxu1 %v33763_v58  ;;  %v33794_v58 = vld [vmem:[%s42552_s14 + $0x1a8] sm:$0xff]  }
 0xf69   :  { %31336 = vmatmul.mubr.msk.bf16.gmra.mrb[96].mxu0 %vm960_vm0, %v42781_v61  ;;  %v33797_v61 = vld [vmem:[%s42552_s14 + $0x1b0] sm:$0xff]  }
 0xf6a   :  { %31347 = vmatprep.mubr.msk.bf16.mxu0 %vm960_vm0, %v16564_v26  ;;  %v40573_v32 = vpop.f32.mrb[84].mxu1 }
 0xf6b   :  { %v40578_v2 = vpop.f32.mrb[85].mxu1 }
 0xf6c   :  { %v40583_v0 = vpop.f32.mrb[86].mxu1 }
 0xf6d   :  { %v40587_v59 = vpop.f32.mrb[87].mxu1 }
 0xf6e   :  { %v16574_v26 = vpack.c.bf16 %v40587_v59, %v40578_v2  ;;  %v33766_v2 = vld [vmem:[%s42549_s13 + $0xe18] sm:$0xff]   ;;  %v42782_v59 = vpack.c.bf16 %v40492_v55, %v40484_v40 }
 0xf6f   :  { %30348 = vmatmul.mubr.bf16.gmra.mrb[192].mxu1 %v33764_v11  ;;  %v33770_v40 = vld [vmem:[%s42549_s13 + $0xe38] sm:$0xff]  }
 0xf70   :  { %30351 = vmatprep.mubr.bf16.mxu1 %v33765_v57  ;;  %v33798_v57 = vld [vmem:[%s42552_s14 + $0x1b8] sm:$0xff]  }
 0xf71   :  { %31348 = vmatmul.mubr.msk.bf16.vlgmr.msra.gmra.mrb[36].mxu0 %vm960_vm0, %v16565_v47 }
 0xf72   :  { %31351 = vmatprep.mubr.msk.bf16.mxu0 %vm960_vm0, %v16566_v41  ;;  %v40599_v18 = vpop.f32.mrb[88].mxu1  ;;  %31412 = vmatpush3.bf16.msra.mxu0 %v33793_v44 }
 0xf73   :  { %v40604_v11 = vpop.f32.mrb[89].mxu1  ;;  %31413 = vmatprep.subr.bf16.mxu0 %v33794_v58 }
 0xf74   :  { %v40612_v48 = vpop.f32.mrb[90].mxu1 }
 0xf75   :  { %v16577_v47 = vpack.c.bf16 %v40612_v48, %v40599_v18  ;;  %v15256_v41 = vpop.f32.mrb[91].mxu1 }
 0xf76   :  { %v16576_v44 = vpack.c.bf16 %v15256_v41, %v40604_v11  ;;  %31414 = vmatpush3.bf16.msra.mxu0 %v33794_v58  ;;  %v33768_v58 = vld [vmem:[%s42549_s13 + $0xe28] sm:$0xff]   ;;  %v33769_v11 = vld [vmem:[%s42549_s13 + $0xe30] sm:$0xff]   ;;  %v42784_v41 = vpack.c.bf16 %v40538_v33, %v40529_v34  ;;  %v42785_v33 = vpack.c.bf16 %v40534_v60, %v40524_v15 }
 0xf77   :  { %30352 = vmatmul.mubr.bf16.gmra.mrb[196].mxu1 %v33766_v2  ;;  %31415 = vmatprep.subr.bf16.mxu0 %v33797_v61 }
 0xf78   :  { %30355 = vmatprep.mubr.bf16.mxu1 %v33767_v54 }
 0xf79   :  { %31352 = vmatmul.mubr.msk.bf16.gmra.mrb[40].mxu0 %vm960_vm0, %v42782_v59 }
 0xf7a   :  { %31355 = vmatprep.mubr.msk.bf16.mxu0 %vm960_vm0, %v16568_v62  ;;  %v40625_v12 = vpop.f32.mrb[92].mxu1  ;;  %31416 = vmatpush3.bf16.msra.mxu0 %v33797_v61  ;;  %v42783_v61 = vpack.c.bf16 %v40511_v35, %v40501_v7 }
 0xf7b   :  { %v15269_v2 = vpop.f32.mrb[93].mxu1  ;;  %31417 = vmatprep.subr.bf16.mxu0 %v33798_v57 }
 0xf7c   :  { %v40633_v54 = vpop.f32.mrb[94].mxu1 }
 0xf7d   :  { %v15272_v55 = vpop.f32.mrb[95].mxu1 }
 0xf7e   :  { %v16578_v62 = vpack.c.bf16 %v15272_v55, %v15269_v2  ;;  %31418 = vmatpush3.bf16.msra.mxu0 %v33798_v57  ;;  %v33771_v57 = vld [vmem:[%s42549_s13 + $0xe40] sm:$0xff]   ;;  %v33772_v55 = vld [vmem:[%s42549_s13 + $0xe48] sm:$0xff]  }
 0xf7f   :  { %30356 = vmatmul.mubr.bf16.gmra.mrb[200].mxu1 %v33768_v58 }
 0xf80   :  { %30359 = vmatprep.mubr.bf16.mxu1 %v33769_v11 }
 0xf81   :  { %31356 = vmatmul.mubr.msk.bf16.gmra.mrb[44].mxu0 %vm960_vm0, %v42783_v61 }
 0xf82   :  { %31359 = vmatprep.mubr.msk.bf16.mxu0 %vm960_vm0, %v42784_v41  ;;  %v40645_v59 = vpop.f32.mrb[96].mxu1  ;;  %v33773_v41 = vld [vmem:[%s42549_s13 + $0xe50] sm:$0xff]  }
 0xf83   :  { %v15285_v2 = vpop.f32.mrb[97].mxu1 }
 0xf84   :  { %v40653_v58 = vpop.f32.mrb[98].mxu1 }
 0xf85   :  { %v16581_v7 = vpack.c.bf16 %v40653_v58, %v40645_v59  ;;  %v15288_v35 = vpop.f32.mrb[99].mxu1 }
 0xf86   :  { %v16580_v34 = vpack.c.bf16 %v15288_v35, %v15285_v2  ;;  %v33774_v35 = vld [vmem:[%s42549_s13 + $0xe58] sm:$0xff]  }
 0xf87   :  { %30360 = vmatmul.mubr.bf16.gmra.mrb[204].mxu1 %v33770_v40 }
 0xf88   :  { %30363 = vmatprep.mubr.bf16.mxu1 %v33771_v57 }
 0xf89   :  { %31360 = vmatmul.mubr.msk.bf16.gmra.mrb[48].mxu0 %vm960_vm0, %v42785_v33 }
 0xf8a   :  { %31363 = vmatprep.mubr.msk.bf16.mxu0 %vm960_vm0, %v16572_v45  ;;  %v40662_v11 = vpop.f32.mrb[100].mxu1  ;;  %v42786_v45 = vpack.c.bf16 %v40560_v22, %v40550_v9 }
 0xf8b   :  { %v15301_v61 = vpop.f32.mrb[101].mxu1 }
 0xf8c   :  { %v40670_v40 = vpop.f32.mrb[102].mxu1 }
 0xf8d   :  { %v15304_v60 = vpop.f32.mrb[103].mxu1 }
 0xf8e   :  { %v16582_v2 = vpack.c.bf16 %v15304_v60, %v15301_v61  ;;  %v33775_v61 = vld [vmem:[%s42549_s13 + $0xe60] sm:$0xff]  }
 0xf8f   :  { %30364 = vmatmul.mubr.bf16.gmra.mrb[208].mxu1 %v33772_v55 }
 0xf90   :  { %30367 = vmatprep.mubr.bf16.mxu1 %v33773_v41 }
 0xf91   :  { %31364 = vmatmul.mubr.msk.bf16.gmra.mrb[52].mxu0 %vm960_vm0, %v42786_v45  ;;  %v33776_v45 = vld [vmem:[%s42549_s13 + $0xe68] sm:$0xff]  }
 0xf92   :  { %31367 = vmatprep.mubr.msk.bf16.mxu0 %vm960_vm0, %v16574_v26  ;;  %v40679_v57 = vpop.f32.mrb[104].mxu1  ;;  %v42787_v26 = vpack.c.bf16 %v40583_v0, %v40573_v32 }
 0xf93   :  { %v15317_v33 = vpop.f32.mrb[105].mxu1 }
 0xf94   :  { %v40687_v55 = vpop.f32.mrb[106].mxu1 }
 0xf95   :  { %v16585_v9 = vpack.c.bf16 %v40687_v55, %v40679_v57  ;;  %v15320_v22 = vpop.f32.mrb[107].mxu1 }
 0xf96   :  { %v16584_v41 = vpack.c.bf16 %v15320_v22, %v15317_v33  ;;  %v33777_v33 = vld [vmem:[%s42549_s13 + $0xe70] sm:$0xff]   ;;  %v33778_v22 = vld [vmem:[%s42549_s13 + $0xe78] sm:$0xff]  }
 0xf97   :  { %30368 = vmatmul.mubr.bf16.gmra.mrb[212].mxu1 %v33774_v35 }
 0xf98   :  { %30371 = vmatprep.mubr.bf16.mxu1 %v33775_v61 }
 0xf99   :  { %31368 = vmatmul.mubr.msk.bf16.gmra.mrb[56].mxu0 %vm960_vm0, %v42787_v26 }
 0xf9a   :  { %31371 = vmatprep.mubr.msk.bf16.mxu0 %vm960_vm0, %v16576_v44  ;;  %v40696_v60 = vpop.f32.mrb[108].mxu1 }
 0xf9b   :  { %v15333_v15 = vpop.f32.mrb[109].mxu1 }
 0xf9c   :  { %v40704_v35 = vpop.f32.mrb[110].mxu1 }
 0xf9d   :  { %v15336_v0 = vpop.f32.mrb[111].mxu1 }
 0xf9e   :  { %v16586_v61 = vpack.c.bf16 %v15336_v0, %v15333_v15  ;;  %v33779_v15 = vld [vmem:[%s42549_s13 + $0xe80] sm:$0xff]   ;;  %v33780_v0 = vld [vmem:[%s42549_s13 + $0xe88] sm:$0xff]  }
 0xf9f   :  { %30372 = vmatmul.mubr.bf16.gmra.mrb[216].mxu1 %v33776_v45 }
 0xfa0   :  { %30375 = vmatprep.mubr.bf16.mxu1 %v33777_v33 }
 0xfa1   :  { %31372 = vmatmul.mubr.msk.bf16.gmra.mrb[60].mxu0 %vm960_vm0, %v16577_v47 }
 0xfa2   :  { %31375 = vmatprep.mubr.msk.bf16.mxu0 %vm960_vm0, %v16578_v62  ;;  %v40713_v44 = vpop.f32.mrb[112].mxu1  ;;  %v42788_v62 = vpack.c.bf16 %v40633_v54, %v40625_v12 }
 0xfa3   :  { %v15349_v26 = vpop.f32.mrb[113].mxu1 }
 0xfa4   :  { %v40721_v45 = vpop.f32.mrb[114].mxu1 }
 0xfa5   :  { %v16589_v18 = vpack.c.bf16 %v40721_v45, %v40713_v44  ;;  %v15352_v48 = vpop.f32.mrb[115].mxu1 }
 0xfa6   :  { %v16588_v47 = vpack.c.bf16 %v15352_v48, %v15349_v26  ;;  %v33781_v26 = vld [vmem:[%s42549_s13 + $0xe90] sm:$0xff]   ;;  %v33782_v48 = vld [vmem:[%s42549_s13 + $0xe98] sm:$0xff]  }
 0xfa7   :  { %30376 = vmatmul.mubr.bf16.gmra.mrb[220].mxu1 %v33778_v22 }
 0xfa8   :  { %30379 = vmatprep.mubr.bf16.mxu1 %v33779_v15 }
 0xfa9   :  { %31376 = vmatmul.mubr.msk.bf16.gmra.mrb[64].mxu0 %vm960_vm0, %v42788_v62 }
 0xfaa   :  { %31379 = vmatprep.mubr.msk.bf16.mxu0 %vm960_vm0, %v16580_v34  ;;  %v40730_v33 = vpop.f32.mrb[116].mxu1 }
 0xfab   :  { %v15365_v32 = vpop.f32.mrb[117].mxu1 }
 0xfac   :  { %v40738_v22 = vpop.f32.mrb[118].mxu1 }
 0xfad   :  { %v15368_v54 = vpop.f32.mrb[119].mxu1 }
 0xfae   :  { %v16590_v15 = vpack.c.bf16 %v15368_v54, %v15365_v32  ;;  %v33783_v32 = vld [vmem:[%s42549_s13 + $0xea0] sm:$0xff]   ;;  %v33784_v54 = vld [vmem:[%s42549_s13 + $0xea8] sm:$0xff]  }
 0xfaf   :  { %30380 = vmatmul.mubr.bf16.gmra.mrb[224].mxu1 %v33780_v0 }
 0xfb0   :  { %30383 = vmatprep.mubr.bf16.mxu1 %v33781_v26 }
 0xfb1   :  { %31380 = vmatmul.mubr.msk.bf16.gmra.mrb[68].mxu0 %vm960_vm0, %v16581_v7 }
 0xfb2   :  { %31383 = vmatprep.mubr.msk.bf16.mxu0 %vm960_vm0, %v16582_v2  ;;  %v40747_v34 = vpop.f32.mrb[120].mxu1  ;;  %v42789_v2 = vpack.c.bf16 %v40670_v40, %v40662_v11 }
 0xfb3   :  { %v15381_v62 = vpop.f32.mrb[121].mxu1 }
 0xfb4   :  { %v40755_v0 = vpop.f32.mrb[122].mxu1 }
 0xfb5   :  { %v16593_v59 = vpack.c.bf16 %v40755_v0, %v40747_v34  ;;  %v15384_v58 = vpop.f32.mrb[123].mxu1  ;;  %v33799_v34 = vld [vmem:[%s42549_s13 + $0xf00] sm:$0xff]  }
 0xfb6   :  { %v16592_v7 = vpack.c.bf16 %v15384_v58, %v15381_v62  ;;  %v33785_v62 = vld [vmem:[%s42549_s13 + $0xeb0] sm:$0xff]   ;;  %v33786_v58 = vld [vmem:[%s42549_s13 + $0xeb8] sm:$0xff]  }
 0xfb7   :  { %30384 = vmatmul.mubr.bf16.gmra.mrb[228].mxu1 %v33782_v48 }
 0xfb8   :  { %30387 = vmatprep.mubr.bf16.mxu1 %v33783_v32 }
 0xfb9   :  { %31384 = vmatmul.mubr.msk.bf16.gmra.mrb[72].mxu0 %vm960_vm0, %v42789_v2 }
 0xfba   :  { %31387 = vmatprep.mubr.msk.bf16.mxu0 %vm960_vm0, %v16584_v41  ;;  %v40764_v26 = vpop.f32.mrb[124].mxu1 }
 0xfbb   :  { %v15397_v12 = vpop.f32.mrb[125].mxu1 }
 0xfbc   :  { %v40772_v48 = vpop.f32.mrb[126].mxu1 }
 0xfbd   :  { %v15400_v40 = vpop.f32.mrb[127].mxu1 }
 0xfbe   :  { %v16594_v32 = vpack.c.bf16 %v15400_v40, %v15397_v12  ;;  %v33787_v12 = vld [vmem:[%s42549_s13 + $0xec0] sm:$0xff]   ;;  %v33788_v40 = vld [vmem:[%s42549_s13 + $0xec8] sm:$0xff]  }
 0xfbf   :  { %30388 = vmatmul.mubr.bf16.gmra.mrb[232].mxu1 %v33784_v54 }
 0xfc0   :  { %30391 = vmatprep.mubr.bf16.mxu1 %v33785_v62 }
 0xfc1   :  { %31388 = vmatmul.mubr.msk.bf16.gmra.mrb[76].mxu0 %vm960_vm0, %v16585_v9 }
 0xfc2   :  { %31391 = vmatprep.mubr.msk.bf16.mxu0 %vm960_vm0, %v16586_v61  ;;  %v40781_v41 = vpop.f32.mrb[128].mxu1  ;;  %v42790_v61 = vpack.c.bf16 %v40704_v35, %v40696_v60 }
 0xfc3   :  { %v15413_v2 = vpop.f32.mrb[129].mxu1 }
 0xfc4   :  { %v40789_v54 = vpop.f32.mrb[130].mxu1 }
 0xfc5   :  { %v16597_v57 = vpack.c.bf16 %v40789_v54, %v40781_v41  ;;  %v15416_v55 = vpop.f32.mrb[131].mxu1  ;;  %v33803_v41 = vld [vmem:[%s42549_s13 + $0xf20] sm:$0xff]  }
 0xfc6   :  { %v16596_v9 = vpack.c.bf16 %v15416_v55, %v15413_v2  ;;  %v33789_v2 = vld [vmem:[%s42549_s13 + $0xed0] sm:$0xff]   ;;  %v33790_v55 = vld [vmem:[%s42549_s13 + $0xed8] sm:$0xff]  }
 0xfc7   :  { %30392 = vmatmul.mubr.bf16.gmra.mrb[236].mxu1 %v33786_v58 }
 0xfc8   :  { %30395 = vmatprep.mubr.bf16.mxu1 %v33787_v12 }
 0xfc9   :  { %31392 = vmatmul.mubr.msk.bf16.gmra.mrb[80].mxu0 %vm960_vm0, %v42790_v61 }
 0xfca   :  { %31395 = vmatprep.mubr.msk.bf16.mxu0 %vm960_vm0, %v16588_v47  ;;  %v40798_v62 = vpop.f32.mrb[132].mxu1 }
 0xfcb   :  { %v15429_v11 = vpop.f32.mrb[133].mxu1 }
 0xfcc   :  { %v40806_v58 = vpop.f32.mrb[134].mxu1 }
 0xfcd   :  { %v15432_v35 = vpop.f32.mrb[135].mxu1 }
 0xfce   :  { %v16598_v12 = vpack.c.bf16 %v15432_v35, %v15429_v11  ;;  %v33791_v11 = vld [vmem:[%s42549_s13 + $0xee0] sm:$0xff]   ;;  %v33792_v35 = vld [vmem:[%s42549_s13 + $0xee8] sm:$0xff]  }
 0xfcf   :  { %30396 = vmatmul.mubr.bf16.gmra.mrb[240].mxu1 %v33788_v40 }
 0xfd0   :  { %30399 = vmatprep.mubr.bf16.mxu1 %v33789_v2 }
 0xfd1   :  { %31396 = vmatmul.mubr.msk.bf16.gmra.mrb[84].mxu0 %vm960_vm0, %v16589_v18 }
 0xfd2   :  { %31399 = vmatprep.mubr.msk.bf16.mxu0 %vm960_vm0, %v16590_v15  ;;  %v40815_v47 = vpop.f32.mrb[136].mxu1  ;;  %v42791_v15 = vpack.c.bf16 %v40738_v22, %v40730_v33 }
 0xfd3   :  { %v40820_v61 = vpop.f32.mrb[137].mxu1 }
 0xfd4   :  { %v40825_v40 = vpop.f32.mrb[138].mxu1 }
 0xfd5   :  { %v40829_v45 = vpop.f32.mrb[139].mxu1 }
 0xfd6   :  { %v16600_v18 = vpack.c.bf16 %v40829_v45, %v40820_v61 }
 0xfd7   :  { %30400 = vmatmul.mubr.bf16.gmra.mrb[244].mxu1 %v33790_v55  ;;  %v33795_v55 = vld [vmem:[%s42549_s13 + $0xef0] sm:$0xff]  }
 0xfd8   :  { %30403 = vmatprep.mubr.bf16.mxu1 %v33791_v11  ;;  %v33829_v11 = vld [vmem:[%s42552_s14 + $0x1c0] sm:$0xff]  }
 0xfd9   :  { %31400 = vmatmul.mubr.msk.bf16.gmra.mrb[88].mxu0 %vm960_vm0, %v42791_v15  ;;  %v33796_v15 = vld [vmem:[%s42549_s13 + $0xef8] sm:$0xff]   ;;  %31483 = vmatprep.subr.bf16.mxu0 %v33829_v11 }
 0xfda   :  { %31403 = vmatprep.mubr.msk.bf16.mxu0 %vm960_vm0, %v16592_v7  ;;  %v40838_v2 = vpop.f32.mrb[140].mxu1 }
 0xfdb   :  { %v40843_v44 = vpop.f32.mrb[141].mxu1 }
 0xfdc   :  { %v40848_v61 = vpop.f32.mrb[142].mxu1 }
 0xfdd   :  { %v40852_v22 = vpop.f32.mrb[143].mxu1 }
 0xfdf   :  { %30404 = vmatmul.mubr.bf16.gmra.mrb[248].mxu1 %v33792_v35 }
 0xfe0   :  { %30407 = vmatprep.mubr.bf16.mxu1 %v33795_v55  ;;  %v42792_v55 = vpack.c.bf16 %v40772_v48, %v40764_v26 }
 0xfe1   :  { %31404 = vmatmul.mubr.msk.bf16.gmra.mrb[92].mxu0 %vm960_vm0, %v16593_v59  ;;  %v33800_v59 = vld [vmem:[%s42549_s13 + $0xf08] sm:$0xff]  }
 0xfe2   :  { %31407 = vmatprep.mubr.msk.bf16.mxu0 %vm960_vm0, %v16594_v32  ;;  %v40864_v45 = vpop.f32.mrb[144].mxu1 }
 0xfe3   :  { %v40869_v33 = vpop.f32.mrb[145].mxu1 }
 0xfe4   :  { %v40874_v0 = vpop.f32.mrb[146].mxu1 }
 0xfe5   :  { %v40878_v35 = vpop.f32.mrb[147].mxu1 }
 0xfe6   :  { %v16604_v32 = vpack.c.bf16 %v40878_v35, %v40869_v33  ;;  %v33801_v33 = vld [vmem:[%s42549_s13 + $0xf10] sm:$0xff]  }
 0xfe7   :  { %30408 = vmatmul.mubr.bf16.gmra.mrb[252].mxu1 %v33796_v15 }
 0xfe8   :  { %30411 = vmatprep.mubr.bf16.mxu1 %v33799_v34  ;;  %v33830_v34 = vld [vmem:[%s42552_s14 + $0x1c8] sm:$0xff]  }
 0xfe9   :  { %31408 = vmatmul.mubr.msk.bf16.gmra.mrb[96].mxu0 %vm960_vm0, %v42792_v55  ;;  %v33833_v55 = vld [vmem:[%s42552_s14 + $0x1d0] sm:$0xff]  }
 0xfea   :  { %31419 = vmatprep.mubr.msk.bf16.mxu0 %vm960_vm0, %v16596_v9  ;;  %v40887_v7 = vpop.f32.mrb[148].mxu1 }
 0xfeb   :  { %v40892_v60 = vpop.f32.mrb[149].mxu1 }
 0xfec   :  { %v40897_v15 = vpop.f32.mrb[150].mxu1 }
 0xfed   :  { %v40901_v48 = vpop.f32.mrb[151].mxu1 }
 0xfee   :  { %v16606_v9 = vpack.c.bf16 %v40901_v48, %v40892_v60  ;;  %v33802_v60 = vld [vmem:[%s42549_s13 + $0xf18] sm:$0xff]   ;;  %v42793_v48 = vpack.c.bf16 %v40806_v58, %v40798_v62 }
 0xfef   :  { %30412 = vmatmul.mubr.bf16.gmra.mrb[0].mxu1 %v33800_v59  ;;  %v33806_v62 = vld [vmem:[%s42549_s13 + $0xf38] sm:$0xff]  }
 0xff0   :  { %30415 = vmatprep.mubr.bf16.mxu1 %v33801_v33  ;;  %v33834_v33 = vld [vmem:[%s42552_s14 + $0x1d8] sm:$0xff]  }
 0xff1   :  { %31420 = vmatmul.mubr.msk.bf16.vlgmr.msra.gmra.mrb[36].mxu0 %vm960_vm0, %v16597_v57 }
 0xff2   :  { %31423 = vmatprep.mubr.msk.bf16.mxu0 %vm960_vm0, %v16598_v12  ;;  %v40913_v35 = vpop.f32.mrb[152].mxu1  ;;  %31484 = vmatpush3.bf16.msra.mxu0 %v33829_v11 }
 0xff3   :  { %v40918_v59 = vpop.f32.mrb[153].mxu1  ;;  %31485 = vmatprep.subr.bf16.mxu0 %v33830_v34 }
 0xff4   :  { %v40926_v54 = vpop.f32.mrb[154].mxu1 }
 0xff5   :  { %v16609_v57 = vpack.c.bf16 %v40926_v54, %v40913_v35  ;;  %v15512_v12 = vpop.f32.mrb[155].mxu1 }
 0xff6   :  { %v16608_v11 = vpack.c.bf16 %v15512_v12, %v40918_v59  ;;  %31486 = vmatpush3.bf16.msra.mxu0 %v33830_v34  ;;  %v33804_v34 = vld [vmem:[%s42549_s13 + $0xf28] sm:$0xff]   ;;  %v33805_v59 = vld [vmem:[%s42549_s13 + $0xf30] sm:$0xff]   ;;  %v42795_v12 = vpack.c.bf16 %v40852_v22, %v40843_v44  ;;  %v42796_v22 = vpack.c.bf16 %v40848_v61, %v40838_v2 }
 0xff7   :  { %30416 = vmatmul.mubr.bf16.gmra.mrb[4].mxu1 %v33802_v60  ;;  %31487 = vmatprep.subr.bf16.mxu0 %v33833_v55 }
 0xff8   :  { %30419 = vmatprep.mubr.bf16.mxu1 %v33803_v41 }
 0xff9   :  { %31424 = vmatmul.mubr.msk.bf16.gmra.mrb[40].mxu0 %vm960_vm0, %v42793_v48 }
 0xffa   :  { %31427 = vmatprep.mubr.msk.bf16.mxu0 %vm960_vm0, %v16600_v18  ;;  %v40939_v26 = vpop.f32.mrb[156].mxu1  ;;  %31488 = vmatpush3.bf16.msra.mxu0 %v33833_v55  ;;  %v42794_v55 = vpack.c.bf16 %v40825_v40, %v40815_v47 }
 0xffb   :  { %v15525_v60 = vpop.f32.mrb[157].mxu1  ;;  %31489 = vmatprep.subr.bf16.mxu0 %v33834_v33 }
 0xffc   :  { %v40947_v41 = vpop.f32.mrb[158].mxu1 }
 0xffd   :  { %v15528_v58 = vpop.f32.mrb[159].mxu1 }
 0xffe   :  { %v16610_v18 = vpack.c.bf16 %v15528_v58, %v15525_v60  ;;  %31490 = vmatpush3.bf16.msra.mxu0 %v33834_v33  ;;  %v33807_v33 = vld [vmem:[%s42549_s13 + $0xf40] sm:$0xff]   ;;  %v33808_v58 = vld [vmem:[%s42549_s13 + $0xf48] sm:$0xff]  }
 0xfff   :  { %30420 = vmatmul.mubr.bf16.gmra.mrb[8].mxu1 %v33804_v34 }
0x1000   :  { %30423 = vmatprep.mubr.bf16.mxu1 %v33805_v59 }
0x1001   :  { %31428 = vmatmul.mubr.msk.bf16.gmra.mrb[44].mxu0 %vm960_vm0, %v42794_v55 }
0x1002   :  { %31431 = vmatprep.mubr.msk.bf16.mxu0 %vm960_vm0, %v42795_v12  ;;  %v40959_v48 = vpop.f32.mrb[160].mxu1  ;;  %v33809_v12 = vld [vmem:[%s42549_s13 + $0xf50] sm:$0xff]  }
0x1003   :  { %v15541_v60 = vpop.f32.mrb[161].mxu1 }
0x1004   :  { %v40967_v34 = vpop.f32.mrb[162].mxu1 }
0x1005   :  { %v16613_v47 = vpack.c.bf16 %v40967_v34, %v40959_v48  ;;  %v15544_v40 = vpop.f32.mrb[163].mxu1 }
0x1006   :  { %v16612_v44 = vpack.c.bf16 %v15544_v40, %v15541_v60  ;;  %v33810_v40 = vld [vmem:[%s42549_s13 + $0xf58] sm:$0xff]  }
0x1007   :  { %30424 = vmatmul.mubr.bf16.gmra.mrb[12].mxu1 %v33806_v62 }
0x1008   :  { %30427 = vmatprep.mubr.bf16.mxu1 %v33807_v33 }
0x1009   :  { %31432 = vmatmul.mubr.msk.bf16.gmra.mrb[48].mxu0 %vm960_vm0, %v42796_v22 }
0x100a   :  { %31435 = vmatprep.mubr.msk.bf16.mxu0 %vm960_vm0, %v16604_v32  ;;  %v40976_v59 = vpop.f32.mrb[164].mxu1  ;;  %v42797_v32 = vpack.c.bf16 %v40874_v0, %v40864_v45 }
0x100b   :  { %v15557_v55 = vpop.f32.mrb[165].mxu1 }
0x100c   :  { %v40984_v62 = vpop.f32.mrb[166].mxu1 }
0x100d   :  { %v15560_v61 = vpop.f32.mrb[167].mxu1 }
0x100e   :  { %v16614_v60 = vpack.c.bf16 %v15560_v61, %v15557_v55  ;;  %v33811_v55 = vld [vmem:[%s42549_s13 + $0xf60] sm:$0xff]  }
0x100f   :  { %30428 = vmatmul.mubr.bf16.gmra.mrb[16].mxu1 %v33808_v58 }
0x1010   :  { %30431 = vmatprep.mubr.bf16.mxu1 %v33809_v12 }
0x1011   :  { %31436 = vmatmul.mubr.msk.bf16.gmra.mrb[52].mxu0 %vm960_vm0, %v42797_v32  ;;  %v33812_v32 = vld [vmem:[%s42549_s13 + $0xf68] sm:$0xff]  }
0x1012   :  { %31439 = vmatprep.mubr.msk.bf16.mxu0 %vm960_vm0, %v16606_v9  ;;  %v40993_v33 = vpop.f32.mrb[168].mxu1  ;;  %v42798_v9 = vpack.c.bf16 %v40897_v15, %v40887_v7 }
0x1013   :  { %v15573_v22 = vpop.f32.mrb[169].mxu1 }
0x1014   :  { %v41001_v58 = vpop.f32.mrb[170].mxu1 }
0x1015   :  { %v16617_v45 = vpack.c.bf16 %v41001_v58, %v40993_v33  ;;  %v15576_v0 = vpop.f32.mrb[171].mxu1 }
0x1016   :  { %v16616_v12 = vpack.c.bf16 %v15576_v0, %v15573_v22  ;;  %v33813_v22 = vld [vmem:[%s42549_s13 + $0xf70] sm:$0xff]   ;;  %v33814_v0 = vld [vmem:[%s42549_s13 + $0xf78] sm:$0xff]  }
0x1017   :  { %30432 = vmatmul.mubr.bf16.gmra.mrb[20].mxu1 %v33810_v40 }
0x1018   :  { %30435 = vmatprep.mubr.bf16.mxu1 %v33811_v55 }
0x1019   :  { %31440 = vmatmul.mubr.msk.bf16.gmra.mrb[56].mxu0 %vm960_vm0, %v42798_v9 }
0x101a   :  { %31443 = vmatprep.mubr.msk.bf16.mxu0 %vm960_vm0, %v16608_v11  ;;  %v41010_v61 = vpop.f32.mrb[172].mxu1 }
0x101b   :  { %v15589_v2 = vpop.f32.mrb[173].mxu1 }
0x101c   :  { %v41018_v40 = vpop.f32.mrb[174].mxu1 }
0x101d   :  { %v15592_v15 = vpop.f32.mrb[175].mxu1 }
0x101e   :  { %v16618_v55 = vpack.c.bf16 %v15592_v15, %v15589_v2  ;;  %v33815_v2 = vld [vmem:[%s42549_s13 + $0xf80] sm:$0xff]   ;;  %v33816_v15 = vld [vmem:[%s42549_s13 + $0xf88] sm:$0xff]  }
0x101f   :  { %30436 = vmatmul.mubr.bf16.gmra.mrb[24].mxu1 %v33812_v32 }
0x1020   :  { %30439 = vmatprep.mubr.bf16.mxu1 %v33813_v22 }
0x1021   :  { %31444 = vmatmul.mubr.msk.bf16.gmra.mrb[60].mxu0 %vm960_vm0, %v16609_v57 }
0x1022   :  { %31447 = vmatprep.mubr.msk.bf16.mxu0 %vm960_vm0, %v16610_v18  ;;  %v41027_v11 = vpop.f32.mrb[176].mxu1  ;;  %v42799_v18 = vpack.c.bf16 %v40947_v41, %v40939_v26 }
0x1023   :  { %v15605_v9 = vpop.f32.mrb[177].mxu1 }
0x1024   :  { %v41035_v32 = vpop.f32.mrb[178].mxu1 }
0x1025   :  { %v16621_v35 = vpack.c.bf16 %v41035_v32, %v41027_v11  ;;  %v15608_v54 = vpop.f32.mrb[179].mxu1 }
0x1026   :  { %v16620_v57 = vpack.c.bf16 %v15608_v54, %v15605_v9  ;;  %v33817_v9 = vld [vmem:[%s42549_s13 + $0xf90] sm:$0xff]   ;;  %v33818_v54 = vld [vmem:[%s42549_s13 + $0xf98] sm:$0xff]  }
0x1027   :  { %30440 = vmatmul.mubr.bf16.gmra.mrb[28].mxu1 %v33814_v0 }
0x1028   :  { %30443 = vmatprep.mubr.bf16.mxu1 %v33815_v2 }
0x1029   :  { %31448 = vmatmul.mubr.msk.bf16.gmra.mrb[64].mxu0 %vm960_vm0, %v42799_v18 }
0x102a   :  { %31451 = vmatprep.mubr.msk.bf16.mxu0 %vm960_vm0, %v16612_v44  ;;  %v41044_v22 = vpop.f32.mrb[180].mxu1 }
0x102b   :  { %v15621_v7 = vpop.f32.mrb[181].mxu1 }
0x102c   :  { %v41052_v0 = vpop.f32.mrb[182].mxu1 }
0x102d   :  { %v15624_v41 = vpop.f32.mrb[183].mxu1 }
0x102e   :  { %v16622_v2 = vpack.c.bf16 %v15624_v41, %v15621_v7  ;;  %v33819_v7 = vld [vmem:[%s42549_s13 + $0xfa0] sm:$0xff]   ;;  %v33820_v41 = vld [vmem:[%s42549_s13 + $0xfa8] sm:$0xff]  }
0x102f   :  { %30444 = vmatmul.mubr.bf16.gmra.mrb[32].mxu1 %v33816_v15 }
0x1030   :  { %30447 = vmatprep.mubr.bf16.mxu1 %v33817_v9 }
0x1031   :  { %31452 = vmatmul.mubr.msk.bf16.gmra.mrb[68].mxu0 %vm960_vm0, %v16613_v47 }
0x1032   :  { %31455 = vmatprep.mubr.msk.bf16.mxu0 %vm960_vm0, %v16614_v60  ;;  %v41061_v44 = vpop.f32.mrb[184].mxu1  ;;  %v42800_v60 = vpack.c.bf16 %v40984_v62, %v40976_v59 }
0x1033   :  { %v15637_v18 = vpop.f32.mrb[185].mxu1 }
0x1034   :  { %v41069_v15 = vpop.f32.mrb[186].mxu1 }
0x1035   :  { %v16625_v48 = vpack.c.bf16 %v41069_v15, %v41061_v44  ;;  %v15640_v34 = vpop.f32.mrb[187].mxu1 }
0x1036   :  { %v16624_v47 = vpack.c.bf16 %v15640_v34, %v15637_v18  ;;  %v33821_v18 = vld [vmem:[%s42549_s13 + $0xfb0] sm:$0xff]   ;;  %v33822_v34 = vld [vmem:[%s42549_s13 + $0xfb8] sm:$0xff]  }
0x1037   :  { %30448 = vmatmul.mubr.bf16.gmra.mrb[36].mxu1 %v33818_v54 }
0x1038   :  { %30451 = vmatprep.mubr.bf16.mxu1 %v33819_v7 }
0x1039   :  { %31456 = vmatmul.mubr.msk.bf16.gmra.mrb[72].mxu0 %vm960_vm0, %v42800_v60 }
0x103a   :  { %31459 = vmatprep.mubr.msk.bf16.mxu0 %vm960_vm0, %v16616_v12  ;;  %v41078_v9 = vpop.f32.mrb[188].mxu1 }
0x103b   :  { %v15653_v26 = vpop.f32.mrb[189].mxu1 }
0x103c   :  { %v41086_v54 = vpop.f32.mrb[190].mxu1 }
0x103d   :  { %v15656_v62 = vpop.f32.mrb[191].mxu1 }
0x103e   :  { %v16626_v7 = vpack.c.bf16 %v15656_v62, %v15653_v26  ;;  %v33823_v26 = vld [vmem:[%s42549_s13 + $0xfc0] sm:$0xff]   ;;  %v33824_v62 = vld [vmem:[%s42549_s13 + $0xfc8] sm:$0xff]  }
0x103f   :  { %30452 = vmatmul.mubr.bf16.gmra.mrb[40].mxu1 %v33820_v41 }
0x1040   :  { %30455 = vmatprep.mubr.bf16.mxu1 %v33821_v18 }
0x1041   :  { %31460 = vmatmul.mubr.msk.bf16.gmra.mrb[76].mxu0 %vm960_vm0, %v16617_v45 }
0x1042   :  { %31463 = vmatprep.mubr.msk.bf16.mxu0 %vm960_vm0, %v16618_v55  ;;  %v41095_v12 = vpop.f32.mrb[192].mxu1  ;;  %v42801_v55 = vpack.c.bf16 %v41018_v40, %v41010_v61 }
0x1043   :  { %v15669_v60 = vpop.f32.mrb[193].mxu1 }
0x1044   :  { %v41103_v41 = vpop.f32.mrb[194].mxu1 }
0x1045   :  { %v16629_v33 = vpack.c.bf16 %v41103_v41, %v41095_v12  ;;  %v15672_v58 = vpop.f32.mrb[195].mxu1  ;;  %v42807_v41 = vpack.c.bf16 %v37062_v5, %v37049_v10 }
0x1046   :  { %v16628_v45 = vpack.c.bf16 %v15672_v58, %v15669_v60  ;;  %v33825_v60 = vld [vmem:[%s42549_s13 + $0xfd0] sm:$0xff]   ;;  %v33826_v58 = vld [vmem:[%s42549_s13 + $0xfd8] sm:$0xff]  }
0x1047   :  { %30456 = vmatmul.mubr.bf16.gmra.mrb[44].mxu1 %v33822_v34 }
0x1048   :  { %30459 = vmatprep.mubr.bf16.mxu1 %v33823_v26 }
0x1049   :  { %31464 = vmatmul.mubr.msk.bf16.gmra.mrb[80].mxu0 %vm960_vm0, %v42801_v55 }
0x104a   :  { %31467 = vmatprep.mubr.msk.bf16.mxu0 %vm960_vm0, %v16620_v57  ;;  %v41112_v18 = vpop.f32.mrb[196].mxu1 }
0x104b   :  { %v15685_v59 = vpop.f32.mrb[197].mxu1 }
0x104c   :  { %v41120_v34 = vpop.f32.mrb[198].mxu1 }
0x104d   :  { %v15688_v40 = vpop.f32.mrb[199].mxu1 }
0x104e   :  { %v16630_v26 = vpack.c.bf16 %v15688_v40, %v15685_v59  ;;  %v33827_v59 = vld [vmem:[%s42549_s13 + $0xfe0] sm:$0xff]   ;;  %v33828_v40 = vld [vmem:[%s42549_s13 + $0xfe8] sm:$0xff]  }
0x104f   :  { %30460 = vmatmul.mubr.bf16.gmra.mrb[48].mxu1 %v33824_v62 }
0x1050   :  { %30463 = vmatprep.mubr.bf16.mxu1 %v33825_v60 }
0x1051   :  { %31468 = vmatmul.mubr.msk.bf16.gmra.mrb[84].mxu0 %vm960_vm0, %v16621_v35 }
0x1052   :  { %31471 = vmatprep.mubr.msk.bf16.mxu0 %vm960_vm0, %v16622_v2  ;;  %v41129_v57 = vpop.f32.mrb[200].mxu1  ;;  %v42802_v2 = vpack.c.bf16 %v41052_v0, %v41044_v22 }
0x1053   :  { %v15701_v55 = vpop.f32.mrb[201].mxu1 }
0x1054   :  { %v41137_v62 = vpop.f32.mrb[202].mxu1 }
0x1055   :  { %v15704_v32 = vpop.f32.mrb[203].mxu1 }
0x1056   :  { %v16632_v35 = vpack.c.bf16 %v15704_v32, %v15701_v55 }
0x1057   :  { %30464 = vmatmul.mubr.bf16.gmra.mrb[52].mxu1 %v33826_v58  ;;  %v33831_v58 = vld [vmem:[%s42549_s13 + $0xff0] sm:$0xff]  }
0x1058   :  { %30467 = vmatprep.mubr.bf16.mxu1 %v33827_v59  ;;  %v33835_v59 = vld [vmem:[%s42552_s14 + $0x1e0] sm:$0xff]  }
0x1059   :  { %31472 = vmatmul.mubr.msk.bf16.gmra.mrb[88].mxu0 %vm960_vm0, %v42802_v2  ;;  %v33832_v2 = vld [vmem:[%s42549_s13 + $0xff8] sm:$0xff]   ;;  %31555 = vmatprep.subr.bf16.mxu0 %v33835_v59 }
0x105a   :  { %31475 = vmatprep.mubr.msk.bf16.mxu0 %vm960_vm0, %v16624_v47  ;;  %v41146_v60 = vpop.f32.mrb[204].mxu1 }
0x105b   :  { %v41151_v61 = vpop.f32.mrb[205].mxu1 }
0x105c   :  { %v41156_v55 = vpop.f32.mrb[206].mxu1 }
0x105d   :  { %v15720_v0 = vpop.f32.mrb[207].mxu1 }
0x105e   :  { %v16634_v47 = vpack.c.bf16 %v15720_v0, %v41151_v61 }
0x105f   :  { %30468 = vmatmul.mubr.bf16.gmra.mrb[56].mxu1 %v33828_v40 }
0x1060   :  { %30471 = vmatprep.mubr.bf16.mxu1 %v33831_v58  ;;  %v42803_v58 = vpack.c.bf16 %v37034_v63, %v37025_v24  ;;  %v42805_v24 = vpack.c.bf16 %v37030_v51, %v37020_v36  ;;  %v33836_v63 = vld [vmem:[%s42552_s14 + $0x1e8] sm:$0xff]   ;;  %v33837_v51 = vld [vmem:[%s42552_s14 + $0x1f0] sm:$0xff]  }
0x1061   :  { %31476 = vmatmul.mubr.msk.bf16.gmra.mrb[92].mxu0 %vm960_vm0, %v16625_v48 }
0x1062   :  { %31479 = vmatprep.mubr.msk.bf16.mxu0 %vm960_vm0, %v16626_v7  ;;  %v41169_v32 = vpop.f32.mrb[208].mxu1  ;;  %v42804_v7 = vpack.c.bf16 %v41086_v54, %v41078_v9  ;;  %v42806_v9 = vpack.c.bf16 %v37066_v31, %v37054_v14 }
0x1063   :  { %v15733_v61 = vpop.f32.mrb[209].mxu1 }
0x1064   :  { %v41174_v40 = vpop.f32.mrb[210].mxu1 }
0x1065   :  { %v16637_v44 = vpack.c.bf16 %v41174_v40, %v41169_v32  ;;  %v15736_v15 = vpop.f32.mrb[211].mxu1 }
0x1066   :  { %v16636_v48 = vpack.c.bf16 %v15736_v15, %v15733_v61 }
0x1067   :  { %30472 = vmatmul.mubr.bf16.gmra.mrb[60].mxu1 %v33832_v2 }
0x1068   :  { %30503 = vmatprep.mubr.msk.bf16.mxu1 %vm960_vm0, %v42803_v58 }
0x1069   :  { %31480 = vmatmul.mubr.msk.bf16.gmra.mrb[96].mxu0 %vm960_vm0, %v42804_v7 }
0x106a   :  { %31491 = vmatprep.mubr.msk.bf16.mxu0 %vm960_vm0, %v16628_v45  ;;  %v41187_v0 = vpop.f32.mrb[212].mxu1 }
0x106b   :  { %v15749_v22 = vpop.f32.mrb[213].mxu1 }
0x106c   :  { %v41189_v11 = vpop.f32.mrb[214].mxu1 }
0x106d   :  { %v16639_v2 = vpack.c.bf16 %v41189_v11, %v41187_v0  ;;  %v15752_v61 = vpop.f32.mrb[215].mxu1 }
0x106e   :  { %v16638_v15 = vpack.c.bf16 %v15752_v61, %v15749_v22  ;;  %v42809_v22 = vpack.c.bf16 %v41120_v34, %v41112_v18  ;;  %v42812_v18 = vpack.c.bf16 %v41137_v62, %v41129_v57 }
0x106f   :  { %30504 = vmatmul.mubr.msk.bf16.vlgmr.msra.gmra.mrb[64].mxu1 %vm960_vm0, %v42805_v24 }
0x1070   :  { %30507 = vmatprep.mubr.msk.bf16.mxu1 %vm960_vm0, %v42806_v9 }
0x1071   :  { %31492 = vmatmul.mubr.msk.bf16.vlgmr.msra.gmra.mrb[36].mxu0 %vm960_vm0, %v16629_v33  ;;  %v33838_v33 = vld [vmem:[%s42552_s14 + $0x1f8] sm:$0xff]  }
0x1072   :  { %31495 = vmatprep.mubr.msk.bf16.mxu0 %vm960_vm0, %v16630_v26  ;;  %v41209_v54 = vpop.f32.mrb[216].mxu1  ;;  %31556 = vmatpush3.bf16.msra.mxu0 %v33835_v59  ;;  %v42808_v26 = vpack.c.bf16 %v37095_v56, %v37086_v53  ;;  %v42810_v53 = vpack.c.bf16 %v37091_v39, %v37081_v13  ;;  %v42811_v56 = vpack.c.bf16 %v37121_v52, %v37112_v1 }
0x1073   :  { %v15765_v36 = vpop.f32.mrb[217].mxu1  ;;  %31557 = vmatprep.subr.bf16.mxu0 %v33836_v63  ;;  %v42813_v39 = vpack.c.bf16 %v37117_v16, %v37107_v50  ;;  %v42814_v1 = vpack.c.bf16 %v37147_v25, %v37138_v43  ;;  %v42815_v52 = vpack.c.bf16 %v41156_v55, %v41146_v60  ;;  %v42816_v16 = vpack.c.bf16 %v37143_v20, %v37133_v30 }
0x1074   :  { %v41214_v45 = vpop.f32.mrb[218].mxu1  ;;  %v42817_v43 = vpack.c.bf16 %v37173_v17, %v37164_v21  ;;  %v42818_v20 = vpack.c.bf16 %v37169_v23, %v37159_v6  ;;  %v42819_v21 = vpack.c.bf16 %v37199_v4, %v37190_v27  ;;  %v42820_v23 = vpack.c.bf16 %v37195_v29, %v37185_v28 }
0x1075   :  { %v16641_v14 = vpack.c.bf16 %v41214_v45, %v41209_v54  ;;  %v15768_v31 = vpop.f32.mrb[219].mxu1  ;;  %v42821_v27 = vpack.c.bf16 %v37225_v8, %v37216_v42  ;;  %v42822_v28 = vpack.c.bf16 %v37221_v46, %v37211_v19  ;;  %v42823_v42 = vpack.c.bf16 %v37251_v49, %v37242_v37  ;;  %v42825_v46 = vld [vmem:[#allocation18_spill] sm:$0xff] }
0x1076   :  { %v16640_v12 = vpack.c.bf16 %v15768_v31, %v15765_v36  ;;  %31558 = vmatpush3.bf16.msra.mxu0 %v33836_v63  ;;  %v42824_v19 = vpack.c.bf16 %v37247_v3, %v37237_v38  ;;  %v42831_v3 = vld [vmem:[#allocation22_spill] sm:$0xff] }
0x1077   :  { %30508 = vmatmul.mubr.msk.bf16.gmra.mrb[68].mxu1 %vm960_vm0, %v42807_v41  ;;  %31559 = vmatprep.subr.bf16.mxu0 %v33837_v51 }
0x1078   :  { %30511 = vmatprep.mubr.msk.bf16.mxu1 %vm960_vm0, %v42808_v26  ;;  %v42826_v26 = vld [vmem:[#allocation16_spill] sm:$0xff] }
0x1079   :  { %31496 = vmatmul.mubr.msk.bf16.gmra.mrb[40].mxu0 %vm960_vm0, %v42809_v22  ;;  %v42827_v37 = vpack.c.bf16 %v42825_v46, %v42826_v26 }
0x107a   :  { %31499 = vmatprep.mubr.msk.bf16.mxu0 %vm960_vm0, %v16632_v35  ;;  %v30377_v10 = vpop.f32.mrb[220].mxu1  ;;  %31560 = vmatpush3.bf16.msra.mxu0 %v33837_v51 }
0x107b   :  { %v15781_v5 = vpop.f32.mrb[221].mxu1  ;;  %31561 = vmatprep.subr.bf16.mxu0 %v33838_v33 }
0x107c   :  { %v30378_v59 = vpop.f32.mrb[222].mxu1 }
0x107d   :  { %v16643_v58 = vpack.c.bf16 %v30378_v59, %v30377_v10  ;;  %v15784_v7 = vpop.f32.mrb[223].mxu1 }
0x107e   :  { %v16642_v61 = vpack.c.bf16 %v15784_v7, %v15781_v5  ;;  %31562 = vmatpush3.bf16.msra.mxu0 %v33838_v33  ;;  %v42828_v7 = vld [vmem:[#allocation17_spill] sm:$0xff] }
0x107f   :  { %30512 = vmatmul.mubr.msk.bf16.gmra.mrb[72].mxu1 %vm960_vm0, %v42810_v53  ;;  %v42832_v53 = vld [vmem:[#allocation20_spill] sm:$0xff] }
0x1080   :  { %30515 = vmatprep.mubr.msk.bf16.mxu1 %vm960_vm0, %v42811_v56  ;;  %v42833_v56 = vpack.c.bf16 %v42831_v3, %v42832_v53 }
0x1081   :  { %31500 = vmatmul.mubr.msk.bf16.gmra.mrb[44].mxu0 %vm960_vm0, %v42812_v18 }
0x1082   :  { %31503 = vmatprep.mubr.msk.bf16.mxu0 %vm960_vm0, %v16634_v47  ;;  %v30381_v34 = vpop.f32.mrb[224].mxu1 }
0x1083   :  { %v15797_v35 = vpop.f32.mrb[225].mxu1 }
0x1084   :  { %v30382_v24 = vpop.f32.mrb[226].mxu1 }
0x1085   :  { %v16645_v63 = vpack.c.bf16 %v30382_v24, %v30381_v34  ;;  %v15800_v9 = vpop.f32.mrb[227].mxu1 }
0x1086   :  { %v16644_v13 = vpack.c.bf16 %v15800_v9, %v15797_v35 }
0x1087   :  { %30516 = vmatmul.mubr.msk.bf16.gmra.mrb[76].mxu1 %vm960_vm0, %v42813_v39  ;;  %v42835_v39 = vld [vmem:[#allocation19_spill] sm:$0xff] }
0x1088   :  { %30519 = vmatprep.mubr.msk.bf16.mxu1 %vm960_vm0, %v42814_v1 }
0x1089   :  { %31504 = vmatmul.mubr.msk.bf16.gmra.mrb[48].mxu0 %vm960_vm0, %v42815_v52 }
0x108a   :  { %31507 = vmatprep.mubr.msk.bf16.mxu0 %vm960_vm0, %v16636_v48  ;;  %v30385_v57 = vpop.f32.mrb[228].mxu1 }
0x108b   :  { %v15813_v62 = vpop.f32.mrb[229].mxu1 }
0x108c   :  { %v30386_v47 = vpop.f32.mrb[230].mxu1 }
0x108d   :  { %v16647_v54 = vpack.c.bf16 %v30386_v47, %v30385_v57  ;;  %v15816_v36 = vpop.f32.mrb[231].mxu1 }
0x108e   :  { %v16646_v50 = vpack.c.bf16 %v15816_v36, %v15813_v62 }
0x108f   :  { %30520 = vmatmul.mubr.msk.bf16.gmra.mrb[80].mxu1 %vm960_vm0, %v42816_v16 }
0x1090   :  { %30523 = vmatprep.mubr.msk.bf16.mxu1 %vm960_vm0, %v42817_v43 }
0x1091   :  { %31508 = vmatmul.mubr.msk.bf16.gmra.mrb[52].mxu0 %vm960_vm0, %v16637_v44 }
0x1092   :  { %31511 = vmatprep.mubr.msk.bf16.mxu0 %vm960_vm0, %v16638_v15  ;;  %v30389_v25 = vpop.f32.mrb[232].mxu1 }
0x1093   :  { %v15829_v60 = vpop.f32.mrb[233].mxu1 }
0x1094   :  { %v30390_v55 = vpop.f32.mrb[234].mxu1 }
0x1095   :  { %v16649_v48 = vpack.c.bf16 %v30390_v55, %v30389_v25  ;;  %v15832_v51 = vpop.f32.mrb[235].mxu1 }
0x1096   :  { %v16648_v30 = vpack.c.bf16 %v15832_v51, %v15829_v60 }
0x1097   :  { %30524 = vmatmul.mubr.msk.bf16.gmra.mrb[84].mxu1 %vm960_vm0, %v42818_v20 }
0x1098   :  { %30527 = vmatprep.mubr.msk.bf16.mxu1 %vm960_vm0, %v42819_v21 }
0x1099   :  { %31512 = vmatmul.mubr.msk.bf16.gmra.mrb[56].mxu0 %vm960_vm0, %v16639_v2 }
0x109a   :  { %31515 = vmatprep.mubr.msk.bf16.mxu0 %vm960_vm0, %v16640_v12  ;;  %v30393_v17 = vpop.f32.mrb[236].mxu1 }
0x109b   :  { %v15845_v32 = vpop.f32.mrb[237].mxu1 }
0x109c   :  { %v30394_v40 = vpop.f32.mrb[238].mxu1 }
0x109d   :  { %v16651_v44 = vpack.c.bf16 %v30394_v40, %v30393_v17  ;;  %v15848_v15 = vpop.f32.mrb[239].mxu1 }
0x109e   :  { %v16650_v6 = vpack.c.bf16 %v15848_v15, %v15845_v32 }
0x109f   :  { %30528 = vmatmul.mubr.msk.bf16.gmra.mrb[88].mxu1 %vm960_vm0, %v42820_v23 }
0x10a0   :  { %30531 = vmatprep.mubr.msk.bf16.mxu1 %vm960_vm0, %v42821_v27 }
0x10a1   :  { %31516 = vmatmul.mubr.msk.bf16.gmra.mrb[60].mxu0 %vm960_vm0, %v16641_v14 }
0x10a2   :  { %31519 = vmatprep.mubr.msk.bf16.mxu0 %vm960_vm0, %v16642_v61  ;;  %v30397_v4 = vpop.f32.mrb[240].mxu1  ;;  %v42829_v61 = vld [vmem:[#allocation15_spill] sm:$0xff] }
0x10a3   :  { %v15861_v11 = vpop.f32.mrb[241].mxu1  ;;  %v42830_v38 = vpack.c.bf16 %v42828_v7, %v42829_v61 }
0x10a4   :  { %v30398_v0 = vpop.f32.mrb[242].mxu1 }
0x10a5   :  { %v16653_v2 = vpack.c.bf16 %v30398_v0, %v30397_v4  ;;  %v15864_v45 = vpop.f32.mrb[243].mxu1 }
0x10a6   :  { %v16652_v31 = vpack.c.bf16 %v15864_v45, %v15861_v11 }
0x10a7   :  { %30532 = vmatmul.mubr.msk.bf16.gmra.mrb[92].mxu1 %vm960_vm0, %v42822_v28 }
0x10a8   :  { %30535 = vmatprep.mubr.msk.bf16.mxu1 %vm960_vm0, %v42823_v42 }
0x10a9   :  { %31520 = vmatmul.mubr.msk.bf16.gmra.mrb[64].mxu0 %vm960_vm0, %v16643_v58 }
0x10aa   :  { %31523 = vmatprep.mubr.msk.bf16.mxu0 %vm960_vm0, %v16644_v13  ;;  %v30401_v29 = vpop.f32.mrb[244].mxu1  ;;  %v42834_v13 = vld [vmem:[#allocation21_spill] sm:$0xff] }
0x10ab   :  { %v15877_v8 = vpop.f32.mrb[245].mxu1  ;;  %v42836_v1 = vpack.c.bf16 %v42834_v13, %v42835_v39 }
0x10ac   :  { %v30402_v14 = vpop.f32.mrb[246].mxu1 }
0x10ad   :  { %v16655_v12 = vpack.c.bf16 %v30402_v14, %v30401_v29  ;;  %v15880_v41 = vpop.f32.mrb[247].mxu1 }
0x10ae   :  { %v16654_v33 = vpack.c.bf16 %v15880_v41, %v15877_v8 }
0x10af   :  { %30536 = vmatmul.mubr.msk.bf16.gmra.mrb[96].mxu1 %vm960_vm0, %v42824_v19 }
0x10b0   :  { %30539 = vmatprep.mubr.msk.bf16.mxu1 %vm960_vm0, %v42827_v37 }
0x10b1   :  { %31524 = vmatmul.mubr.msk.bf16.gmra.mrb[68].mxu0 %vm960_vm0, %v16645_v63 }
0x10b2   :  { %31527 = vmatprep.mubr.msk.bf16.mxu0 %vm960_vm0, %v16646_v50  ;;  %v30405_v49 = vpop.f32.mrb[248].mxu1 }
0x10b3   :  { %v15893_v22 = vpop.f32.mrb[249].mxu1 }
0x10b4   :  { %v30406_v10 = vpop.f32.mrb[250].mxu1 }
0x10b5   :  { %v16657_v5 = vpack.c.bf16 %v30406_v10, %v30405_v49  ;;  %v15896_v59 = vpop.f32.mrb[251].mxu1 }
0x10b6   :  { %v16656_v58 = vpack.c.bf16 %v15896_v59, %v15893_v22 }
0x10b7   :  { %30540 = vmatmul.mubr.msk.bf16.gmra.mrb[100].mxu1 %vm960_vm0, %v42830_v38 }
0x10b8   :  { %30543 = vmatprep.mubr.msk.bf16.mxu1 %vm960_vm0, %v42833_v56 }
0x10b9   :  { %31528 = vmatmul.mubr.msk.bf16.gmra.mrb[72].mxu0 %vm960_vm0, %v16647_v54 }
0x10ba   :  { %31531 = vmatprep.mubr.msk.bf16.mxu0 %vm960_vm0, %v16648_v30  ;;  %v30409_v18 = vpop.f32.mrb[252].mxu1 }
0x10bb   :  { %v15909_v34 = vpop.f32.mrb[253].mxu1 }
0x10bc   :  { %v30410_v35 = vpop.f32.mrb[254].mxu1 }
0x10bd   :  { %v16659_v24 = vpack.c.bf16 %v30410_v35, %v30409_v18  ;;  %v15912_v63 = vpop.f32.mrb[255].mxu1 }
0x10be   :  { %v16658_v9 = vpack.c.bf16 %v15912_v63, %v15909_v34 }
0x10bf   :  { %30544 = vmatmul.mubr.msk.bf16.gmra.mrb[104].mxu1 %vm960_vm0, %v42836_v1 }
0x10c1   :  { %31532 = vmatmul.mubr.msk.bf16.gmra.mrb[76].mxu0 %vm960_vm0, %v16649_v48 }
0x10c2   :  { %31535 = vmatprep.mubr.msk.bf16.mxu0 %vm960_vm0, %v16650_v6  ;;  %v30413_v52 = vpop.f32.mrb[0].mxu1 }
0x10c3   :  { %v15925_v57 = vpop.f32.mrb[1].mxu1 }
0x10c4   :  { %v30414_v62 = vpop.f32.mrb[2].mxu1 }
0x10c5   :  { %v16661_v47 = vpack.c.bf16 %v30414_v62, %v30413_v52  ;;  %v15928_v54 = vpop.f32.mrb[3].mxu1 }
0x10c6   :  { %v16660_v36 = vpack.c.bf16 %v15928_v54, %v15925_v57 }
0x10c9   :  { %31536 = vmatmul.mubr.msk.bf16.gmra.mrb[80].mxu0 %vm960_vm0, %v16651_v44 }
0x10ca   :  { %31539 = vmatprep.mubr.msk.bf16.mxu0 %vm960_vm0, %v16652_v31  ;;  %v30417_v50 = vpop.f32.mrb[4].mxu1 }
0x10cb   :  { %v15941_v16 = vpop.f32.mrb[5].mxu1 }
0x10cc   :  { %v30418_v43 = vpop.f32.mrb[6].mxu1 }
0x10cd   :  { %v16663_v25 = vpack.c.bf16 %v30418_v43, %v30417_v50  ;;  %v15944_v60 = vpop.f32.mrb[7].mxu1 }
0x10ce   :  { %v16662_v55 = vpack.c.bf16 %v15944_v60, %v15941_v16 }
0x10d1   :  { %31540 = vmatmul.mubr.msk.bf16.gmra.mrb[84].mxu0 %vm960_vm0, %v16653_v2 }
0x10d2   :  { %31543 = vmatprep.mubr.msk.bf16.mxu0 %vm960_vm0, %v16654_v33  ;;  %v30421_v48 = vpop.f32.mrb[8].mxu1 }
0x10d3   :  { %v15957_v51 = vpop.f32.mrb[9].mxu1 }
0x10d4   :  { %v30422_v30 = vpop.f32.mrb[10].mxu1 }
0x10d5   :  { %v16665_v20 = vpack.c.bf16 %v30422_v30, %v30421_v48  ;;  %v15960_v21 = vpop.f32.mrb[11].mxu1 }
0x10d6   :  { %v16664_v17 = vpack.c.bf16 %v15960_v21, %v15957_v51 }
0x10d9   :  { %31544 = vmatmul.mubr.msk.bf16.gmra.mrb[88].mxu0 %vm960_vm0, %v16655_v12 }
0x10da   :  { %31547 = vmatprep.mubr.msk.bf16.mxu0 %vm960_vm0, %v16656_v58  ;;  %v30425_v32 = vpop.f32.mrb[12].mxu1 }
0x10db   :  { %v15973_v40 = vpop.f32.mrb[13].mxu1 }
0x10dc   :  { %v30426_v44 = vpop.f32.mrb[14].mxu1 }
0x10dd   :  { %v16667_v15 = vpack.c.bf16 %v30426_v44, %v30425_v32  ;;  %v15976_v6 = vpop.f32.mrb[15].mxu1 }
0x10de   :  { %v16666_v23 = vpack.c.bf16 %v15976_v6, %v15973_v40 }
0x10e1   :  { %31548 = vmatmul.mubr.msk.bf16.gmra.mrb[92].mxu0 %vm960_vm0, %v16657_v5 }
0x10e2   :  { %31551 = vmatprep.mubr.msk.bf16.mxu0 %vm960_vm0, %v16658_v9  ;;  %v30429_v27 = vpop.f32.mrb[16].mxu1 }
0x10e3   :  { %v15989_v4 = vpop.f32.mrb[17].mxu1 }
0x10e4   :  { %v30430_v11 = vpop.f32.mrb[18].mxu1 }
0x10e5   :  { %v16669_v0 = vpack.c.bf16 %v30430_v11, %v30429_v27  ;;  %v15992_v2 = vpop.f32.mrb[19].mxu1 }
0x10e6   :  { %v16668_v45 = vpack.c.bf16 %v15992_v2, %v15989_v4 }
0x10e9   :  { %31552 = vmatmul.mubr.msk.bf16.gmra.mrb[96].mxu0 %vm960_vm0, %v16659_v24 }
0x10ea   :  { %31563 = vmatprep.mubr.msk.bf16.mxu0 %vm960_vm0, %v16660_v36  ;;  %v30433_v31 = vpop.f32.mrb[20].mxu1 }
0x10eb   :  { %v16005_v28 = vpop.f32.mrb[21].mxu1 }
0x10ec   :  { %v30434_v42 = vpop.f32.mrb[22].mxu1 }
0x10ed   :  { %v16671_v29 = vpack.c.bf16 %v30434_v42, %v30433_v31  ;;  %v16008_v8 = vpop.f32.mrb[23].mxu1 }
0x10ee   :  { %v16670_v14 = vpack.c.bf16 %v16008_v8, %v16005_v28 }
0x10f1   :  { %31564 = vmatmul.mubr.msk.bf16.vlgmr.msra.gmra.mrb[36].mxu0 %vm960_vm0, %v16661_v47 }
0x10f2   :  { %31567 = vmatprep.mubr.msk.bf16.mxu0 %vm960_vm0, %v16662_v55  ;;  %v30437_v12 = vpop.f32.mrb[24].mxu1 }
0x10f3   :  { %v16021_v41 = vpop.f32.mrb[25].mxu1 }
0x10f4   :  { %v30438_v33 = vpop.f32.mrb[26].mxu1 }
0x10f5   :  { %v16673_v19 = vpack.c.bf16 %v30438_v33, %v30437_v12  ;;  %v16024_v46 = vpop.f32.mrb[27].mxu1 }
0x10f6   :  { %v16672_v26 = vpack.c.bf16 %v16024_v46, %v16021_v41 }
0x10f9   :  { %31568 = vmatmul.mubr.msk.bf16.gmra.mrb[40].mxu0 %vm960_vm0, %v16663_v25 }
0x10fa   :  { %31571 = vmatprep.mubr.msk.bf16.mxu0 %vm960_vm0, %v16664_v17  ;;  %v30441_v37 = vpop.f32.mrb[28].mxu1 }
0x10fb   :  { %v16037_v49 = vpop.f32.mrb[29].mxu1 }
0x10fc   :  { %v30442_v22 = vpop.f32.mrb[30].mxu1 }
0x10fd   :  { %v16675_v10 = vpack.c.bf16 %v30442_v22, %v30441_v37  ;;  %v16040_v5 = vpop.f32.mrb[31].mxu1 }
0x10fe   :  { %v16674_v59 = vpack.c.bf16 %v16040_v5, %v16037_v49 }
0x1101   :  { %31572 = vmatmul.mubr.msk.bf16.gmra.mrb[44].mxu0 %vm960_vm0, %v16665_v20 }
0x1102   :  { %31575 = vmatprep.mubr.msk.bf16.mxu0 %vm960_vm0, %v16666_v23  ;;  %v30445_v58 = vpop.f32.mrb[32].mxu1 }
0x1103   :  { %v16053_v7 = vpop.f32.mrb[33].mxu1 }
0x1104   :  { %v30446_v61 = vpop.f32.mrb[34].mxu1 }
0x1105   :  { %v16677_v38 = vpack.c.bf16 %v30446_v61, %v30445_v58  ;;  %v16056_v3 = vpop.f32.mrb[35].mxu1 }
0x1106   :  { %v16676_v53 = vpack.c.bf16 %v16056_v3, %v16053_v7 }
0x1109   :  { %31576 = vmatmul.mubr.msk.bf16.gmra.mrb[48].mxu0 %vm960_vm0, %v16667_v15 }
0x110a   :  { %31579 = vmatprep.mubr.msk.bf16.mxu0 %vm960_vm0, %v16668_v45  ;;  %v30449_v56 = vpop.f32.mrb[36].mxu1 }
0x110b   :  { %v16069_v18 = vpop.f32.mrb[37].mxu1 }
0x110c   :  { %v30450_v34 = vpop.f32.mrb[38].mxu1 }
0x110d   :  { %v16679_v35 = vpack.c.bf16 %v30450_v34, %v30449_v56  ;;  %v16072_v24 = vpop.f32.mrb[39].mxu1 }
0x110e   :  { %v16678_v63 = vpack.c.bf16 %v16072_v24, %v16069_v18 }
0x1111   :  { %31580 = vmatmul.mubr.msk.bf16.gmra.mrb[52].mxu0 %vm960_vm0, %v16669_v0 }
0x1112   :  { %31583 = vmatprep.mubr.msk.bf16.mxu0 %vm960_vm0, %v16670_v14  ;;  %v30453_v9 = vpop.f32.mrb[40].mxu1 }
0x1113   :  { %v16085_v13 = vpop.f32.mrb[41].mxu1 }
0x1114   :  { %v30454_v39 = vpop.f32.mrb[42].mxu1 }
0x1115   :  { %v16681_v1 = vpack.c.bf16 %v30454_v39, %v30453_v9  ;;  %v16088_v52 = vpop.f32.mrb[43].mxu1 }
0x1116   :  { %v16680_v57 = vpack.c.bf16 %v16088_v52, %v16085_v13 }
0x1119   :  { %31584 = vmatmul.mubr.msk.bf16.gmra.mrb[56].mxu0 %vm960_vm0, %v16671_v29 }
0x111a   :  { %31587 = vmatprep.mubr.msk.bf16.mxu0 %vm960_vm0, %v16672_v26  ;;  %v30457_v62 = vpop.f32.mrb[44].mxu1 }
0x111b   :  { %v16101_v47 = vpop.f32.mrb[45].mxu1 }
0x111c   :  { %v30458_v54 = vpop.f32.mrb[46].mxu1 }
0x111d   :  { %v16683_v36 = vpack.c.bf16 %v30458_v54, %v30457_v62  ;;  %v16104_v50 = vpop.f32.mrb[47].mxu1 }
0x111e   :  { %v16682_v16 = vpack.c.bf16 %v16104_v50, %v16101_v47 }
0x1121   :  { %31588 = vmatmul.mubr.msk.bf16.gmra.mrb[60].mxu0 %vm960_vm0, %v16673_v19 }
0x1122   :  { %31591 = vmatprep.mubr.msk.bf16.mxu0 %vm960_vm0, %v16674_v59  ;;  %v30461_v43 = vpop.f32.mrb[48].mxu1 }
0x1123   :  { %v16117_v25 = vpop.f32.mrb[49].mxu1 }
0x1124   :  { %v30462_v60 = vpop.f32.mrb[50].mxu1 }
0x1125   :  { %v16685_v55 = vpack.c.bf16 %v30462_v60, %v30461_v43  ;;  %v16120_v48 = vpop.f32.mrb[51].mxu1 }
0x1126   :  { %v16684_v51 = vpack.c.bf16 %v16120_v48, %v16117_v25  ;;  %v42837_v48 = vlaneseq }
0x1129   :  { %31592 = vmatmul.mubr.msk.bf16.gmra.mrb[64].mxu0 %vm960_vm0, %v16675_v10 }
0x112a   :  { %31595 = vmatprep.mubr.msk.bf16.mxu0 %vm960_vm0, %v16676_v53  ;;  %v30465_v30 = vpop.f32.mrb[52].mxu1 }
0x112b   :  { %v16133_v20 = vpop.f32.mrb[53].mxu1 }
0x112c   :  { %v30466_v21 = vpop.f32.mrb[54].mxu1 }
0x112d   :  { %v16687_v17 = vpack.c.bf16 %v30466_v21, %v30465_v30  ;;  %v16136_v32 = vpop.f32.mrb[55].mxu1  ;;  %v41467_v30 = vld [vmem:[%s42553_s15] ss:$0 sm:$0xff] }
0x112e   :  { %v16686_v40 = vpack.c.bf16 %v16136_v32, %v16133_v20 }
0x1131   :  { %31596 = vmatmul.mubr.msk.bf16.gmra.mrb[68].mxu0 %vm960_vm0, %v16677_v38 }
0x1132   :  { %31599 = vmatprep.mubr.msk.bf16.mxu0 %vm960_vm0, %v16678_v63  ;;  %v30469_v44 = vpop.f32.mrb[56].mxu1 }
0x1133   :  { %v16149_v15 = vpop.f32.mrb[57].mxu1 }
0x1134   :  { %v30470_v6 = vpop.f32.mrb[58].mxu1 }
0x1135   :  { %v16689_v23 = vpack.c.bf16 %v30470_v6, %v30469_v44  ;;  %v16152_v27 = vpop.f32.mrb[59].mxu1 }
0x1136   :  { %v16688_v4 = vpack.c.bf16 %v16152_v27, %v16149_v15 }
0x1139   :  { %31600 = vmatmul.mubr.msk.bf16.gmra.mrb[72].mxu0 %vm960_vm0, %v16679_v35 }
0x113a   :  { %v30473_v11 = vpop.f32.mrb[60].mxu1  ;;  %31603 = vmatprep.mubr.msk.bf16.mxu0 %vm960_vm0, %v16680_v57 }
0x113b   :  { %v16165_v0 = vpop.f32.mrb[61].mxu1 }
0x113c   :  { %v30474_v2 = vpop.f32.mrb[62].mxu1 }
0x113d   :  { %v16691_v45 = vpack.c.bf16 %v30474_v2, %v30473_v11  ;;  %v16168_v31 = vpop.f32.mrb[63].mxu1 }
0x113e   :  { %v16690_v28 = vpack.c.bf16 %v16168_v31, %v16165_v0 }
0x1141   :  { %31604 = vmatmul.mubr.msk.bf16.gmra.mrb[76].mxu0 %vm960_vm0, %v16681_v1 }
0x1142   :  { %v41363_v42 = vpop.f32.mrb[64].mxu1  ;;  %31607 = vmatprep.mubr.msk.bf16.mxu0 %vm960_vm0, %v16682_v16 }
0x1143   :  { %v41366_v29 = vpop.f32.mrb[65].mxu1 }
0x1144   :  { %v41368_v8 = vpop.f32.mrb[66].mxu1 }
0x1145   :  { %v41370_v14 = vpop.f32.mrb[67].mxu1 }
0x1149   :  { %31608 = vmatmul.mubr.msk.bf16.gmra.mrb[80].mxu0 %vm960_vm0, %v16683_v36 }
0x114a   :  { %v41373_v12 = vpop.f32.mrb[68].mxu1  ;;  %31611 = vmatprep.mubr.msk.bf16.mxu0 %vm960_vm0, %v16684_v51  ;;  %v41462_v51 = vand.u32 127, %v42837_v48 }
0x114b   :  { %v41376_v41 = vpop.f32.mrb[69].mxu1 }
0x114c   :  { %v41378_v33 = vpop.f32.mrb[70].mxu1 }
0x114d   :  { %v41380_v19 = vpop.f32.mrb[71].mxu1 }
0x1151   :  { %31612 = vmatmul.mubr.msk.bf16.gmra.mrb[84].mxu0 %vm960_vm0, %v16685_v55 }
0x1152   :  { %v41383_v46 = vpop.f32.mrb[72].mxu1  ;;  %31615 = vmatprep.mubr.msk.bf16.mxu0 %vm960_vm0, %v16686_v40 }
0x1153   :  { %v41386_v26 = vpop.f32.mrb[73].mxu1 }
0x1154   :  { %v41388_v37 = vpop.f32.mrb[74].mxu1 }
0x1155   :  { %v41390_v49 = vpop.f32.mrb[75].mxu1 }
0x1159   :  { %31616 = vmatmul.mubr.msk.bf16.gmra.mrb[88].mxu0 %vm960_vm0, %v16687_v17 }
0x115a   :  { %v41393_v22 = vpop.f32.mrb[76].mxu1  ;;  %31619 = vmatprep.mubr.msk.bf16.mxu0 %vm960_vm0, %v16688_v4 }
0x115b   :  { %v41396_v10 = vpop.f32.mrb[77].mxu1 }
0x115c   :  { %v41398_v5 = vpop.f32.mrb[78].mxu1 }
0x115d   :  { %v41400_v59 = vpop.f32.mrb[79].mxu1 }
0x1161   :  { %31620 = vmatmul.mubr.msk.bf16.gmra.mrb[92].mxu0 %vm960_vm0, %v16689_v23 }
0x1162   :  { %v41403_v58 = vpop.f32.mrb[80].mxu1  ;;  %31623 = vmatprep.mubr.msk.bf16.mxu0 %vm960_vm0, %v16690_v28 }
0x1163   :  { %v41406_v7 = vpop.f32.mrb[81].mxu1 }
0x1164   :  { %v41408_v61 = vpop.f32.mrb[82].mxu1 }
0x1165   :  { %v41410_v38 = vpop.f32.mrb[83].mxu1 }
0x1169   :  { %31624 = vmatmul.mubr.msk.bf16.gmra.mrb[96].mxu0 %vm960_vm0, %v16691_v45  ;;  %vm24332_vm0 = vcmp.lt.s32.totalorder %v41462_v51, 3 }
0x116a   :  { %v41413_v3 = vpop.f32.mrb[84].mxu1 }
0x116b   :  { %v41415_v53 = vpop.f32.mrb[85].mxu1 }
0x116c   :  { %v41417_v56 = vpop.f32.mrb[86].mxu1 }
0x116d   :  { %v41419_v18 = vpop.f32.mrb[87].mxu1 }
0x1172   :  { %v41421_v34 = vpop.f32.mrb[88].mxu1 }
0x1173   :  { %v41423_v35 = vpop.f32.mrb[89].mxu1 }
0x1174   :  { %v41425_v24 = vpop.f32.mrb[90].mxu1 }
0x1175   :  { %v41427_v63 = vpop.f32.mrb[91].mxu1 }
0x117a   :  { %v41429_v9 = vpop.f32.mrb[92].mxu1 }
0x117b   :  { %v41431_v13 = vpop.f32.mrb[93].mxu1 }
0x117c   :  { %v41433_v39 = vpop.f32.mrb[94].mxu1 }
0x117d   :  { %v41435_v1 = vpop.f32.mrb[95].mxu1 }
0x1182   :  { %v41437_v52 = vpop.f32.mrb[96].mxu1 }
0x1183   :  { %v41439_v57 = vpop.f32.mrb[97].mxu1 }
0x1184   :  { %v41441_v62 = vpop.f32.mrb[98].mxu1 }
0x1185   :  { %v41443_v47 = vpop.f32.mrb[99].mxu1 }
0x118a   :  { %v41445_v54 = vpop.f32.mrb[100].mxu1 }
0x118b   :  { %v41447_v36 = vpop.f32.mrb[101].mxu1 }
0x118c   :  { %v41449_v50 = vpop.f32.mrb[102].mxu1 }
0x118d   :  { %v41451_v16 = vpop.f32.mrb[103].mxu1 }
0x1192   :  { %v41453_v43 = vpop.f32.mrb[104].mxu1 }
0x1193   :  { %v41455_v25 = vpop.f32.mrb[105].mxu1 }
0x1194   :  { %v41457_v60 = vpop.f32.mrb[106].mxu1 }
0x1195   :  { %v41459_v55 = vpop.f32.mrb[107].mxu1 }
0x11c4   :  { %v31565_v20 = vpop.f32.mrb[36].mxu0 }
0x11c5   :  { %v41471_v21 = vadd.f32 %v31565_v20, %v41467_v30  ;;  %v23941_v17 = vpop.f32.mrb[37].mxu0 }
0x11c6   :  { %v41474_v32 = vadd.f32 %v41467_v30, %v23941_v17  ;;  %v31566_v40 = vpop.f32.mrb[38].mxu0 }
0x11c7   :  { %v41477_v44 = vadd.f32 %v31566_v40, %v41467_v30  ;;  %v23944_v15 = vpop.f32.mrb[39].mxu0  ;;  %v24335_v6 = vsel %vm24332_vm0, %v41471_v21, -1e+30 }
0x11c8   :  { %v41483_v23 = vadd.f32 %v41467_v30, %v23944_v15  ;;  %24401 = vmax.xlane.f32.xlu1 %v24335_v6  ;;  %v24333_v27 = vsel %vm24332_vm0, %v41474_v32, -1e+30 }
0x11c9   :  { %24397 = vmax.xlane.f32.xlu0 %v24333_v27  ;;  %v24336_v4 = vsel %vm24332_vm0, %v41477_v44, -1e+30 }
0x11ca   :  { %v24334_v0 = vsel %vm24332_vm0, %v41483_v23, -1e+30 }
0x11cc   :  { %24403 = vmax.xlane.f32.xlu1 %v24336_v4  ;;  %v31569_v11 = vpop.f32.mrb[40].mxu0 }
0x11cd   :  { %v41495_v2 = vadd.f32 %v31569_v11, %v41467_v30  ;;  %24399 = vmax.xlane.f32.xlu0 %v24334_v0  ;;  %v23957_v45 = vpop.f32.mrb[41].mxu0 }
0x11ce   :  { %v31570_v31 = vpop.f32.mrb[42].mxu0  ;;  %v41504_v17 = vadd.f32 %v41467_v30, %v23957_v45 }
0x11cf   :  { %v41498_v28 = vadd.f32 %v31570_v31, %v41467_v30  ;;  %v23960_v48 = vpop.f32.mrb[43].mxu0  ;;  %v24339_v20 = vsel %vm24332_vm0, %v41495_v2, -1e+30 }
0x11d0   :  { %42838 = vst [vmem:[#allocation3_spill] sm:$0xff] %v41504_v17  ;;  %v41507_v40 = vadd.f32 %v41467_v30, %v23960_v48  ;;  %v24337_v27 = vsel %vm24332_vm0, %v41504_v17, -1e+30 }
0x11d1   :  { %24409 = vmax.xlane.f32.xlu0 %v24339_v20  ;;  %v24340_v15 = vsel %vm24332_vm0, %v41498_v28, -1e+30 }
0x11d2   :  { %42839 = vst [vmem:[#allocation4_spill] sm:$0xff] %v41507_v40  ;;  %24411 = vmax.xlane.f32.xlu1 %v24340_v15  ;;  %v24338_v0 = vsel %vm24332_vm0, %v41507_v40, -1e+30 }
0x11d4   :  { %v31573_v6 = vpop.f32.mrb[44].mxu0 }
0x11d5   :  { %v41516_v4 = vadd.f32 %v31573_v6, %v41467_v30  ;;  %24405 = vmax.xlane.f32.xlu0 %v24337_v27  ;;  %v23973_v11 = vpop.f32.mrb[45].mxu0 }
0x11d6   :  { %24407 = vmax.xlane.f32.xlu1 %v24338_v0  ;;  %v31574_v45 = vpop.f32.mrb[46].mxu0  ;;  %v41528_v15 = vadd.f32 %v41467_v30, %v23973_v11 }
0x11d7   :  { %42840 = vst [vmem:[#allocation2_spill] sm:$0xff] %v41516_v4  ;;  %v41522_v31 = vadd.f32 %v31574_v45, %v41467_v30  ;;  %v23976_v48 = vpop.f32.mrb[47].mxu0  ;;  %v24343_v20 = vsel %vm24332_vm0, %v41516_v4, -1e+30 }
0x11d8   :  { %42842 = vst [vmem:[#allocation6_spill] sm:$0xff] %v41528_v15  ;;  %v41531_v6 = vadd.f32 %v41467_v30, %v23976_v48  ;;  %v24341_v45 = vsel %vm24332_vm0, %v41528_v15, -1e+30 }
0x11d9   :  { %42841 = vst [vmem:[#allocation8_spill] sm:$0xff] %v41522_v31  ;;  %24417 = vmax.xlane.f32.xlu0 %v24343_v20  ;;  %v24344_v27 = vsel %vm24332_vm0, %v41522_v31, -1e+30 }
0x11da   :  { %42843 = vst [vmem:[#allocation7_spill] sm:$0xff] %v41531_v6  ;;  %24419 = vmax.xlane.f32.xlu1 %v24344_v27  ;;  %v24342_v48 = vsel %vm24332_vm0, %v41531_v6, -1e+30 }
0x11dc   :  { %v31577_v0 = vpop.f32.mrb[48].mxu0 }
0x11dd   :  { %v41540_v40 = vadd.f32 %v31577_v0, %v41467_v30  ;;  %24413 = vmax.xlane.f32.xlu0 %v24341_v45  ;;  %v23989_v11 = vpop.f32.mrb[49].mxu0 }
0x11de   :  { %24415 = vmax.xlane.f32.xlu1 %v24342_v48  ;;  %v31578_v20 = vpop.f32.mrb[50].mxu0  ;;  %v41552_v15 = vadd.f32 %v41467_v30, %v23989_v11 }
0x11df   :  { %42844 = vst [vmem:[#allocation5_spill] sm:$0xff] %v41540_v40  ;;  %v41546_v4 = vadd.f32 %v31578_v20, %v41467_v30  ;;  %v23992_v27 = vpop.f32.mrb[51].mxu0  ;;  %v24347_v31 = vsel %vm24332_vm0, %v41540_v40, -1e+30 }
0x11e0   :  { %42846 = vst [vmem:[#allocation10_spill] sm:$0xff] %v41552_v15  ;;  %v41555_v0 = vadd.f32 %v41467_v30, %v23992_v27  ;;  %v24345_v20 = vsel %vm24332_vm0, %v41552_v15, -1e+30 }
0x11e1   :  { %42845 = vst [vmem:[#allocation12_spill] sm:$0xff] %v41546_v4  ;;  %24425 = vmax.xlane.f32.xlu0 %v24347_v31  ;;  %v24348_v45 = vsel %vm24332_vm0, %v41546_v4, -1e+30 }
0x11e2   :  { %42847 = vst [vmem:[#allocation11_spill] sm:$0xff] %v41555_v0  ;;  %24427 = vmax.xlane.f32.xlu1 %v24348_v45  ;;  %v24346_v27 = vsel %vm24332_vm0, %v41555_v0, -1e+30 }
0x11e4   :  { %v31581_v48 = vpop.f32.mrb[52].mxu0 }
0x11e5   :  { %v41564_v6 = vadd.f32 %v31581_v48, %v41467_v30  ;;  %24421 = vmax.xlane.f32.xlu0 %v24345_v20  ;;  %v24005_v11 = vpop.f32.mrb[53].mxu0 }
0x11e6   :  { %24423 = vmax.xlane.f32.xlu1 %v24346_v27  ;;  %v31582_v31 = vpop.f32.mrb[54].mxu0  ;;  %v41576_v15 = vadd.f32 %v41467_v30, %v24005_v11 }
0x11e7   :  { %42848 = vst [vmem:[#allocation9_spill] sm:$0xff] %v41564_v6  ;;  %v41570_v40 = vadd.f32 %v31582_v31, %v41467_v30  ;;  %v24008_v45 = vpop.f32.mrb[55].mxu0  ;;  %v24351_v4 = vsel %vm24332_vm0, %v41564_v6, -1e+30 }
0x11e8   :  { %42850 = vst [vmem:[#allocation13_spill] sm:$0xff] %v41576_v15  ;;  %v41579_v48 = vadd.f32 %v41467_v30, %v24008_v45  ;;  %v24349_v31 = vsel %vm24332_vm0, %v41576_v15, -1e+30 }
0x11e9   :  { %42849 = vst [vmem:[#allocation14_spill] sm:$0xff] %v41570_v40  ;;  %24433 = vmax.xlane.f32.xlu0 %v24351_v4  ;;  %v24352_v20 = vsel %vm24332_vm0, %v41570_v40, -1e+30 }
0x11ea   :  { %24435 = vmax.xlane.f32.xlu1 %v24352_v20  ;;  %v24350_v11 = vsel %vm24332_vm0, %v41579_v48, -1e+30 }
0x11ec   :  { %v31585_v27 = vpop.f32.mrb[56].mxu0 }
0x11ed   :  { %v31635_v0 = vadd.f32 %v31585_v27, %v41363_v42  ;;  %24429 = vmax.xlane.f32.xlu0 %v24349_v31  ;;  %v24021_v6 = vpop.f32.mrb[57].mxu0 }
0x11ee   :  { %v31636_v4 = vadd.f32 %v24021_v6, %v41366_v29  ;;  %24431 = vmax.xlane.f32.xlu1 %v24350_v11  ;;  %v31586_v45 = vpop.f32.mrb[58].mxu0 }
0x11ef   :  { %v31637_v40 = vadd.f32 %v31586_v45, %v41368_v8  ;;  %v24024_v20 = vpop.f32.mrb[59].mxu0  ;;  %v41594_v17 = vadd.f32 %v31635_v0, %v41467_v30 }
0x11f0   :  { %v31638_v15 = vadd.f32 %v24024_v20, %v41370_v14  ;;  %v41604_v31 = vadd.f32 %v31636_v4, %v41467_v30 }
0x11f1   :  { %v24355_v42 = vsel %vm24332_vm0, %v41594_v17, -1e+30  ;;  %v41601_v27 = vadd.f32 %v31637_v40, %v41467_v30 }
0x11f2   :  { %24441 = vmax.xlane.f32.xlu0 %v24355_v42  ;;  %v41610_v8 = vadd.f32 %v31638_v15, %v41467_v30  ;;  %v24353_v40 = vsel %vm24332_vm0, %v41604_v31, -1e+30 }
0x11f3   :  { %v24356_v29 = vsel %vm24332_vm0, %v41601_v27, -1e+30 }
0x11f4   :  { %v31589_v6 = vpop.f32.mrb[60].mxu0  ;;  %24443 = vmax.xlane.f32.xlu1 %v24356_v29  ;;  %v24354_v15 = vsel %vm24332_vm0, %v41610_v8, -1e+30 }
0x11f5   :  { %v31639_v14 = vadd.f32 %v31589_v6, %v41373_v12  ;;  %v24037_v0 = vpop.f32.mrb[61].mxu0 }
0x11f6   :  { %v31640_v11 = vadd.f32 %v24037_v0, %v41376_v41  ;;  %v31590_v4 = vpop.f32.mrb[62].mxu0  ;;  %24437 = vmax.xlane.f32.xlu0 %v24353_v40 }
0x11f7   :  { %v31641_v45 = vadd.f32 %v31590_v4, %v41378_v33  ;;  %v24040_v20 = vpop.f32.mrb[63].mxu0  ;;  %v41622_v42 = vadd.f32 %v31639_v14, %v41467_v30 }
0x11f8   :  { %v31642_v12 = vadd.f32 %v24040_v20, %v41380_v19  ;;  %24439 = vmax.xlane.f32.xlu1 %v24354_v15  ;;  %v41632_v33 = vadd.f32 %v31640_v11, %v41467_v30 }
0x11f9   :  { %v24359_v29 = vsel %vm24332_vm0, %v41622_v42, -1e+30  ;;  %v41629_v41 = vadd.f32 %v31641_v45, %v41467_v30 }
0x11fa   :  { %24449 = vmax.xlane.f32.xlu0 %v24359_v29  ;;  %v41638_v14 = vadd.f32 %v31642_v12, %v41467_v30  ;;  %v24357_v4 = vsel %vm24332_vm0, %v41632_v33, -1e+30 }
0x11fb   :  { %v24360_v6 = vsel %vm24332_vm0, %v41629_v41, -1e+30 }
0x11fc   :  { %v31593_v19 = vpop.f32.mrb[64].mxu0  ;;  %24451 = vmax.xlane.f32.xlu1 %v24360_v6  ;;  %v24358_v12 = vsel %vm24332_vm0, %v41638_v14, -1e+30 }
0x11fd   :  { %v31643_v0 = vadd.f32 %v31593_v19, %v41383_v46  ;;  %v24053_v40 = vpop.f32.mrb[65].mxu0 }
0x11fe   :  { %v31644_v11 = vadd.f32 %v24053_v40, %v41386_v26  ;;  %v31594_v45 = vpop.f32.mrb[66].mxu0  ;;  %24445 = vmax.xlane.f32.xlu0 %v24357_v4 }
0x11ff   :  { %v31645_v20 = vadd.f32 %v31594_v45, %v41388_v37  ;;  %v24056_v15 = vpop.f32.mrb[67].mxu0  ;;  %v41650_v29 = vadd.f32 %v31643_v0, %v41467_v30 }
0x1200   :  { %v31646_v46 = vadd.f32 %v24056_v15, %v41390_v49  ;;  %24447 = vmax.xlane.f32.xlu1 %v24358_v12  ;;  %v41660_v37 = vadd.f32 %v31644_v11, %v41467_v30 }
0x1201   :  { %v24363_v6 = vsel %vm24332_vm0, %v41650_v29, -1e+30  ;;  %v41657_v26 = vadd.f32 %v31645_v20, %v41467_v30 }
0x1202   :  { %24457 = vmax.xlane.f32.xlu0 %v24363_v6  ;;  %v41666_v0 = vadd.f32 %v31646_v46, %v41467_v30  ;;  %v24361_v45 = vsel %vm24332_vm0, %v41660_v37, -1e+30 }
0x1203   :  { %v24364_v19 = vsel %vm24332_vm0, %v41657_v26, -1e+30 }
0x1204   :  { %v31597_v49 = vpop.f32.mrb[68].mxu0  ;;  %24459 = vmax.xlane.f32.xlu1 %v24364_v19  ;;  %v24362_v46 = vsel %vm24332_vm0, %v41666_v0, -1e+30 }
0x1205   :  { %v31647_v40 = vadd.f32 %v31597_v49, %v41393_v22  ;;  %v24069_v4 = vpop.f32.mrb[69].mxu0 }
0x1206   :  { %v31648_v11 = vadd.f32 %v24069_v4, %v41396_v10  ;;  %v31598_v20 = vpop.f32.mrb[70].mxu0  ;;  %24453 = vmax.xlane.f32.xlu0 %v24361_v45 }
0x1207   :  { %v31649_v15 = vadd.f32 %v31598_v20, %v41398_v5  ;;  %v24072_v12 = vpop.f32.mrb[71].mxu0  ;;  %v41678_v6 = vadd.f32 %v31647_v40, %v41467_v30 }
0x1208   :  { %v31650_v22 = vadd.f32 %v24072_v12, %v41400_v59  ;;  %24455 = vmax.xlane.f32.xlu1 %v24362_v46  ;;  %v41688_v5 = vadd.f32 %v31648_v11, %v41467_v30 }
0x1209   :  { %v24367_v19 = vsel %vm24332_vm0, %v41678_v6, -1e+30  ;;  %v41685_v10 = vadd.f32 %v31649_v15, %v41467_v30 }
0x120a   :  { %24465 = vmax.xlane.f32.xlu0 %v24367_v19  ;;  %v41694_v40 = vadd.f32 %v31650_v22, %v41467_v30  ;;  %v24365_v20 = vsel %vm24332_vm0, %v41688_v5, -1e+30 }
0x120b   :  { %v24368_v49 = vsel %vm24332_vm0, %v41685_v10, -1e+30 }
0x120c   :  { %v31601_v59 = vpop.f32.mrb[72].mxu0  ;;  %24467 = vmax.xlane.f32.xlu1 %v24368_v49  ;;  %v24366_v22 = vsel %vm24332_vm0, %v41694_v40, -1e+30 }
0x120d   :  { %v31651_v4 = vadd.f32 %v31601_v59, %v41403_v58  ;;  %v24085_v45 = vpop.f32.mrb[73].mxu0 }
0x120e   :  { %v31652_v11 = vadd.f32 %v24085_v45, %v41406_v7  ;;  %v31602_v15 = vpop.f32.mrb[74].mxu0  ;;  %24461 = vmax.xlane.f32.xlu0 %v24365_v20 }
0x120f   :  { %v31653_v12 = vadd.f32 %v31602_v15, %v41408_v61  ;;  %v24088_v46 = vpop.f32.mrb[75].mxu0  ;;  %v41706_v19 = vadd.f32 %v31651_v4, %v41467_v30 }
0x1210   :  { %v31654_v58 = vadd.f32 %v24088_v46, %v41410_v38  ;;  %24463 = vmax.xlane.f32.xlu1 %v24366_v22  ;;  %v41716_v61 = vadd.f32 %v31652_v11, %v41467_v30 }
0x1211   :  { %v24371_v49 = vsel %vm24332_vm0, %v41706_v19, -1e+30  ;;  %v41713_v7 = vadd.f32 %v31653_v12, %v41467_v30 }
0x1212   :  { %24473 = vmax.xlane.f32.xlu0 %v24371_v49  ;;  %v41722_v4 = vadd.f32 %v31654_v58, %v41467_v30  ;;  %v24369_v15 = vsel %vm24332_vm0, %v41716_v61, -1e+30 }
0x1213   :  { %v24372_v59 = vsel %vm24332_vm0, %v41713_v7, -1e+30 }
0x1214   :  { %v31605_v38 = vpop.f32.mrb[76].mxu0  ;;  %24475 = vmax.xlane.f32.xlu1 %v24372_v59  ;;  %v24370_v58 = vsel %vm24332_vm0, %v41722_v4, -1e+30 }
0x1215   :  { %v31655_v45 = vadd.f32 %v31605_v38, %v41413_v3  ;;  %v24101_v20 = vpop.f32.mrb[77].mxu0 }
0x1216   :  { %v31656_v11 = vadd.f32 %v24101_v20, %v41415_v53  ;;  %v31606_v12 = vpop.f32.mrb[78].mxu0  ;;  %24469 = vmax.xlane.f32.xlu0 %v24369_v15 }
0x1217   :  { %v31657_v46 = vadd.f32 %v31606_v12, %v41417_v56  ;;  %v24104_v22 = vpop.f32.mrb[79].mxu0  ;;  %v41734_v49 = vadd.f32 %v31655_v45, %v41467_v30 }
0x1218   :  { %v31658_v3 = vadd.f32 %v24104_v22, %v41419_v18  ;;  %24471 = vmax.xlane.f32.xlu1 %v24370_v58  ;;  %v41744_v56 = vadd.f32 %v31656_v11, %v41467_v30 }
0x1219   :  { %v24375_v59 = vsel %vm24332_vm0, %v41734_v49, -1e+30  ;;  %v41741_v53 = vadd.f32 %v31657_v46, %v41467_v30 }
0x121a   :  { %24481 = vmax.xlane.f32.xlu0 %v24375_v59  ;;  %v41750_v45 = vadd.f32 %v31658_v3, %v41467_v30  ;;  %v24373_v12 = vsel %vm24332_vm0, %v41744_v56, -1e+30 }
0x121b   :  { %v24376_v38 = vsel %vm24332_vm0, %v41741_v53, -1e+30 }
0x121c   :  { %v31609_v18 = vpop.f32.mrb[80].mxu0  ;;  %24483 = vmax.xlane.f32.xlu1 %v24376_v38  ;;  %v24374_v3 = vsel %vm24332_vm0, %v41750_v45, -1e+30 }
0x121d   :  { %v31659_v20 = vadd.f32 %v31609_v18, %v41421_v34  ;;  %v24117_v15 = vpop.f32.mrb[81].mxu0 }
0x121e   :  { %v31660_v11 = vadd.f32 %v24117_v15, %v41423_v35  ;;  %v31610_v46 = vpop.f32.mrb[82].mxu0  ;;  %24477 = vmax.xlane.f32.xlu0 %v24373_v12 }
0x121f   :  { %v31661_v22 = vadd.f32 %v31610_v46, %v41425_v24  ;;  %v24120_v58 = vpop.f32.mrb[83].mxu0  ;;  %v41762_v59 = vadd.f32 %v31659_v20, %v41467_v30 }
0x1220   :  { %v31662_v34 = vadd.f32 %v24120_v58, %v41427_v63  ;;  %24479 = vmax.xlane.f32.xlu1 %v24374_v3  ;;  %v41772_v24 = vadd.f32 %v31660_v11, %v41467_v30 }
0x1221   :  { %v24379_v38 = vsel %vm24332_vm0, %v41762_v59, -1e+30  ;;  %v41769_v35 = vadd.f32 %v31661_v22, %v41467_v30 }
0x1222   :  { %24489 = vmax.xlane.f32.xlu0 %v24379_v38  ;;  %v41778_v20 = vadd.f32 %v31662_v34, %v41467_v30  ;;  %v24377_v46 = vsel %vm24332_vm0, %v41772_v24, -1e+30 }
0x1223   :  { %v24380_v18 = vsel %vm24332_vm0, %v41769_v35, -1e+30 }
0x1224   :  { %v31613_v63 = vpop.f32.mrb[84].mxu0  ;;  %24491 = vmax.xlane.f32.xlu1 %v24380_v18  ;;  %v24378_v34 = vsel %vm24332_vm0, %v41778_v20, -1e+30 }
0x1225   :  { %v31663_v15 = vadd.f32 %v31613_v63, %v41429_v9  ;;  %v24133_v12 = vpop.f32.mrb[85].mxu0 }
0x1226   :  { %v31664_v11 = vadd.f32 %v24133_v12, %v41431_v13  ;;  %v31614_v22 = vpop.f32.mrb[86].mxu0  ;;  %24485 = vmax.xlane.f32.xlu0 %v24377_v46 }
0x1227   :  { %v31665_v58 = vadd.f32 %v31614_v22, %v41433_v39  ;;  %v24136_v3 = vpop.f32.mrb[87].mxu0  ;;  %v41790_v38 = vadd.f32 %v31663_v15, %v41467_v30 }
0x1228   :  { %v31666_v9 = vadd.f32 %v24136_v3, %v41435_v1  ;;  %24487 = vmax.xlane.f32.xlu1 %v24378_v34  ;;  %v41800_v39 = vadd.f32 %v31664_v11, %v41467_v30 }
0x1229   :  { %v24383_v18 = vsel %vm24332_vm0, %v41790_v38, -1e+30  ;;  %v41797_v13 = vadd.f32 %v31665_v58, %v41467_v30 }
0x122a   :  { %24497 = vmax.xlane.f32.xlu0 %v24383_v18  ;;  %v41806_v15 = vadd.f32 %v31666_v9, %v41467_v30  ;;  %v24381_v22 = vsel %vm24332_vm0, %v41800_v39, -1e+30 }
0x122b   :  { %v24384_v63 = vsel %vm24332_vm0, %v41797_v13, -1e+30 }
0x122c   :  { %v31617_v1 = vpop.f32.mrb[88].mxu0  ;;  %24499 = vmax.xlane.f32.xlu1 %v24384_v63  ;;  %v24382_v9 = vsel %vm24332_vm0, %v41806_v15, -1e+30 }
0x122d   :  { %v31667_v12 = vadd.f32 %v31617_v1, %v41437_v52  ;;  %v24149_v46 = vpop.f32.mrb[89].mxu0 }
0x122e   :  { %v31668_v11 = vadd.f32 %v24149_v46, %v41439_v57  ;;  %v31618_v58 = vpop.f32.mrb[90].mxu0  ;;  %24493 = vmax.xlane.f32.xlu0 %v24381_v22 }
0x122f   :  { %v31669_v3 = vadd.f32 %v31618_v58, %v41441_v62  ;;  %v24152_v34 = vpop.f32.mrb[91].mxu0  ;;  %v41818_v18 = vadd.f32 %v31667_v12, %v41467_v30 }
0x1230   :  { %v31670_v52 = vadd.f32 %v24152_v34, %v41443_v47  ;;  %24495 = vmax.xlane.f32.xlu1 %v24382_v9  ;;  %v41828_v62 = vadd.f32 %v31668_v11, %v41467_v30 }
0x1231   :  { %v24387_v63 = vsel %vm24332_vm0, %v41818_v18, -1e+30  ;;  %v41825_v57 = vadd.f32 %v31669_v3, %v41467_v30 }
0x1232   :  { %24505 = vmax.xlane.f32.xlu0 %v24387_v63  ;;  %v41834_v12 = vadd.f32 %v31670_v52, %v41467_v30  ;;  %v24385_v58 = vsel %vm24332_vm0, %v41828_v62, -1e+30 }
0x1233   :  { %v24388_v1 = vsel %vm24332_vm0, %v41825_v57, -1e+30 }
0x1234   :  { %v31621_v47 = vpop.f32.mrb[92].mxu0  ;;  %24507 = vmax.xlane.f32.xlu1 %v24388_v1  ;;  %v24386_v52 = vsel %vm24332_vm0, %v41834_v12, -1e+30 }
0x1235   :  { %v31671_v46 = vadd.f32 %v31621_v47, %v41445_v54  ;;  %v24165_v22 = vpop.f32.mrb[93].mxu0 }
0x1236   :  { %v31672_v11 = vadd.f32 %v24165_v22, %v41447_v36  ;;  %v31622_v3 = vpop.f32.mrb[94].mxu0  ;;  %24501 = vmax.xlane.f32.xlu0 %v24385_v58 }
0x1237   :  { %v31673_v34 = vadd.f32 %v31622_v3, %v41449_v50  ;;  %v24168_v9 = vpop.f32.mrb[95].mxu0  ;;  %v41846_v63 = vadd.f32 %v31671_v46, %v41467_v30 }
0x1238   :  { %v31674_v54 = vadd.f32 %v24168_v9, %v41451_v16  ;;  %24503 = vmax.xlane.f32.xlu1 %v24386_v52  ;;  %v41856_v50 = vadd.f32 %v31672_v11, %v41467_v30 }
0x1239   :  { %v24391_v1 = vsel %vm24332_vm0, %v41846_v63, -1e+30  ;;  %v41853_v36 = vadd.f32 %v31673_v34, %v41467_v30 }
0x123a   :  { %24513 = vmax.xlane.f32.xlu0 %v24391_v1  ;;  %v41862_v46 = vadd.f32 %v31674_v54, %v41467_v30  ;;  %v24389_v3 = vsel %vm24332_vm0, %v41856_v50, -1e+30 }
0x123b   :  { %v24392_v47 = vsel %vm24332_vm0, %v41853_v36, -1e+30 }
0x123c   :  { %24515 = vmax.xlane.f32.xlu1 %v24392_v47  ;;  %v31625_v16 = vpop.f32.mrb[96].mxu0  ;;  %v24390_v54 = vsel %vm24332_vm0, %v41862_v46, -1e+30 }
0x123d   :  { %v31675_v22 = vadd.f32 %v31625_v16, %v41453_v43  ;;  %v24181_v58 = vpop.f32.mrb[97].mxu0 }
0x123e   :  { %v31676_v11 = vadd.f32 %v24181_v58, %v41455_v25  ;;  %24509 = vmax.xlane.f32.xlu0 %v24389_v3  ;;  %v31626_v34 = vpop.f32.mrb[98].mxu0 }
0x123f   :  { %v31677_v9 = vadd.f32 %v31626_v34, %v41457_v60  ;;  %v24184_v52 = vpop.f32.mrb[99].mxu0  ;;  %v41874_v1 = vadd.f32 %v31675_v22, %v41467_v30 }
0x1240   :  { %v31678_v43 = vadd.f32 %v24184_v52, %v41459_v55  ;;  %24511 = vmax.xlane.f32.xlu1 %v24390_v54  ;;  %v41884_v60 = vadd.f32 %v31676_v11, %v41467_v30 }
0x1241   :  { %v24395_v47 = vsel %vm24332_vm0, %v41874_v1, -1e+30  ;;  %v41881_v25 = vadd.f32 %v31677_v9, %v41467_v30 }
0x1242   :  { %42851 = vst [vmem:[#allocation18_spill] sm:$0xff] %v41884_v60  ;;  %24521 = vmax.xlane.f32.xlu0 %v24395_v47  ;;  %v41890_v22 = vadd.f32 %v31678_v43, %v41467_v30  ;;  %v24393_v55 = vsel %vm24332_vm0, %v41884_v60, -1e+30 }
0x1243   :  { %v24396_v16 = vsel %vm24332_vm0, %v41881_v25, -1e+30 }
0x1244   :  { %42852 = vst [vmem:[#allocation16_spill] sm:$0xff] %v41890_v22  ;;  %24523 = vmax.xlane.f32.xlu1 %v24396_v16  ;;  %v24394_v58 = vsel %vm24332_vm0, %v41890_v22, -1e+30 }
0x1246   :  { %24517 = vmax.xlane.f32.xlu0 %v24393_v55 }
0x1248   :  { %24519 = vmax.xlane.f32.xlu1 %v24394_v58 }
0x1255   :  { %v24402_v3 = vpop.xlane.xlu1 %24401 }
0x1256   :  { %v24527_v11 = vsub.f32 %v41471_v21, %v24402_v3  ;;  %v24398_v34 = vpop.xlane.xlu0 %24397 }
0x1257   :  { %v24525_v9 = vsub.f32 %v41474_v32, %v24398_v34 }
0x1258   :  { %v24593_v52 = vmul.f32 1.442695, %v24527_v11 }
0x1259   :  { %v24589_v30 = vmul.f32 1.442695, %v24525_v9  ;;  %v24404_v54 = vpop.xlane.xlu1 %24403  ;;  %v42853_v9 = vld [vmem:[#allocation3_spill] sm:$0xff] }
0x125a   :  { %33843 = vpow2.f32 %v24593_v52  ;;  %v24528_v43 = vsub.f32 %v41477_v44, %v24404_v54  ;;  %v24400_v47 = vpop.xlane.xlu0 %24399 }
0x125b   :  { %v24526_v16 = vsub.f32 %v41483_v23, %v24400_v47  ;;  %33845 = vpow2.f32 %v24589_v30  ;;  %v42854_v23 = vld [vmem:[#allocation4_spill] sm:$0xff] }
0x125c   :  { %v24595_v55 = vmul.f32 1.442695, %v24528_v43 }
0x125d   :  { %v24591_v60 = vmul.f32 1.442695, %v24526_v16 }
0x125e   :  { %33847 = vpow2.f32 %v24595_v55  ;;  %v24410_v58 = vpop.xlane.xlu0 %24409 }
0x125f   :  { %v24531_v22 = vsub.f32 %v41495_v2, %v24410_v58  ;;  %v24412_v21 = vpop.xlane.xlu1 %24411  ;;  %33849 = vpow2.f32 %v24591_v60 }
0x1260   :  { %v24532_v32 = vsub.f32 %v41498_v28, %v24412_v21  ;;  %v42855_v28 = vld [vmem:[#allocation2_spill] sm:$0xff]  ;;  %v42856_v21 = vld [vmem:[#allocation8_spill] sm:$0xff] }
0x1261   :  { %v24601_v3 = vmul.f32 1.442695, %v24531_v22 }
0x1262   :  { %v24603_v11 = vmul.f32 1.442695, %v24532_v32  ;;  %v24406_v34 = vpop.xlane.xlu0 %24405 }
0x1263   :  { %33851 = vpow2.f32 %v24601_v3  ;;  %v24529_v44 = vsub.f32 %v42853_v9, %v24406_v34  ;;  %v24408_v52 = vpop.xlane.xlu1 %24407 }
0x1264   :  { %v33844_v54 = vpop.eup %33843  ;;  %33853 = vpow2.f32 %v24603_v11  ;;  %v24530_v30 = vsub.f32 %v42854_v23, %v24408_v52 }
0x1265   :  { %v24597_v43 = vmul.f32 1.442695, %v24529_v44  ;;  %v41908_v47 = vsel %vm24332_vm0, %v33844_v54, 0.0  ;;  %v33846_v2 = vpop.eup %33845  ;;  %v42857_v54 = vld [vmem:[#allocation6_spill] sm:$0xff] }
0x1266   :  { %v24599_v60 = vmul.f32 1.442695, %v24530_v30  ;;  %v24418_v16 = vpop.xlane.xlu0 %24417  ;;  %24785 = vadd.xlane.f32.xlu0 %v41908_v47  ;;  %v41915_v11 = vsel %vm24332_vm0, %v33846_v2, 0.0 }
0x1267   :  { %33855 = vpow2.f32 %v24597_v43  ;;  %v24535_v22 = vsub.f32 %v42855_v28, %v24418_v16  ;;  %v24420_v55 = vpop.xlane.xlu1 %24419  ;;  %v42858_v43 = vld [vmem:[#allocation7_spill] sm:$0xff] }
0x1268   :  { %v33848_v58 = vpop.eup %33847  ;;  %33857 = vpow2.f32 %v24599_v60  ;;  %v24536_v32 = vsub.f32 %v42856_v21, %v24420_v55 }
0x1269   :  { %v24609_v3 = vmul.f32 1.442695, %v24535_v22  ;;  %v41919_v34 = vsel %vm24332_vm0, %v33848_v58, 0.0  ;;  %v33850_v9 = vpop.eup %33849 }
0x126a   :  { %v24611_v44 = vmul.f32 1.442695, %v24536_v32  ;;  %v24414_v52 = vpop.xlane.xlu0 %24413  ;;  %24781 = vadd.xlane.f32.xlu0 %v41915_v11  ;;  %24787 = vadd.xlane.f32.xlu1 %v41919_v34  ;;  %v41927_v28 = vsel %vm24332_vm0, %v33850_v9, 0.0  ;;  %v42861_v32 = vld [vmem:[#allocation5_spill] sm:$0xff] }
0x126b   :  { %33859 = vpow2.f32 %v24609_v3  ;;  %v24533_v23 = vsub.f32 %v42857_v54, %v24414_v52  ;;  %v24416_v30 = vpop.xlane.xlu1 %24415  ;;  %42859 = vst [vmem:[#allocation17_spill] sm:$0xff] %v41927_v28  ;;  %v42862_v52 = vld [vmem:[#allocation12_spill] sm:$0xff] }
0x126c   :  { %33861 = vpow2.f32 %v24611_v44  ;;  %v24534_v60 = vsub.f32 %v42858_v43, %v24416_v30 }
0x126d   :  { %v33852_v2 = vpop.eup %33851  ;;  %v24605_v16 = vmul.f32 1.442695, %v24533_v23 }
0x126e   :  { %v33854_v22 = vpop.eup %33853  ;;  %v24607_v55 = vmul.f32 1.442695, %v24534_v60  ;;  %v24426_v58 = vpop.xlane.xlu0 %24425  ;;  %24783 = vadd.xlane.f32.xlu1 %v41927_v28  ;;  %v41932_v21 = vsel %vm24332_vm0, %v33852_v2, 0.0 }
0x126f   :  { %42860 = vst [vmem:[#allocation15_spill] sm:$0xff] %v41932_v21  ;;  %33863 = vpow2.f32 %v24605_v16  ;;  %v24539_v3 = vsub.f32 %v42861_v32, %v24426_v58  ;;  %v24428_v44 = vpop.xlane.xlu1 %24427  ;;  %24793 = vadd.xlane.f32.xlu0 %v41932_v21  ;;  %v41939_v30 = vsel %vm24332_vm0, %v33854_v22, 0.0  ;;  %v42865_v16 = vld [vmem:[#allocation10_spill] sm:$0xff]  ;;  %v42866_v32 = vld [vmem:[#allocation11_spill] sm:$0xff] }
0x1270   :  { %33865 = vpow2.f32 %v24607_v55  ;;  %v24540_v54 = vsub.f32 %v42862_v52, %v24428_v44  ;;  %42863 = vst [vmem:[#allocation22_spill] sm:$0xff] %v41939_v30 }
0x1271   :  { %v33856_v9 = vpop.eup %33855  ;;  %v24617_v23 = vmul.f32 1.442695, %v24539_v3 }
0x1272   :  { %v33858_v43 = vpop.eup %33857  ;;  %v24619_v60 = vmul.f32 1.442695, %v24540_v54  ;;  %v24422_v28 = vpop.xlane.xlu0 %24421  ;;  %24795 = vadd.xlane.f32.xlu1 %v41939_v30  ;;  %v41944_v2 = vsel %vm24332_vm0, %v33856_v9, 0.0  ;;  %v42868_v9 = vld [vmem:[#allocation9_spill] sm:$0xff] }
0x1273   :  { %42864 = vst [vmem:[#allocation20_spill] sm:$0xff] %v41944_v2  ;;  %33867 = vpow2.f32 %v24617_v23  ;;  %v24537_v55 = vsub.f32 %v42865_v16, %v24422_v28  ;;  %v24424_v58 = vpop.xlane.xlu1 %24423  ;;  %24789 = vadd.xlane.f32.xlu0 %v41944_v2  ;;  %v41951_v52 = vsel %vm24332_vm0, %v33858_v43, 0.0  ;;  %v42869_v16 = vld [vmem:[#allocation14_spill] sm:$0xff] }
0x1274   :  { %33869 = vpow2.f32 %v24619_v60  ;;  %v24538_v3 = vsub.f32 %v42866_v32, %v24424_v58  ;;  %42867 = vst [vmem:[#allocation21_spill] sm:$0xff] %v41951_v52 }
0x1275   :  { %v33860_v22 = vpop.eup %33859  ;;  %v24613_v44 = vmul.f32 1.442695, %v24537_v55 }
0x1276   :  { %v33862_v54 = vpop.eup %33861  ;;  %v24615_v30 = vmul.f32 1.442695, %v24538_v3  ;;  %v24434_v21 = vpop.xlane.xlu0 %24433  ;;  %24791 = vadd.xlane.f32.xlu1 %v41951_v52  ;;  %v41956_v28 = vsel %vm24332_vm0, %v33860_v22, 0.0  ;;  %v42870_v22 = vld [vmem:[#allocation13_spill] sm:$0xff] }
0x1277   :  { %33871 = vpow2.f32 %v24613_v44  ;;  %v24543_v23 = vsub.f32 %v42868_v9, %v24434_v21  ;;  %v24436_v60 = vpop.xlane.xlu1 %24435  ;;  %24801 = vadd.xlane.f32.xlu0 %v41956_v28  ;;  %v41963_v32 = vsel %vm24332_vm0, %v33862_v54, 0.0 }
0x1278   :  { %33873 = vpow2.f32 %v24615_v30  ;;  %v24544_v55 = vsub.f32 %v42869_v16, %v24436_v60 }
0x1279   :  { %v33864_v43 = vpop.eup %33863  ;;  %v24625_v58 = vmul.f32 1.442695, %v24543_v23 }
0x127a   :  { %v33866_v3 = vpop.eup %33865  ;;  %v24627_v52 = vmul.f32 1.442695, %v24544_v55  ;;  %v24430_v2 = vpop.xlane.xlu0 %24429  ;;  %24803 = vadd.xlane.f32.xlu1 %v41963_v32  ;;  %v41968_v21 = vsel %vm24332_vm0, %v33864_v43, 0.0 }
0x127b   :  { %33875 = vpow2.f32 %v24625_v58  ;;  %v24541_v30 = vsub.f32 %v42870_v22, %v24430_v2  ;;  %v24432_v44 = vpop.xlane.xlu1 %24431  ;;  %24797 = vadd.xlane.f32.xlu0 %v41968_v21  ;;  %v41975_v60 = vsel %vm24332_vm0, %v33866_v3, 0.0 }
0x127c   :  { %33877 = vpow2.f32 %v24627_v52  ;;  %v24542_v9 = vsub.f32 %v41579_v48, %v24432_v44 }
0x127d   :  { %v33868_v54 = vpop.eup %33867  ;;  %v24621_v23 = vmul.f32 1.442695, %v24541_v30 }
0x127e   :  { %v33870_v16 = vpop.eup %33869  ;;  %v24623_v55 = vmul.f32 1.442695, %v24542_v9  ;;  %24799 = vadd.xlane.f32.xlu1 %v41975_v60  ;;  %v41980_v43 = vsel %vm24332_vm0, %v33868_v54, 0.0 }
0x127f   :  { %33879 = vpow2.f32 %v24621_v23  ;;  %v24442_v2 = vpop.xlane.xlu0 %24441  ;;  %24809 = vadd.xlane.f32.xlu0 %v41980_v43  ;;  %v41986_v3 = vsel %vm24332_vm0, %v33870_v16, 0.0 }
0x1280   :  { %33881 = vpow2.f32 %v24623_v55  ;;  %v24547_v48 = vsub.f32 %v41594_v17, %v24442_v2 }
0x1281   :  { %v33872_v52 = vpop.eup %33871  ;;  %v24444_v58 = vpop.xlane.xlu1 %24443 }
0x1282   :  { %v33874_v22 = vpop.eup %33873  ;;  %v24633_v30 = vmul.f32 1.442695, %v24547_v48  ;;  %v24548_v44 = vsub.f32 %v41601_v27, %v24444_v58  ;;  %24811 = vadd.xlane.f32.xlu1 %v41986_v3  ;;  %v41992_v9 = vsel %vm24332_vm0, %v33872_v52, 0.0 }
0x1283   :  { %v24438_v54 = vpop.xlane.xlu0 %24437  ;;  %24805 = vadd.xlane.f32.xlu0 %v41992_v9  ;;  %v41998_v2 = vsel %vm24332_vm0, %v33874_v22, 0.0 }
0x1284   :  { %33883 = vpow2.f32 %v24633_v30  ;;  %v24635_v17 = vmul.f32 1.442695, %v24548_v44  ;;  %v24545_v23 = vsub.f32 %v41604_v31, %v24438_v54 }
0x1285   :  { %v33876_v55 = vpop.eup %33875  ;;  %v24440_v16 = vpop.xlane.xlu1 %24439 }
0x1286   :  { %v33878_v27 = vpop.eup %33877  ;;  %33885 = vpow2.f32 %v24635_v17  ;;  %v24629_v48 = vmul.f32 1.442695, %v24545_v23  ;;  %v24546_v58 = vsub.f32 %v41610_v8, %v24440_v16  ;;  %24807 = vadd.xlane.f32.xlu1 %v41998_v2  ;;  %v42004_v52 = vsel %vm24332_vm0, %v33876_v55, 0.0 }
0x1287   :  { %v24450_v30 = vpop.xlane.xlu0 %24449  ;;  %24817 = vadd.xlane.f32.xlu0 %v42004_v52  ;;  %v42010_v17 = vsel %vm24332_vm0, %v33878_v27, 0.0 }
0x1288   :  { %33887 = vpow2.f32 %v24629_v48  ;;  %v24631_v31 = vmul.f32 1.442695, %v24546_v58  ;;  %v24551_v44 = vsub.f32 %v41622_v42, %v24450_v30 }
0x1289   :  { %v33880_v22 = vpop.eup %33879  ;;  %v24452_v54 = vpop.xlane.xlu1 %24451 }
0x128a   :  { %v33882_v8 = vpop.eup %33881  ;;  %33889 = vpow2.f32 %v24631_v31  ;;  %v24641_v23 = vmul.f32 1.442695, %v24551_v44  ;;  %v24552_v16 = vsub.f32 %v41629_v41, %v24452_v54  ;;  %24819 = vadd.xlane.f32.xlu1 %v42010_v17  ;;  %v42016_v55 = vsel %vm24332_vm0, %v33880_v22, 0.0 }
0x128b   :  { %v24446_v48 = vpop.xlane.xlu0 %24445  ;;  %24813 = vadd.xlane.f32.xlu0 %v42016_v55  ;;  %v42022_v30 = vsel %vm24332_vm0, %v33882_v8, 0.0 }
0x128c   :  { %33891 = vpow2.f32 %v24641_v23  ;;  %v24643_v42 = vmul.f32 1.442695, %v24552_v16  ;;  %v24549_v58 = vsub.f32 %v41632_v33, %v24446_v48 }
0x128d   :  { %v24448_v27 = vpop.xlane.xlu1 %24447 }
0x128e   :  { %v33884_v31 = vpop.eup %33883  ;;  %33893 = vpow2.f32 %v24643_v42  ;;  %v24637_v41 = vmul.f32 1.442695, %v24549_v58  ;;  %v24550_v44 = vsub.f32 %v41638_v14, %v24448_v27  ;;  %24815 = vadd.xlane.f32.xlu1 %v42022_v30 }
0x128f   :  { %v24458_v22 = vpop.xlane.xlu0 %24457  ;;  %v42028_v54 = vsel %vm24332_vm0, %v33884_v31, 0.0 }
0x1290   :  { %v33886_v23 = vpop.eup %33885  ;;  %33895 = vpow2.f32 %v24637_v41  ;;  %v24639_v33 = vmul.f32 1.442695, %v24550_v44  ;;  %v24555_v16 = vsub.f32 %v41650_v29, %v24458_v22  ;;  %24825 = vadd.xlane.f32.xlu0 %v42028_v54 }
0x1291   :  { %v24460_v8 = vpop.xlane.xlu1 %24459  ;;  %v42034_v48 = vsel %vm24332_vm0, %v33886_v23, 0.0 }
0x1292   :  { %v33888_v14 = vpop.eup %33887  ;;  %33897 = vpow2.f32 %v24639_v33  ;;  %v24649_v42 = vmul.f32 1.442695, %v24555_v16  ;;  %v24556_v58 = vsub.f32 %v41657_v26, %v24460_v8  ;;  %24827 = vadd.xlane.f32.xlu1 %v42034_v48 }
0x1293   :  { %v24454_v27 = vpop.xlane.xlu0 %24453  ;;  %v42040_v31 = vsel %vm24332_vm0, %v33888_v14, 0.0 }
0x1294   :  { %v33890_v29 = vpop.eup %33889  ;;  %33899 = vpow2.f32 %v24649_v42  ;;  %v24651_v41 = vmul.f32 1.442695, %v24556_v58  ;;  %v24553_v44 = vsub.f32 %v41660_v37, %v24454_v27  ;;  %24821 = vadd.xlane.f32.xlu0 %v42040_v31 }
0x1295   :  { %v24456_v22 = vpop.xlane.xlu1 %24455  ;;  %v42046_v23 = vsel %vm24332_vm0, %v33890_v29, 0.0 }
0x1296   :  { %v33892_v26 = vpop.eup %33891  ;;  %33901 = vpow2.f32 %v24651_v41  ;;  %v24645_v33 = vmul.f32 1.442695, %v24553_v44  ;;  %v24554_v16 = vsub.f32 %v41666_v0, %v24456_v22  ;;  %24823 = vadd.xlane.f32.xlu1 %v42046_v23 }
0x1297   :  { %v24466_v8 = vpop.xlane.xlu0 %24465  ;;  %v42052_v14 = vsel %vm24332_vm0, %v33892_v26, 0.0 }
0x1298   :  { %v33894_v37 = vpop.eup %33893  ;;  %33903 = vpow2.f32 %v24645_v33  ;;  %v24647_v42 = vmul.f32 1.442695, %v24554_v16  ;;  %v24559_v58 = vsub.f32 %v41678_v6, %v24466_v8  ;;  %24833 = vadd.xlane.f32.xlu0 %v42052_v14 }
0x1299   :  { %v24468_v27 = vpop.xlane.xlu1 %24467  ;;  %v42058_v29 = vsel %vm24332_vm0, %v33894_v37, 0.0 }
0x129a   :  { %v33896_v0 = vpop.eup %33895  ;;  %33905 = vpow2.f32 %v24647_v42  ;;  %v24657_v41 = vmul.f32 1.442695, %v24559_v58  ;;  %v24560_v44 = vsub.f32 %v41685_v10, %v24468_v27  ;;  %24835 = vadd.xlane.f32.xlu1 %v42058_v29 }
0x129b   :  { %v24462_v22 = vpop.xlane.xlu0 %24461  ;;  %v42064_v26 = vsel %vm24332_vm0, %v33896_v0, 0.0 }
0x129c   :  { %v33898_v6 = vpop.eup %33897  ;;  %33907 = vpow2.f32 %v24657_v41  ;;  %v24659_v33 = vmul.f32 1.442695, %v24560_v44  ;;  %v24557_v16 = vsub.f32 %v41688_v5, %v24462_v22  ;;  %24829 = vadd.xlane.f32.xlu0 %v42064_v26 }
0x129d   :  { %v24464_v8 = vpop.xlane.xlu1 %24463  ;;  %v42070_v37 = vsel %vm24332_vm0, %v33898_v6, 0.0 }
0x129e   :  { %v33900_v10 = vpop.eup %33899  ;;  %33909 = vpow2.f32 %v24659_v33  ;;  %v24653_v42 = vmul.f32 1.442695, %v24557_v16  ;;  %v24558_v58 = vsub.f32 %v41694_v40, %v24464_v8  ;;  %24831 = vadd.xlane.f32.xlu1 %v42070_v37 }
0x129f   :  { %v24474_v27 = vpop.xlane.xlu0 %24473  ;;  %v42076_v0 = vsel %vm24332_vm0, %v33900_v10, 0.0 }
0x12a0   :  { %v33902_v5 = vpop.eup %33901  ;;  %33911 = vpow2.f32 %v24653_v42  ;;  %v24655_v41 = vmul.f32 1.442695, %v24558_v58  ;;  %v24563_v44 = vsub.f32 %v41706_v19, %v24474_v27  ;;  %24841 = vadd.xlane.f32.xlu0 %v42076_v0 }
0x12a1   :  { %v24476_v22 = vpop.xlane.xlu1 %24475  ;;  %v42082_v6 = vsel %vm24332_vm0, %v33902_v5, 0.0 }
0x12a2   :  { %v33904_v40 = vpop.eup %33903  ;;  %33913 = vpow2.f32 %v24655_v41  ;;  %v24665_v33 = vmul.f32 1.442695, %v24563_v44  ;;  %v24564_v16 = vsub.f32 %v41713_v7, %v24476_v22  ;;  %24843 = vadd.xlane.f32.xlu1 %v42082_v6 }
0x12a3   :  { %v24470_v8 = vpop.xlane.xlu0 %24469  ;;  %v42088_v10 = vsel %vm24332_vm0, %v33904_v40, 0.0 }
0x12a4   :  { %v33906_v19 = vpop.eup %33905  ;;  %33915 = vpow2.f32 %v24665_v33  ;;  %v24667_v42 = vmul.f32 1.442695, %v24564_v16  ;;  %v24561_v58 = vsub.f32 %v41716_v61, %v24470_v8  ;;  %24837 = vadd.xlane.f32.xlu0 %v42088_v10 }
0x12a5   :  { %v24472_v27 = vpop.xlane.xlu1 %24471  ;;  %v42094_v5 = vsel %vm24332_vm0, %v33906_v19, 0.0 }
0x12a6   :  { %v33908_v7 = vpop.eup %33907  ;;  %33917 = vpow2.f32 %v24667_v42  ;;  %v24661_v41 = vmul.f32 1.442695, %v24561_v58  ;;  %v24562_v44 = vsub.f32 %v41722_v4, %v24472_v27  ;;  %24839 = vadd.xlane.f32.xlu1 %v42094_v5 }
0x12a7   :  { %v24482_v22 = vpop.xlane.xlu0 %24481  ;;  %v42100_v40 = vsel %vm24332_vm0, %v33908_v7, 0.0 }
0x12a8   :  { %v33910_v61 = vpop.eup %33909  ;;  %33919 = vpow2.f32 %v24661_v41  ;;  %v24663_v33 = vmul.f32 1.442695, %v24562_v44  ;;  %v24567_v16 = vsub.f32 %v41734_v49, %v24482_v22  ;;  %24849 = vadd.xlane.f32.xlu0 %v42100_v40 }
0x12a9   :  { %v24484_v8 = vpop.xlane.xlu1 %24483  ;;  %v42106_v19 = vsel %vm24332_vm0, %v33910_v61, 0.0 }
0x12aa   :  { %v33912_v4 = vpop.eup %33911  ;;  %33921 = vpow2.f32 %v24663_v33  ;;  %v24673_v42 = vmul.f32 1.442695, %v24567_v16  ;;  %v24568_v58 = vsub.f32 %v41741_v53, %v24484_v8  ;;  %24851 = vadd.xlane.f32.xlu1 %v42106_v19 }
0x12ab   :  { %v24478_v27 = vpop.xlane.xlu0 %24477  ;;  %v42112_v7 = vsel %vm24332_vm0, %v33912_v4, 0.0 }
0x12ac   :  { %v33914_v49 = vpop.eup %33913  ;;  %33923 = vpow2.f32 %v24673_v42  ;;  %v24675_v41 = vmul.f32 1.442695, %v24568_v58  ;;  %v24565_v44 = vsub.f32 %v41744_v56, %v24478_v27  ;;  %24845 = vadd.xlane.f32.xlu0 %v42112_v7 }
0x12ad   :  { %v24480_v22 = vpop.xlane.xlu1 %24479  ;;  %v42118_v61 = vsel %vm24332_vm0, %v33914_v49, 0.0 }
0x12ae   :  { %v33916_v53 = vpop.eup %33915  ;;  %33925 = vpow2.f32 %v24675_v41  ;;  %v24669_v33 = vmul.f32 1.442695, %v24565_v44  ;;  %v24566_v16 = vsub.f32 %v41750_v45, %v24480_v22  ;;  %24847 = vadd.xlane.f32.xlu1 %v42118_v61 }
0x12af   :  { %v24490_v8 = vpop.xlane.xlu0 %24489  ;;  %v42124_v4 = vsel %vm24332_vm0, %v33916_v53, 0.0 }
0x12b0   :  { %v33918_v56 = vpop.eup %33917  ;;  %33927 = vpow2.f32 %v24669_v33  ;;  %v24671_v42 = vmul.f32 1.442695, %v24566_v16  ;;  %v24571_v58 = vsub.f32 %v41762_v59, %v24490_v8  ;;  %24857 = vadd.xlane.f32.xlu0 %v42124_v4 }
0x12b1   :  { %v24492_v27 = vpop.xlane.xlu1 %24491  ;;  %v42130_v49 = vsel %vm24332_vm0, %v33918_v56, 0.0 }
0x12b2   :  { %v33920_v45 = vpop.eup %33919  ;;  %33929 = vpow2.f32 %v24671_v42  ;;  %v24681_v41 = vmul.f32 1.442695, %v24571_v58  ;;  %v24572_v44 = vsub.f32 %v41769_v35, %v24492_v27  ;;  %24859 = vadd.xlane.f32.xlu1 %v42130_v49 }
0x12b3   :  { %v24486_v22 = vpop.xlane.xlu0 %24485  ;;  %v42136_v53 = vsel %vm24332_vm0, %v33920_v45, 0.0 }
0x12b4   :  { %v33922_v59 = vpop.eup %33921  ;;  %33931 = vpow2.f32 %v24681_v41  ;;  %v24683_v33 = vmul.f32 1.442695, %v24572_v44  ;;  %v24569_v16 = vsub.f32 %v41772_v24, %v24486_v22  ;;  %24853 = vadd.xlane.f32.xlu0 %v42136_v53 }
0x12b5   :  { %v24488_v8 = vpop.xlane.xlu1 %24487  ;;  %v42142_v56 = vsel %vm24332_vm0, %v33922_v59, 0.0 }
0x12b6   :  { %v33924_v35 = vpop.eup %33923  ;;  %33933 = vpow2.f32 %v24683_v33  ;;  %v24677_v42 = vmul.f32 1.442695, %v24569_v16  ;;  %v24570_v58 = vsub.f32 %v41778_v20, %v24488_v8  ;;  %24855 = vadd.xlane.f32.xlu1 %v42142_v56 }
0x12b7   :  { %v24498_v27 = vpop.xlane.xlu0 %24497  ;;  %v42148_v45 = vsel %vm24332_vm0, %v33924_v35, 0.0 }
0x12b8   :  { %v33926_v24 = vpop.eup %33925  ;;  %33935 = vpow2.f32 %v24677_v42  ;;  %v24679_v41 = vmul.f32 1.442695, %v24570_v58  ;;  %v24575_v44 = vsub.f32 %v41790_v38, %v24498_v27  ;;  %24865 = vadd.xlane.f32.xlu0 %v42148_v45 }
0x12b9   :  { %v24500_v22 = vpop.xlane.xlu1 %24499  ;;  %v42154_v59 = vsel %vm24332_vm0, %v33926_v24, 0.0 }
0x12ba   :  { %v33928_v20 = vpop.eup %33927  ;;  %33937 = vpow2.f32 %v24679_v41  ;;  %v24689_v33 = vmul.f32 1.442695, %v24575_v44  ;;  %v24576_v16 = vsub.f32 %v41797_v13, %v24500_v22  ;;  %24867 = vadd.xlane.f32.xlu1 %v42154_v59 }
0x12bb   :  { %v24494_v8 = vpop.xlane.xlu0 %24493  ;;  %v42160_v35 = vsel %vm24332_vm0, %v33928_v20, 0.0 }
0x12bc   :  { %v33930_v38 = vpop.eup %33929  ;;  %33939 = vpow2.f32 %v24689_v33  ;;  %v24691_v42 = vmul.f32 1.442695, %v24576_v16  ;;  %v24573_v58 = vsub.f32 %v41800_v39, %v24494_v8  ;;  %24861 = vadd.xlane.f32.xlu0 %v42160_v35 }
0x12bd   :  { %v24496_v27 = vpop.xlane.xlu1 %24495  ;;  %v42166_v24 = vsel %vm24332_vm0, %v33930_v38, 0.0 }
0x12be   :  { %v33932_v13 = vpop.eup %33931  ;;  %33941 = vpow2.f32 %v24691_v42  ;;  %v24685_v41 = vmul.f32 1.442695, %v24573_v58  ;;  %v24574_v44 = vsub.f32 %v41806_v15, %v24496_v27  ;;  %24863 = vadd.xlane.f32.xlu1 %v42166_v24 }
0x12bf   :  { %v24506_v22 = vpop.xlane.xlu0 %24505  ;;  %v42172_v20 = vsel %vm24332_vm0, %v33932_v13, 0.0 }
0x12c0   :  { %v33934_v39 = vpop.eup %33933  ;;  %33943 = vpow2.f32 %v24685_v41  ;;  %v24687_v33 = vmul.f32 1.442695, %v24574_v44  ;;  %v24579_v16 = vsub.f32 %v41818_v18, %v24506_v22  ;;  %24873 = vadd.xlane.f32.xlu0 %v42172_v20 }
0x12c1   :  { %v24508_v8 = vpop.xlane.xlu1 %24507  ;;  %v42178_v38 = vsel %vm24332_vm0, %v33934_v39, 0.0 }
0x12c2   :  { %v33936_v15 = vpop.eup %33935  ;;  %33945 = vpow2.f32 %v24687_v33  ;;  %v24697_v42 = vmul.f32 1.442695, %v24579_v16  ;;  %v24580_v58 = vsub.f32 %v41825_v57, %v24508_v8  ;;  %24875 = vadd.xlane.f32.xlu1 %v42178_v38 }
0x12c3   :  { %v24502_v27 = vpop.xlane.xlu0 %24501  ;;  %v42184_v13 = vsel %vm24332_vm0, %v33936_v15, 0.0 }
0x12c4   :  { %v33938_v18 = vpop.eup %33937  ;;  %33947 = vpow2.f32 %v24697_v42  ;;  %v24699_v41 = vmul.f32 1.442695, %v24580_v58  ;;  %v24577_v44 = vsub.f32 %v41828_v62, %v24502_v27  ;;  %24869 = vadd.xlane.f32.xlu0 %v42184_v13 }
0x12c5   :  { %v24504_v22 = vpop.xlane.xlu1 %24503  ;;  %v42190_v39 = vsel %vm24332_vm0, %v33938_v18, 0.0 }
0x12c6   :  { %v33940_v57 = vpop.eup %33939  ;;  %33949 = vpow2.f32 %v24699_v41  ;;  %v24693_v33 = vmul.f32 1.442695, %v24577_v44  ;;  %v24578_v16 = vsub.f32 %v41834_v12, %v24504_v22  ;;  %24871 = vadd.xlane.f32.xlu1 %v42190_v39 }
0x12c7   :  { %v24514_v8 = vpop.xlane.xlu0 %24513  ;;  %v42196_v15 = vsel %vm24332_vm0, %v33940_v57, 0.0 }
0x12c8   :  { %v33942_v62 = vpop.eup %33941  ;;  %33951 = vpow2.f32 %v24693_v33  ;;  %v24695_v42 = vmul.f32 1.442695, %v24578_v16  ;;  %v24583_v58 = vsub.f32 %v41846_v63, %v24514_v8  ;;  %24881 = vadd.xlane.f32.xlu0 %v42196_v15 }
0x12c9   :  { %v24516_v27 = vpop.xlane.xlu1 %24515  ;;  %v42202_v18 = vsel %vm24332_vm0, %v33942_v62, 0.0 }
0x12ca   :  { %v33944_v12 = vpop.eup %33943  ;;  %33953 = vpow2.f32 %v24695_v42  ;;  %v24705_v41 = vmul.f32 1.442695, %v24583_v58  ;;  %v24584_v44 = vsub.f32 %v41853_v36, %v24516_v27  ;;  %24883 = vadd.xlane.f32.xlu1 %v42202_v18 }
0x12cb   :  { %v24510_v22 = vpop.xlane.xlu0 %24509  ;;  %v42208_v57 = vsel %vm24332_vm0, %v33944_v12, 0.0 }
0x12cc   :  { %v33946_v63 = vpop.eup %33945  ;;  %33955 = vpow2.f32 %v24705_v41  ;;  %v24707_v33 = vmul.f32 1.442695, %v24584_v44  ;;  %v24581_v16 = vsub.f32 %v41856_v50, %v24510_v22  ;;  %24877 = vadd.xlane.f32.xlu0 %v42208_v57 }
0x12cd   :  { %v24512_v8 = vpop.xlane.xlu1 %24511  ;;  %v42214_v62 = vsel %vm24332_vm0, %v33946_v63, 0.0 }
0x12ce   :  { %42871 = vst [vmem:[#allocation19_spill] sm:$0xff] %v42214_v62  ;;  %v33948_v36 = vpop.eup %33947  ;;  %33957 = vpow2.f32 %v24707_v33  ;;  %v24701_v42 = vmul.f32 1.442695, %v24581_v16  ;;  %v24582_v58 = vsub.f32 %v41862_v46, %v24512_v8  ;;  %24879 = vadd.xlane.f32.xlu1 %v42214_v62 }
0x12cf   :  { %v24522_v27 = vpop.xlane.xlu0 %24521  ;;  %v42220_v12 = vsel %vm24332_vm0, %v33948_v36, 0.0 }
0x12d0   :  { %42872 = vst [vmem:[#allocation3_spill] sm:$0xff] %v42220_v12  ;;  %v33950_v50 = vpop.eup %33949  ;;  %33959 = vpow2.f32 %v24701_v42  ;;  %v24703_v41 = vmul.f32 1.442695, %v24582_v58  ;;  %24889 = vadd.xlane.f32.xlu0 %v42220_v12  ;;  %v24587_v44 = vsub.f32 %v41874_v1, %v24522_v27  ;;  %v42874_v42 = vld [vmem:[#allocation18_spill] sm:$0xff]  ;;  %v42875_v12 = vld [vmem:[#allocation16_spill] sm:$0xff] }
0x12d1   :  { %v24524_v22 = vpop.xlane.xlu1 %24523  ;;  %v42226_v63 = vsel %vm24332_vm0, %v33950_v50, 0.0 }
0x12d2   :  { %42873 = vst [vmem:[#allocation4_spill] sm:$0xff] %v42226_v63  ;;  %v33952_v46 = vpop.eup %33951  ;;  %33961 = vpow2.f32 %v24703_v41  ;;  %24891 = vadd.xlane.f32.xlu1 %v42226_v63  ;;  %v24588_v36 = vsub.f32 %v41881_v25, %v24524_v22  ;;  %v24713_v1 = vmul.f32 1.442695, %v24587_v44 }
0x12d3   :  { %v24518_v33 = vpop.xlane.xlu0 %24517  ;;  %v42231_v16 = vsel %vm24332_vm0, %v33952_v46, 0.0 }
0x12d4   :  { %v33954_v8 = vpop.eup %33953  ;;  %v24585_v58 = vsub.f32 %v42874_v42, %v24518_v33  ;;  %24885 = vadd.xlane.f32.xlu0 %v42231_v16  ;;  %v24715_v22 = vmul.f32 1.442695, %v24588_v36 }
0x12d5   :  { %v24520_v27 = vpop.xlane.xlu1 %24519  ;;  %v42238_v50 = vsel %vm24332_vm0, %v33954_v8, 0.0 }
0x12d6   :  { %v33956_v41 = vpop.eup %33955  ;;  %v24709_v63 = vmul.f32 1.442695, %v24585_v58  ;;  %v24586_v62 = vsub.f32 %v42875_v12, %v24520_v27  ;;  %24887 = vadd.xlane.f32.xlu1 %v42238_v50 }
0x12d7   :  { %v42244_v46 = vsel %vm24332_vm0, %v33956_v41, 0.0 }
0x12d8   :  { %v33958_v25 = vpop.eup %33957  ;;  %33963 = vpow2.f32 %v24709_v63  ;;  %v24711_v33 = vmul.f32 1.442695, %v24586_v62  ;;  %24897 = vadd.xlane.f32.xlu0 %v42244_v46 }
0x12d9   :  { %33965 = vpow2.f32 %v24713_v1  ;;  %v42249_v44 = vsel %vm24332_vm0, %v33958_v25, 0.0 }
0x12da   :  { %v33960_v8 = vpop.eup %33959  ;;  %33967 = vpow2.f32 %v24711_v33  ;;  %24899 = vadd.xlane.f32.xlu1 %v42249_v44 }
0x12db   :  { %v42254_v12 = vsel %vm24332_vm0, %v33960_v8, 0.0  ;;  %33969 = vpow2.f32 %v24715_v22 }
0x12dc   :  { %v33962_v42 = vpop.eup %33961  ;;  %24893 = vadd.xlane.f32.xlu0 %v42254_v12 }
0x12dd   :  { %v42259_v62 = vsel %vm24332_vm0, %v33962_v42, 0.0 }
0x12de   :  { %24895 = vadd.xlane.f32.xlu1 %v42259_v62 }
0x12e2   :  { %v33964_v63 = vpop.eup %33963 }
0x12e3   :  { %v33966_v36 = vpop.eup %33965  ;;  %v42264_v58 = vsel %vm24332_vm0, %v33964_v63, 0.0 }
0x12e4   :  { %v33968_v1 = vpop.eup %33967  ;;  %24901 = vadd.xlane.f32.xlu0 %v42264_v58  ;;  %v42274_v25 = vsel %vm24332_vm0, %v33966_v36, 0.0 }
0x12e5   :  { %v42269_v27 = vsel %vm24332_vm0, %v33968_v1, 0.0  ;;  %v33970_v41 = vpop.eup %33969  ;;  %42877 = vst [vmem:[#allocation8_spill] sm:$0xff] %v42274_v25 }
0x12e6   :  { %42876 = vst [vmem:[#allocation2_spill] sm:$0xff] %v42269_v27  ;;  %24903 = vadd.xlane.f32.xlu1 %v42269_v27  ;;  %v42279_v22 = vsel %vm24332_vm0, %v33970_v41, 0.0 }
0x12e8   :  { %24905 = vadd.xlane.f32.xlu0 %v42274_v25 }
0x12ea   :  { %24907 = vadd.xlane.f32.xlu1 %v42279_v22 }
0x12f3   :  { %v24786_v33 = vpop.xlane.xlu0 %24785 }
0x12f4   :  { %33971 = vrcp.f32 %v24786_v33 }
0x12f7   :  { %v24782_v8 = vpop.xlane.xlu0 %24781  ;;  %v24788_v42 = vpop.xlane.xlu1 %24787 }
0x12f8   :  { %33973 = vrcp.f32 %v24782_v8 }
0x12f9   :  { %33975 = vrcp.f32 %v24788_v42 }
0x12fb   :  { %v24784_v63 = vpop.xlane.xlu1 %24783 }
0x12fc   :  { %33977 = vrcp.f32 %v24784_v63  ;;  %v24794_v1 = vpop.xlane.xlu0 %24793 }
0x12fd   :  { %33979 = vrcp.f32 %v24794_v1 }
0x12fe   :  { %v33972_v36 = vpop.eup %33971 }
0x12ff   :  { %v24914_v27 = vmul.f32 %v33972_v36, %v41908_v47  ;;  %v24796_v25 = vpop.xlane.xlu1 %24795 }
0x1300   :  { %33981 = vrcp.f32 %v24796_v25  ;;  %v24790_v51 = vpop.xlane.xlu0 %24789  ;;  %v42878_v25 = vld [vmem:[#allocation17_spill] sm:$0xff] }
0x1301   :  { %25039 = vst [vmem:[%s42554_s16 + $0x10] sm:$0xff] %v24914_v27  ;;  %33983 = vrcp.f32 %v24790_v51 }
0x1302   :  { %v33974_v41 = vpop.eup %33973 }
0x1303   :  { %v33976_v33 = vpop.eup %33975  ;;  %v24910_v8 = vmul.f32 %v33974_v41, %v41915_v11  ;;  %v24792_v42 = vpop.xlane.xlu1 %24791  ;;  %v42879_v11 = vld [vmem:[#allocation15_spill] sm:$0xff] }
0x1304   :  { %v24916_v63 = vmul.f32 %v33976_v33, %v41919_v34  ;;  %33985 = vrcp.f32 %v24792_v42  ;;  %v24802_v1 = vpop.xlane.xlu0 %24801  ;;  %v42880_v42 = vld [vmem:[#allocation22_spill] sm:$0xff] }
0x1305   :  { %25037 = vst [vmem:[%s42554_s16] sm:$0xff] %v24910_v8  ;;  %33987 = vrcp.f32 %v24802_v1 }
0x1306   :  { %v33978_v47 = vpop.eup %33977  ;;  %25040 = vst [vmem:[%s42554_s16 + $0x18] sm:$0xff] %v24916_v63 }
0x1307   :  { %v33980_v27 = vpop.eup %33979  ;;  %v24912_v36 = vmul.f32 %v33978_v47, %v42878_v25  ;;  %v24804_v51 = vpop.xlane.xlu1 %24803  ;;  %v42881_v47 = vld [vmem:[#allocation20_spill] sm:$0xff] }
0x1308   :  { %v24922_v41 = vmul.f32 %v33980_v27, %v42879_v11  ;;  %33989 = vrcp.f32 %v24804_v51  ;;  %v24798_v34 = vpop.xlane.xlu0 %24797  ;;  %v42882_v11 = vld [vmem:[#allocation21_spill] sm:$0xff] }
0x1309   :  { %25038 = vst [vmem:[%s42554_s16 + $0x8] sm:$0xff] %v24912_v36  ;;  %33991 = vrcp.f32 %v24798_v34 }
0x130a   :  { %v33982_v33 = vpop.eup %33981  ;;  %25043 = vst [vmem:[%s42554_s16 + $0x30] sm:$0xff] %v24922_v41 }
0x130b   :  { %v33984_v8 = vpop.eup %33983  ;;  %v24924_v63 = vmul.f32 %v33982_v33, %v42880_v42  ;;  %v24800_v1 = vpop.xlane.xlu1 %24799 }
0x130c   :  { %v24918_v25 = vmul.f32 %v33984_v8, %v42881_v47  ;;  %33993 = vrcp.f32 %v24800_v1  ;;  %v24810_v27 = vpop.xlane.xlu0 %24809 }
0x130d   :  { %25044 = vst [vmem:[%s42554_s16 + $0x38] sm:$0xff] %v24924_v63  ;;  %33995 = vrcp.f32 %v24810_v27 }
0x130e   :  { %v33986_v36 = vpop.eup %33985  ;;  %25041 = vst [vmem:[%s42554_s16 + $0x20] sm:$0xff] %v24918_v25 }
0x130f   :  { %v33988_v51 = vpop.eup %33987  ;;  %v24920_v41 = vmul.f32 %v33986_v36, %v42882_v11  ;;  %v24812_v34 = vpop.xlane.xlu1 %24811 }
0x1310   :  { %v24930_v33 = vmul.f32 %v33988_v51, %v41956_v28  ;;  %33997 = vrcp.f32 %v24812_v34  ;;  %v24806_v8 = vpop.xlane.xlu0 %24805 }
0x1311   :  { %25042 = vst [vmem:[%s42554_s16 + $0x28] sm:$0xff] %v24920_v41  ;;  %33999 = vrcp.f32 %v24806_v8 }
0x1312   :  { %v33990_v42 = vpop.eup %33989  ;;  %25047 = vst [vmem:[%s42554_s16 + $0x50] sm:$0xff] %v24930_v33 }
0x1313   :  { %v33992_v63 = vpop.eup %33991  ;;  %v24932_v1 = vmul.f32 %v33990_v42, %v41963_v32  ;;  %v24808_v47 = vpop.xlane.xlu1 %24807 }
0x1314   :  { %v24926_v25 = vmul.f32 %v33992_v63, %v41968_v21  ;;  %34001 = vrcp.f32 %v24808_v47  ;;  %v24818_v28 = vpop.xlane.xlu0 %24817 }
0x1315   :  { %25048 = vst [vmem:[%s42554_s16 + $0x58] sm:$0xff] %v24932_v1  ;;  %34003 = vrcp.f32 %v24818_v28 }
0x1316   :  { %v33994_v27 = vpop.eup %33993  ;;  %25045 = vst [vmem:[%s42554_s16 + $0x40] sm:$0xff] %v24926_v25 }
0x1317   :  { %v33996_v36 = vpop.eup %33995  ;;  %v24928_v51 = vmul.f32 %v33994_v27, %v41975_v60  ;;  %v24820_v11 = vpop.xlane.xlu1 %24819 }
0x1318   :  { %v24938_v32 = vmul.f32 %v33996_v36, %v41980_v43  ;;  %34005 = vrcp.f32 %v24820_v11  ;;  %v24814_v21 = vpop.xlane.xlu0 %24813 }
0x1319   :  { %25046 = vst [vmem:[%s42554_s16 + $0x48] sm:$0xff] %v24928_v51  ;;  %34007 = vrcp.f32 %v24814_v21 }
0x131a   :  { %v33998_v41 = vpop.eup %33997  ;;  %25051 = vst [vmem:[%s42554_s16 + $0x70] sm:$0xff] %v24938_v32 }
0x131b   :  { %v34000_v34 = vpop.eup %33999  ;;  %v24940_v33 = vmul.f32 %v33998_v41, %v41986_v3  ;;  %v24816_v8 = vpop.xlane.xlu1 %24815 }
0x131c   :  { %v24934_v60 = vmul.f32 %v34000_v34, %v41992_v9  ;;  %34009 = vrcp.f32 %v24816_v8 }
0x131d   :  { %25052 = vst [vmem:[%s42554_s16 + $0x78] sm:$0xff] %v24940_v33  ;;  %v24826_v43 = vpop.xlane.xlu0 %24825 }
0x131e   :  { %v34002_v42 = vpop.eup %34001  ;;  %25049 = vst [vmem:[%s42554_s16 + $0x60] sm:$0xff] %v24934_v60  ;;  %34011 = vrcp.f32 %v24826_v43 }
0x131f   :  { %v34004_v63 = vpop.eup %34003  ;;  %v24936_v1 = vmul.f32 %v34002_v42, %v41998_v2  ;;  %v24828_v47 = vpop.xlane.xlu1 %24827 }
0x1320   :  { %v24946_v3 = vmul.f32 %v34004_v63, %v42004_v52  ;;  %34013 = vrcp.f32 %v24828_v47 }
0x1321   :  { %25050 = vst [vmem:[%s42554_s16 + $0x68] sm:$0xff] %v24936_v1  ;;  %v24822_v9 = vpop.xlane.xlu0 %24821 }
0x1322   :  { %v34006_v25 = vpop.eup %34005  ;;  %25055 = vst [vmem:[%s42554_s16 + $0x90] sm:$0xff] %v24946_v3  ;;  %34015 = vrcp.f32 %v24822_v9 }
0x1323   :  { %v34008_v28 = vpop.eup %34007  ;;  %v24948_v27 = vmul.f32 %v34006_v25, %v42010_v17  ;;  %v24824_v36 = vpop.xlane.xlu1 %24823 }
0x1324   :  { %v24942_v2 = vmul.f32 %v34008_v28, %v42016_v55  ;;  %34017 = vrcp.f32 %v24824_v36 }
0x1325   :  { %25056 = vst [vmem:[%s42554_s16 + $0x98] sm:$0xff] %v24948_v27  ;;  %v24834_v52 = vpop.xlane.xlu0 %24833 }
0x1326   :  { %v34010_v51 = vpop.eup %34009  ;;  %25053 = vst [vmem:[%s42554_s16 + $0x80] sm:$0xff] %v24942_v2  ;;  %34019 = vrcp.f32 %v24834_v52 }
0x1327   :  { %v24944_v11 = vmul.f32 %v34010_v51, %v42022_v30  ;;  %v24836_v32 = vpop.xlane.xlu1 %24835 }
0x1328   :  { %v34012_v21 = vpop.eup %34011  ;;  %34021 = vrcp.f32 %v24836_v32 }
0x1329   :  { %25054 = vst [vmem:[%s42554_s16 + $0x88] sm:$0xff] %v24944_v11  ;;  %v24954_v17 = vmul.f32 %v34012_v21, %v42028_v54  ;;  %v24830_v55 = vpop.xlane.xlu0 %24829 }
0x132a   :  { %v34014_v41 = vpop.eup %34013  ;;  %34023 = vrcp.f32 %v24830_v55 }
0x132b   :  { %25059 = vst [vmem:[%s42554_s16 + $0xb0] sm:$0xff] %v24954_v17  ;;  %v24956_v34 = vmul.f32 %v34014_v41, %v42034_v48  ;;  %v24832_v33 = vpop.xlane.xlu1 %24831 }
0x132c   :  { %v34016_v30 = vpop.eup %34015  ;;  %34025 = vrcp.f32 %v24832_v33 }
0x132d   :  { %25060 = vst [vmem:[%s42554_s16 + $0xb8] sm:$0xff] %v24956_v34  ;;  %v24950_v8 = vmul.f32 %v34016_v30, %v42040_v31  ;;  %v24842_v60 = vpop.xlane.xlu0 %24841 }
0x132e   :  { %v34018_v54 = vpop.eup %34017  ;;  %34027 = vrcp.f32 %v24842_v60 }
0x132f   :  { %25057 = vst [vmem:[%s42554_s16 + $0xa0] sm:$0xff] %v24950_v8  ;;  %v24952_v43 = vmul.f32 %v34018_v54, %v42046_v23  ;;  %v24844_v42 = vpop.xlane.xlu1 %24843 }
0x1330   :  { %v34020_v48 = vpop.eup %34019  ;;  %34029 = vrcp.f32 %v24844_v42 }
0x1331   :  { %25058 = vst [vmem:[%s42554_s16 + $0xa8] sm:$0xff] %v24952_v43  ;;  %v24962_v63 = vmul.f32 %v34020_v48, %v42052_v14  ;;  %v24838_v1 = vpop.xlane.xlu0 %24837 }
0x1332   :  { %v34022_v31 = vpop.eup %34021  ;;  %34031 = vrcp.f32 %v24838_v1 }
0x1333   :  { %25063 = vst [vmem:[%s42554_s16 + $0xd0] sm:$0xff] %v24962_v63  ;;  %v24964_v47 = vmul.f32 %v34022_v31, %v42058_v29  ;;  %v24840_v3 = vpop.xlane.xlu1 %24839 }
0x1334   :  { %v34024_v23 = vpop.eup %34023  ;;  %34033 = vrcp.f32 %v24840_v3 }
0x1335   :  { %25064 = vst [vmem:[%s42554_s16 + $0xd8] sm:$0xff] %v24964_v47  ;;  %v24958_v9 = vmul.f32 %v34024_v23, %v42064_v26  ;;  %v24850_v25 = vpop.xlane.xlu0 %24849 }
0x1336   :  { %v34026_v14 = vpop.eup %34025  ;;  %34035 = vrcp.f32 %v24850_v25 }
0x1337   :  { %25061 = vst [vmem:[%s42554_s16 + $0xc0] sm:$0xff] %v24958_v9  ;;  %v24960_v28 = vmul.f32 %v34026_v14, %v42070_v37  ;;  %v24852_v27 = vpop.xlane.xlu1 %24851 }
0x1338   :  { %v34028_v29 = vpop.eup %34027  ;;  %34037 = vrcp.f32 %v24852_v27 }
0x1339   :  { %25062 = vst [vmem:[%s42554_s16 + $0xc8] sm:$0xff] %v24960_v28  ;;  %v24970_v36 = vmul.f32 %v34028_v29, %v42076_v0  ;;  %v24846_v2 = vpop.xlane.xlu0 %24845 }
0x133a   :  { %v34030_v26 = vpop.eup %34029  ;;  %34039 = vrcp.f32 %v24846_v2 }
0x133b   :  { %25067 = vst [vmem:[%s42554_s16 + $0xf0] sm:$0xff] %v24970_v36  ;;  %v24972_v52 = vmul.f32 %v34030_v26, %v42082_v6  ;;  %v24848_v51 = vpop.xlane.xlu1 %24847 }
0x133c   :  { %v34032_v37 = vpop.eup %34031  ;;  %34041 = vrcp.f32 %v24848_v51 }
0x133d   :  { %25068 = vst [vmem:[%s42554_s16 + $0xf8] sm:$0xff] %v24972_v52  ;;  %v24966_v11 = vmul.f32 %v34032_v37, %v42088_v10  ;;  %v24858_v32 = vpop.xlane.xlu0 %24857 }
0x133e   :  { %v34034_v0 = vpop.eup %34033  ;;  %34043 = vrcp.f32 %v24858_v32 }
0x133f   :  { %25065 = vst [vmem:[%s42554_s16 + $0xe0] sm:$0xff] %v24966_v11  ;;  %v24968_v21 = vmul.f32 %v34034_v0, %v42094_v5  ;;  %v24860_v17 = vpop.xlane.xlu1 %24859 }
0x1340   :  { %v34036_v6 = vpop.eup %34035  ;;  %34045 = vrcp.f32 %v24860_v17 }
0x1341   :  { %25066 = vst [vmem:[%s42554_s16 + $0xe8] sm:$0xff] %v24968_v21  ;;  %v24978_v55 = vmul.f32 %v34036_v6, %v42100_v40  ;;  %v24854_v41 = vpop.xlane.xlu0 %24853 }
0x1342   :  { %v34038_v10 = vpop.eup %34037  ;;  %34047 = vrcp.f32 %v24854_v41 }
0x1343   :  { %25071 = vst [vmem:[%s42554_s16 + $0x110] sm:$0xff] %v24978_v55  ;;  %v24980_v34 = vmul.f32 %v34038_v10, %v42106_v19  ;;  %v24856_v33 = vpop.xlane.xlu1 %24855 }
0x1344   :  { %v34040_v5 = vpop.eup %34039  ;;  %34049 = vrcp.f32 %v24856_v33 }
0x1345   :  { %25072 = vst [vmem:[%s42554_s16 + $0x118] sm:$0xff] %v24980_v34  ;;  %v24974_v30 = vmul.f32 %v34040_v5, %v42112_v7  ;;  %v24866_v8 = vpop.xlane.xlu0 %24865  ;;  %v42883_v34 = vld [vmem:[#allocation19_spill] sm:$0xff] }
0x1346   :  { %v34042_v40 = vpop.eup %34041  ;;  %34051 = vrcp.f32 %v24866_v8 }
0x1347   :  { %25069 = vst [vmem:[%s42554_s16 + $0x100] sm:$0xff] %v24974_v30  ;;  %v24976_v60 = vmul.f32 %v34042_v40, %v42118_v61  ;;  %v24868_v54 = vpop.xlane.xlu1 %24867  ;;  %v42884_v30 = vld [vmem:[#allocation3_spill] sm:$0xff] }
0x1348   :  { %v34044_v19 = vpop.eup %34043  ;;  %34053 = vrcp.f32 %v24868_v54 }
0x1349   :  { %25070 = vst [vmem:[%s42554_s16 + $0x108] sm:$0xff] %v24976_v60  ;;  %v24986_v43 = vmul.f32 %v34044_v19, %v42124_v4  ;;  %v24862_v42 = vpop.xlane.xlu0 %24861  ;;  %v42885_v60 = vld [vmem:[#allocation4_spill] sm:$0xff] }
0x134a   :  { %v34046_v7 = vpop.eup %34045  ;;  %34055 = vrcp.f32 %v24862_v42 }
0x134b   :  { %25075 = vst [vmem:[%s42554_s16 + $0x130] sm:$0xff] %v24986_v43  ;;  %v24988_v48 = vmul.f32 %v34046_v7, %v42130_v49  ;;  %v24864_v63 = vpop.xlane.xlu1 %24863 }
0x134c   :  { %v34048_v61 = vpop.eup %34047  ;;  %34057 = vrcp.f32 %v24864_v63 }
0x134d   :  { %25076 = vst [vmem:[%s42554_s16 + $0x138] sm:$0xff] %v24988_v48  ;;  %v24982_v1 = vmul.f32 %v34048_v61, %v42136_v53  ;;  %v24874_v31 = vpop.xlane.xlu0 %24873 }
0x134e   :  { %v34050_v4 = vpop.eup %34049  ;;  %34059 = vrcp.f32 %v24874_v31 }
0x134f   :  { %25073 = vst [vmem:[%s42554_s16 + $0x120] sm:$0xff] %v24982_v1  ;;  %v24984_v47 = vmul.f32 %v34050_v4, %v42142_v56  ;;  %v24876_v3 = vpop.xlane.xlu1 %24875 }
0x1350   :  { %v34052_v49 = vpop.eup %34051  ;;  %34061 = vrcp.f32 %v24876_v3 }
0x1351   :  { %25074 = vst [vmem:[%s42554_s16 + $0x128] sm:$0xff] %v24984_v47  ;;  %v24994_v23 = vmul.f32 %v34052_v49, %v42148_v45  ;;  %v24870_v9 = vpop.xlane.xlu0 %24869 }
0x1352   :  { %v34054_v53 = vpop.eup %34053  ;;  %34063 = vrcp.f32 %v24870_v9 }
0x1353   :  { %25079 = vst [vmem:[%s42554_s16 + $0x150] sm:$0xff] %v24994_v23  ;;  %v24996_v25 = vmul.f32 %v34054_v53, %v42154_v59  ;;  %v24872_v14 = vpop.xlane.xlu1 %24871 }
0x1354   :  { %v34056_v56 = vpop.eup %34055  ;;  %34065 = vrcp.f32 %v24872_v14 }
0x1355   :  { %25080 = vst [vmem:[%s42554_s16 + $0x158] sm:$0xff] %v24996_v25  ;;  %v24990_v28 = vmul.f32 %v34056_v56, %v42160_v35  ;;  %v24882_v27 = vpop.xlane.xlu0 %24881 }
0x1356   :  { %v34058_v45 = vpop.eup %34057  ;;  %34067 = vrcp.f32 %v24882_v27 }
0x1357   :  { %25077 = vst [vmem:[%s42554_s16 + $0x140] sm:$0xff] %v24990_v28  ;;  %v24992_v29 = vmul.f32 %v34058_v45, %v42166_v24  ;;  %v24884_v36 = vpop.xlane.xlu1 %24883 }
0x1358   :  { %v34060_v59 = vpop.eup %34059  ;;  %34069 = vrcp.f32 %v24884_v36 }
0x1359   :  { %25078 = vst [vmem:[%s42554_s16 + $0x148] sm:$0xff] %v24992_v29  ;;  %v25002_v2 = vmul.f32 %v34060_v59, %v42172_v20  ;;  %v24878_v26 = vpop.xlane.xlu0 %24877 }
0x135a   :  { %v34062_v35 = vpop.eup %34061  ;;  %34071 = vrcp.f32 %v24878_v26 }
0x135b   :  { %25083 = vst [vmem:[%s42554_s16 + $0x170] sm:$0xff] %v25002_v2  ;;  %v25004_v52 = vmul.f32 %v34062_v35, %v42178_v38  ;;  %v24880_v51 = vpop.xlane.xlu1 %24879 }
0x135c   :  { %v34064_v24 = vpop.eup %34063  ;;  %34073 = vrcp.f32 %v24880_v51 }
0x135d   :  { %25084 = vst [vmem:[%s42554_s16 + $0x178] sm:$0xff] %v25004_v52  ;;  %v24998_v37 = vmul.f32 %v34064_v24, %v42184_v13  ;;  %v24890_v11 = vpop.xlane.xlu0 %24889 }
0x135e   :  { %v34066_v20 = vpop.eup %34065  ;;  %34075 = vrcp.f32 %v24890_v11 }
0x135f   :  { %25081 = vst [vmem:[%s42554_s16 + $0x160] sm:$0xff] %v24998_v37  ;;  %v25000_v32 = vmul.f32 %v34066_v20, %v42190_v39  ;;  %v24892_v0 = vpop.xlane.xlu1 %24891 }
0x1360   :  { %v34068_v38 = vpop.eup %34067  ;;  %34077 = vrcp.f32 %v24892_v0 }
0x1361   :  { %25082 = vst [vmem:[%s42554_s16 + $0x168] sm:$0xff] %v25000_v32  ;;  %v25010_v21 = vmul.f32 %v34068_v38, %v42196_v15  ;;  %v24886_v17 = vpop.xlane.xlu0 %24885 }
0x1362   :  { %v34070_v13 = vpop.eup %34069  ;;  %34079 = vrcp.f32 %v24886_v17 }
0x1363   :  { %25087 = vst [vmem:[%s42554_s16 + $0x190] sm:$0xff] %v25010_v21  ;;  %v25012_v6 = vmul.f32 %v34070_v13, %v42202_v18  ;;  %v24888_v55 = vpop.xlane.xlu1 %24887 }
0x1364   :  { %v34072_v39 = vpop.eup %34071  ;;  %34081 = vrcp.f32 %v24888_v55 }
0x1365   :  { %25088 = vst [vmem:[%s42554_s16 + $0x198] sm:$0xff] %v25012_v6  ;;  %v25006_v41 = vmul.f32 %v34072_v39, %v42208_v57  ;;  %v24898_v10 = vpop.xlane.xlu0 %24897 }
0x1366   :  { %v34074_v15 = vpop.eup %34073  ;;  %34083 = vrcp.f32 %v24898_v10 }
0x1367   :  { %25085 = vst [vmem:[%s42554_s16 + $0x180] sm:$0xff] %v25006_v41  ;;  %v25008_v33 = vmul.f32 %v34074_v15, %v42883_v34  ;;  %v24900_v5 = vpop.xlane.xlu1 %24899 }
0x1368   :  { %v34076_v18 = vpop.eup %34075  ;;  %34085 = vrcp.f32 %v24900_v5 }
0x1369   :  { %25086 = vst [vmem:[%s42554_s16 + $0x188] sm:$0xff] %v25008_v33  ;;  %v25018_v8 = vmul.f32 %v34076_v18, %v42884_v30  ;;  %v24894_v40 = vpop.xlane.xlu0 %24893 }
0x136a   :  { %v34078_v57 = vpop.eup %34077  ;;  %34087 = vrcp.f32 %v24894_v40 }
0x136b   :  { %25091 = vst [vmem:[%s42554_s16 + $0x1b0] sm:$0xff] %v25018_v8  ;;  %v25020_v54 = vmul.f32 %v34078_v57, %v42885_v60  ;;  %v24896_v19 = vpop.xlane.xlu1 %24895 }
0x136c   :  { %v34080_v43 = vpop.eup %34079  ;;  %34089 = vrcp.f32 %v24896_v19 }
0x136d   :  { %25092 = vst [vmem:[%s42554_s16 + $0x1b8] sm:$0xff] %v25020_v54  ;;  %v25014_v42 = vmul.f32 %v34080_v43, %v42231_v16 }
0x136e   :  { %v34082_v7 = vpop.eup %34081 }
0x136f   :  { %25089 = vst [vmem:[%s42554_s16 + $0x1a0] sm:$0xff] %v25014_v42  ;;  %v25016_v48 = vmul.f32 %v34082_v7, %v42238_v50 }
0x1370   :  { %v34084_v63 = vpop.eup %34083 }
0x1371   :  { %25090 = vst [vmem:[%s42554_s16 + $0x1a8] sm:$0xff] %v25016_v48  ;;  %v25026_v61 = vmul.f32 %v34084_v63, %v42244_v46  ;;  %v24902_v1 = vpop.xlane.xlu0 %24901 }
0x1372   :  { %v34086_v31 = vpop.eup %34085  ;;  %34091 = vrcp.f32 %v24902_v1 }
0x1373   :  { %25095 = vst [vmem:[%s42554_s16 + $0x1d0] sm:$0xff] %v25026_v61  ;;  %v25028_v16 = vmul.f32 %v34086_v31, %v42249_v44  ;;  %v24904_v4 = vpop.xlane.xlu1 %24903 }
0x1374   :  { %v34088_v47 = vpop.eup %34087  ;;  %34093 = vrcp.f32 %v24904_v4 }
0x1375   :  { %25096 = vst [vmem:[%s42554_s16 + $0x1d8] sm:$0xff] %v25028_v16  ;;  %v25022_v50 = vmul.f32 %v34088_v47, %v42254_v12  ;;  %v24906_v3 = vpop.xlane.xlu0 %24905  ;;  %v42886_v12 = vld [vmem:[#allocation2_spill] sm:$0xff] }
0x1376   :  { %v34090_v46 = vpop.eup %34089  ;;  %34095 = vrcp.f32 %v24906_v3 }
0x1377   :  { %25093 = vst [vmem:[%s42554_s16 + $0x1c0] sm:$0xff] %v25022_v50  ;;  %v25024_v49 = vmul.f32 %v34090_v46, %v42259_v62  ;;  %v24908_v23 = vpop.xlane.xlu1 %24907  ;;  %v42887_v62 = vld [vmem:[#allocation8_spill] sm:$0xff] }
0x1378   :  { %34097 = vrcp.f32 %v24908_v23 }
0x1379   :  { %25094 = vst [vmem:[%s42554_s16 + $0x1c8] sm:$0xff] %v25024_v49 }
0x137c   :  { %v34092_v44 = vpop.eup %34091 }
0x137d   :  { %v25030_v9 = vmul.f32 %v34092_v44, %v42264_v58 }
0x137e   :  { %v34094_v53 = vpop.eup %34093 }
0x137f   :  { %25097 = vst [vmem:[%s42554_s16 + $0x1e0] sm:$0xff] %v25030_v9  ;;  %v25032_v25 = vmul.f32 %v34094_v53, %v42886_v12 }
0x1380   :  { %v34096_v14 = vpop.eup %34095 }
0x1381   :  { %25098 = vst [vmem:[%s42554_s16 + $0x1e8] sm:$0xff] %v25032_v25  ;;  %v25034_v56 = vmul.f32 %v34096_v14, %v42887_v62 }
0x1382   :  { %v34098_v28 = vpop.eup %34097 }
0x1383   :  { %25099 = vst [vmem:[%s42554_s16 + $0x1f0] sm:$0xff] %v25034_v56  ;;  %v25036_v58 = vmul.f32 %v34098_v28, %v42279_v22 }
0x1385   :  { %25100 = vst [vmem:[%s42554_s16 + $0x1f8] sm:$0xff] %v25036_v58 }

</bundles_post_ra>
